<compile_context>
chip_gen: v5e
topology: v5e:2x2
jax: 0.10.0
libtpu: 0.0.40
codegen_flags: <defaults>
</compile_context>

<pallas_src>
import numpy as np
import jax
import jax.numpy as jnp
from jax import lax
from jax.experimental import pallas as pl
from jax.experimental.pallas import tpu as pltpu

_COMPUTE_DTYPE = jnp.bfloat16   # MXU operand dtype; accumulation stays f32.
_OUT_DTYPE = jnp.bfloat16       # lane-dense bf16 writeback.

# 3x3x3 tap enumeration (kd, kh, kw) — shared by host mask/weight prep and kernel.
_TAPS = [(kd, kh, kw) for kd in range(3) for kh in range(3) for kw in range(3)]


def _make_fused_kernel(Nb, C, D, H, W):
    P = D * H * W                 # flattened spatial extent (lane axis)
    M = H * W + W + 1             # max |flat shift| of any 3x3x3 tap

    def kernel(x_ref, mask_ref, w1_ref, b1_ref, w2_ref, b2_ref,
               out_ref, halo_ref):
        # Margins are only ever multiplied by a 0.0 mask, but they must hold
        # *finite* data (uninitialized VMEM could decode as NaN/Inf).  Two tiny
        # (Nb, C, M) stores per step; unconditional so there is no dependence
        # on scratch state from other grid steps ("parallel"-safe).
        zmargin = jnp.zeros((Nb, C, M), _COMPUTE_DTYPE)
        halo_ref[:, :, 0:M] = zmargin
        halo_ref[:, :, M + P:2 * M + P] = zmargin

        def conv(b, w_ref):
            # Streaming per-tap accumulation (no im2col patch matrix):
            #   acc(C,P,f32) += w_tap(C,C) @ masked_shift_tap(halo)(C,P)
            acc = jnp.zeros((C, P), jnp.float32)
            for t, (kd, kh, kw) in enumerate(_TAPS):
                off = (kd - 1) * H * W + (kh - 1) * W + (kw - 1)
                xs = halo_ref[b, :, M + off:M + off + P]        # (C, P) bf16
                if not (kd == 1 and kh == 1 and kw == 1):       # center tap: no mask
                    xs = xs * mask_ref[t]                       # (1, P) bf16 bcast
                acc = acc + jnp.dot(w_ref[t], xs,
                                    preferred_element_type=jnp.float32)
            return acc

        for b in range(Nb):
            xb = x_ref[b]                                       # (C, P) f32
            # ---- conv1 (+ folded bn1 scale) + bias + relu ----
            halo_ref[b, :, M:M + P] = xb.astype(_COMPUTE_DTYPE)
            y1 = jnp.maximum(conv(b, w1_ref) + b1_ref[...], 0.0)
            # ---- conv2 (+ folded bn2 scale) + bias + f32 residual + relu ----
            # y1 never leaves VMEM.
            halo_ref[b, :, M:M + P] = y1.astype(_COMPUTE_DTYPE)
            y2 = conv(b, w2_ref) + b2_ref[...] + xb
            out_ref[b] = jnp.maximum(y2, 0.0).astype(_OUT_DTYPE)

    return kernel, M


def _pick_batch_per_step(N):
    """Largest divisor of N that still leaves >= 2 grid steps (v7x megacore);
    falls back to 1 (grid=(N,)) for tiny batches."""
    for nb in range(N, 0, -1):
        if N % nb == 0 and N // nb >= 2:
            return nb
    return 1


def _basic_block_pallas(x_flat, masks, w1, b1, w2, b2, D, H, W):
    N, C, P = x_flat.shape
    Nb = _pick_batch_per_step(N)
    kernel, M = _make_fused_kernel(Nb, C, D, H, W)

    const3 = lambda n: (0, 0, 0)
    const2 = lambda n: (0, 0)
    return pl.pallas_call(
        kernel,
        out_shape=jax.ShapeDtypeStruct((N, C, P), _OUT_DTYPE),
        grid=(N // Nb,),
        in_specs=[
            pl.BlockSpec((Nb, C, P), lambda n: (n, 0, 0)),    # x (f32, lane-dense)
            pl.BlockSpec((27, 1, P), const3),                 # tap masks (bf16 const)
            pl.BlockSpec((27, C, C), const3),                 # w1 * bn1_scale (bf16)
            pl.BlockSpec((C, 1), const2),                     # bn1 bias (f32)
            pl.BlockSpec((27, C, C), const3),                 # w2 * bn2_scale (bf16)
            pl.BlockSpec((C, 1), const2),                     # bn2 bias (f32)
        ],
        out_specs=pl.BlockSpec((Nb, C, P), lambda n: (n, 0, 0)),
        scratch_shapes=[
            pltpu.VMEM((Nb, C, P + 2 * M), _COMPUTE_DTYPE),   # halo buffer (x, then y1)
        ],
        compiler_params=pltpu.CompilerParams(
            dimension_semantics=("parallel",),                # batch steps across TCs
        ),
    )(x_flat, masks, w1, b1, w2, b2)


def _fold_bn(gamma, beta, mean, var, eps=1e-5):
    scale = gamma / jnp.sqrt(var + eps)
    return scale, beta - mean * scale


def _tap_masks(D, H, W):
    """(27, 1, D*H*W) bf16 'SAME'-padding validity masks — host constants."""
    P = D * H * W
    pos = np.arange(P)
    d, h, w = pos // (H * W), (pos // W) % H, pos % W
    rows = []
    for kd, kh, kw in _TAPS:
        dd, hh, ww = d + kd - 1, h + kh - 1, w + kw - 1
        rows.append((0 <= dd) & (dd < D) & (0 <= hh) & (hh < H)
                    & (0 <= ww) & (ww < W))
    return jnp.asarray(np.stack(rows).reshape(27, 1, P), dtype=_COMPUTE_DTYPE)


def _prep_weight(wt, scale):
    """(Cout, Cin, 3,3,3) f32 -> (27, Cout, Cin) bf16, BN scale folded into
    the output-channel rows."""
    co, ci = wt.shape[0], wt.shape[1]
    w3 = jnp.transpose(wt, (2, 3, 4, 0, 1)).reshape(27, co, ci)
    return (w3 * scale[None, :, None]).astype(_COMPUTE_DTYPE)


@jax.jit
def basic_block_forward(x_ncdhw, params):
    """BasicBlock forward (stride=1, no downsample, eval-mode BN).

    x_ncdhw: (N, C, D, H, W) float32 (PyTorch layout).
    Returns (N, C, D, H, W) bfloat16 (bf16 activations end-to-end).
    """
    N, C, D, H, W = x_ncdhw.shape
    # Fail loudly if the unsupported configs are attempted.
    assert params["w1"].shape == (C, C, 3, 3, 3), "in_planes must equal planes"
    assert params["w2"].shape == (C, C, 3, 3, 3), "in_planes must equal planes"

    s1, b1 = _fold_bn(params["bn1_gamma"], params["bn1_beta"],
                      params["bn1_mean"], params["bn1_var"])
    s2, b2 = _fold_bn(params["bn2_gamma"], params["bn2_beta"],
                      params["bn2_mean"], params["bn2_var"])

    out = _basic_block_pallas(
        x_ncdhw.reshape(N, C, D * H * W),        # free trailing-dim collapse, stays f32
        _tap_masks(D, H, W),
        _prep_weight(params["w1"], s1), b1.reshape(C, 1).astype(jnp.float32),
        _prep_weight(params["w2"], s2), b2.reshape(C, 1).astype(jnp.float32),
        D, H, W)
    return out.reshape(N, C, D, H, W)


def reference_forward(x_ncdhw, params):
    """Pure-JAX reference with the same numerics as the kernel: BN scale folded
    into bf16 conv weights, bf16 conv operands, f32 accumulation, f32 residual."""
    s1, b1 = _fold_bn(params["bn1_gamma"], params["bn1_beta"],
                      params["bn1_mean"], params["bn1_var"])
    s2, b2 = _fold_bn(params["bn2_gamma"], params["bn2_beta"],
                      params["bn2_mean"], params["bn2_var"])

    def conv(v, wt, scale):
        ws = (wt * scale[:, None, None, None, None]).astype(_COMPUTE_DTYPE)
        return lax.conv_general_dilated(
            v.astype(_COMPUTE_DTYPE), ws,
            window_strides=(1, 1, 1), padding=[(1, 1)] * 3,
            dimension_numbers=("NCDHW", "OIDHW", "NCDHW"),
            preferred_element_type=jnp.float32)

    bcast = lambda v: v[None, :, None, None, None]
    y1 = jnp.maximum(conv(x_ncdhw, params["w1"], s1) + bcast(b1), 0.0)
    y2 = conv(y1, params["w2"], s2) + bcast(b2) + x_ncdhw
    return jnp.maximum(y2, 0.0)


if __name__ == "__main__":
    # Small shapes consistent with the module: in_planes == planes, stride=1.
    N, C, D, H, W = 2, 8, 8, 8, 8

    key = jax.random.PRNGKey(0)
    keys = jax.random.split(key, 11)

    x = jax.random.normal(keys[0], (N, C, D, H, W), jnp.float32)

    params = {
        # conv weights in the PyTorch layout (Cout, Cin, kd, kh, kw)
        "w1": jax.random.normal(keys[1], (C, C, 3, 3, 3), jnp.float32) * 0.1,
        "w2": jax.random.normal(keys[2], (C, C, 3, 3, 3), jnp.float32) * 0.1,
        "bn1_gamma": 1.0 + 0.1 * jax.random.normal(keys[3], (C,), jnp.float32),
        "bn1_beta": 0.1 * jax.random.normal(keys[4], (C,), jnp.float32),
        "bn1_mean": 0.1 * jax.random.normal(keys[5], (C,), jnp.float32),
        "bn1_var": jnp.abs(jax.random.normal(keys[6], (C,), jnp.float32)) + 0.5,
        "bn2_gamma": 1.0 + 0.1 * jax.random.normal(keys[7], (C,), jnp.float32),
        "bn2_beta": 0.1 * jax.random.normal(keys[8], (C,), jnp.float32),
        "bn2_mean": 0.1 * jax.random.normal(keys[9], (C,), jnp.float32),
        "bn2_var": jnp.abs(jax.random.normal(keys[10], (C,), jnp.float32)) + 0.5,
    }

    out = jax.block_until_ready(basic_block_forward(x, params))
    ref = jax.block_until_ready(reference_forward(x, params))

    assert out.shape == (N, C, D, H, W)
    out_f32 = out.astype(jnp.float32)
    max_err = jnp.max(jnp.abs(out_f32 - ref))
    assert jnp.allclose(out_f32, ref, atol=5e-2, rtol=5e-2), f"max err {max_err}"

    print("KERNEL_OK")
</pallas_src>

<mosaic_0001>
module attributes {stable_mosaic.version = 11 : i64} {
  func.func @kernel(%arg0: i32, %arg1: memref<1x8x512xf32, #tpu.memory_space<vmem>>, %arg2: memref<27x1x512xbf16, #tpu.memory_space<vmem>>, %arg3: memref<27x8x8xbf16, #tpu.memory_space<vmem>>, %arg4: memref<8x1xf32, #tpu.memory_space<vmem>>, %arg5: memref<27x8x8xbf16, #tpu.memory_space<vmem>>, %arg6: memref<8x1xf32, #tpu.memory_space<vmem>>, %arg7: memref<1x8x512xbf16, #tpu.memory_space<vmem>>, %arg8: memref<1x8x658xbf16, #tpu.memory_space<vmem>>) attributes {dimension_semantics = [#tpu.dimension_semantics<parallel>], iteration_bounds = array<i64: 2>, scalar_prefetch = 0 : i64, scratch_operands = 1 : i64, tpu.core_type = #tpu.core_type<tc>, window_params = [{transform_indices = @transform_0, window_bounds = array<i64: 1, 8, 512>}, {pipeline_mode = #tpu.pipeline_mode<synchronous>, transform_indices = @transform_1, window_bounds = array<i64: 27, 1, 512>}, {pipeline_mode = #tpu.pipeline_mode<synchronous>, transform_indices = @transform_2, window_bounds = array<i64: 27, 8, 8>}, {pipeline_mode = #tpu.pipeline_mode<synchronous>, transform_indices = @transform_3, window_bounds = array<i64: 8, 1>}, {pipeline_mode = #tpu.pipeline_mode<synchronous>, transform_indices = @transform_4, window_bounds = array<i64: 27, 8, 8>}, {pipeline_mode = #tpu.pipeline_mode<synchronous>, transform_indices = @transform_5, window_bounds = array<i64: 8, 1>}, {transform_indices = @transform_6, window_bounds = array<i64: 1, 8, 512>}]} {
    %cst = arith.constant 0.000000e+00 : bf16
    %0 = vector.broadcast %cst : bf16 to vector<1x8x73xbf16>
    %c0 = arith.constant 0 : index
    %c0_0 = arith.constant 0 : index
    %c0_1 = arith.constant 0 : index
    %1 = vector.load %arg8[%c0, %c0_0, %c0_1] : memref<1x8x658xbf16, #tpu.memory_space<vmem>>, vector<1x8x73xbf16>
    tpu.vector_store %arg8[%c0, %c0_0, %c0_1], %0 {strides = array<i32>} : memref<1x8x658xbf16, #tpu.memory_space<vmem>>, vector<1x8x73xbf16>,
    %c0_2 = arith.constant 0 : index
    %c0_3 = arith.constant 0 : index
    %c585 = arith.constant 585 : index
    %2 = vector.load %arg8[%c0_2, %c0_3, %c585] : memref<1x8x658xbf16, #tpu.memory_space<vmem>>, vector<1x8x73xbf16>
    tpu.vector_store %arg8[%c0_2, %c0_3, %c585], %0 {strides = array<i32>} : memref<1x8x658xbf16, #tpu.memory_space<vmem>>, vector<1x8x73xbf16>,
    %c0_4 = arith.constant 0 : index
    %c0_5 = arith.constant 0 : index
    %c0_6 = arith.constant 0 : index
    %3 = vector.load %arg1[%c0_4, %c0_5, %c0_6] : memref<1x8x512xf32, #tpu.memory_space<vmem>>, vector<1x8x512xf32>
    %4 = vector.shape_cast %3 : vector<1x8x512xf32> to vector<8x512xf32>
    %5 = arith.truncf %4 : vector<8x512xf32> to vector<8x512xbf16>
    %c0_7 = arith.constant 0 : index
    %c0_8 = arith.constant 0 : index
    %c73 = arith.constant 73 : index
    %6 = vector.load %arg8[%c0_7, %c0_8, %c73] : memref<1x8x658xbf16, #tpu.memory_space<vmem>>, vector<1x8x512xbf16>
    %7 = vector.shape_cast %6 : vector<1x8x512xbf16> to vector<8x512xbf16>
    %8 = vector.shape_cast %5 : vector<8x512xbf16> to vector<1x8x512xbf16>
    tpu.vector_store %arg8[%c0_7, %c0_8, %c73], %8 {strides = array<i32>} : memref<1x8x658xbf16, #tpu.memory_space<vmem>>, vector<1x8x512xbf16>,
    %cst_9 = arith.constant 0.000000e+00 : f32
    %9 = vector.broadcast %cst_9 : f32 to vector<8x512xf32>
    %c0_10 = arith.constant 0 : index
    %c0_11 = arith.constant 0 : index
    %c0_12 = arith.constant 0 : index
    %10 = vector.load %arg8[%c0_10, %c0_11, %c0_12] : memref<1x8x658xbf16, #tpu.memory_space<vmem>>, vector<1x8x512xbf16>
    %11 = vector.shape_cast %10 : vector<1x8x512xbf16> to vector<8x512xbf16>
    %c0_13 = arith.constant 0 : index
    %c0_14 = arith.constant 0 : index
    %c0_15 = arith.constant 0 : index
    %12 = vector.load %arg2[%c0_13, %c0_14, %c0_15] : memref<27x1x512xbf16, #tpu.memory_space<vmem>>, vector<1x1x512xbf16>
    %13 = vector.shape_cast %12 : vector<1x1x512xbf16> to vector<1x512xbf16>
    %14 = vector.broadcast %13 : vector<1x512xbf16> to vector<8x512xbf16>
    %15 = arith.mulf %11, %14 : vector<8x512xbf16>
    %c0_16 = arith.constant 0 : index
    %c0_17 = arith.constant 0 : index
    %c0_18 = arith.constant 0 : index
    %16 = vector.load %arg3[%c0_16, %c0_17, %c0_18] : memref<27x8x8xbf16, #tpu.memory_space<vmem>>, vector<1x8x8xbf16>
    %17 = vector.shape_cast %16 : vector<1x8x8xbf16> to vector<8x8xbf16>
    %cst_19 = arith.constant dense<0.000000e+00> : vector<8x512xf32>
    %18 = tpu.matmul %17, %15, %cst_19 {dimension_numbers = #tpu.dot_dimension_numbers<[1], [0], [0], [1], [0, 0, 1, 1], [], []>} : vector<8x8xbf16>, vector<8x512xbf16>, vector<8x512xf32> -> vector<8x512xf32>
    %19 = arith.addf %9, %18 : vector<8x512xf32>
    %c0_20 = arith.constant 0 : index
    %c0_21 = arith.constant 0 : index
    %c1 = arith.constant 1 : index
    %20 = vector.load %arg8[%c0_20, %c0_21, %c1] : memref<1x8x658xbf16, #tpu.memory_space<vmem>>, vector<1x8x512xbf16>
    %21 = vector.shape_cast %20 : vector<1x8x512xbf16> to vector<8x512xbf16>
    %c1_22 = arith.constant 1 : index
    %c0_23 = arith.constant 0 : index
    %c0_24 = arith.constant 0 : index
    %22 = vector.load %arg2[%c1_22, %c0_23, %c0_24] : memref<27x1x512xbf16, #tpu.memory_space<vmem>>, vector<1x1x512xbf16>
    %23 = vector.shape_cast %22 : vector<1x1x512xbf16> to vector<1x512xbf16>
    %24 = vector.broadcast %23 : vector<1x512xbf16> to vector<8x512xbf16>
    %25 = arith.mulf %21, %24 : vector<8x512xbf16>
    %c1_25 = arith.constant 1 : index
    %c0_26 = arith.constant 0 : index
    %c0_27 = arith.constant 0 : index
    %26 = vector.load %arg3[%c1_25, %c0_26, %c0_27] : memref<27x8x8xbf16, #tpu.memory_space<vmem>>, vector<1x8x8xbf16>
    %27 = vector.shape_cast %26 : vector<1x8x8xbf16> to vector<8x8xbf16>
    %cst_28 = arith.constant dense<0.000000e+00> : vector<8x512xf32>
    %28 = tpu.matmul %27, %25, %cst_28 {dimension_numbers = #tpu.dot_dimension_numbers<[1], [0], [0], [1], [0, 0, 1, 1], [], []>} : vector<8x8xbf16>, vector<8x512xbf16>, vector<8x512xf32> -> vector<8x512xf32>
    %29 = arith.addf %19, %28 : vector<8x512xf32>
    %c0_29 = arith.constant 0 : index
    %c0_30 = arith.constant 0 : index
    %c2 = arith.constant 2 : index
    %30 = vector.load %arg8[%c0_29, %c0_30, %c2] : memref<1x8x658xbf16, #tpu.memory_space<vmem>>, vector<1x8x512xbf16>
    %31 = vector.shape_cast %30 : vector<1x8x512xbf16> to vector<8x512xbf16>
    %c2_31 = arith.constant 2 : index
    %c0_32 = arith.constant 0 : index
    %c0_33 = arith.constant 0 : index
    %32 = vector.load %arg2[%c2_31, %c0_32, %c0_33] : memref<27x1x512xbf16, #tpu.memory_space<vmem>>, vector<1x1x512xbf16>
    %33 = vector.shape_cast %32 : vector<1x1x512xbf16> to vector<1x512xbf16>
    %34 = vector.broadcast %33 : vector<1x512xbf16> to vector<8x512xbf16>
    %35 = arith.mulf %31, %34 : vector<8x512xbf16>
    %c2_34 = arith.constant 2 : index
    %c0_35 = arith.constant 0 : index
    %c0_36 = arith.constant 0 : index
    %36 = vector.load %arg3[%c2_34, %c0_35, %c0_36] : memref<27x8x8xbf16, #tpu.memory_space<vmem>>, vector<1x8x8xbf16>
    %37 = vector.shape_cast %36 : vector<1x8x8xbf16> to vector<8x8xbf16>
    %cst_37 = arith.constant dense<0.000000e+00> : vector<8x512xf32>
    %38 = tpu.matmul %37, %35, %cst_37 {dimension_numbers = #tpu.dot_dimension_numbers<[1], [0], [0], [1], [0, 0, 1, 1], [], []>} : vector<8x8xbf16>, vector<8x512xbf16>, vector<8x512xf32> -> vector<8x512xf32>
    %39 = arith.addf %29, %38 : vector<8x512xf32>
    %c0_38 = arith.constant 0 : index
    %c0_39 = arith.constant 0 : index
    %c8 = arith.constant 8 : index
    %40 = vector.load %arg8[%c0_38, %c0_39, %c8] : memref<1x8x658xbf16, #tpu.memory_space<vmem>>, vector<1x8x512xbf16>
    %41 = vector.shape_cast %40 : vector<1x8x512xbf16> to vector<8x512xbf16>
    %c3 = arith.constant 3 : index
    %c0_40 = arith.constant 0 : index
    %c0_41 = arith.constant 0 : index
    %42 = vector.load %arg2[%c3, %c0_40, %c0_41] : memref<27x1x512xbf16, #tpu.memory_space<vmem>>, vector<1x1x512xbf16>
    %43 = vector.shape_cast %42 : vector<1x1x512xbf16> to vector<1x512xbf16>
    %44 = vector.broadcast %43 : vector<1x512xbf16> to vector<8x512xbf16>
    %45 = arith.mulf %41, %44 : vector<8x512xbf16>
    %c3_42 = arith.constant 3 : index
    %c0_43 = arith.constant 0 : index
    %c0_44 = arith.constant 0 : index
    %46 = vector.load %arg3[%c3_42, %c0_43, %c0_44] : memref<27x8x8xbf16, #tpu.memory_space<vmem>>, vector<1x8x8xbf16>
    %47 = vector.shape_cast %46 : vector<1x8x8xbf16> to vector<8x8xbf16>
    %cst_45 = arith.constant dense<0.000000e+00> : vector<8x512xf32>
    %48 = tpu.matmul %47, %45, %cst_45 {dimension_numbers = #tpu.dot_dimension_numbers<[1], [0], [0], [1], [0, 0, 1, 1], [], []>} : vector<8x8xbf16>, vector<8x512xbf16>, vector<8x512xf32> -> vector<8x512xf32>
    %49 = arith.addf %39, %48 : vector<8x512xf32>
    %c0_46 = arith.constant 0 : index
    %c0_47 = arith.constant 0 : index
    %c9 = arith.constant 9 : index
    %50 = vector.load %arg8[%c0_46, %c0_47, %c9] : memref<1x8x658xbf16, #tpu.memory_space<vmem>>, vector<1x8x512xbf16>
    %51 = vector.shape_cast %50 : vector<1x8x512xbf16> to vector<8x512xbf16>
    %c4 = arith.constant 4 : index
    %c0_48 = arith.constant 0 : index
    %c0_49 = arith.constant 0 : index
    %52 = vector.load %arg2[%c4, %c0_48, %c0_49] : memref<27x1x512xbf16, #tpu.memory_space<vmem>>, vector<1x1x512xbf16>
    %53 = vector.shape_cast %52 : vector<1x1x512xbf16> to vector<1x512xbf16>
    %54 = vector.broadcast %53 : vector<1x512xbf16> to vector<8x512xbf16>
    %55 = arith.mulf %51, %54 : vector<8x512xbf16>
    %c4_50 = arith.constant 4 : index
    %c0_51 = arith.constant 0 : index
    %c0_52 = arith.constant 0 : index
    %56 = vector.load %arg3[%c4_50, %c0_51, %c0_52] : memref<27x8x8xbf16, #tpu.memory_space<vmem>>, vector<1x8x8xbf16>
    %57 = vector.shape_cast %56 : vector<1x8x8xbf16> to vector<8x8xbf16>
    %cst_53 = arith.constant dense<0.000000e+00> : vector<8x512xf32>
    %58 = tpu.matmul %57, %55, %cst_53 {dimension_numbers = #tpu.dot_dimension_numbers<[1], [0], [0], [1], [0, 0, 1, 1], [], []>} : vector<8x8xbf16>, vector<8x512xbf16>, vector<8x512xf32> -> vector<8x512xf32>
    %59 = arith.addf %49, %58 : vector<8x512xf32>
    %c0_54 = arith.constant 0 : index
    %c0_55 = arith.constant 0 : index
    %c10 = arith.constant 10 : index
    %60 = vector.load %arg8[%c0_54, %c0_55, %c10] : memref<1x8x658xbf16, #tpu.memory_space<vmem>>, vector<1x8x512xbf16>
    %61 = vector.shape_cast %60 : vector<1x8x512xbf16> to vector<8x512xbf16>
    %c5 = arith.constant 5 : index
    %c0_56 = arith.constant 0 : index
    %c0_57 = arith.constant 0 : index
    %62 = vector.load %arg2[%c5, %c0_56, %c0_57] : memref<27x1x512xbf16, #tpu.memory_space<vmem>>, vector<1x1x512xbf16>
    %63 = vector.shape_cast %62 : vector<1x1x512xbf16> to vector<1x512xbf16>
    %64 = vector.broadcast %63 : vector<1x512xbf16> to vector<8x512xbf16>
    %65 = arith.mulf %61, %64 : vector<8x512xbf16>
    %c5_58 = arith.constant 5 : index
    %c0_59 = arith.constant 0 : index
    %c0_60 = arith.constant 0 : index
    %66 = vector.load %arg3[%c5_58, %c0_59, %c0_60] : memref<27x8x8xbf16, #tpu.memory_space<vmem>>, vector<1x8x8xbf16>
    %67 = vector.shape_cast %66 : vector<1x8x8xbf16> to vector<8x8xbf16>
    %cst_61 = arith.constant dense<0.000000e+00> : vector<8x512xf32>
    %68 = tpu.matmul %67, %65, %cst_61 {dimension_numbers = #tpu.dot_dimension_numbers<[1], [0], [0], [1], [0, 0, 1, 1], [], []>} : vector<8x8xbf16>, vector<8x512xbf16>, vector<8x512xf32> -> vector<8x512xf32>
    %69 = arith.addf %59, %68 : vector<8x512xf32>
    %c0_62 = arith.constant 0 : index
    %c0_63 = arith.constant 0 : index
    %c16 = arith.constant 16 : index
    %70 = vector.load %arg8[%c0_62, %c0_63, %c16] : memref<1x8x658xbf16, #tpu.memory_space<vmem>>, vector<1x8x512xbf16>
    %71 = vector.shape_cast %70 : vector<1x8x512xbf16> to vector<8x512xbf16>
    %c6 = arith.constant 6 : index
    %c0_64 = arith.constant 0 : index
    %c0_65 = arith.constant 0 : index
    %72 = vector.load %arg2[%c6, %c0_64, %c0_65] : memref<27x1x512xbf16, #tpu.memory_space<vmem>>, vector<1x1x512xbf16>
    %73 = vector.shape_cast %72 : vector<1x1x512xbf16> to vector<1x512xbf16>
    %74 = vector.broadcast %73 : vector<1x512xbf16> to vector<8x512xbf16>
    %75 = arith.mulf %71, %74 : vector<8x512xbf16>
    %c6_66 = arith.constant 6 : index
    %c0_67 = arith.constant 0 : index
    %c0_68 = arith.constant 0 : index
    %76 = vector.load %arg3[%c6_66, %c0_67, %c0_68] : memref<27x8x8xbf16, #tpu.memory_space<vmem>>, vector<1x8x8xbf16>
    %77 = vector.shape_cast %76 : vector<1x8x8xbf16> to vector<8x8xbf16>
    %cst_69 = arith.constant dense<0.000000e+00> : vector<8x512xf32>
    %78 = tpu.matmul %77, %75, %cst_69 {dimension_numbers = #tpu.dot_dimension_numbers<[1], [0], [0], [1], [0, 0, 1, 1], [], []>} : vector<8x8xbf16>, vector<8x512xbf16>, vector<8x512xf32> -> vector<8x512xf32>
    %79 = arith.addf %69, %78 : vector<8x512xf32>
    %c0_70 = arith.constant 0 : index
    %c0_71 = arith.constant 0 : index
    %c17 = arith.constant 17 : index
    %80 = vector.load %arg8[%c0_70, %c0_71, %c17] : memref<1x8x658xbf16, #tpu.memory_space<vmem>>, vector<1x8x512xbf16>
    %81 = vector.shape_cast %80 : vector<1x8x512xbf16> to vector<8x512xbf16>
    %c7 = arith.constant 7 : index
    %c0_72 = arith.constant 0 : index
    %c0_73 = arith.constant 0 : index
    %82 = vector.load %arg2[%c7, %c0_72, %c0_73] : memref<27x1x512xbf16, #tpu.memory_space<vmem>>, vector<1x1x512xbf16>
    %83 = vector.shape_cast %82 : vector<1x1x512xbf16> to vector<1x512xbf16>
    %84 = vector.broadcast %83 : vector<1x512xbf16> to vector<8x512xbf16>
    %85 = arith.mulf %81, %84 : vector<8x512xbf16>
    %c7_74 = arith.constant 7 : index
    %c0_75 = arith.constant 0 : index
    %c0_76 = arith.constant 0 : index
    %86 = vector.load %arg3[%c7_74, %c0_75, %c0_76] : memref<27x8x8xbf16, #tpu.memory_space<vmem>>, vector<1x8x8xbf16>
    %87 = vector.shape_cast %86 : vector<1x8x8xbf16> to vector<8x8xbf16>
    %cst_77 = arith.constant dense<0.000000e+00> : vector<8x512xf32>
    %88 = tpu.matmul %87, %85, %cst_77 {dimension_numbers = #tpu.dot_dimension_numbers<[1], [0], [0], [1], [0, 0, 1, 1], [], []>} : vector<8x8xbf16>, vector<8x512xbf16>, vector<8x512xf32> -> vector<8x512xf32>
    %89 = arith.addf %79, %88 : vector<8x512xf32>
    %c0_78 = arith.constant 0 : index
    %c0_79 = arith.constant 0 : index
    %c18 = arith.constant 18 : index
    %90 = vector.load %arg8[%c0_78, %c0_79, %c18] : memref<1x8x658xbf16, #tpu.memory_space<vmem>>, vector<1x8x512xbf16>
    %91 = vector.shape_cast %90 : vector<1x8x512xbf16> to vector<8x512xbf16>
    %c8_80 = arith.constant 8 : index
    %c0_81 = arith.constant 0 : index
    %c0_82 = arith.constant 0 : index
    %92 = vector.load %arg2[%c8_80, %c0_81, %c0_82] : memref<27x1x512xbf16, #tpu.memory_space<vmem>>, vector<1x1x512xbf16>
    %93 = vector.shape_cast %92 : vector<1x1x512xbf16> to vector<1x512xbf16>
    %94 = vector.broadcast %93 : vector<1x512xbf16> to vector<8x512xbf16>
    %95 = arith.mulf %91, %94 : vector<8x512xbf16>
    %c8_83 = arith.constant 8 : index
    %c0_84 = arith.constant 0 : index
    %c0_85 = arith.constant 0 : index
    %96 = vector.load %arg3[%c8_83, %c0_84, %c0_85] : memref<27x8x8xbf16, #tpu.memory_space<vmem>>, vector<1x8x8xbf16>
    %97 = vector.shape_cast %96 : vector<1x8x8xbf16> to vector<8x8xbf16>
    %cst_86 = arith.constant dense<0.000000e+00> : vector<8x512xf32>
    %98 = tpu.matmul %97, %95, %cst_86 {dimension_numbers = #tpu.dot_dimension_numbers<[1], [0], [0], [1], [0, 0, 1, 1], [], []>} : vector<8x8xbf16>, vector<8x512xbf16>, vector<8x512xf32> -> vector<8x512xf32>
    %99 = arith.addf %89, %98 : vector<8x512xf32>
    %c0_87 = arith.constant 0 : index
    %c0_88 = arith.constant 0 : index
    %c64 = arith.constant 64 : index
    %100 = vector.load %arg8[%c0_87, %c0_88, %c64] : memref<1x8x658xbf16, #tpu.memory_space<vmem>>, vector<1x8x512xbf16>
    %101 = vector.shape_cast %100 : vector<1x8x512xbf16> to vector<8x512xbf16>
    %c9_89 = arith.constant 9 : index
    %c0_90 = arith.constant 0 : index
    %c0_91 = arith.constant 0 : index
    %102 = vector.load %arg2[%c9_89, %c0_90, %c0_91] : memref<27x1x512xbf16, #tpu.memory_space<vmem>>, vector<1x1x512xbf16>
    %103 = vector.shape_cast %102 : vector<1x1x512xbf16> to vector<1x512xbf16>
    %104 = vector.broadcast %103 : vector<1x512xbf16> to vector<8x512xbf16>
    %105 = arith.mulf %101, %104 : vector<8x512xbf16>
    %c9_92 = arith.constant 9 : index
    %c0_93 = arith.constant 0 : index
    %c0_94 = arith.constant 0 : index
    %106 = vector.load %arg3[%c9_92, %c0_93, %c0_94] : memref<27x8x8xbf16, #tpu.memory_space<vmem>>, vector<1x8x8xbf16>
    %107 = vector.shape_cast %106 : vector<1x8x8xbf16> to vector<8x8xbf16>
    %cst_95 = arith.constant dense<0.000000e+00> : vector<8x512xf32>
    %108 = tpu.matmul %107, %105, %cst_95 {dimension_numbers = #tpu.dot_dimension_numbers<[1], [0], [0], [1], [0, 0, 1, 1], [], []>} : vector<8x8xbf16>, vector<8x512xbf16>, vector<8x512xf32> -> vector<8x512xf32>
    %109 = arith.addf %99, %108 : vector<8x512xf32>
    %c0_96 = arith.constant 0 : index
    %c0_97 = arith.constant 0 : index
    %c65 = arith.constant 65 : index
    %110 = vector.load %arg8[%c0_96, %c0_97, %c65] : memref<1x8x658xbf16, #tpu.memory_space<vmem>>, vector<1x8x512xbf16>
    %111 = vector.shape_cast %110 : vector<1x8x512xbf16> to vector<8x512xbf16>
    %c10_98 = arith.constant 10 : index
    %c0_99 = arith.constant 0 : index
    %c0_100 = arith.constant 0 : index
    %112 = vector.load %arg2[%c10_98, %c0_99, %c0_100] : memref<27x1x512xbf16, #tpu.memory_space<vmem>>, vector<1x1x512xbf16>
    %113 = vector.shape_cast %112 : vector<1x1x512xbf16> to vector<1x512xbf16>
    %114 = vector.broadcast %113 : vector<1x512xbf16> to vector<8x512xbf16>
    %115 = arith.mulf %111, %114 : vector<8x512xbf16>
    %c10_101 = arith.constant 10 : index
    %c0_102 = arith.constant 0 : index
    %c0_103 = arith.constant 0 : index
    %116 = vector.load %arg3[%c10_101, %c0_102, %c0_103] : memref<27x8x8xbf16, #tpu.memory_space<vmem>>, vector<1x8x8xbf16>
    %117 = vector.shape_cast %116 : vector<1x8x8xbf16> to vector<8x8xbf16>
    %cst_104 = arith.constant dense<0.000000e+00> : vector<8x512xf32>
    %118 = tpu.matmul %117, %115, %cst_104 {dimension_numbers = #tpu.dot_dimension_numbers<[1], [0], [0], [1], [0, 0, 1, 1], [], []>} : vector<8x8xbf16>, vector<8x512xbf16>, vector<8x512xf32> -> vector<8x512xf32>
    %119 = arith.addf %109, %118 : vector<8x512xf32>
    %c0_105 = arith.constant 0 : index
    %c0_106 = arith.constant 0 : index
    %c66 = arith.constant 66 : index
    %120 = vector.load %arg8[%c0_105, %c0_106, %c66] : memref<1x8x658xbf16, #tpu.memory_space<vmem>>, vector<1x8x512xbf16>
    %121 = vector.shape_cast %120 : vector<1x8x512xbf16> to vector<8x512xbf16>
    %c11 = arith.constant 11 : index
    %c0_107 = arith.constant 0 : index
    %c0_108 = arith.constant 0 : index
    %122 = vector.load %arg2[%c11, %c0_107, %c0_108] : memref<27x1x512xbf16, #tpu.memory_space<vmem>>, vector<1x1x512xbf16>
    %123 = vector.shape_cast %122 : vector<1x1x512xbf16> to vector<1x512xbf16>
    %124 = vector.broadcast %123 : vector<1x512xbf16> to vector<8x512xbf16>
    %125 = arith.mulf %121, %124 : vector<8x512xbf16>
    %c11_109 = arith.constant 11 : index
    %c0_110 = arith.constant 0 : index
    %c0_111 = arith.constant 0 : index
    %126 = vector.load %arg3[%c11_109, %c0_110, %c0_111] : memref<27x8x8xbf16, #tpu.memory_space<vmem>>, vector<1x8x8xbf16>
    %127 = vector.shape_cast %126 : vector<1x8x8xbf16> to vector<8x8xbf16>
    %cst_112 = arith.constant dense<0.000000e+00> : vector<8x512xf32>
    %128 = tpu.matmul %127, %125, %cst_112 {dimension_numbers = #tpu.dot_dimension_numbers<[1], [0], [0], [1], [0, 0, 1, 1], [], []>} : vector<8x8xbf16>, vector<8x512xbf16>, vector<8x512xf32> -> vector<8x512xf32>
    %129 = arith.addf %119, %128 : vector<8x512xf32>
    %c0_113 = arith.constant 0 : index
    %c0_114 = arith.constant 0 : index
    %c72 = arith.constant 72 : index
    %130 = vector.load %arg8[%c0_113, %c0_114, %c72] : memref<1x8x658xbf16, #tpu.memory_space<vmem>>, vector<1x8x512xbf16>
    %131 = vector.shape_cast %130 : vector<1x8x512xbf16> to vector<8x512xbf16>
    %c12 = arith.constant 12 : index
    %c0_115 = arith.constant 0 : index
    %c0_116 = arith.constant 0 : index
    %132 = vector.load %arg2[%c12, %c0_115, %c0_116] : memref<27x1x512xbf16, #tpu.memory_space<vmem>>, vector<1x1x512xbf16>
    %133 = vector.shape_cast %132 : vector<1x1x512xbf16> to vector<1x512xbf16>
    %134 = vector.broadcast %133 : vector<1x512xbf16> to vector<8x512xbf16>
    %135 = arith.mulf %131, %134 : vector<8x512xbf16>
    %c12_117 = arith.constant 12 : index
    %c0_118 = arith.constant 0 : index
    %c0_119 = arith.constant 0 : index
    %136 = vector.load %arg3[%c12_117, %c0_118, %c0_119] : memref<27x8x8xbf16, #tpu.memory_space<vmem>>, vector<1x8x8xbf16>
    %137 = vector.shape_cast %136 : vector<1x8x8xbf16> to vector<8x8xbf16>
    %cst_120 = arith.constant dense<0.000000e+00> : vector<8x512xf32>
    %138 = tpu.matmul %137, %135, %cst_120 {dimension_numbers = #tpu.dot_dimension_numbers<[1], [0], [0], [1], [0, 0, 1, 1], [], []>} : vector<8x8xbf16>, vector<8x512xbf16>, vector<8x512xf32> -> vector<8x512xf32>
    %139 = arith.addf %129, %138 : vector<8x512xf32>
    %c0_121 = arith.constant 0 : index
    %c0_122 = arith.constant 0 : index
    %c73_123 = arith.constant 73 : index
    %140 = vector.load %arg8[%c0_121, %c0_122, %c73_123] : memref<1x8x658xbf16, #tpu.memory_space<vmem>>, vector<1x8x512xbf16>
    %141 = vector.shape_cast %140 : vector<1x8x512xbf16> to vector<8x512xbf16>
    %c13 = arith.constant 13 : index
    %c0_124 = arith.constant 0 : index
    %c0_125 = arith.constant 0 : index
    %142 = vector.load %arg3[%c13, %c0_124, %c0_125] : memref<27x8x8xbf16, #tpu.memory_space<vmem>>, vector<1x8x8xbf16>
    %143 = vector.shape_cast %142 : vector<1x8x8xbf16> to vector<8x8xbf16>
    %cst_126 = arith.constant dense<0.000000e+00> : vector<8x512xf32>
    %144 = tpu.matmul %143, %141, %cst_126 {dimension_numbers = #tpu.dot_dimension_numbers<[1], [0], [0], [1], [0, 0, 1, 1], [], []>} : vector<8x8xbf16>, vector<8x512xbf16>, vector<8x512xf32> -> vector<8x512xf32>
    %145 = arith.addf %139, %144 : vector<8x512xf32>
    %c0_127 = arith.constant 0 : index
    %c0_128 = arith.constant 0 : index
    %c74 = arith.constant 74 : index
    %146 = vector.load %arg8[%c0_127, %c0_128, %c74] : memref<1x8x658xbf16, #tpu.memory_space<vmem>>, vector<1x8x512xbf16>
    %147 = vector.shape_cast %146 : vector<1x8x512xbf16> to vector<8x512xbf16>
    %c14 = arith.constant 14 : index
    %c0_129 = arith.constant 0 : index
    %c0_130 = arith.constant 0 : index
    %148 = vector.load %arg2[%c14, %c0_129, %c0_130] : memref<27x1x512xbf16, #tpu.memory_space<vmem>>, vector<1x1x512xbf16>
    %149 = vector.shape_cast %148 : vector<1x1x512xbf16> to vector<1x512xbf16>
    %150 = vector.broadcast %149 : vector<1x512xbf16> to vector<8x512xbf16>
    %151 = arith.mulf %147, %150 : vector<8x512xbf16>
    %c14_131 = arith.constant 14 : index
    %c0_132 = arith.constant 0 : index
    %c0_133 = arith.constant 0 : index
    %152 = vector.load %arg3[%c14_131, %c0_132, %c0_133] : memref<27x8x8xbf16, #tpu.memory_space<vmem>>, vector<1x8x8xbf16>
    %153 = vector.shape_cast %152 : vector<1x8x8xbf16> to vector<8x8xbf16>
    %cst_134 = arith.constant dense<0.000000e+00> : vector<8x512xf32>
    %154 = tpu.matmul %153, %151, %cst_134 {dimension_numbers = #tpu.dot_dimension_numbers<[1], [0], [0], [1], [0, 0, 1, 1], [], []>} : vector<8x8xbf16>, vector<8x512xbf16>, vector<8x512xf32> -> vector<8x512xf32>
    %155 = arith.addf %145, %154 : vector<8x512xf32>
    %c0_135 = arith.constant 0 : index
    %c0_136 = arith.constant 0 : index
    %c80 = arith.constant 80 : index
    %156 = vector.load %arg8[%c0_135, %c0_136, %c80] : memref<1x8x658xbf16, #tpu.memory_space<vmem>>, vector<1x8x512xbf16>
    %157 = vector.shape_cast %156 : vector<1x8x512xbf16> to vector<8x512xbf16>
    %c15 = arith.constant 15 : index
    %c0_137 = arith.constant 0 : index
    %c0_138 = arith.constant 0 : index
    %158 = vector.load %arg2[%c15, %c0_137, %c0_138] : memref<27x1x512xbf16, #tpu.memory_space<vmem>>, vector<1x1x512xbf16>
    %159 = vector.shape_cast %158 : vector<1x1x512xbf16> to vector<1x512xbf16>
    %160 = vector.broadcast %159 : vector<1x512xbf16> to vector<8x512xbf16>
    %161 = arith.mulf %157, %160 : vector<8x512xbf16>
    %c15_139 = arith.constant 15 : index
    %c0_140 = arith.constant 0 : index
    %c0_141 = arith.constant 0 : index
    %162 = vector.load %arg3[%c15_139, %c0_140, %c0_141] : memref<27x8x8xbf16, #tpu.memory_space<vmem>>, vector<1x8x8xbf16>
    %163 = vector.shape_cast %162 : vector<1x8x8xbf16> to vector<8x8xbf16>
    %cst_142 = arith.constant dense<0.000000e+00> : vector<8x512xf32>
    %164 = tpu.matmul %163, %161, %cst_142 {dimension_numbers = #tpu.dot_dimension_numbers<[1], [0], [0], [1], [0, 0, 1, 1], [], []>} : vector<8x8xbf16>, vector<8x512xbf16>, vector<8x512xf32> -> vector<8x512xf32>
    %165 = arith.addf %155, %164 : vector<8x512xf32>
    %c0_143 = arith.constant 0 : index
    %c0_144 = arith.constant 0 : index
    %c81 = arith.constant 81 : index
    %166 = vector.load %arg8[%c0_143, %c0_144, %c81] : memref<1x8x658xbf16, #tpu.memory_space<vmem>>, vector<1x8x512xbf16>
    %167 = vector.shape_cast %166 : vector<1x8x512xbf16> to vector<8x512xbf16>
    %c16_145 = arith.constant 16 : index
    %c0_146 = arith.constant 0 : index
    %c0_147 = arith.constant 0 : index
    %168 = vector.load %arg2[%c16_145, %c0_146, %c0_147] : memref<27x1x512xbf16, #tpu.memory_space<vmem>>, vector<1x1x512xbf16>
    %169 = vector.shape_cast %168 : vector<1x1x512xbf16> to vector<1x512xbf16>
    %170 = vector.broadcast %169 : vector<1x512xbf16> to vector<8x512xbf16>
    %171 = arith.mulf %167, %170 : vector<8x512xbf16>
    %c16_148 = arith.constant 16 : index
    %c0_149 = arith.constant 0 : index
    %c0_150 = arith.constant 0 : index
    %172 = vector.load %arg3[%c16_148, %c0_149, %c0_150] : memref<27x8x8xbf16, #tpu.memory_space<vmem>>, vector<1x8x8xbf16>
    %173 = vector.shape_cast %172 : vector<1x8x8xbf16> to vector<8x8xbf16>
    %cst_151 = arith.constant dense<0.000000e+00> : vector<8x512xf32>
    %174 = tpu.matmul %173, %171, %cst_151 {dimension_numbers = #tpu.dot_dimension_numbers<[1], [0], [0], [1], [0, 0, 1, 1], [], []>} : vector<8x8xbf16>, vector<8x512xbf16>, vector<8x512xf32> -> vector<8x512xf32>
    %175 = arith.addf %165, %174 : vector<8x512xf32>
    %c0_152 = arith.constant 0 : index
    %c0_153 = arith.constant 0 : index
    %c82 = arith.constant 82 : index
    %176 = vector.load %arg8[%c0_152, %c0_153, %c82] : memref<1x8x658xbf16, #tpu.memory_space<vmem>>, vector<1x8x512xbf16>
    %177 = vector.shape_cast %176 : vector<1x8x512xbf16> to vector<8x512xbf16>
    %c17_154 = arith.constant 17 : index
    %c0_155 = arith.constant 0 : index
    %c0_156 = arith.constant 0 : index
    %178 = vector.load %arg2[%c17_154, %c0_155, %c0_156] : memref<27x1x512xbf16, #tpu.memory_space<vmem>>, vector<1x1x512xbf16>
    %179 = vector.shape_cast %178 : vector<1x1x512xbf16> to vector<1x512xbf16>
    %180 = vector.broadcast %179 : vector<1x512xbf16> to vector<8x512xbf16>
    %181 = arith.mulf %177, %180 : vector<8x512xbf16>
    %c17_157 = arith.constant 17 : index
    %c0_158 = arith.constant 0 : index
    %c0_159 = arith.constant 0 : index
    %182 = vector.load %arg3[%c17_157, %c0_158, %c0_159] : memref<27x8x8xbf16, #tpu.memory_space<vmem>>, vector<1x8x8xbf16>
    %183 = vector.shape_cast %182 : vector<1x8x8xbf16> to vector<8x8xbf16>
    %cst_160 = arith.constant dense<0.000000e+00> : vector<8x512xf32>
    %184 = tpu.matmul %183, %181, %cst_160 {dimension_numbers = #tpu.dot_dimension_numbers<[1], [0], [0], [1], [0, 0, 1, 1], [], []>} : vector<8x8xbf16>, vector<8x512xbf16>, vector<8x512xf32> -> vector<8x512xf32>
    %185 = arith.addf %175, %184 : vector<8x512xf32>
    %c0_161 = arith.constant 0 : index
    %c0_162 = arith.constant 0 : index
    %c128 = arith.constant 128 : index
    %186 = vector.load %arg8[%c0_161, %c0_162, %c128] : memref<1x8x658xbf16, #tpu.memory_space<vmem>>, vector<1x8x512xbf16>
    %187 = vector.shape_cast %186 : vector<1x8x512xbf16> to vector<8x512xbf16>
    %c18_163 = arith.constant 18 : index
    %c0_164 = arith.constant 0 : index
    %c0_165 = arith.constant 0 : index
    %188 = vector.load %arg2[%c18_163, %c0_164, %c0_165] : memref<27x1x512xbf16, #tpu.memory_space<vmem>>, vector<1x1x512xbf16>
    %189 = vector.shape_cast %188 : vector<1x1x512xbf16> to vector<1x512xbf16>
    %190 = vector.broadcast %189 : vector<1x512xbf16> to vector<8x512xbf16>
    %191 = arith.mulf %187, %190 : vector<8x512xbf16>
    %c18_166 = arith.constant 18 : index
    %c0_167 = arith.constant 0 : index
    %c0_168 = arith.constant 0 : index
    %192 = vector.load %arg3[%c18_166, %c0_167, %c0_168] : memref<27x8x8xbf16, #tpu.memory_space<vmem>>, vector<1x8x8xbf16>
    %193 = vector.shape_cast %192 : vector<1x8x8xbf16> to vector<8x8xbf16>
    %cst_169 = arith.constant dense<0.000000e+00> : vector<8x512xf32>
    %194 = tpu.matmul %193, %191, %cst_169 {dimension_numbers = #tpu.dot_dimension_numbers<[1], [0], [0], [1], [0, 0, 1, 1], [], []>} : vector<8x8xbf16>, vector<8x512xbf16>, vector<8x512xf32> -> vector<8x512xf32>
    %195 = arith.addf %185, %194 : vector<8x512xf32>
    %c0_170 = arith.constant 0 : index
    %c0_171 = arith.constant 0 : index
    %c129 = arith.constant 129 : index
    %196 = vector.load %arg8[%c0_170, %c0_171, %c129] : memref<1x8x658xbf16, #tpu.memory_space<vmem>>, vector<1x8x512xbf16>
    %197 = vector.shape_cast %196 : vector<1x8x512xbf16> to vector<8x512xbf16>
    %c19 = arith.constant 19 : index
    %c0_172 = arith.constant 0 : index
    %c0_173 = arith.constant 0 : index
    %198 = vector.load %arg2[%c19, %c0_172, %c0_173] : memref<27x1x512xbf16, #tpu.memory_space<vmem>>, vector<1x1x512xbf16>
    %199 = vector.shape_cast %198 : vector<1x1x512xbf16> to vector<1x512xbf16>
    %200 = vector.broadcast %199 : vector<1x512xbf16> to vector<8x512xbf16>
    %201 = arith.mulf %197, %200 : vector<8x512xbf16>
    %c19_174 = arith.constant 19 : index
    %c0_175 = arith.constant 0 : index
    %c0_176 = arith.constant 0 : index
    %202 = vector.load %arg3[%c19_174, %c0_175, %c0_176] : memref<27x8x8xbf16, #tpu.memory_space<vmem>>, vector<1x8x8xbf16>
    %203 = vector.shape_cast %202 : vector<1x8x8xbf16> to vector<8x8xbf16>
    %cst_177 = arith.constant dense<0.000000e+00> : vector<8x512xf32>
    %204 = tpu.matmul %203, %201, %cst_177 {dimension_numbers = #tpu.dot_dimension_numbers<[1], [0], [0], [1], [0, 0, 1, 1], [], []>} : vector<8x8xbf16>, vector<8x512xbf16>, vector<8x512xf32> -> vector<8x512xf32>
    %205 = arith.addf %195, %204 : vector<8x512xf32>
    %c0_178 = arith.constant 0 : index
    %c0_179 = arith.constant 0 : index
    %c130 = arith.constant 130 : index
    %206 = vector.load %arg8[%c0_178, %c0_179, %c130] : memref<1x8x658xbf16, #tpu.memory_space<vmem>>, vector<1x8x512xbf16>
    %207 = vector.shape_cast %206 : vector<1x8x512xbf16> to vector<8x512xbf16>
    %c20 = arith.constant 20 : index
    %c0_180 = arith.constant 0 : index
    %c0_181 = arith.constant 0 : index
    %208 = vector.load %arg2[%c20, %c0_180, %c0_181] : memref<27x1x512xbf16, #tpu.memory_space<vmem>>, vector<1x1x512xbf16>
    %209 = vector.shape_cast %208 : vector<1x1x512xbf16> to vector<1x512xbf16>
    %210 = vector.broadcast %209 : vector<1x512xbf16> to vector<8x512xbf16>
    %211 = arith.mulf %207, %210 : vector<8x512xbf16>
    %c20_182 = arith.constant 20 : index
    %c0_183 = arith.constant 0 : index
    %c0_184 = arith.constant 0 : index
    %212 = vector.load %arg3[%c20_182, %c0_183, %c0_184] : memref<27x8x8xbf16, #tpu.memory_space<vmem>>, vector<1x8x8xbf16>
    %213 = vector.shape_cast %212 : vector<1x8x8xbf16> to vector<8x8xbf16>
    %cst_185 = arith.constant dense<0.000000e+00> : vector<8x512xf32>
    %214 = tpu.matmul %213, %211, %cst_185 {dimension_numbers = #tpu.dot_dimension_numbers<[1], [0], [0], [1], [0, 0, 1, 1], [], []>} : vector<8x8xbf16>, vector<8x512xbf16>, vector<8x512xf32> -> vector<8x512xf32>
    %215 = arith.addf %205, %214 : vector<8x512xf32>
    %c0_186 = arith.constant 0 : index
    %c0_187 = arith.constant 0 : index
    %c136 = arith.constant 136 : index
    %216 = vector.load %arg8[%c0_186, %c0_187, %c136] : memref<1x8x658xbf16, #tpu.memory_space<vmem>>, vector<1x8x512xbf16>
    %217 = vector.shape_cast %216 : vector<1x8x512xbf16> to vector<8x512xbf16>
    %c21 = arith.constant 21 : index
    %c0_188 = arith.constant 0 : index
    %c0_189 = arith.constant 0 : index
    %218 = vector.load %arg2[%c21, %c0_188, %c0_189] : memref<27x1x512xbf16, #tpu.memory_space<vmem>>, vector<1x1x512xbf16>
    %219 = vector.shape_cast %218 : vector<1x1x512xbf16> to vector<1x512xbf16>
    %220 = vector.broadcast %219 : vector<1x512xbf16> to vector<8x512xbf16>
    %221 = arith.mulf %217, %220 : vector<8x512xbf16>
    %c21_190 = arith.constant 21 : index
    %c0_191 = arith.constant 0 : index
    %c0_192 = arith.constant 0 : index
    %222 = vector.load %arg3[%c21_190, %c0_191, %c0_192] : memref<27x8x8xbf16, #tpu.memory_space<vmem>>, vector<1x8x8xbf16>
    %223 = vector.shape_cast %222 : vector<1x8x8xbf16> to vector<8x8xbf16>
    %cst_193 = arith.constant dense<0.000000e+00> : vector<8x512xf32>
    %224 = tpu.matmul %223, %221, %cst_193 {dimension_numbers = #tpu.dot_dimension_numbers<[1], [0], [0], [1], [0, 0, 1, 1], [], []>} : vector<8x8xbf16>, vector<8x512xbf16>, vector<8x512xf32> -> vector<8x512xf32>
    %225 = arith.addf %215, %224 : vector<8x512xf32>
    %c0_194 = arith.constant 0 : index
    %c0_195 = arith.constant 0 : index
    %c137 = arith.constant 137 : index
    %226 = vector.load %arg8[%c0_194, %c0_195, %c137] : memref<1x8x658xbf16, #tpu.memory_space<vmem>>, vector<1x8x512xbf16>
    %227 = vector.shape_cast %226 : vector<1x8x512xbf16> to vector<8x512xbf16>
    %c22 = arith.constant 22 : index
    %c0_196 = arith.constant 0 : index
    %c0_197 = arith.constant 0 : index
    %228 = vector.load %arg2[%c22, %c0_196, %c0_197] : memref<27x1x512xbf16, #tpu.memory_space<vmem>>, vector<1x1x512xbf16>
    %229 = vector.shape_cast %228 : vector<1x1x512xbf16> to vector<1x512xbf16>
    %230 = vector.broadcast %229 : vector<1x512xbf16> to vector<8x512xbf16>
    %231 = arith.mulf %227, %230 : vector<8x512xbf16>
    %c22_198 = arith.constant 22 : index
    %c0_199 = arith.constant 0 : index
    %c0_200 = arith.constant 0 : index
    %232 = vector.load %arg3[%c22_198, %c0_199, %c0_200] : memref<27x8x8xbf16, #tpu.memory_space<vmem>>, vector<1x8x8xbf16>
    %233 = vector.shape_cast %232 : vector<1x8x8xbf16> to vector<8x8xbf16>
    %cst_201 = arith.constant dense<0.000000e+00> : vector<8x512xf32>
    %234 = tpu.matmul %233, %231, %cst_201 {dimension_numbers = #tpu.dot_dimension_numbers<[1], [0], [0], [1], [0, 0, 1, 1], [], []>} : vector<8x8xbf16>, vector<8x512xbf16>, vector<8x512xf32> -> vector<8x512xf32>
    %235 = arith.addf %225, %234 : vector<8x512xf32>
    %c0_202 = arith.constant 0 : index
    %c0_203 = arith.constant 0 : index
    %c138 = arith.constant 138 : index
    %236 = vector.load %arg8[%c0_202, %c0_203, %c138] : memref<1x8x658xbf16, #tpu.memory_space<vmem>>, vector<1x8x512xbf16>
    %237 = vector.shape_cast %236 : vector<1x8x512xbf16> to vector<8x512xbf16>
    %c23 = arith.constant 23 : index
    %c0_204 = arith.constant 0 : index
    %c0_205 = arith.constant 0 : index
    %238 = vector.load %arg2[%c23, %c0_204, %c0_205] : memref<27x1x512xbf16, #tpu.memory_space<vmem>>, vector<1x1x512xbf16>
    %239 = vector.shape_cast %238 : vector<1x1x512xbf16> to vector<1x512xbf16>
    %240 = vector.broadcast %239 : vector<1x512xbf16> to vector<8x512xbf16>
    %241 = arith.mulf %237, %240 : vector<8x512xbf16>
    %c23_206 = arith.constant 23 : index
    %c0_207 = arith.constant 0 : index
    %c0_208 = arith.constant 0 : index
    %242 = vector.load %arg3[%c23_206, %c0_207, %c0_208] : memref<27x8x8xbf16, #tpu.memory_space<vmem>>, vector<1x8x8xbf16>
    %243 = vector.shape_cast %242 : vector<1x8x8xbf16> to vector<8x8xbf16>
    %cst_209 = arith.constant dense<0.000000e+00> : vector<8x512xf32>
    %244 = tpu.matmul %243, %241, %cst_209 {dimension_numbers = #tpu.dot_dimension_numbers<[1], [0], [0], [1], [0, 0, 1, 1], [], []>} : vector<8x8xbf16>, vector<8x512xbf16>, vector<8x512xf32> -> vector<8x512xf32>
    %245 = arith.addf %235, %244 : vector<8x512xf32>
    %c0_210 = arith.constant 0 : index
    %c0_211 = arith.constant 0 : index
    %c144 = arith.constant 144 : index
    %246 = vector.load %arg8[%c0_210, %c0_211, %c144] : memref<1x8x658xbf16, #tpu.memory_space<vmem>>, vector<1x8x512xbf16>
    %247 = vector.shape_cast %246 : vector<1x8x512xbf16> to vector<8x512xbf16>
    %c24 = arith.constant 24 : index
    %c0_212 = arith.constant 0 : index
    %c0_213 = arith.constant 0 : index
    %248 = vector.load %arg2[%c24, %c0_212, %c0_213] : memref<27x1x512xbf16, #tpu.memory_space<vmem>>, vector<1x1x512xbf16>
    %249 = vector.shape_cast %248 : vector<1x1x512xbf16> to vector<1x512xbf16>
    %250 = vector.broadcast %249 : vector<1x512xbf16> to vector<8x512xbf16>
    %251 = arith.mulf %247, %250 : vector<8x512xbf16>
    %c24_214 = arith.constant 24 : index
    %c0_215 = arith.constant 0 : index
    %c0_216 = arith.constant 0 : index
    %252 = vector.load %arg3[%c24_214, %c0_215, %c0_216] : memref<27x8x8xbf16, #tpu.memory_space<vmem>>, vector<1x8x8xbf16>
    %253 = vector.shape_cast %252 : vector<1x8x8xbf16> to vector<8x8xbf16>
    %cst_217 = arith.constant dense<0.000000e+00> : vector<8x512xf32>
    %254 = tpu.matmul %253, %251, %cst_217 {dimension_numbers = #tpu.dot_dimension_numbers<[1], [0], [0], [1], [0, 0, 1, 1], [], []>} : vector<8x8xbf16>, vector<8x512xbf16>, vector<8x512xf32> -> vector<8x512xf32>
    %255 = arith.addf %245, %254 : vector<8x512xf32>
    %c0_218 = arith.constant 0 : index
    %c0_219 = arith.constant 0 : index
    %c145 = arith.constant 145 : index
    %256 = vector.load %arg8[%c0_218, %c0_219, %c145] : memref<1x8x658xbf16, #tpu.memory_space<vmem>>, vector<1x8x512xbf16>
    %257 = vector.shape_cast %256 : vector<1x8x512xbf16> to vector<8x512xbf16>
    %c25 = arith.constant 25 : index
    %c0_220 = arith.constant 0 : index
    %c0_221 = arith.constant 0 : index
    %258 = vector.load %arg2[%c25, %c0_220, %c0_221] : memref<27x1x512xbf16, #tpu.memory_space<vmem>>, vector<1x1x512xbf16>
    %259 = vector.shape_cast %258 : vector<1x1x512xbf16> to vector<1x512xbf16>
    %260 = vector.broadcast %259 : vector<1x512xbf16> to vector<8x512xbf16>
    %261 = arith.mulf %257, %260 : vector<8x512xbf16>
    %c25_222 = arith.constant 25 : index
    %c0_223 = arith.constant 0 : index
    %c0_224 = arith.constant 0 : index
    %262 = vector.load %arg3[%c25_222, %c0_223, %c0_224] : memref<27x8x8xbf16, #tpu.memory_space<vmem>>, vector<1x8x8xbf16>
    %263 = vector.shape_cast %262 : vector<1x8x8xbf16> to vector<8x8xbf16>
    %cst_225 = arith.constant dense<0.000000e+00> : vector<8x512xf32>
    %264 = tpu.matmul %263, %261, %cst_225 {dimension_numbers = #tpu.dot_dimension_numbers<[1], [0], [0], [1], [0, 0, 1, 1], [], []>} : vector<8x8xbf16>, vector<8x512xbf16>, vector<8x512xf32> -> vector<8x512xf32>
    %265 = arith.addf %255, %264 : vector<8x512xf32>
    %c0_226 = arith.constant 0 : index
    %c0_227 = arith.constant 0 : index
    %c146 = arith.constant 146 : index
    %266 = vector.load %arg8[%c0_226, %c0_227, %c146] : memref<1x8x658xbf16, #tpu.memory_space<vmem>>, vector<1x8x512xbf16>
    %267 = vector.shape_cast %266 : vector<1x8x512xbf16> to vector<8x512xbf16>
    %c26 = arith.constant 26 : index
    %c0_228 = arith.constant 0 : index
    %c0_229 = arith.constant 0 : index
    %268 = vector.load %arg2[%c26, %c0_228, %c0_229] : memref<27x1x512xbf16, #tpu.memory_space<vmem>>, vector<1x1x512xbf16>
    %269 = vector.shape_cast %268 : vector<1x1x512xbf16> to vector<1x512xbf16>
    %270 = vector.broadcast %269 : vector<1x512xbf16> to vector<8x512xbf16>
    %271 = arith.mulf %267, %270 : vector<8x512xbf16>
    %c26_230 = arith.constant 26 : index
    %c0_231 = arith.constant 0 : index
    %c0_232 = arith.constant 0 : index
    %272 = vector.load %arg3[%c26_230, %c0_231, %c0_232] : memref<27x8x8xbf16, #tpu.memory_space<vmem>>, vector<1x8x8xbf16>
    %273 = vector.shape_cast %272 : vector<1x8x8xbf16> to vector<8x8xbf16>
    %cst_233 = arith.constant dense<0.000000e+00> : vector<8x512xf32>
    %274 = tpu.matmul %273, %271, %cst_233 {dimension_numbers = #tpu.dot_dimension_numbers<[1], [0], [0], [1], [0, 0, 1, 1], [], []>} : vector<8x8xbf16>, vector<8x512xbf16>, vector<8x512xf32> -> vector<8x512xf32>
    %275 = arith.addf %265, %274 : vector<8x512xf32>
    %c0_234 = arith.constant 0 : index
    %c0_235 = arith.constant 0 : index
    %276 = vector.load %arg4[%c0_234, %c0_235] : memref<8x1xf32, #tpu.memory_space<vmem>>, vector<8x1xf32>
    %277 = vector.broadcast %276 : vector<8x1xf32> to vector<8x512xf32>
    %278 = arith.addf %275, %277 : vector<8x512xf32>
    %cst_236 = arith.constant 0.000000e+00 : f32
    %279 = vector.broadcast %cst_236 : f32 to vector<8x512xf32>
    %280 = arith.maximumf %278, %279 : vector<8x512xf32>
    %281 = arith.truncf %280 : vector<8x512xf32> to vector<8x512xbf16>
    %c0_237 = arith.constant 0 : index
    %c0_238 = arith.constant 0 : index
    %c73_239 = arith.constant 73 : index
    %282 = vector.load %arg8[%c0_237, %c0_238, %c73_239] : memref<1x8x658xbf16, #tpu.memory_space<vmem>>, vector<1x8x512xbf16>
    %283 = vector.shape_cast %282 : vector<1x8x512xbf16> to vector<8x512xbf16>
    %284 = vector.shape_cast %281 : vector<8x512xbf16> to vector<1x8x512xbf16>
    tpu.vector_store %arg8[%c0_237, %c0_238, %c73_239], %284 {strides = array<i32>} : memref<1x8x658xbf16, #tpu.memory_space<vmem>>, vector<1x8x512xbf16>,
    %cst_240 = arith.constant 0.000000e+00 : f32
    %285 = vector.broadcast %cst_240 : f32 to vector<8x512xf32>
    %c0_241 = arith.constant 0 : index
    %c0_242 = arith.constant 0 : index
    %c0_243 = arith.constant 0 : index
    %286 = vector.load %arg8[%c0_241, %c0_242, %c0_243] : memref<1x8x658xbf16, #tpu.memory_space<vmem>>, vector<1x8x512xbf16>
    %287 = vector.shape_cast %286 : vector<1x8x512xbf16> to vector<8x512xbf16>
    %c0_244 = arith.constant 0 : index
    %c0_245 = arith.constant 0 : index
    %c0_246 = arith.constant 0 : index
    %288 = vector.load %arg2[%c0_244, %c0_245, %c0_246] : memref<27x1x512xbf16, #tpu.memory_space<vmem>>, vector<1x1x512xbf16>
    %289 = vector.shape_cast %288 : vector<1x1x512xbf16> to vector<1x512xbf16>
    %290 = vector.broadcast %289 : vector<1x512xbf16> to vector<8x512xbf16>
    %291 = arith.mulf %287, %290 : vector<8x512xbf16>
    %c0_247 = arith.constant 0 : index
    %c0_248 = arith.constant 0 : index
    %c0_249 = arith.constant 0 : index
    %292 = vector.load %arg5[%c0_247, %c0_248, %c0_249] : memref<27x8x8xbf16, #tpu.memory_space<vmem>>, vector<1x8x8xbf16>
    %293 = vector.shape_cast %292 : vector<1x8x8xbf16> to vector<8x8xbf16>
    %cst_250 = arith.constant dense<0.000000e+00> : vector<8x512xf32>
    %294 = tpu.matmul %293, %291, %cst_250 {dimension_numbers = #tpu.dot_dimension_numbers<[1], [0], [0], [1], [0, 0, 1, 1], [], []>} : vector<8x8xbf16>, vector<8x512xbf16>, vector<8x512xf32> -> vector<8x512xf32>
    %295 = arith.addf %285, %294 : vector<8x512xf32>
    %c0_251 = arith.constant 0 : index
    %c0_252 = arith.constant 0 : index
    %c1_253 = arith.constant 1 : index
    %296 = vector.load %arg8[%c0_251, %c0_252, %c1_253] : memref<1x8x658xbf16, #tpu.memory_space<vmem>>, vector<1x8x512xbf16>
    %297 = vector.shape_cast %296 : vector<1x8x512xbf16> to vector<8x512xbf16>
    %c1_254 = arith.constant 1 : index
    %c0_255 = arith.constant 0 : index
    %c0_256 = arith.constant 0 : index
    %298 = vector.load %arg2[%c1_254, %c0_255, %c0_256] : memref<27x1x512xbf16, #tpu.memory_space<vmem>>, vector<1x1x512xbf16>
    %299 = vector.shape_cast %298 : vector<1x1x512xbf16> to vector<1x512xbf16>
    %300 = vector.broadcast %299 : vector<1x512xbf16> to vector<8x512xbf16>
    %301 = arith.mulf %297, %300 : vector<8x512xbf16>
    %c1_257 = arith.constant 1 : index
    %c0_258 = arith.constant 0 : index
    %c0_259 = arith.constant 0 : index
    %302 = vector.load %arg5[%c1_257, %c0_258, %c0_259] : memref<27x8x8xbf16, #tpu.memory_space<vmem>>, vector<1x8x8xbf16>
    %303 = vector.shape_cast %302 : vector<1x8x8xbf16> to vector<8x8xbf16>
    %cst_260 = arith.constant dense<0.000000e+00> : vector<8x512xf32>
    %304 = tpu.matmul %303, %301, %cst_260 {dimension_numbers = #tpu.dot_dimension_numbers<[1], [0], [0], [1], [0, 0, 1, 1], [], []>} : vector<8x8xbf16>, vector<8x512xbf16>, vector<8x512xf32> -> vector<8x512xf32>
    %305 = arith.addf %295, %304 : vector<8x512xf32>
    %c0_261 = arith.constant 0 : index
    %c0_262 = arith.constant 0 : index
    %c2_263 = arith.constant 2 : index
    %306 = vector.load %arg8[%c0_261, %c0_262, %c2_263] : memref<1x8x658xbf16, #tpu.memory_space<vmem>>, vector<1x8x512xbf16>
    %307 = vector.shape_cast %306 : vector<1x8x512xbf16> to vector<8x512xbf16>
    %c2_264 = arith.constant 2 : index
    %c0_265 = arith.constant 0 : index
    %c0_266 = arith.constant 0 : index
    %308 = vector.load %arg2[%c2_264, %c0_265, %c0_266] : memref<27x1x512xbf16, #tpu.memory_space<vmem>>, vector<1x1x512xbf16>
    %309 = vector.shape_cast %308 : vector<1x1x512xbf16> to vector<1x512xbf16>
    %310 = vector.broadcast %309 : vector<1x512xbf16> to vector<8x512xbf16>
    %311 = arith.mulf %307, %310 : vector<8x512xbf16>
    %c2_267 = arith.constant 2 : index
    %c0_268 = arith.constant 0 : index
    %c0_269 = arith.constant 0 : index
    %312 = vector.load %arg5[%c2_267, %c0_268, %c0_269] : memref<27x8x8xbf16, #tpu.memory_space<vmem>>, vector<1x8x8xbf16>
    %313 = vector.shape_cast %312 : vector<1x8x8xbf16> to vector<8x8xbf16>
    %cst_270 = arith.constant dense<0.000000e+00> : vector<8x512xf32>
    %314 = tpu.matmul %313, %311, %cst_270 {dimension_numbers = #tpu.dot_dimension_numbers<[1], [0], [0], [1], [0, 0, 1, 1], [], []>} : vector<8x8xbf16>, vector<8x512xbf16>, vector<8x512xf32> -> vector<8x512xf32>
    %315 = arith.addf %305, %314 : vector<8x512xf32>
    %c0_271 = arith.constant 0 : index
    %c0_272 = arith.constant 0 : index
    %c8_273 = arith.constant 8 : index
    %316 = vector.load %arg8[%c0_271, %c0_272, %c8_273] : memref<1x8x658xbf16, #tpu.memory_space<vmem>>, vector<1x8x512xbf16>
    %317 = vector.shape_cast %316 : vector<1x8x512xbf16> to vector<8x512xbf16>
    %c3_274 = arith.constant 3 : index
    %c0_275 = arith.constant 0 : index
    %c0_276 = arith.constant 0 : index
    %318 = vector.load %arg2[%c3_274, %c0_275, %c0_276] : memref<27x1x512xbf16, #tpu.memory_space<vmem>>, vector<1x1x512xbf16>
    %319 = vector.shape_cast %318 : vector<1x1x512xbf16> to vector<1x512xbf16>
    %320 = vector.broadcast %319 : vector<1x512xbf16> to vector<8x512xbf16>
    %321 = arith.mulf %317, %320 : vector<8x512xbf16>
    %c3_277 = arith.constant 3 : index
    %c0_278 = arith.constant 0 : index
    %c0_279 = arith.constant 0 : index
    %322 = vector.load %arg5[%c3_277, %c0_278, %c0_279] : memref<27x8x8xbf16, #tpu.memory_space<vmem>>, vector<1x8x8xbf16>
    %323 = vector.shape_cast %322 : vector<1x8x8xbf16> to vector<8x8xbf16>
    %cst_280 = arith.constant dense<0.000000e+00> : vector<8x512xf32>
    %324 = tpu.matmul %323, %321, %cst_280 {dimension_numbers = #tpu.dot_dimension_numbers<[1], [0], [0], [1], [0, 0, 1, 1], [], []>} : vector<8x8xbf16>, vector<8x512xbf16>, vector<8x512xf32> -> vector<8x512xf32>
    %325 = arith.addf %315, %324 : vector<8x512xf32>
    %c0_281 = arith.constant 0 : index
    %c0_282 = arith.constant 0 : index
    %c9_283 = arith.constant 9 : index
    %326 = vector.load %arg8[%c0_281, %c0_282, %c9_283] : memref<1x8x658xbf16, #tpu.memory_space<vmem>>, vector<1x8x512xbf16>
    %327 = vector.shape_cast %326 : vector<1x8x512xbf16> to vector<8x512xbf16>
    %c4_284 = arith.constant 4 : index
    %c0_285 = arith.constant 0 : index
    %c0_286 = arith.constant 0 : index
    %328 = vector.load %arg2[%c4_284, %c0_285, %c0_286] : memref<27x1x512xbf16, #tpu.memory_space<vmem>>, vector<1x1x512xbf16>
    %329 = vector.shape_cast %328 : vector<1x1x512xbf16> to vector<1x512xbf16>
    %330 = vector.broadcast %329 : vector<1x512xbf16> to vector<8x512xbf16>
    %331 = arith.mulf %327, %330 : vector<8x512xbf16>
    %c4_287 = arith.constant 4 : index
    %c0_288 = arith.constant 0 : index
    %c0_289 = arith.constant 0 : index
    %332 = vector.load %arg5[%c4_287, %c0_288, %c0_289] : memref<27x8x8xbf16, #tpu.memory_space<vmem>>, vector<1x8x8xbf16>
    %333 = vector.shape_cast %332 : vector<1x8x8xbf16> to vector<8x8xbf16>
    %cst_290 = arith.constant dense<0.000000e+00> : vector<8x512xf32>
    %334 = tpu.matmul %333, %331, %cst_290 {dimension_numbers = #tpu.dot_dimension_numbers<[1], [0], [0], [1], [0, 0, 1, 1], [], []>} : vector<8x8xbf16>, vector<8x512xbf16>, vector<8x512xf32> -> vector<8x512xf32>
    %335 = arith.addf %325, %334 : vector<8x512xf32>
    %c0_291 = arith.constant 0 : index
    %c0_292 = arith.constant 0 : index
    %c10_293 = arith.constant 10 : index
    %336 = vector.load %arg8[%c0_291, %c0_292, %c10_293] : memref<1x8x658xbf16, #tpu.memory_space<vmem>>, vector<1x8x512xbf16>
    %337 = vector.shape_cast %336 : vector<1x8x512xbf16> to vector<8x512xbf16>
    %c5_294 = arith.constant 5 : index
    %c0_295 = arith.constant 0 : index
    %c0_296 = arith.constant 0 : index
    %338 = vector.load %arg2[%c5_294, %c0_295, %c0_296] : memref<27x1x512xbf16, #tpu.memory_space<vmem>>, vector<1x1x512xbf16>
    %339 = vector.shape_cast %338 : vector<1x1x512xbf16> to vector<1x512xbf16>
    %340 = vector.broadcast %339 : vector<1x512xbf16> to vector<8x512xbf16>
    %341 = arith.mulf %337, %340 : vector<8x512xbf16>
    %c5_297 = arith.constant 5 : index
    %c0_298 = arith.constant 0 : index
    %c0_299 = arith.constant 0 : index
    %342 = vector.load %arg5[%c5_297, %c0_298, %c0_299] : memref<27x8x8xbf16, #tpu.memory_space<vmem>>, vector<1x8x8xbf16>
    %343 = vector.shape_cast %342 : vector<1x8x8xbf16> to vector<8x8xbf16>
    %cst_300 = arith.constant dense<0.000000e+00> : vector<8x512xf32>
    %344 = tpu.matmul %343, %341, %cst_300 {dimension_numbers = #tpu.dot_dimension_numbers<[1], [0], [0], [1], [0, 0, 1, 1], [], []>} : vector<8x8xbf16>, vector<8x512xbf16>, vector<8x512xf32> -> vector<8x512xf32>
    %345 = arith.addf %335, %344 : vector<8x512xf32>
    %c0_301 = arith.constant 0 : index
    %c0_302 = arith.constant 0 : index
    %c16_303 = arith.constant 16 : index
    %346 = vector.load %arg8[%c0_301, %c0_302, %c16_303] : memref<1x8x658xbf16, #tpu.memory_space<vmem>>, vector<1x8x512xbf16>
    %347 = vector.shape_cast %346 : vector<1x8x512xbf16> to vector<8x512xbf16>
    %c6_304 = arith.constant 6 : index
    %c0_305 = arith.constant 0 : index
    %c0_306 = arith.constant 0 : index
    %348 = vector.load %arg2[%c6_304, %c0_305, %c0_306] : memref<27x1x512xbf16, #tpu.memory_space<vmem>>, vector<1x1x512xbf16>
    %349 = vector.shape_cast %348 : vector<1x1x512xbf16> to vector<1x512xbf16>
    %350 = vector.broadcast %349 : vector<1x512xbf16> to vector<8x512xbf16>
    %351 = arith.mulf %347, %350 : vector<8x512xbf16>
    %c6_307 = arith.constant 6 : index
    %c0_308 = arith.constant 0 : index
    %c0_309 = arith.constant 0 : index
    %352 = vector.load %arg5[%c6_307, %c0_308, %c0_309] : memref<27x8x8xbf16, #tpu.memory_space<vmem>>, vector<1x8x8xbf16>
    %353 = vector.shape_cast %352 : vector<1x8x8xbf16> to vector<8x8xbf16>
    %cst_310 = arith.constant dense<0.000000e+00> : vector<8x512xf32>
    %354 = tpu.matmul %353, %351, %cst_310 {dimension_numbers = #tpu.dot_dimension_numbers<[1], [0], [0], [1], [0, 0, 1, 1], [], []>} : vector<8x8xbf16>, vector<8x512xbf16>, vector<8x512xf32> -> vector<8x512xf32>
    %355 = arith.addf %345, %354 : vector<8x512xf32>
    %c0_311 = arith.constant 0 : index
    %c0_312 = arith.constant 0 : index
    %c17_313 = arith.constant 17 : index
    %356 = vector.load %arg8[%c0_311, %c0_312, %c17_313] : memref<1x8x658xbf16, #tpu.memory_space<vmem>>, vector<1x8x512xbf16>
    %357 = vector.shape_cast %356 : vector<1x8x512xbf16> to vector<8x512xbf16>
    %c7_314 = arith.constant 7 : index
    %c0_315 = arith.constant 0 : index
    %c0_316 = arith.constant 0 : index
    %358 = vector.load %arg2[%c7_314, %c0_315, %c0_316] : memref<27x1x512xbf16, #tpu.memory_space<vmem>>, vector<1x1x512xbf16>
    %359 = vector.shape_cast %358 : vector<1x1x512xbf16> to vector<1x512xbf16>
    %360 = vector.broadcast %359 : vector<1x512xbf16> to vector<8x512xbf16>
    %361 = arith.mulf %357, %360 : vector<8x512xbf16>
    %c7_317 = arith.constant 7 : index
    %c0_318 = arith.constant 0 : index
    %c0_319 = arith.constant 0 : index
    %362 = vector.load %arg5[%c7_317, %c0_318, %c0_319] : memref<27x8x8xbf16, #tpu.memory_space<vmem>>, vector<1x8x8xbf16>
    %363 = vector.shape_cast %362 : vector<1x8x8xbf16> to vector<8x8xbf16>
    %cst_320 = arith.constant dense<0.000000e+00> : vector<8x512xf32>
    %364 = tpu.matmul %363, %361, %cst_320 {dimension_numbers = #tpu.dot_dimension_numbers<[1], [0], [0], [1], [0, 0, 1, 1], [], []>} : vector<8x8xbf16>, vector<8x512xbf16>, vector<8x512xf32> -> vector<8x512xf32>
    %365 = arith.addf %355, %364 : vector<8x512xf32>
    %c0_321 = arith.constant 0 : index
    %c0_322 = arith.constant 0 : index
    %c18_323 = arith.constant 18 : index
    %366 = vector.load %arg8[%c0_321, %c0_322, %c18_323] : memref<1x8x658xbf16, #tpu.memory_space<vmem>>, vector<1x8x512xbf16>
    %367 = vector.shape_cast %366 : vector<1x8x512xbf16> to vector<8x512xbf16>
    %c8_324 = arith.constant 8 : index
    %c0_325 = arith.constant 0 : index
    %c0_326 = arith.constant 0 : index
    %368 = vector.load %arg2[%c8_324, %c0_325, %c0_326] : memref<27x1x512xbf16, #tpu.memory_space<vmem>>, vector<1x1x512xbf16>
    %369 = vector.shape_cast %368 : vector<1x1x512xbf16> to vector<1x512xbf16>
    %370 = vector.broadcast %369 : vector<1x512xbf16> to vector<8x512xbf16>
    %371 = arith.mulf %367, %370 : vector<8x512xbf16>
    %c8_327 = arith.constant 8 : index
    %c0_328 = arith.constant 0 : index
    %c0_329 = arith.constant 0 : index
    %372 = vector.load %arg5[%c8_327, %c0_328, %c0_329] : memref<27x8x8xbf16, #tpu.memory_space<vmem>>, vector<1x8x8xbf16>
    %373 = vector.shape_cast %372 : vector<1x8x8xbf16> to vector<8x8xbf16>
    %cst_330 = arith.constant dense<0.000000e+00> : vector<8x512xf32>
    %374 = tpu.matmul %373, %371, %cst_330 {dimension_numbers = #tpu.dot_dimension_numbers<[1], [0], [0], [1], [0, 0, 1, 1], [], []>} : vector<8x8xbf16>, vector<8x512xbf16>, vector<8x512xf32> -> vector<8x512xf32>
    %375 = arith.addf %365, %374 : vector<8x512xf32>
    %c0_331 = arith.constant 0 : index
    %c0_332 = arith.constant 0 : index
    %c64_333 = arith.constant 64 : index
    %376 = vector.load %arg8[%c0_331, %c0_332, %c64_333] : memref<1x8x658xbf16, #tpu.memory_space<vmem>>, vector<1x8x512xbf16>
    %377 = vector.shape_cast %376 : vector<1x8x512xbf16> to vector<8x512xbf16>
    %c9_334 = arith.constant 9 : index
    %c0_335 = arith.constant 0 : index
    %c0_336 = arith.constant 0 : index
    %378 = vector.load %arg2[%c9_334, %c0_335, %c0_336] : memref<27x1x512xbf16, #tpu.memory_space<vmem>>, vector<1x1x512xbf16>
    %379 = vector.shape_cast %378 : vector<1x1x512xbf16> to vector<1x512xbf16>
    %380 = vector.broadcast %379 : vector<1x512xbf16> to vector<8x512xbf16>
    %381 = arith.mulf %377, %380 : vector<8x512xbf16>
    %c9_337 = arith.constant 9 : index
    %c0_338 = arith.constant 0 : index
    %c0_339 = arith.constant 0 : index
    %382 = vector.load %arg5[%c9_337, %c0_338, %c0_339] : memref<27x8x8xbf16, #tpu.memory_space<vmem>>, vector<1x8x8xbf16>
    %383 = vector.shape_cast %382 : vector<1x8x8xbf16> to vector<8x8xbf16>
    %cst_340 = arith.constant dense<0.000000e+00> : vector<8x512xf32>
    %384 = tpu.matmul %383, %381, %cst_340 {dimension_numbers = #tpu.dot_dimension_numbers<[1], [0], [0], [1], [0, 0, 1, 1], [], []>} : vector<8x8xbf16>, vector<8x512xbf16>, vector<8x512xf32> -> vector<8x512xf32>
    %385 = arith.addf %375, %384 : vector<8x512xf32>
    %c0_341 = arith.constant 0 : index
    %c0_342 = arith.constant 0 : index
    %c65_343 = arith.constant 65 : index
    %386 = vector.load %arg8[%c0_341, %c0_342, %c65_343] : memref<1x8x658xbf16, #tpu.memory_space<vmem>>, vector<1x8x512xbf16>
    %387 = vector.shape_cast %386 : vector<1x8x512xbf16> to vector<8x512xbf16>
    %c10_344 = arith.constant 10 : index
    %c0_345 = arith.constant 0 : index
    %c0_346 = arith.constant 0 : index
    %388 = vector.load %arg2[%c10_344, %c0_345, %c0_346] : memref<27x1x512xbf16, #tpu.memory_space<vmem>>, vector<1x1x512xbf16>
    %389 = vector.shape_cast %388 : vector<1x1x512xbf16> to vector<1x512xbf16>
    %390 = vector.broadcast %389 : vector<1x512xbf16> to vector<8x512xbf16>
    %391 = arith.mulf %387, %390 : vector<8x512xbf16>
    %c10_347 = arith.constant 10 : index
    %c0_348 = arith.constant 0 : index
    %c0_349 = arith.constant 0 : index
    %392 = vector.load %arg5[%c10_347, %c0_348, %c0_349] : memref<27x8x8xbf16, #tpu.memory_space<vmem>>, vector<1x8x8xbf16>
    %393 = vector.shape_cast %392 : vector<1x8x8xbf16> to vector<8x8xbf16>
    %cst_350 = arith.constant dense<0.000000e+00> : vector<8x512xf32>
    %394 = tpu.matmul %393, %391, %cst_350 {dimension_numbers = #tpu.dot_dimension_numbers<[1], [0], [0], [1], [0, 0, 1, 1], [], []>} : vector<8x8xbf16>, vector<8x512xbf16>, vector<8x512xf32> -> vector<8x512xf32>
    %395 = arith.addf %385, %394 : vector<8x512xf32>
    %c0_351 = arith.constant 0 : index
    %c0_352 = arith.constant 0 : index
    %c66_353 = arith.constant 66 : index
    %396 = vector.load %arg8[%c0_351, %c0_352, %c66_353] : memref<1x8x658xbf16, #tpu.memory_space<vmem>>, vector<1x8x512xbf16>
    %397 = vector.shape_cast %396 : vector<1x8x512xbf16> to vector<8x512xbf16>
    %c11_354 = arith.constant 11 : index
    %c0_355 = arith.constant 0 : index
    %c0_356 = arith.constant 0 : index
    %398 = vector.load %arg2[%c11_354, %c0_355, %c0_356] : memref<27x1x512xbf16, #tpu.memory_space<vmem>>, vector<1x1x512xbf16>
    %399 = vector.shape_cast %398 : vector<1x1x512xbf16> to vector<1x512xbf16>
    %400 = vector.broadcast %399 : vector<1x512xbf16> to vector<8x512xbf16>
    %401 = arith.mulf %397, %400 : vector<8x512xbf16>
    %c11_357 = arith.constant 11 : index
    %c0_358 = arith.constant 0 : index
    %c0_359 = arith.constant 0 : index
    %402 = vector.load %arg5[%c11_357, %c0_358, %c0_359] : memref<27x8x8xbf16, #tpu.memory_space<vmem>>, vector<1x8x8xbf16>
    %403 = vector.shape_cast %402 : vector<1x8x8xbf16> to vector<8x8xbf16>
    %cst_360 = arith.constant dense<0.000000e+00> : vector<8x512xf32>
    %404 = tpu.matmul %403, %401, %cst_360 {dimension_numbers = #tpu.dot_dimension_numbers<[1], [0], [0], [1], [0, 0, 1, 1], [], []>} : vector<8x8xbf16>, vector<8x512xbf16>, vector<8x512xf32> -> vector<8x512xf32>
    %405 = arith.addf %395, %404 : vector<8x512xf32>
    %c0_361 = arith.constant 0 : index
    %c0_362 = arith.constant 0 : index
    %c72_363 = arith.constant 72 : index
    %406 = vector.load %arg8[%c0_361, %c0_362, %c72_363] : memref<1x8x658xbf16, #tpu.memory_space<vmem>>, vector<1x8x512xbf16>
    %407 = vector.shape_cast %406 : vector<1x8x512xbf16> to vector<8x512xbf16>
    %c12_364 = arith.constant 12 : index
    %c0_365 = arith.constant 0 : index
    %c0_366 = arith.constant 0 : index
    %408 = vector.load %arg2[%c12_364, %c0_365, %c0_366] : memref<27x1x512xbf16, #tpu.memory_space<vmem>>, vector<1x1x512xbf16>
    %409 = vector.shape_cast %408 : vector<1x1x512xbf16> to vector<1x512xbf16>
    %410 = vector.broadcast %409 : vector<1x512xbf16> to vector<8x512xbf16>
    %411 = arith.mulf %407, %410 : vector<8x512xbf16>
    %c12_367 = arith.constant 12 : index
    %c0_368 = arith.constant 0 : index
    %c0_369 = arith.constant 0 : index
    %412 = vector.load %arg5[%c12_367, %c0_368, %c0_369] : memref<27x8x8xbf16, #tpu.memory_space<vmem>>, vector<1x8x8xbf16>
    %413 = vector.shape_cast %412 : vector<1x8x8xbf16> to vector<8x8xbf16>
    %cst_370 = arith.constant dense<0.000000e+00> : vector<8x512xf32>
    %414 = tpu.matmul %413, %411, %cst_370 {dimension_numbers = #tpu.dot_dimension_numbers<[1], [0], [0], [1], [0, 0, 1, 1], [], []>} : vector<8x8xbf16>, vector<8x512xbf16>, vector<8x512xf32> -> vector<8x512xf32>
    %415 = arith.addf %405, %414 : vector<8x512xf32>
    %c0_371 = arith.constant 0 : index
    %c0_372 = arith.constant 0 : index
    %c73_373 = arith.constant 73 : index
    %416 = vector.load %arg8[%c0_371, %c0_372, %c73_373] : memref<1x8x658xbf16, #tpu.memory_space<vmem>>, vector<1x8x512xbf16>
    %417 = vector.shape_cast %416 : vector<1x8x512xbf16> to vector<8x512xbf16>
    %c13_374 = arith.constant 13 : index
    %c0_375 = arith.constant 0 : index
    %c0_376 = arith.constant 0 : index
    %418 = vector.load %arg5[%c13_374, %c0_375, %c0_376] : memref<27x8x8xbf16, #tpu.memory_space<vmem>>, vector<1x8x8xbf16>
    %419 = vector.shape_cast %418 : vector<1x8x8xbf16> to vector<8x8xbf16>
    %cst_377 = arith.constant dense<0.000000e+00> : vector<8x512xf32>
    %420 = tpu.matmul %419, %417, %cst_377 {dimension_numbers = #tpu.dot_dimension_numbers<[1], [0], [0], [1], [0, 0, 1, 1], [], []>} : vector<8x8xbf16>, vector<8x512xbf16>, vector<8x512xf32> -> vector<8x512xf32>
    %421 = arith.addf %415, %420 : vector<8x512xf32>
    %c0_378 = arith.constant 0 : index
    %c0_379 = arith.constant 0 : index
    %c74_380 = arith.constant 74 : index
    %422 = vector.load %arg8[%c0_378, %c0_379, %c74_380] : memref<1x8x658xbf16, #tpu.memory_space<vmem>>, vector<1x8x512xbf16>
    %423 = vector.shape_cast %422 : vector<1x8x512xbf16> to vector<8x512xbf16>
    %c14_381 = arith.constant 14 : index
    %c0_382 = arith.constant 0 : index
    %c0_383 = arith.constant 0 : index
    %424 = vector.load %arg2[%c14_381, %c0_382, %c0_383] : memref<27x1x512xbf16, #tpu.memory_space<vmem>>, vector<1x1x512xbf16>
    %425 = vector.shape_cast %424 : vector<1x1x512xbf16> to vector<1x512xbf16>
    %426 = vector.broadcast %425 : vector<1x512xbf16> to vector<8x512xbf16>
    %427 = arith.mulf %423, %426 : vector<8x512xbf16>
    %c14_384 = arith.constant 14 : index
    %c0_385 = arith.constant 0 : index
    %c0_386 = arith.constant 0 : index
    %428 = vector.load %arg5[%c14_384, %c0_385, %c0_386] : memref<27x8x8xbf16, #tpu.memory_space<vmem>>, vector<1x8x8xbf16>
    %429 = vector.shape_cast %428 : vector<1x8x8xbf16> to vector<8x8xbf16>
    %cst_387 = arith.constant dense<0.000000e+00> : vector<8x512xf32>
    %430 = tpu.matmul %429, %427, %cst_387 {dimension_numbers = #tpu.dot_dimension_numbers<[1], [0], [0], [1], [0, 0, 1, 1], [], []>} : vector<8x8xbf16>, vector<8x512xbf16>, vector<8x512xf32> -> vector<8x512xf32>
    %431 = arith.addf %421, %430 : vector<8x512xf32>
    %c0_388 = arith.constant 0 : index
    %c0_389 = arith.constant 0 : index
    %c80_390 = arith.constant 80 : index
    %432 = vector.load %arg8[%c0_388, %c0_389, %c80_390] : memref<1x8x658xbf16, #tpu.memory_space<vmem>>, vector<1x8x512xbf16>
    %433 = vector.shape_cast %432 : vector<1x8x512xbf16> to vector<8x512xbf16>
    %c15_391 = arith.constant 15 : index
    %c0_392 = arith.constant 0 : index
    %c0_393 = arith.constant 0 : index
    %434 = vector.load %arg2[%c15_391, %c0_392, %c0_393] : memref<27x1x512xbf16, #tpu.memory_space<vmem>>, vector<1x1x512xbf16>
    %435 = vector.shape_cast %434 : vector<1x1x512xbf16> to vector<1x512xbf16>
    %436 = vector.broadcast %435 : vector<1x512xbf16> to vector<8x512xbf16>
    %437 = arith.mulf %433, %436 : vector<8x512xbf16>
    %c15_394 = arith.constant 15 : index
    %c0_395 = arith.constant 0 : index
    %c0_396 = arith.constant 0 : index
    %438 = vector.load %arg5[%c15_394, %c0_395, %c0_396] : memref<27x8x8xbf16, #tpu.memory_space<vmem>>, vector<1x8x8xbf16>
    %439 = vector.shape_cast %438 : vector<1x8x8xbf16> to vector<8x8xbf16>
    %cst_397 = arith.constant dense<0.000000e+00> : vector<8x512xf32>
    %440 = tpu.matmul %439, %437, %cst_397 {dimension_numbers = #tpu.dot_dimension_numbers<[1], [0], [0], [1], [0, 0, 1, 1], [], []>} : vector<8x8xbf16>, vector<8x512xbf16>, vector<8x512xf32> -> vector<8x512xf32>
    %441 = arith.addf %431, %440 : vector<8x512xf32>
    %c0_398 = arith.constant 0 : index
    %c0_399 = arith.constant 0 : index
    %c81_400 = arith.constant 81 : index
    %442 = vector.load %arg8[%c0_398, %c0_399, %c81_400] : memref<1x8x658xbf16, #tpu.memory_space<vmem>>, vector<1x8x512xbf16>
    %443 = vector.shape_cast %442 : vector<1x8x512xbf16> to vector<8x512xbf16>
    %c16_401 = arith.constant 16 : index
    %c0_402 = arith.constant 0 : index
    %c0_403 = arith.constant 0 : index
    %444 = vector.load %arg2[%c16_401, %c0_402, %c0_403] : memref<27x1x512xbf16, #tpu.memory_space<vmem>>, vector<1x1x512xbf16>
    %445 = vector.shape_cast %444 : vector<1x1x512xbf16> to vector<1x512xbf16>
    %446 = vector.broadcast %445 : vector<1x512xbf16> to vector<8x512xbf16>
    %447 = arith.mulf %443, %446 : vector<8x512xbf16>
    %c16_404 = arith.constant 16 : index
    %c0_405 = arith.constant 0 : index
    %c0_406 = arith.constant 0 : index
    %448 = vector.load %arg5[%c16_404, %c0_405, %c0_406] : memref<27x8x8xbf16, #tpu.memory_space<vmem>>, vector<1x8x8xbf16>
    %449 = vector.shape_cast %448 : vector<1x8x8xbf16> to vector<8x8xbf16>
    %cst_407 = arith.constant dense<0.000000e+00> : vector<8x512xf32>
    %450 = tpu.matmul %449, %447, %cst_407 {dimension_numbers = #tpu.dot_dimension_numbers<[1], [0], [0], [1], [0, 0, 1, 1], [], []>} : vector<8x8xbf16>, vector<8x512xbf16>, vector<8x512xf32> -> vector<8x512xf32>
    %451 = arith.addf %441, %450 : vector<8x512xf32>
    %c0_408 = arith.constant 0 : index
    %c0_409 = arith.constant 0 : index
    %c82_410 = arith.constant 82 : index
    %452 = vector.load %arg8[%c0_408, %c0_409, %c82_410] : memref<1x8x658xbf16, #tpu.memory_space<vmem>>, vector<1x8x512xbf16>
    %453 = vector.shape_cast %452 : vector<1x8x512xbf16> to vector<8x512xbf16>
    %c17_411 = arith.constant 17 : index
    %c0_412 = arith.constant 0 : index
    %c0_413 = arith.constant 0 : index
    %454 = vector.load %arg2[%c17_411, %c0_412, %c0_413] : memref<27x1x512xbf16, #tpu.memory_space<vmem>>, vector<1x1x512xbf16>
    %455 = vector.shape_cast %454 : vector<1x1x512xbf16> to vector<1x512xbf16>
    %456 = vector.broadcast %455 : vector<1x512xbf16> to vector<8x512xbf16>
    %457 = arith.mulf %453, %456 : vector<8x512xbf16>
    %c17_414 = arith.constant 17 : index
    %c0_415 = arith.constant 0 : index
    %c0_416 = arith.constant 0 : index
    %458 = vector.load %arg5[%c17_414, %c0_415, %c0_416] : memref<27x8x8xbf16, #tpu.memory_space<vmem>>, vector<1x8x8xbf16>
    %459 = vector.shape_cast %458 : vector<1x8x8xbf16> to vector<8x8xbf16>
    %cst_417 = arith.constant dense<0.000000e+00> : vector<8x512xf32>
    %460 = tpu.matmul %459, %457, %cst_417 {dimension_numbers = #tpu.dot_dimension_numbers<[1], [0], [0], [1], [0, 0, 1, 1], [], []>} : vector<8x8xbf16>, vector<8x512xbf16>, vector<8x512xf32> -> vector<8x512xf32>
    %461 = arith.addf %451, %460 : vector<8x512xf32>
    %c0_418 = arith.constant 0 : index
    %c0_419 = arith.constant 0 : index
    %c128_420 = arith.constant 128 : index
    %462 = vector.load %arg8[%c0_418, %c0_419, %c128_420] : memref<1x8x658xbf16, #tpu.memory_space<vmem>>, vector<1x8x512xbf16>
    %463 = vector.shape_cast %462 : vector<1x8x512xbf16> to vector<8x512xbf16>
    %c18_421 = arith.constant 18 : index
    %c0_422 = arith.constant 0 : index
    %c0_423 = arith.constant 0 : index
    %464 = vector.load %arg2[%c18_421, %c0_422, %c0_423] : memref<27x1x512xbf16, #tpu.memory_space<vmem>>, vector<1x1x512xbf16>
    %465 = vector.shape_cast %464 : vector<1x1x512xbf16> to vector<1x512xbf16>
    %466 = vector.broadcast %465 : vector<1x512xbf16> to vector<8x512xbf16>
    %467 = arith.mulf %463, %466 : vector<8x512xbf16>
    %c18_424 = arith.constant 18 : index
    %c0_425 = arith.constant 0 : index
    %c0_426 = arith.constant 0 : index
    %468 = vector.load %arg5[%c18_424, %c0_425, %c0_426] : memref<27x8x8xbf16, #tpu.memory_space<vmem>>, vector<1x8x8xbf16>
    %469 = vector.shape_cast %468 : vector<1x8x8xbf16> to vector<8x8xbf16>
    %cst_427 = arith.constant dense<0.000000e+00> : vector<8x512xf32>
    %470 = tpu.matmul %469, %467, %cst_427 {dimension_numbers = #tpu.dot_dimension_numbers<[1], [0], [0], [1], [0, 0, 1, 1], [], []>} : vector<8x8xbf16>, vector<8x512xbf16>, vector<8x512xf32> -> vector<8x512xf32>
    %471 = arith.addf %461, %470 : vector<8x512xf32>
    %c0_428 = arith.constant 0 : index
    %c0_429 = arith.constant 0 : index
    %c129_430 = arith.constant 129 : index
    %472 = vector.load %arg8[%c0_428, %c0_429, %c129_430] : memref<1x8x658xbf16, #tpu.memory_space<vmem>>, vector<1x8x512xbf16>
    %473 = vector.shape_cast %472 : vector<1x8x512xbf16> to vector<8x512xbf16>
    %c19_431 = arith.constant 19 : index
    %c0_432 = arith.constant 0 : index
    %c0_433 = arith.constant 0 : index
    %474 = vector.load %arg2[%c19_431, %c0_432, %c0_433] : memref<27x1x512xbf16, #tpu.memory_space<vmem>>, vector<1x1x512xbf16>
    %475 = vector.shape_cast %474 : vector<1x1x512xbf16> to vector<1x512xbf16>
    %476 = vector.broadcast %475 : vector<1x512xbf16> to vector<8x512xbf16>
    %477 = arith.mulf %473, %476 : vector<8x512xbf16>
    %c19_434 = arith.constant 19 : index
    %c0_435 = arith.constant 0 : index
    %c0_436 = arith.constant 0 : index
    %478 = vector.load %arg5[%c19_434, %c0_435, %c0_436] : memref<27x8x8xbf16, #tpu.memory_space<vmem>>, vector<1x8x8xbf16>
    %479 = vector.shape_cast %478 : vector<1x8x8xbf16> to vector<8x8xbf16>
    %cst_437 = arith.constant dense<0.000000e+00> : vector<8x512xf32>
    %480 = tpu.matmul %479, %477, %cst_437 {dimension_numbers = #tpu.dot_dimension_numbers<[1], [0], [0], [1], [0, 0, 1, 1], [], []>} : vector<8x8xbf16>, vector<8x512xbf16>, vector<8x512xf32> -> vector<8x512xf32>
    %481 = arith.addf %471, %480 : vector<8x512xf32>
    %c0_438 = arith.constant 0 : index
    %c0_439 = arith.constant 0 : index
    %c130_440 = arith.constant 130 : index
    %482 = vector.load %arg8[%c0_438, %c0_439, %c130_440] : memref<1x8x658xbf16, #tpu.memory_space<vmem>>, vector<1x8x512xbf16>
    %483 = vector.shape_cast %482 : vector<1x8x512xbf16> to vector<8x512xbf16>
    %c20_441 = arith.constant 20 : index
    %c0_442 = arith.constant 0 : index
    %c0_443 = arith.constant 0 : index
    %484 = vector.load %arg2[%c20_441, %c0_442, %c0_443] : memref<27x1x512xbf16, #tpu.memory_space<vmem>>, vector<1x1x512xbf16>
    %485 = vector.shape_cast %484 : vector<1x1x512xbf16> to vector<1x512xbf16>
    %486 = vector.broadcast %485 : vector<1x512xbf16> to vector<8x512xbf16>
    %487 = arith.mulf %483, %486 : vector<8x512xbf16>
    %c20_444 = arith.constant 20 : index
    %c0_445 = arith.constant 0 : index
    %c0_446 = arith.constant 0 : index
    %488 = vector.load %arg5[%c20_444, %c0_445, %c0_446] : memref<27x8x8xbf16, #tpu.memory_space<vmem>>, vector<1x8x8xbf16>
    %489 = vector.shape_cast %488 : vector<1x8x8xbf16> to vector<8x8xbf16>
    %cst_447 = arith.constant dense<0.000000e+00> : vector<8x512xf32>
    %490 = tpu.matmul %489, %487, %cst_447 {dimension_numbers = #tpu.dot_dimension_numbers<[1], [0], [0], [1], [0, 0, 1, 1], [], []>} : vector<8x8xbf16>, vector<8x512xbf16>, vector<8x512xf32> -> vector<8x512xf32>
    %491 = arith.addf %481, %490 : vector<8x512xf32>
    %c0_448 = arith.constant 0 : index
    %c0_449 = arith.constant 0 : index
    %c136_450 = arith.constant 136 : index
    %492 = vector.load %arg8[%c0_448, %c0_449, %c136_450] : memref<1x8x658xbf16, #tpu.memory_space<vmem>>, vector<1x8x512xbf16>
    %493 = vector.shape_cast %492 : vector<1x8x512xbf16> to vector<8x512xbf16>
    %c21_451 = arith.constant 21 : index
    %c0_452 = arith.constant 0 : index
    %c0_453 = arith.constant 0 : index
    %494 = vector.load %arg2[%c21_451, %c0_452, %c0_453] : memref<27x1x512xbf16, #tpu.memory_space<vmem>>, vector<1x1x512xbf16>
    %495 = vector.shape_cast %494 : vector<1x1x512xbf16> to vector<1x512xbf16>
    %496 = vector.broadcast %495 : vector<1x512xbf16> to vector<8x512xbf16>
    %497 = arith.mulf %493, %496 : vector<8x512xbf16>
    %c21_454 = arith.constant 21 : index
    %c0_455 = arith.constant 0 : index
    %c0_456 = arith.constant 0 : index
    %498 = vector.load %arg5[%c21_454, %c0_455, %c0_456] : memref<27x8x8xbf16, #tpu.memory_space<vmem>>, vector<1x8x8xbf16>
    %499 = vector.shape_cast %498 : vector<1x8x8xbf16> to vector<8x8xbf16>
    %cst_457 = arith.constant dense<0.000000e+00> : vector<8x512xf32>
    %500 = tpu.matmul %499, %497, %cst_457 {dimension_numbers = #tpu.dot_dimension_numbers<[1], [0], [0], [1], [0, 0, 1, 1], [], []>} : vector<8x8xbf16>, vector<8x512xbf16>, vector<8x512xf32> -> vector<8x512xf32>
    %501 = arith.addf %491, %500 : vector<8x512xf32>
    %c0_458 = arith.constant 0 : index
    %c0_459 = arith.constant 0 : index
    %c137_460 = arith.constant 137 : index
    %502 = vector.load %arg8[%c0_458, %c0_459, %c137_460] : memref<1x8x658xbf16, #tpu.memory_space<vmem>>, vector<1x8x512xbf16>
    %503 = vector.shape_cast %502 : vector<1x8x512xbf16> to vector<8x512xbf16>
    %c22_461 = arith.constant 22 : index
    %c0_462 = arith.constant 0 : index
    %c0_463 = arith.constant 0 : index
    %504 = vector.load %arg2[%c22_461, %c0_462, %c0_463] : memref<27x1x512xbf16, #tpu.memory_space<vmem>>, vector<1x1x512xbf16>
    %505 = vector.shape_cast %504 : vector<1x1x512xbf16> to vector<1x512xbf16>
    %506 = vector.broadcast %505 : vector<1x512xbf16> to vector<8x512xbf16>
    %507 = arith.mulf %503, %506 : vector<8x512xbf16>
    %c22_464 = arith.constant 22 : index
    %c0_465 = arith.constant 0 : index
    %c0_466 = arith.constant 0 : index
    %508 = vector.load %arg5[%c22_464, %c0_465, %c0_466] : memref<27x8x8xbf16, #tpu.memory_space<vmem>>, vector<1x8x8xbf16>
    %509 = vector.shape_cast %508 : vector<1x8x8xbf16> to vector<8x8xbf16>
    %cst_467 = arith.constant dense<0.000000e+00> : vector<8x512xf32>
    %510 = tpu.matmul %509, %507, %cst_467 {dimension_numbers = #tpu.dot_dimension_numbers<[1], [0], [0], [1], [0, 0, 1, 1], [], []>} : vector<8x8xbf16>, vector<8x512xbf16>, vector<8x512xf32> -> vector<8x512xf32>
    %511 = arith.addf %501, %510 : vector<8x512xf32>
    %c0_468 = arith.constant 0 : index
    %c0_469 = arith.constant 0 : index
    %c138_470 = arith.constant 138 : index
    %512 = vector.load %arg8[%c0_468, %c0_469, %c138_470] : memref<1x8x658xbf16, #tpu.memory_space<vmem>>, vector<1x8x512xbf16>
    %513 = vector.shape_cast %512 : vector<1x8x512xbf16> to vector<8x512xbf16>
    %c23_471 = arith.constant 23 : index
    %c0_472 = arith.constant 0 : index
    %c0_473 = arith.constant 0 : index
    %514 = vector.load %arg2[%c23_471, %c0_472, %c0_473] : memref<27x1x512xbf16, #tpu.memory_space<vmem>>, vector<1x1x512xbf16>
    %515 = vector.shape_cast %514 : vector<1x1x512xbf16> to vector<1x512xbf16>
    %516 = vector.broadcast %515 : vector<1x512xbf16> to vector<8x512xbf16>
    %517 = arith.mulf %513, %516 : vector<8x512xbf16>
    %c23_474 = arith.constant 23 : index
    %c0_475 = arith.constant 0 : index
    %c0_476 = arith.constant 0 : index
    %518 = vector.load %arg5[%c23_474, %c0_475, %c0_476] : memref<27x8x8xbf16, #tpu.memory_space<vmem>>, vector<1x8x8xbf16>
    %519 = vector.shape_cast %518 : vector<1x8x8xbf16> to vector<8x8xbf16>
    %cst_477 = arith.constant dense<0.000000e+00> : vector<8x512xf32>
    %520 = tpu.matmul %519, %517, %cst_477 {dimension_numbers = #tpu.dot_dimension_numbers<[1], [0], [0], [1], [0, 0, 1, 1], [], []>} : vector<8x8xbf16>, vector<8x512xbf16>, vector<8x512xf32> -> vector<8x512xf32>
    %521 = arith.addf %511, %520 : vector<8x512xf32>
    %c0_478 = arith.constant 0 : index
    %c0_479 = arith.constant 0 : index
    %c144_480 = arith.constant 144 : index
    %522 = vector.load %arg8[%c0_478, %c0_479, %c144_480] : memref<1x8x658xbf16, #tpu.memory_space<vmem>>, vector<1x8x512xbf16>
    %523 = vector.shape_cast %522 : vector<1x8x512xbf16> to vector<8x512xbf16>
    %c24_481 = arith.constant 24 : index
    %c0_482 = arith.constant 0 : index
    %c0_483 = arith.constant 0 : index
    %524 = vector.load %arg2[%c24_481, %c0_482, %c0_483] : memref<27x1x512xbf16, #tpu.memory_space<vmem>>, vector<1x1x512xbf16>
    %525 = vector.shape_cast %524 : vector<1x1x512xbf16> to vector<1x512xbf16>
    %526 = vector.broadcast %525 : vector<1x512xbf16> to vector<8x512xbf16>
    %527 = arith.mulf %523, %526 : vector<8x512xbf16>
    %c24_484 = arith.constant 24 : index
    %c0_485 = arith.constant 0 : index
    %c0_486 = arith.constant 0 : index
    %528 = vector.load %arg5[%c24_484, %c0_485, %c0_486] : memref<27x8x8xbf16, #tpu.memory_space<vmem>>, vector<1x8x8xbf16>
    %529 = vector.shape_cast %528 : vector<1x8x8xbf16> to vector<8x8xbf16>
    %cst_487 = arith.constant dense<0.000000e+00> : vector<8x512xf32>
    %530 = tpu.matmul %529, %527, %cst_487 {dimension_numbers = #tpu.dot_dimension_numbers<[1], [0], [0], [1], [0, 0, 1, 1], [], []>} : vector<8x8xbf16>, vector<8x512xbf16>, vector<8x512xf32> -> vector<8x512xf32>
    %531 = arith.addf %521, %530 : vector<8x512xf32>
    %c0_488 = arith.constant 0 : index
    %c0_489 = arith.constant 0 : index
    %c145_490 = arith.constant 145 : index
    %532 = vector.load %arg8[%c0_488, %c0_489, %c145_490] : memref<1x8x658xbf16, #tpu.memory_space<vmem>>, vector<1x8x512xbf16>
    %533 = vector.shape_cast %532 : vector<1x8x512xbf16> to vector<8x512xbf16>
    %c25_491 = arith.constant 25 : index
    %c0_492 = arith.constant 0 : index
    %c0_493 = arith.constant 0 : index
    %534 = vector.load %arg2[%c25_491, %c0_492, %c0_493] : memref<27x1x512xbf16, #tpu.memory_space<vmem>>, vector<1x1x512xbf16>
    %535 = vector.shape_cast %534 : vector<1x1x512xbf16> to vector<1x512xbf16>
    %536 = vector.broadcast %535 : vector<1x512xbf16> to vector<8x512xbf16>
    %537 = arith.mulf %533, %536 : vector<8x512xbf16>
    %c25_494 = arith.constant 25 : index
    %c0_495 = arith.constant 0 : index
    %c0_496 = arith.constant 0 : index
    %538 = vector.load %arg5[%c25_494, %c0_495, %c0_496] : memref<27x8x8xbf16, #tpu.memory_space<vmem>>, vector<1x8x8xbf16>
    %539 = vector.shape_cast %538 : vector<1x8x8xbf16> to vector<8x8xbf16>
    %cst_497 = arith.constant dense<0.000000e+00> : vector<8x512xf32>
    %540 = tpu.matmul %539, %537, %cst_497 {dimension_numbers = #tpu.dot_dimension_numbers<[1], [0], [0], [1], [0, 0, 1, 1], [], []>} : vector<8x8xbf16>, vector<8x512xbf16>, vector<8x512xf32> -> vector<8x512xf32>
    %541 = arith.addf %531, %540 : vector<8x512xf32>
    %c0_498 = arith.constant 0 : index
    %c0_499 = arith.constant 0 : index
    %c146_500 = arith.constant 146 : index
    %542 = vector.load %arg8[%c0_498, %c0_499, %c146_500] : memref<1x8x658xbf16, #tpu.memory_space<vmem>>, vector<1x8x512xbf16>
    %543 = vector.shape_cast %542 : vector<1x8x512xbf16> to vector<8x512xbf16>
    %c26_501 = arith.constant 26 : index
    %c0_502 = arith.constant 0 : index
    %c0_503 = arith.constant 0 : index
    %544 = vector.load %arg2[%c26_501, %c0_502, %c0_503] : memref<27x1x512xbf16, #tpu.memory_space<vmem>>, vector<1x1x512xbf16>
    %545 = vector.shape_cast %544 : vector<1x1x512xbf16> to vector<1x512xbf16>
    %546 = vector.broadcast %545 : vector<1x512xbf16> to vector<8x512xbf16>
    %547 = arith.mulf %543, %546 : vector<8x512xbf16>
    %c26_504 = arith.constant 26 : index
    %c0_505 = arith.constant 0 : index
    %c0_506 = arith.constant 0 : index
    %548 = vector.load %arg5[%c26_504, %c0_505, %c0_506] : memref<27x8x8xbf16, #tpu.memory_space<vmem>>, vector<1x8x8xbf16>
    %549 = vector.shape_cast %548 : vector<1x8x8xbf16> to vector<8x8xbf16>
    %cst_507 = arith.constant dense<0.000000e+00> : vector<8x512xf32>
    %550 = tpu.matmul %549, %547, %cst_507 {dimension_numbers = #tpu.dot_dimension_numbers<[1], [0], [0], [1], [0, 0, 1, 1], [], []>} : vector<8x8xbf16>, vector<8x512xbf16>, vector<8x512xf32> -> vector<8x512xf32>
    %551 = arith.addf %541, %550 : vector<8x512xf32>
    %c0_508 = arith.constant 0 : index
    %c0_509 = arith.constant 0 : index
    %552 = vector.load %arg6[%c0_508, %c0_509] : memref<8x1xf32, #tpu.memory_space<vmem>>, vector<8x1xf32>
    %553 = vector.broadcast %552 : vector<8x1xf32> to vector<8x512xf32>
    %554 = arith.addf %551, %553 : vector<8x512xf32>
    %555 = arith.addf %554, %4 : vector<8x512xf32>
    %cst_510 = arith.constant 0.000000e+00 : f32
    %556 = vector.broadcast %cst_510 : f32 to vector<8x512xf32>
    %557 = arith.maximumf %555, %556 : vector<8x512xf32>
    %558 = arith.truncf %557 : vector<8x512xf32> to vector<8x512xbf16>
    %c0_511 = arith.constant 0 : index
    %c0_512 = arith.constant 0 : index
    %c0_513 = arith.constant 0 : index
    %559 = vector.load %arg7[%c0_511, %c0_512, %c0_513] : memref<1x8x512xbf16, #tpu.memory_space<vmem>>, vector<1x8x512xbf16>
    %560 = vector.shape_cast %559 : vector<1x8x512xbf16> to vector<8x512xbf16>
    %561 = vector.shape_cast %558 : vector<8x512xbf16> to vector<1x8x512xbf16>
    tpu.vector_store %arg7[%c0_511, %c0_512, %c0_513], %561 {strides = array<i32>} : memref<1x8x512xbf16, #tpu.memory_space<vmem>>, vector<1x8x512xbf16>,
    return
  }
  func.func @transform_0(%arg0: i32) -> (i32, i32, i32) {
    %c0_i32 = arith.constant 0 : i32
    %c0_i32_0 = arith.constant 0 : i32
    %c0_i32_1 = arith.constant 0 : i32
    return %arg0, %c0_i32, %c0_i32_0 : i32, i32, i32
  }
  func.func @transform_1(%arg0: i32) -> (i32, i32, i32) {
    %c0_i32 = arith.constant 0 : i32
    %c0_i32_0 = arith.constant 0 : i32
    %c0_i32_1 = arith.constant 0 : i32
    %c0_i32_2 = arith.constant 0 : i32
    return %c0_i32, %c0_i32_0, %c0_i32_1 : i32, i32, i32
  }
  func.func @transform_2(%arg0: i32) -> (i32, i32, i32) {
    %c0_i32 = arith.constant 0 : i32
    %c0_i32_0 = arith.constant 0 : i32
    %c0_i32_1 = arith.constant 0 : i32
    %c0_i32_2 = arith.constant 0 : i32
    return %c0_i32, %c0_i32_0, %c0_i32_1 : i32, i32, i32
  }
  func.func @transform_3(%arg0: i32) -> (i32, i32) {
    %c0_i32 = arith.constant 0 : i32
    %c0_i32_0 = arith.constant 0 : i32
    %c0_i32_1 = arith.constant 0 : i32
    return %c0_i32, %c0_i32_0 : i32, i32
  }
  func.func @transform_4(%arg0: i32) -> (i32, i32, i32) {
    %c0_i32 = arith.constant 0 : i32
    %c0_i32_0 = arith.constant 0 : i32
    %c0_i32_1 = arith.constant 0 : i32
    %c0_i32_2 = arith.constant 0 : i32
    return %c0_i32, %c0_i32_0, %c0_i32_1 : i32, i32, i32
  }
  func.func @transform_5(%arg0: i32) -> (i32, i32) {
    %c0_i32 = arith.constant 0 : i32
    %c0_i32_0 = arith.constant 0 : i32
    %c0_i32_1 = arith.constant 0 : i32
    return %c0_i32, %c0_i32_0 : i32, i32
  }
  func.func @transform_6(%arg0: i32) -> (i32, i32, i32) {
    %c0_i32 = arith.constant 0 : i32
    %c0_i32_0 = arith.constant 0 : i32
    %c0_i32_1 = arith.constant 0 : i32
    return %arg0, %c0_i32, %c0_i32_0 : i32, i32, i32
  }
}

</mosaic_0001>

<bundles_post_ra>
// kernel: basic_block_forward.1
= control target key start
LH: loop header
LB: loop body
LE: loop exit
PB: predicated region body
PF: predicated region fallthrough
CT: control target
= control target key end

     0   :  { %s9352_s21 = smov 0   ;;  %s12527_s0 = inlined_call_operand.vmem [shape: f32[2,8,512], index: 0, kind: input, shape index: {}]   ;;  %s12528_s1 = inlined_call_operand.vmem [shape: bf16[27,1,512], index: 1, kind: input, shape index: {}]   ;;  %s12529_s2 = inlined_call_operand.vmem [shape: bf16[27,8,8], index: 2, kind: input, shape index: {}]   ;;  %s12530_s3 = inlined_call_operand.vmem [shape: f32[8,1], index: 3, kind: input, shape index: {}]   ;;  %s12531_s4 = inlined_call_operand.vmem [shape: bf16[27,8,8], index: 4, kind: input, shape index: {}]   ;;  %s12532_s5 = inlined_call_operand.vmem [shape: f32[8,1], index: 5, kind: input, shape index: {}]   ;;  %s12533_s6 = inlined_call_operand.vmem [shape: bf16[2,8,512], index: 6, kind: output, shape index: {}]  }
   0x1 LB: > { %s8421_s22 = sadd.s32 4294967295, %s9281_s21   ;;  %p8425_p0 = scmp.ge.s32.totalorder %s9281_s21, 1  ;;  %s9281_s21 = sphi %s9352_s21, %s16_s21  }
   0x2   : > { %p212_p1 = scmp.lt.s32.totalorder %s9281_s21, 3 }
   0x4   : > { %p213_p2 = pnand %p8425_p0, %p212_p1 }
   0x6   : > { %216 = sbr.rel (%p213_p2) target bundleno = 2489 (0x9b9), region = 44 }
   0xb   : > { %p242_p3 = scmp.lt.s32.totalorder %s8421_s22, 1  ;;  %v288_v0 = vld [vmem:[%s12528_s1] sm:$0xf]  ;;  %v8430_v4 = vld [vmem:[%s12528_s1 + $0x4] sm:$0xf]  ;;  %s12554_s7 = smov 73  }
   0xc   : > { %290 = vst [vmem:[#allocation1] ss:$9 sm:$0xff] %v288_v0  ;;  %v8440_v12 = vld [vmem:[%s12528_s1 + $0x8] sm:$0xf]  ;;  %v8446_v28 = vld [vmem:[%s12528_s1 + $0xc] sm:$0xf] }
   0xd   : > { %s12815_s22 = smov (!%p242_p3, %s8421_s22), 1  ;;  %s9284_s12 = smov 1   ;;  %vm12539_vm0 = vcmask 592896   ;;  %v9285_v47 = vmov 0   ;;  %v8452_v50 = vld [vmem:[%s12528_s1 + $0x10] sm:$0xf] }
   0xe   : > { %s8750_s25 = sshll.u32 %s12815_s22, 5  ;;  %254 = vst.msk [vmem:[#allocation2] sm:$0xf] %vm12539_vm0, %v9285_v47  ;;  %9034 = vset.pattern.permute.xlu1 %v9285_v47  ;;  %9270 = vset.pattern.permute.xlu0 %v9285_v47  ;;  %s12595_s15 = smov 2   ;;  %vm255_vm1 = vcmask 1044040   ;;  %vm256_vm2 = vcmask 146436  }
   0xf   : > { %s9369_s28 = scalar_lea.vmem %s12527_s0, %s8750_s25  ;;  %s12593_s18 = smov 8   ;;  %vm257_vm3 = vmor %vm256_vm2, %vm255_vm1  ;;  %vm281_vm4 = vcmask 1047556   ;;  %vm12542_vm5 = vcmask 596992   ;;  %vm275_vm7 = vcmask 1043456   ;;  %vm368_vm8 = vcmask 7168  }
  0x10   : > { %v259_v1 = vld [vmem:[%s9369_s28] sm:$0xff]  ;;  %v260_v2 = vld [vmem:[%s9369_s28 + $0x8] sm:$0xff]  ;;  %v261_v9 = vld [vmem:[%s9369_s28 + $0x10] sm:$0xff]  ;;  %s9288_s23 = smov 9   ;;  %s9289_s26 = smov 10   ;;  %258 = vst.msk [vmem:[#allocation2 + $0x10] sm:$0xff] %vm257_vm3, %v9285_v47 }
  0x11   : > { %v263_v3 = vpack.c.bf16 %v260_v2, %v259_v1  ;;  %v262_v10 = vld [vmem:[%s9369_s28 + $0x18] sm:$0xff]  ;;  %vm9497_vm6 = vmor %vm281_vm4, %vm255_vm1  ;;  %s9290_s8 = smov 127   ;;  %s9291_s11 = smov 16   ;;  %vm589_vm9 = vcmask 15360   ;;  %vm409_vm10 = vcmask 64512   ;;  %vm900_vm11 = vcmask 72704  }
  0x12   : > { %v264_v11 = vpack.c.bf16 %v262_v10, %v261_v9  ;;  %v8458_v9 = vld [vmem:[%s12528_s1 + $0x14] sm:$0xf]  ;;  %s9292_s13 = smov 17   ;;  %s9293_s14 = smov 18   ;;  %vm1056_vm12 = vcmask 80896   ;;  %vm404_vm13 = vcmask 1039360  }
  0x13   : > { %v9376_v5 = vld [vmem:[#allocation1] sm:$0xff]  ;;  %v9378_v6 = vld [vmem:[#allocation1 + $0x9] sm:$0xff]  ;;  %v9380_v7 = vld [vmem:[#allocation1 + $0x12] sm:$0xff]  ;;  %267 = vrot.lane.b32.xlu0 %v263_v3, %s12554_s7  ;;  %s12550_s16 = smov 64   ;;  %s12540_s17 = smov 65   ;;  %vm1212_vm14 = vcmask 130048  }
  0x14   : > { %v9383_v8 = vld [vmem:[#allocation1 + $0x1b] sm:$0xff]  ;;  %s9296_s19 = smov 126   ;;  %s9297_s20 = smov 120   ;;  %vm1368_vm15 = vcmask 138240   ;;  %vm12546_vm1 = vcmask 146432   ;;  %vm625_vm2 = vcmask 1031168  }
  0x15   : > { %330 = vst [vmem:[#allocation1] ss:$9 sm:$0xff] %v8430_v4  ;;  %s9298_s24 = smov 119   ;;  %s12537_s25 = smov 66   ;;  %vm780_vm3 = vcmask 982016   ;;  %vm12586_vm4 = vcmask 523264  }
  0x16   : > { %s9300_s27 = smov 118   ;;  %s9301_s9 = smov 112  }
  0x17   : > { %s12535_s10 = smov 72   ;;  %s9303_s29 = smov 111  }
  0x18   : > { %s12559_s30 = smov 110  }
  0x1b   : > { %269 = vrot.lane.b32.xlu0 %v264_v11, %s12554_s7  ;;  %s12566_s7 = smov 55  }
  0x1c   : > { %v331_v13 = vld [vmem:[#allocation1] sm:$0xff]  ;;  %v332_v14 = vld [vmem:[#allocation1 + $0x9] sm:$0xff]  ;;  %v333_v15 = vld [vmem:[#allocation1 + $0x12] sm:$0xff] }
  0x1d   : > { %v335_v16 = vpack.i.b16 %v331_v13, %v331_v13  ;;  %v338_v17 = vpack.i.b16 %v332_v14, %v332_v14  ;;  %v334_v18 = vld [vmem:[#allocation1 + $0x1b] sm:$0xff]  ;;  %v341_v19 = vpack.i.b16 %v333_v15, %v333_v15 }
  0x1e   : > { %v344_v20 = vpack.i.b16 %v334_v18, %v334_v18  ;;  %551 = vst [vmem:[#allocation1] ss:$9 sm:$0xff] %v8440_v12 }
  0x1f   : > { %v337_v21 = vperm.slane %v335_v16, 0  ;;  %v340_v22 = vperm.slane %v338_v17, 0  ;;  %v343_v25 = vperm.slane %v341_v19, 0 }
  0x20   : > { %v346_v26 = vperm.slane %v344_v20, 0 }
  0x21   : > { %v352_v23 = vunpack.c.l.bf16 %v337_v21  ;;  %v353_v24 = vunpack.c.l.bf16 %v340_v22  ;;  %v354_v29 = vunpack.c.l.bf16 %v343_v25 }
  0x22   : > { %v355_v30 = vunpack.c.l.bf16 %v346_v26 }
  0x23   : > { %v8794_v27 = vpack.i.bf16 %v353_v24, %v352_v23 }
  0x24   : > { %v8799_v41 = vpack.i.bf16 %v355_v30, %v354_v29  ;;  %v8464_v29 = vld [vmem:[%s12528_s1 + $0x18] sm:$0xf] }
  0x25   : > { %8795 = vrot.lane.b32.xlu1 %v8794_v27, %s9284_s12  ;;  %v552_v31 = vld [vmem:[#allocation1] sm:$0xff]  ;;  %v553_v32 = vld [vmem:[#allocation1 + $0x9] sm:$0xff]  ;;  %v554_v33 = vld [vmem:[#allocation1 + $0x12] sm:$0xff] }
  0x26   : > { %v555_v34 = vld [vmem:[#allocation1 + $0x1b] sm:$0xff]  ;;  %v556_v35 = vpack.i.b16 %v552_v31, %v552_v31  ;;  %v559_v36 = vpack.i.b16 %v553_v32, %v553_v32  ;;  %v562_v37 = vpack.i.b16 %v554_v33, %v554_v33 }
  0x27   : > { %707 = vst [vmem:[#allocation1] ss:$9 sm:$0xff] %v8446_v28  ;;  %v565_v38 = vpack.i.b16 %v555_v34, %v555_v34 }
  0x28   : > { %v558_v39 = vperm.slane %v556_v35, 0  ;;  %v561_v40 = vperm.slane %v559_v36, 0  ;;  %v564_v42 = vperm.slane %v562_v37, 0 }
  0x29   : > { %v567_v43 = vperm.slane %v565_v38, 0 }
  0x2a   : > { %v573_v44 = vunpack.c.l.bf16 %v558_v39  ;;  %v574_v45 = vunpack.c.l.bf16 %v561_v40  ;;  %v575_v48 = vunpack.c.l.bf16 %v564_v42 }
  0x2b   : > { %v576_v49 = vunpack.c.l.bf16 %v567_v43 }
  0x2c   : > { %v8804_v46 = vpack.i.bf16 %v574_v45, %v573_v44 }
  0x2d   : > { %8800 = vrot.lane.b32.xlu1 %v8799_v41, %s9284_s12  ;;  %v8809_v61 = vpack.i.bf16 %v576_v49, %v575_v48  ;;  %v8470_v49 = vld [vmem:[%s12528_s1 + $0x1c] sm:$0xf] }
  0x2e   : > { %8805 = vrot.lane.b32.xlu0 %v8804_v46, %s12595_s15  ;;  %v710_v51 = vld [vmem:[#allocation1 + $0x12] sm:$0xff]  ;;  %v711_v52 = vld [vmem:[#allocation1 + $0x1b] sm:$0xff]  ;;  %v709_v56 = vld [vmem:[#allocation1 + $0x9] sm:$0xff] }
  0x2f   : > { %v708_v53 = vld [vmem:[#allocation1] sm:$0xff]  ;;  %v718_v54 = vpack.i.b16 %v710_v51, %v710_v51  ;;  %v721_v55 = vpack.i.b16 %v711_v52, %v711_v52  ;;  %v715_v58 = vpack.i.b16 %v709_v56, %v709_v56 }
  0x30   : > { %v712_v57 = vpack.i.b16 %v708_v53, %v708_v53  ;;  %862 = vst [vmem:[#allocation1] ss:$9 sm:$0xff] %v8452_v50 }
  0x31   : > { %v720_v59 = vperm.slane %v718_v54, 0  ;;  %v723_v60 = vperm.slane %v721_v55, 0  ;;  %v717_v63 = vperm.slane %v715_v58, 0  ;;  %v8476_v54 = vld [vmem:[%s12528_s1 + $0x20] sm:$0xf] }
  0x32   : > { %v714_v62 = vperm.slane %v712_v57, 0 }
  0x33   : > { %v731_v0 = vunpack.c.l.bf16 %v720_v59  ;;  %v732_v1 = vunpack.c.l.bf16 %v723_v60  ;;  %v730_v4 = vunpack.c.l.bf16 %v717_v63  ;;  %v8482_v59 = vld [vmem:[%s12528_s1 + $0x24] sm:$0xf] }
  0x34   : > { %v729_v3 = vunpack.c.l.bf16 %v714_v62 }
  0x35   : > { %v8819_v2 = vpack.i.bf16 %v732_v1, %v731_v0  ;;  %8810 = vrot.lane.b32.xlu1 %v8809_v61, %s12595_s15  ;;  %v8488_v0 = vld [vmem:[%s12528_s1 + $0x28] sm:$0xf] }
  0x36   : > { %v8814_v17 = vpack.i.bf16 %v730_v4, %v729_v3 }
  0x37   : > { %8820 = vrot.lane.b32.xlu2 %v8819_v2, %s12593_s18  ;;  %v863_v10 = vld [vmem:[#allocation1] sm:$0xff]  ;;  %v864_v11 = vld [vmem:[#allocation1 + $0x9] sm:$0xff]  ;;  %v865_v12 = vld [vmem:[#allocation1 + $0x12] sm:$0xff] }
  0x38   : > { %v867_v13 = vpack.i.b16 %v863_v10, %v863_v10  ;;  %v870_v14 = vpack.i.b16 %v864_v11, %v864_v11  ;;  %v866_v15 = vld [vmem:[#allocation1 + $0x1b] sm:$0xff]  ;;  %v873_v16 = vpack.i.b16 %v865_v12, %v865_v12 }
  0x39   : > { %v876_v18 = vpack.i.b16 %v866_v15, %v866_v15  ;;  %1018 = vst [vmem:[#allocation1] ss:$9 sm:$0xff] %v8458_v9  ;;  %v8494_v9 = vld [vmem:[%s12528_s1 + $0x2c] sm:$0xf] }
  0x3a   : > { %v869_v19 = vperm.slane %v867_v13, 0  ;;  %v872_v20 = vperm.slane %v870_v14, 0  ;;  %v875_v21 = vperm.slane %v873_v16, 0  ;;  %v8500_v14 = vld [vmem:[%s12528_s1 + $0x30] sm:$0xf] }
  0x3b   : > { %v878_v22 = vperm.slane %v876_v18, 0 }
  0x3c   : > { %v884_v23 = vunpack.c.l.bf16 %v869_v19  ;;  %v885_v24 = vunpack.c.l.bf16 %v872_v20  ;;  %v886_v25 = vunpack.c.l.bf16 %v875_v21  ;;  %v8511_v19 = vld [vmem:[%s12528_s1 + $0x38] sm:$0xf] }
  0x3d   : > { %8815 = vrot.lane.b32.xlu1 %v8814_v17, %s12593_s18  ;;  %v887_v26 = vunpack.c.l.bf16 %v878_v22 }
  0x3e   : > { %v8824_v27 = vpack.i.bf16 %v885_v24, %v884_v23  ;;  %v12604_v24 = vmov 0 }
  0x3f   : > { %v8829_v28 = vpack.i.bf16 %v887_v26, %v886_v25  ;;  %v12605_v24 = vsel %vm9497_vm6, 4294967295, %v12604_v24  ;;  %v8517_v26 = vld [vmem:[%s12528_s1 + $0x3c] sm:$0xf] }
  0x40   : > { %8825 = vrot.lane.b32.xlu2 %v8824_v27, %s9288_s23  ;;  %v1021_v30 = vld [vmem:[#allocation1 + $0x12] sm:$0xff]  ;;  %v1022_v31 = vld [vmem:[#allocation1 + $0x1b] sm:$0xff]  ;;  %v1020_v35 = vld [vmem:[#allocation1 + $0x9] sm:$0xff]  ;;  %12606 = vst [vmem:[#allocation3_spill] sm:$0xff] %v12605_v24 }
  0x41   : > { %v1019_v32 = vld [vmem:[#allocation1] sm:$0xff]  ;;  %8830 = vrot.lane.b32.xlu0 %v8829_v28, %s9288_s23  ;;  %v1029_v33 = vpack.i.b16 %v1021_v30, %v1021_v30  ;;  %v1032_v34 = vpack.i.b16 %v1022_v31, %v1022_v31  ;;  %v1026_v37 = vpack.i.b16 %v1020_v35, %v1020_v35 }
  0x42   : > { %v1023_v36 = vpack.i.b16 %v1019_v32, %v1019_v32  ;;  %1174 = vst [vmem:[#allocation1] ss:$9 sm:$0xff] %v8464_v29  ;;  %v8523_v35 = vld [vmem:[%s12528_s1 + $0x40] sm:$0xf] }
  0x43   : > { %v1031_v38 = vperm.slane %v1029_v33, 0  ;;  %v1034_v39 = vperm.slane %v1032_v34, 0  ;;  %v1028_v41 = vperm.slane %v1026_v37, 0 }
  0x44   : > { %v1025_v40 = vperm.slane %v1023_v36, 0 }
  0x45   : > { %v1042_v42 = vunpack.c.l.bf16 %v1031_v38  ;;  %v1043_v43 = vunpack.c.l.bf16 %v1034_v39  ;;  %v1041_v45 = vunpack.c.l.bf16 %v1028_v41 }
  0x46   : > { %v1040_v44 = vunpack.c.l.bf16 %v1025_v40 }
  0x47   : > { %v8839_v46 = vpack.i.bf16 %v1043_v43, %v1042_v42 }
  0x48   : > { %v8834_v48 = vpack.i.bf16 %v1041_v45, %v1040_v44 }
  0x49   : > { %8840 = vrot.lane.b32.xlu1 %v8839_v46, %s9289_s26  ;;  %v9419_v50 = vld [vmem:[#allocation1] sm:$0xff]  ;;  %v9421_v51 = vld [vmem:[#allocation1 + $0x9] sm:$0xff]  ;;  %v9423_v52 = vld [vmem:[#allocation1 + $0x12] sm:$0xff] }
  0x4a   : > { %8835 = vrot.lane.b32.xlu0 %v8834_v48, %s9289_s26  ;;  %v9426_v53 = vld [vmem:[#allocation1 + $0x1b] sm:$0xff] }
  0x4b   : > { %1330 = vst [vmem:[#allocation1] ss:$9 sm:$0xff] %v8470_v49  ;;  %v1179_v49 = vpack.i.b16 %v9419_v50, %v9419_v50 }
  0x52   : > { %v9431_v55 = vld [vmem:[#allocation1] sm:$0xff]  ;;  %v9433_v56 = vld [vmem:[#allocation1 + $0x9] sm:$0xff]  ;;  %v9435_v57 = vld [vmem:[#allocation1 + $0x12] sm:$0xff] }
  0x53   : > { %v9437_v58 = vld [vmem:[#allocation1 + $0x1b] sm:$0xff] }
  0x54   : > { %1486 = vst [vmem:[#allocation1] ss:$9 sm:$0xff] %v8476_v54 }
  0x5b   : > { %v9442_v60 = vld [vmem:[#allocation1] sm:$0xff]  ;;  %v9446_v62 = vld [vmem:[#allocation1 + $0x9] sm:$0xff]  ;;  %v9448_v63 = vld [vmem:[#allocation1 + $0x12] sm:$0xff] }
  0x5c   : > { %v9444_v61 = vld [vmem:[#allocation1 + $0x1b] sm:$0xff] }
  0x5d   : > { %1642 = vst [vmem:[#allocation1] ss:$9 sm:$0xff] %v8482_v59 }
  0x64   : > { %v9453_v1 = vld [vmem:[#allocation1] sm:$0xff]  ;;  %v9457_v3 = vld [vmem:[#allocation1 + $0x9] sm:$0xff]  ;;  %v9459_v4 = vld [vmem:[#allocation1 + $0x12] sm:$0xff] }
  0x65   : > { %v9455_v2 = vld [vmem:[#allocation1 + $0x1b] sm:$0xff] }
  0x66   : > { %1798 = vst [vmem:[#allocation1] ss:$9 sm:$0xff] %v8488_v0  ;;  %v8529_v0 = vld [vmem:[%s12528_s1 + $0x44] sm:$0xf] }
  0x6d   : > { %v9464_v10 = vld [vmem:[#allocation1 + $0x9] sm:$0xff]  ;;  %v9466_v11 = vld [vmem:[#allocation1 + $0x12] sm:$0xff]  ;;  %v9468_v12 = vld [vmem:[#allocation1] sm:$0xff] }
  0x6e   : > { %v9470_v13 = vld [vmem:[#allocation1 + $0x1b] sm:$0xff] }
  0x6f   : > { %1954 = vst [vmem:[#allocation1] ss:$9 sm:$0xff] %v8494_v9  ;;  %v1182_v9 = vpack.i.b16 %v9421_v51, %v9421_v51 }
  0x76   : > { %v9477_v15 = vld [vmem:[#allocation1] sm:$0xff]  ;;  %v9481_v17 = vld [vmem:[#allocation1 + $0x9] sm:$0xff]  ;;  %v9483_v18 = vld [vmem:[#allocation1 + $0x12] sm:$0xff] }
  0x77   : > { %v9479_v16 = vld [vmem:[#allocation1 + $0x1b] sm:$0xff] }
  0x78   : > { %2110 = vst [vmem:[#allocation1] ss:$9 sm:$0xff] %v8500_v14  ;;  %v1335_v14 = vpack.i.b16 %v9431_v55, %v9431_v55 }
  0x7f   : > { %v9488_v20 = vld [vmem:[#allocation1] sm:$0xff]  ;;  %v9492_v21 = vld [vmem:[#allocation1 + $0x9] sm:$0xff]  ;;  %v9494_v22 = vld [vmem:[#allocation1 + $0x12] sm:$0xff] }
  0x80   : > { %v9490_v47 = vld [vmem:[#allocation1 + $0x1b] sm:$0xff] }
  0x81   : > { %2367 = vst [vmem:[#allocation1] ss:$9 sm:$0xff] %v8511_v19 }
  0x85   : > { %v268_v23 = vpop.permute.xlu0 %267 }
  0x86   : > { %v271_v25 = vrot.slane %v268_v23, 4 }
  0x88   : > { %v9504_v27 = vld [vmem:[#allocation1] sm:$0xff]  ;;  %v9508_v29 = vld [vmem:[#allocation1 + $0x9] sm:$0xff]  ;;  %v274_v30 = vsel %vm12542_vm5, %v271_v25, %v268_v23  ;;  %v9511_v31 = vld [vmem:[#allocation1 + $0x12] sm:$0xff] }
  0x89   : > { %v9506_v28 = vld [vmem:[#allocation1 + $0x1b] sm:$0xff]  ;;  %283 = vst.msk [vmem:[#allocation2] sm:$0xff] %vm9497_vm6, %v274_v30 }
  0x8a   : > { %2523 = vst [vmem:[#allocation1] ss:$9 sm:$0xff] %v8517_v26 }
  0x8d   : > { %v270_v32 = vpop.permute.xlu0 %269 }
  0x8e   : > { %v272_v33 = vrot.slane %v270_v32, 4 }
  0x90   : > { %v276_v34 = vsel %vm275_vm7, %v271_v25, %v272_v33  ;;  %285 = vst.msk [vmem:[#allocation2 + $0x10] sm:$0xf] %vm12539_vm0, %v272_v33  ;;  %v324_v40 = vld [vmem:[#allocation2] sm:$0xff]  ;;  %v1344_v25 = vpack.i.b16 %v9437_v58, %v9437_v58  ;;  %v1181_v33 = vperm.slane %v1179_v49, 0  ;;  %v1185_v49 = vpack.i.b16 %v9423_v52, %v9423_v52 }
  0x91   : > { %v277_v36 = vsel %vm12542_vm5, %v276_v34, %v270_v32  ;;  %v9521_v37 = vld [vmem:[#allocation1 + $0x9] sm:$0xff]  ;;  %v9523_v38 = vld [vmem:[#allocation1 + $0x12] sm:$0xff]  ;;  %v9525_v39 = vld [vmem:[#allocation1 + $0x1b] sm:$0xff]  ;;  %v9529_v42 = vunpack.c.l.bf16 %v324_v40  ;;  %vm12558_vm0 = vcmask 973824   ;;  %vm12545_vm5 = vcmask 531456  }
  0x92   : > { %12607 = vst [vmem:[#allocation4_spill] sm:$0xff] %v9525_v39  ;;  %v9527_v41 = vld [vmem:[#allocation1] sm:$0xff]  ;;  %v9552_v34 = vunpack.c.h.bf16 %v277_v36  ;;  %v9554_v55 = vunpack.c.l.bf16 %v277_v36  ;;  %v8535_v52 = vld [vmem:[%s12528_s1 + $0x48] sm:$0xf] }
  0x93   : > { %284 = vst [vmem:[#allocation2 + $0x8] sm:$0xff] %v277_v36  ;;  %v1188_v36 = vpack.i.b16 %v9426_v53, %v9426_v53  ;;  %v1497_v53 = vpack.i.b16 %v9448_v63, %v9448_v63 }
  0x94   : > { %2679 = vst [vmem:[#allocation1] ss:$9 sm:$0xff] %v8523_v35  ;;  %v1184_v35 = vperm.slane %v1182_v9, 0  ;;  %v1491_v9 = vpack.i.b16 %v9442_v60, %v9442_v60 }
  0x95   : > { %v1190_v63 = vperm.slane %v1188_v36, 0  ;;  %v1341_v36 = vpack.i.b16 %v9435_v57, %v9435_v57 }
  0x97   : > { %v8796_v43 = vpop.permute.xlu1 %8795  ;;  %v326_v46 = vld [vmem:[#allocation2 + $0x10] sm:$0xf] }
  0x98   : > { %v8797_v44 = vunpack.i.l.bf16 %v8796_v43  ;;  %v351_v50 = vunpack.c.l.bf16 %v326_v46  ;;  %v8798_v30 = vunpack.i.h.bf16 %v8796_v43  ;;  %v9560_v43 = vunpack.c.h.bf16 %v324_v40 }
  0x99   : > { %v1494_v40 = vpack.i.b16 %v9446_v62, %v9446_v62  ;;  %v1196_v62 = vunpack.c.l.bf16 %v1181_v33 }
  0x9a   : > { %v377_v45 = vmul.f32 %v8797_v44, %v9529_v42 }
  0x9b   : > { %v9534_v54 = vld [vmem:[#allocation1] sm:$0xff]  ;;  %v9545_v19 = vld [vmem:[#allocation1 + $0x9] sm:$0xff]  ;;  %v9547_v23 = vld [vmem:[#allocation1 + $0x12] sm:$0xff] }
  0x9c   : > { %v382_v48 = vpack.c.bf16 %v377_v45, %v377_v45  ;;  %v9536_v59 = vld [vmem:[#allocation1 + $0x1b] sm:$0xff]  ;;  %12608 = vst [vmem:[#allocation5_spill] sm:$0xff] %v9545_v19  ;;  %v1337_v45 = vperm.slane %v1335_v14, 0  ;;  %v1500_v14 = vpack.i.b16 %v9444_v61, %v9444_v61 }
  0x9d   : > { %12609 = vst [vmem:[#allocation6_spill] sm:$0xff] %v9547_v23  ;;  %v1346_v23 = vperm.slane %v1344_v25, 0 }
  0x9e   : > { %394 = vrot.lane.b32.xlu2 %v382_v48, %s9290_s8  ;;  %2835 = vst [vmem:[#allocation1] ss:$9 sm:$0xff] %v8529_v0 }
  0x9f   : > { %v8801_v26 = vpop.permute.xlu1 %8800 }
  0xa0   : > { %v8803_v32 = vunpack.i.h.bf16 %v8801_v26  ;;  %v8802_v51 = vunpack.i.l.bf16 %v8801_v26 }
  0xa2   : > { %v381_v24 = vmul.f32 %v8803_v32, %v351_v50  ;;  %v371_v48 = vsel %vm368_vm8, %v8802_v51, %v8803_v32  ;;  %v370_v46 = vsel %vm368_vm8, %v8798_v30, %v8802_v51  ;;  %v369_v32 = vsel %vm368_vm8, %v8797_v44, %v8798_v30 }
  0xa3   : > { %v380_v58 = vmul.f32 %v371_v48, %v9552_v34  ;;  %v379_v0 = vmul.f32 %v370_v46, %v9554_v55  ;;  %v1197_v44 = vunpack.c.l.bf16 %v1184_v35  ;;  %v1352_v30 = vunpack.c.l.bf16 %v1337_v45 }
  0xa4   : > { %v386_v26 = vpack.c.bf16 %v381_v24, %v381_v24  ;;  %v1355_v51 = vunpack.c.l.bf16 %v1346_v23  ;;  %v378_v46 = vmul.f32 %v369_v32, %v9560_v43  ;;  %v1650_v32 = vpack.i.b16 %v9457_v3, %v9457_v3 }
  0xa5   : > { %v385_v50 = vpack.c.bf16 %v380_v58, %v380_v58  ;;  %v384_v25 = vpack.c.bf16 %v379_v0, %v379_v0  ;;  %v9579_v60 = vld [vmem:[#allocation1] sm:$0xff]  ;;  %v9581_v24 = vld [vmem:[#allocation1 + $0x9] sm:$0xff]  ;;  %v9583_v61 = vld [vmem:[#allocation1 + $0x12] sm:$0xff]  ;;  %v1187_v58 = vperm.slane %v1185_v49, 0  ;;  %v1493_v0 = vperm.slane %v1491_v9, 0 }
  0xa6   : > { %402 = vrot.lane.b32.xlu2 %v386_v26, %s9290_s8  ;;  %12610 = vst [vmem:[#allocation7_spill] sm:$0xff] %v9579_v60  ;;  %v9587_v48 = vld [vmem:[#allocation1 + $0x1b] sm:$0xff]  ;;  %v1502_v26 = vperm.slane %v1500_v14, 0  ;;  %v1499_v60 = vperm.slane %v1497_v53, 0  ;;  %v8859_v19 = vpack.i.bf16 %v1352_v30, %v1355_v51  ;;  %v1338_v49 = vpack.i.b16 %v9433_v56, %v9433_v56 }
  0xa7   : > { %12611 = vst [vmem:[#allocation8_spill] sm:$0xff] %v9581_v24  ;;  %400 = vrot.lane.b32.xlu1 %v385_v50, %s9290_s8  ;;  %398 = vrot.lane.b32.xlu0 %v384_v25, %s9290_s8  ;;  %v1496_v24 = vperm.slane %v1494_v40, 0  ;;  %v383_v50 = vpack.c.bf16 %v378_v46, %v378_v46  ;;  %v1198_v39 = vunpack.c.l.bf16 %v1187_v58  ;;  %v1199_v25 = vunpack.c.l.bf16 %v1190_v63  ;;  %v8806_v58 = vpop.permute.xlu0 %8805 }
  0xa8   : > { %12612 = vst [vmem:[#allocation9_spill] sm:$0xff] %v9583_v61  ;;  %v8844_v61 = vpack.i.bf16 %v1197_v44, %v1196_v62  ;;  %v1508_v33 = vunpack.c.l.bf16 %v1493_v0  ;;  %v1511_v35 = vunpack.c.l.bf16 %v1502_v26  ;;  %v1510_v23 = vunpack.c.l.bf16 %v1499_v60 }
  0xa9   : > { %2990 = vst [vmem:[#allocation1] ss:$9 sm:$0xff] %v8535_v52  ;;  %v1509_v45 = vunpack.c.l.bf16 %v1496_v24  ;;  %v1647_v9 = vpack.i.b16 %v9453_v1, %v9453_v1  ;;  %v1656_v14 = vpack.i.b16 %v9455_v2, %v9455_v2  ;;  %v1653_v56 = vpack.i.b16 %v9459_v4, %v9459_v4  ;;  %v8811_v4 = vpop.permute.xlu1 %8810 }
  0xaa   : > { %v8849_v40 = vpack.i.bf16 %v1199_v25, %v1198_v39  ;;  %v8869_v57 = vpack.i.bf16 %v1508_v33, %v1511_v35  ;;  %v1340_v53 = vperm.slane %v1338_v49, 0  ;;  %v1343_v1 = vperm.slane %v1341_v36, 0  ;;  %v547_v25 = vld [vmem:[#allocation2 + $0x10] sm:$0xf] }
  0xab   : > { %v8864_v52 = vpack.i.bf16 %v1510_v23, %v1509_v45  ;;  %v1649_v60 = vperm.slane %v1647_v9, 0  ;;  %v1658_v24 = vperm.slane %v1656_v14, 0  ;;  %v1655_v62 = vperm.slane %v1653_v56, 0 }
  0xac   : > { %v1354_v44 = vunpack.c.l.bf16 %v1343_v1  ;;  %v1806_v2 = vpack.i.b16 %v9464_v10, %v9464_v10  ;;  %v1809_v3 = vpack.i.b16 %v9466_v11, %v9466_v11  ;;  %v8812_v63 = vunpack.i.l.bf16 %v8811_v4  ;;  %v8821_v1 = vpop.permute.xlu2 %8820 }
  0xad   : > { %v1664_v39 = vunpack.c.l.bf16 %v1649_v60  ;;  %v1667_v30 = vunpack.c.l.bf16 %v1658_v24  ;;  %v1666_v46 = vunpack.c.l.bf16 %v1655_v62  ;;  %v8808_v35 = vunpack.i.h.bf16 %v8806_v58 }
  0xae   : > { %396 = vrot.lane.b32.xlu2 %v383_v50, %s9290_s8  ;;  %v1808_v26 = vperm.slane %v1806_v2, 0  ;;  %v1811_v50 = vperm.slane %v1809_v3, 0  ;;  %v8813_v11 = vunpack.i.h.bf16 %v8811_v4  ;;  %v572_v45 = vunpack.c.l.bf16 %v547_v25 }
  0xaf   : > { %8845 = vrot.lane.b32.xlu1 %v8844_v61, %s9291_s11  ;;  %8860 = vrot.lane.b32.xlu0 %v8859_v19, %s9292_s13  ;;  %v1652_v61 = vperm.slane %v1650_v32, 0  ;;  %v1353_v19 = vunpack.c.l.bf16 %v1340_v53  ;;  %v8879_v10 = vpack.i.bf16 %v1664_v39, %v1667_v30  ;;  %v591_v36 = vsel %vm589_vm9, %v8808_v35, %v8812_v63 }
  0xb0   : > { %v1821_v23 = vunpack.c.l.bf16 %v1808_v26  ;;  %v1822_v49 = vunpack.c.l.bf16 %v1811_v50  ;;  %v602_v9 = vmul.f32 %v8813_v11, %v572_v45  ;;  %v600_v14 = vmul.f32 %v591_v36, %v9554_v55 }
  0xb1   : > { %v1665_v51 = vunpack.c.l.bf16 %v1652_v61  ;;  %v8854_v0 = vpack.i.bf16 %v1354_v44, %v1353_v19  ;;  %v8807_v32 = vunpack.i.l.bf16 %v8806_v58  ;;  %v8823_v24 = vunpack.i.h.bf16 %v8821_v1  ;;  %v8816_v61 = vpop.permute.xlu1 %8815 }
  0xb2   : > { %v8884_v56 = vpack.i.bf16 %v1822_v49, %v1821_v23  ;;  %v8818_v2 = vunpack.i.h.bf16 %v8816_v61  ;;  %v8817_v3 = vunpack.i.l.bf16 %v8816_v61  ;;  %v8822_v50 = vunpack.i.l.bf16 %v8821_v1 }
  0xb3   : > { %v8874_v33 = vpack.i.bf16 %v1666_v46, %v1665_v51  ;;  %v590_v60 = vsel %vm589_vm9, %v8807_v32, %v8808_v35  ;;  %v598_v62 = vmul.f32 %v8807_v32, %v9529_v42  ;;  %v592_v51 = vsel %vm589_vm9, %v8812_v63, %v8813_v11  ;;  %v8831_v23 = vpop.permute.xlu0 %8830 }
  0xb4   : > { %v599_v44 = vmul.f32 %v590_v60, %v9560_v43  ;;  %v745_v46 = vsel %vm409_vm10, %v8817_v3, %v8818_v2  ;;  %v601_v58 = vmul.f32 %v592_v51, %v9552_v34  ;;  %v753_v26 = vmul.f32 %v8817_v3, %v9529_v42  ;;  %v8826_v25 = vpop.permute.xlu2 %8825 }
  0xb5   : > { %v603_v4 = vpack.c.bf16 %v598_v62, %v598_v62  ;;  %v8827_v63 = vunpack.i.l.bf16 %v8826_v25  ;;  %v746_v11 = vsel %vm409_vm10, %v8818_v2, %v8822_v50  ;;  %v747_v45 = vsel %vm409_vm10, %v8822_v50, %v8823_v24 }
  0xb6   : > { %8850 = vrot.lane.b32.xlu2 %v8849_v40, %s9291_s11  ;;  %v703_v40 = vld [vmem:[#allocation2 + $0x10] sm:$0xf]  ;;  %v604_v30 = vpack.c.bf16 %v599_v44, %v599_v44  ;;  %v758_v35 = vpack.c.bf16 %v753_v26, %v753_v26  ;;  %v1803_v49 = vpack.i.b16 %v9468_v12, %v9468_v12  ;;  %v1812_v36 = vpack.i.b16 %v9470_v13, %v9470_v13 }
  0xb7   : > { %8870 = vrot.lane.b32.xlu1 %v8869_v57, %s9293_s14  ;;  %8865 = vrot.lane.b32.xlu0 %v8864_v52, %s9293_s14  ;;  %v607_v57 = vpack.c.bf16 %v602_v9, %v602_v9  ;;  %v605_v52 = vpack.c.bf16 %v600_v14, %v600_v14  ;;  %v728_v53 = vunpack.c.l.bf16 %v703_v40  ;;  %v755_v9 = vmul.f32 %v746_v11, %v9554_v55 }
  0xb8   : > { %v909_v14 = vmul.f32 %v8827_v63, %v9529_v42  ;;  %v756_v32 = vmul.f32 %v747_v45, %v9552_v34  ;;  %v8832_v40 = vunpack.i.l.bf16 %v8831_v23  ;;  %v1968_v44 = vpack.i.b16 %v9479_v16, %v9479_v16 }
  0xb9   : > { %v757_v19 = vmul.f32 %v8823_v24, %v728_v53  ;;  %v1814_v53 = vperm.slane %v1812_v36, 0  ;;  %v760_v1 = vpack.c.bf16 %v755_v9, %v755_v9  ;;  %v8828_v3 = vunpack.i.h.bf16 %v8826_v25 }
  0xba   : > { %v914_v60 = vpack.c.bf16 %v909_v14, %v909_v14  ;;  %v761_v24 = vpack.c.bf16 %v756_v32, %v756_v32  ;;  %v1970_v51 = vperm.slane %v1968_v44, 0 }
  0xbb   : > { %v762_v39 = vpack.c.bf16 %v757_v19, %v757_v19  ;;  %v1823_v62 = vunpack.c.l.bf16 %v1814_v53  ;;  %v1959_v19 = vpack.i.b16 %v9477_v15, %v9477_v15  ;;  %v902_v26 = vsel %vm900_vm11, %v8828_v3, %v8832_v40  ;;  %v8841_v50 = vpop.permute.xlu1 %8840 }
  0xbc   : > { %v8836_v15 = vpop.permute.xlu0 %8835  ;;  %v1979_v25 = vunpack.c.l.bf16 %v1970_v51  ;;  %v8842_v11 = vunpack.i.l.bf16 %v8841_v50 }
  0xbd   : > { %v8838_v45 = vunpack.i.h.bf16 %v8836_v15  ;;  %v8837_v9 = vunpack.i.l.bf16 %v8836_v15 }
  0xbe   : > { %8855 = vrot.lane.b32.xlu2 %v8854_v0, %s9292_s13  ;;  %v754_v0 = vmul.f32 %v745_v46, %v9560_v43 }
  0xbf   : > { %8880 = vrot.lane.b32.xlu1 %v8879_v10, %s12550_s16  ;;  %8875 = vrot.lane.b32.xlu0 %v8874_v33, %s12550_s16  ;;  %v606_v10 = vpack.c.bf16 %v601_v58, %v601_v58 }
  0xc0   : > { %v759_v33 = vpack.c.bf16 %v754_v0, %v754_v0  ;;  %v901_v0 = vsel %vm900_vm11, %v8827_v63, %v8828_v3 }
  0xc1   : > { %v910_v63 = vmul.f32 %v901_v0, %v9560_v43 }
  0xc3   : > { %v915_v14 = vpack.c.bf16 %v910_v63, %v910_v63 }
  0xc6   : > { %8885 = vrot.lane.b32.xlu2 %v8884_v56, %s12540_s17  ;;  %v8833_v56 = vunpack.i.h.bf16 %v8831_v23 }
  0xc7   : > { %623 = vrot.lane.b32.xlu0 %v607_v57, %s9296_s19  ;;  %619 = vrot.lane.b32.xlu1 %v605_v52, %s9296_s19  ;;  %v858_v57 = vld [vmem:[#allocation2 + $0x10] sm:$0xf]  ;;  %v1805_v52 = vperm.slane %v1803_v49, 0 }
  0xc8   : > { %v883_v12 = vunpack.c.l.bf16 %v858_v57  ;;  %v903_v13 = vsel %vm900_vm11, %v8832_v40, %v8833_v56  ;;  %v1065_v40 = vmul.f32 %v8837_v9, %v9529_v42  ;;  %v8843_v57 = vunpack.i.h.bf16 %v8841_v50 }
  0xc9   : > { %v1820_v61 = vunpack.c.l.bf16 %v1805_v52  ;;  %v298_v50 = vpack.i.b16 %v9378_v6, %v9378_v6  ;;  %v2115_v6 = vpack.i.b16 %v9488_v20, %v9488_v20 }
  0xca   : > { %v913_v2 = vmul.f32 %v8833_v56, %v883_v12  ;;  %v1059_v12 = vsel %vm1056_vm12, %v8842_v11, %v8843_v57 }
  0xcb   : > { %v300_v63 = vperm.slane %v298_v50, 0 }
  0xcc   : > { %v918_v46 = vpack.c.bf16 %v913_v2, %v913_v2 }
  0xce   : > { %615 = vrot.lane.b32.xlu2 %v603_v4, %s9296_s19  ;;  %v912_v4 = vmul.f32 %v903_v13, %v9552_v34 }
  0xcf   : > { %778 = vrot.lane.b32.xlu1 %v762_v39, %s9297_s20  ;;  %617 = vrot.lane.b32.xlu0 %v604_v30, %s9296_s19  ;;  %v8889_v39 = vpack.i.bf16 %v1820_v61, %v1823_v62  ;;  %v1961_v30 = vperm.slane %v1959_v19, 0  ;;  %v295_v61 = vpack.i.b16 %v9376_v5, %v9376_v5  ;;  %v1068_v19 = vmul.f32 %v1059_v12, %v9552_v34 }
  0xd0   : > { %v917_v58 = vpack.c.bf16 %v912_v4, %v912_v4 }
  0xd1   : > { %v1976_v16 = vunpack.c.l.bf16 %v1961_v30  ;;  %v297_v2 = vperm.slane %v295_v61, 0  ;;  %v1073_v3 = vpack.c.bf16 %v1068_v19, %v1068_v19 }
  0xd3   : > { %v8899_v23 = vpack.i.bf16 %v1976_v16, %v1979_v25  ;;  %v311_v30 = vunpack.c.l.bf16 %v297_v2  ;;  %v301_v16 = vpack.i.b16 %v9380_v7, %v9380_v7  ;;  %v304_v25 = vpack.i.b16 %v9383_v8, %v9383_v8 }
  0xd6   : > { %621 = vrot.lane.b32.xlu2 %v606_v10, %s9296_s19  ;;  %v1962_v10 = vpack.i.b16 %v9481_v17, %v9481_v17  ;;  %v1058_v17 = vsel %vm1056_vm12, %v8838_v45, %v8842_v11  ;;  %v306_v11 = vperm.slane %v304_v25, 0 }
  0xd7   : > { %772 = vrot.lane.b32.xlu1 %v759_v33, %s9297_s20  ;;  %770 = vrot.lane.b32.xlu0 %v758_v35, %s9297_s20  ;;  %v1965_v33 = vpack.i.b16 %v9483_v18, %v9483_v18  ;;  %v911_v35 = vmul.f32 %v902_v26, %v9554_v55  ;;  %v1067_v52 = vmul.f32 %v1058_v17, %v9554_v55 }
  0xd8   : > { %v1964_v49 = vperm.slane %v1962_v10, 0 }
  0xd9   : > { %v1967_v36 = vperm.slane %v1965_v33, 0  ;;  %v916_v32 = vpack.c.bf16 %v911_v35, %v911_v35  ;;  %v303_v35 = vperm.slane %v301_v16, 0 }
  0xda   : > { %v1977_v18 = vunpack.c.l.bf16 %v1964_v49  ;;  %v312_v49 = vunpack.c.l.bf16 %v300_v63  ;;  %v323_v63 = vld [vmem:[%s12529_s2] sm:$0xf] }
  0xdb   : > { %v1978_v56 = vunpack.c.l.bf16 %v1967_v36 }
  0xdc   : > { %v316_v20 = vmul.f32 %v9560_v43, %v312_v49 }
  0xdd   : > { %v8894_v53 = vpack.i.bf16 %v1978_v56, %v1977_v18  ;;  %v2117_v18 = vperm.slane %v2115_v6, 0 }
  0xde   : > { %774 = vrot.lane.b32.xlu2 %v760_v1, %s9297_s20  ;;  %v1070_v1 = vpack.c.bf16 %v1065_v40, %v1065_v40 }
  0xdf   : > { %926 = vrot.lane.b32.xlu1 %v914_v60, %s9298_s24  ;;  %776 = vrot.lane.b32.xlu0 %v761_v24, %s9297_s20  ;;  %v1014_v60 = vld [vmem:[#allocation2 + $0x10] sm:$0xf]  ;;  %v1072_v24 = vpack.c.bf16 %v1067_v52, %v1067_v52  ;;  %v2132_v52 = vunpack.c.l.bf16 %v2117_v18 }
  0xe0   : > { %v1039_v13 = vunpack.c.l.bf16 %v1014_v60  ;;  %v320_v60 = vpack.c.bf16 %v316_v20, %v316_v20  ;;  %v2121_v20 = vpack.i.b16 %v9494_v22, %v9494_v22 }
  0xe2   : > { %v1069_v44 = vmul.f32 %v8843_v57, %v1039_v13 }
  0xe4   : > { %v1074_v4 = vpack.c.bf16 %v1069_v44, %v1069_v44 }
  0xe6   : > { %934 = vrot.lane.b32.xlu2 %v918_v46, %s9298_s24 }
  0xe7   : > { %932 = vrot.lane.b32.xlu1 %v917_v58, %s9298_s24  ;;  %8890 = vrot.lane.b32.xlu0 %v8889_v39, %s12540_s17  ;;  %v1057_v39 = vsel %vm1056_vm12, %v8837_v9, %v8838_v45  ;;  %v315_v58 = vmul.f32 %v9529_v42, %v311_v30  ;;  %v1170_v45 = vld [vmem:[#allocation2 + $0x10] sm:$0xf]  ;;  %v313_v9 = vunpack.c.l.bf16 %v303_v35  ;;  %s12548_s17 = smov 63  }
  0xe8   : > { %v1066_v46 = vmul.f32 %v1057_v39, %v9560_v43  ;;  %v1195_v36 = vunpack.c.l.bf16 %v1170_v45 }
  0xe9   : > { %v319_v0 = vpack.c.bf16 %v315_v58, %v315_v58  ;;  %v317_v40 = vmul.f32 %v9554_v55, %v313_v9 }
  0xea   : > { %v1071_v5 = vpack.c.bf16 %v1066_v46, %v1066_v46  ;;  %v485_v46 = vsel %vm275_vm7, %v320_v60, 0 }
  0xeb   : > { %v482_v33 = vsel %vm275_vm7, %v319_v0, 0  ;;  %v321_v13 = vpack.c.bf16 %v317_v40, %v317_v40 }
  0xed   : > { %v488_v58 = vsel %vm275_vm7, %v321_v13, 0 }
  0xee   : > { %928 = vrot.lane.b32.xlu2 %v915_v14, %s9298_s24  ;;  %v314_v14 = vunpack.c.l.bf16 %v306_v11 }
  0xef   : > { %8900 = vrot.lane.b32.xlu1 %v8899_v23, %s12537_s25  ;;  %930 = vrot.lane.b32.xlu0 %v916_v32, %s9298_s24  ;;  %v2124_v23 = vpack.i.b16 %v9490_v47, %v9490_v47  ;;  %v8431_v32 = vld [vmem:[%s12529_s2 + $0x4] sm:$0xf] }
  0xf0   : > { %v318_v57 = vmul.f32 %v9552_v34, %v314_v14 }
  0xf1   : > { %v2126_v56 = vperm.slane %v2124_v23, 0 }
  0xf2   : > { %v322_v61 = vpack.c.bf16 %v318_v57, %v318_v57 }
  0xf6   : > { %1082 = vrot.lane.b32.xlu2 %v1070_v1, %s9300_s27 }
  0xf7   : > { %1086 = vrot.lane.b32.xlu1 %v1072_v24, %s9300_s27  ;;  %8895 = vrot.lane.b32.xlu0 %v8894_v53, %s12537_s25  ;;  %v2135_v53 = vunpack.c.l.bf16 %v2126_v56  ;;  %v2118_v56 = vpack.i.b16 %v9492_v21, %v9492_v21  ;;  %s12543_s25 = smov 74  }
  0xf8   : > { %v395_v62 = vpop.permute.xlu2 %394 }
  0xf9   : > { %v8909_v30 = vpack.i.bf16 %v2132_v52, %v2135_v53  ;;  %v2120_v60 = vperm.slane %v2118_v56, 0 }
  0xfe   : > { %1088 = vrot.lane.b32.xlu2 %v1073_v3, %s9300_s27 }
  0xff   : > { %1090 = vrot.lane.b32.xlu0 %v1074_v4, %s9300_s27 }
 0x100   : > { %v403_v51 = vpop.permute.xlu2 %402 }
 0x107   : > { %1084 = vrot.lane.b32.xlu0 %v1071_v5, %s9300_s27  ;;  %v491_v5 = vsel %vm275_vm7, %v322_v61, 0 }
 0x108   : > { %v397_v26 = vpop.permute.xlu2 %396 }
 0x109   : > { %v405_v15 = vsel %vm404_vm13, %v395_v62, %v397_v26 }
 0x10a   : > { %v415_v10 = vsel %vm275_vm7, %v405_v15, 0 }
 0x10b   : > { %433 = vmatpush.bf16.msra.mxu0 %v415_v10 }
 0x10e   : > { %8432 = vmatmul.msk.bf16.vlgmr.msra.gmra.mxu0 %vm409_vm10, %v8431_v32 }
 0x10f   : > { %500 = vmatpush.bf16.msrb.mxu0 %v482_v33 }
 0x110   : > { %v9695_v7 = vpop.permute.xlu2 %8850 }
 0x111   : > { %v8853_v8 = vunpack.i.h.bf16 %v9695_v7  ;;  %v8852_v62 = vunpack.i.l.bf16 %v9695_v7 }
 0x113   : > { %v1225_v17 = vmul.f32 %v8853_v8, %v1195_v36 }
 0x115   : > { %v1230_v47 = vpack.c.bf16 %v1225_v17, %v1225_v17 }
 0x117   : > { %1246 = vrot.lane.b32.xlu2 %v1230_v47, %s9301_s9 }
 0x118   : > { %v9706_v1 = vpop.permute.xlu2 %8855 }
 0x119   : > { %v401_v24 = vpop.permute.xlu1 %400  ;;  %v399_v12 = vpop.permute.xlu0 %398  ;;  %v8858_v16 = vunpack.i.h.bf16 %v9706_v1  ;;  %v8857_v25 = vunpack.i.l.bf16 %v9706_v1 }
 0x11a   : > { %v406_v19 = vsel %vm404_vm13, %v397_v26, %v399_v12  ;;  %v407_v44 = vsel %vm404_vm13, %v399_v12, %v401_v24  ;;  %v408_v2 = vsel %vm404_vm13, %v401_v24, %v403_v51  ;;  %v1215_v51 = vsel %vm1212_vm14, %v8852_v62, %v8853_v8 }
 0x11b   : > { %v418_v3 = vsel %vm275_vm7, %v406_v19, 0  ;;  %v421_v4 = vsel %vm275_vm7, %v407_v44, 0  ;;  %v424_v39 = vsel %vm275_vm7, %v408_v2, 0  ;;  %v1224_v15 = vmul.f32 %v1215_v51, %v9552_v34 }
 0x11c   : > { %446 = vmatpush.bf16.msra.mxu1 %v418_v3  ;;  %459 = vmatpush.bf16.msra.mxu2 %v421_v4  ;;  %v1370_v49 = vsel %vm1368_vm15, %v8857_v25, %v8858_v16  ;;  %v2123_v24 = vperm.slane %v2121_v20, 0  ;;  %v2133_v44 = vunpack.c.l.bf16 %v2120_v60  ;;  %v2381_v20 = vpack.i.b16 %v9506_v28, %v9506_v28 }
 0x11d   : > { %472 = vmatpush.bf16.msra.mxu3 %v424_v39  ;;  %v1229_v6 = vpack.c.bf16 %v1224_v15, %v1224_v15  ;;  %v1379_v18 = vmul.f32 %v1370_v49, %v9554_v55 }
 0x11e   : > { %8436 = vmatmul.msk.bf16.vlgmr.msrb.gmra.mxu0 %vm409_vm10, %v323_v63  ;;  %v2134_v2 = vunpack.c.l.bf16 %v2123_v24 }
 0x11f   : > { %8910 = vrot.lane.b32.xlu2 %v8909_v30, %s12535_s10  ;;  %8433 = vmatmul.msk.bf16.vlgmr.msra.gmra.mxu1 %vm409_vm10, %v8431_v32  ;;  %v1384_v1 = vpack.c.bf16 %v1379_v18, %v1379_v18  ;;  %v1482_v30 = vld [vmem:[#allocation2 + $0x10] sm:$0xf] }
 0x120   : > { %513 = vmatpush.bf16.msrb.mxu1 %v485_v46  ;;  %526 = vmatpush.bf16.msrb.mxu2 %v488_v58  ;;  %v9721_v0 = vpop.permute.xlu2 %8885  ;;  %v1507_v15 = vunpack.c.l.bf16 %v1482_v30 }
 0x121   : > { %539 = vmatpush.bf16.msrb.mxu3 %v491_v5  ;;  %8434 = vmatmul.msk.bf16.vlgmr.msra.gmra.mxu2 %vm409_vm10, %v8431_v32  ;;  %v8846_v26 = vpop.permute.xlu1 %8845  ;;  %v9725_v50 = vpop.permute.xlu0 %8860  ;;  %v8904_v5 = vpack.i.bf16 %v2134_v2, %v2133_v44  ;;  %v9821_v44 = vld [vmem:[#allocation2] sm:$0xff] }
 0x122   : > { %8435 = vmatmul.msk.bf16.vlgmr.msra.gmra.mxu3 %vm409_vm10, %v8431_v32  ;;  %v8848_v10 = vunpack.i.h.bf16 %v8846_v26  ;;  %v8847_v33 = vunpack.i.l.bf16 %v8846_v26  ;;  %v8862_v35 = vunpack.i.l.bf16 %v9725_v50  ;;  %v8863_v47 = vunpack.i.h.bf16 %v9725_v50  ;;  %v1326_v26 = vld [vmem:[#allocation2 + $0x10] sm:$0xf] }
 0x124   : > { %v1221_v11 = vmul.f32 %v8847_v33, %v9529_v42  ;;  %v1213_v45 = vsel %vm1212_vm14, %v8847_v33, %v8848_v10  ;;  %v1371_v36 = vsel %vm1368_vm15, %v8858_v16, %v8862_v35  ;;  %v1214_v14 = vsel %vm1212_vm14, %v8848_v10, %v8852_v62 }
 0x125   : > { %v1222_v23 = vmul.f32 %v1213_v45, %v9560_v43  ;;  %v1380_v40 = vmul.f32 %v1371_v36, %v9552_v34  ;;  %v1223_v53 = vmul.f32 %v1214_v14, %v9554_v55  ;;  %v1369_v21 = vsel %vm1368_vm15, %v8863_v47, %v8857_v25  ;;  %v1638_v36 = vld [vmem:[#allocation2 + $0x10] sm:$0xf] }
 0x126   : > { %v1226_v7 = vpack.c.bf16 %v1221_v11, %v1221_v11  ;;  %v1378_v19 = vmul.f32 %v1369_v21, %v9560_v43  ;;  %v1351_v33 = vunpack.c.l.bf16 %v1326_v26  ;;  %v1377_v24 = vmul.f32 %v8863_v47, %v9529_v42 }
 0x127   : > { %1244 = vrot.lane.b32.xlu2 %v1229_v6, %s9301_s9  ;;  %v1227_v8 = vpack.c.bf16 %v1222_v23, %v1222_v23  ;;  %v1385_v12 = vpack.c.bf16 %v1380_v40, %v1380_v40  ;;  %v1228_v22 = vpack.c.bf16 %v1223_v53, %v1223_v53  ;;  %v1663_v40 = vunpack.c.l.bf16 %v1638_v36 }
 0x128   : > { %v9743_v9 = vpop.permute.xlu2 %615  ;;  %1238 = vrot.lane.b32.xlu0 %v1226_v7, %s9301_s9  ;;  %v1383_v58 = vpack.c.bf16 %v1378_v19, %v1378_v19  ;;  %v1381_v7 = vmul.f32 %v8862_v35, %v1351_v33  ;;  %v8441_v35 = vld [vmem:[%s12529_s2 + $0x8] sm:$0xf]  ;;  %v1382_v50 = vpack.c.bf16 %v1377_v24, %v1377_v24 }
 0x129   : > { %v9747_v32 = vpop.permute.xlu1 %8870  ;;  %v9749_v17 = vpop.permute.xlu0 %8865  ;;  %1240 = vrot.lane.b32.xlu1 %v1227_v8, %s9301_s9 }
 0x12a   : > { %v8868_v57 = vunpack.i.h.bf16 %v9749_v17  ;;  %v8867_v52 = vunpack.i.l.bf16 %v9749_v17  ;;  %v8873_v39 = vunpack.i.h.bf16 %v9747_v32  ;;  %v8872_v46 = vunpack.i.l.bf16 %v9747_v32 }
 0x12b   : > { %v1386_v56 = vpack.c.bf16 %v1381_v7, %v1381_v7 }
 0x12c   : > { %v1526_v13 = vsel %vm12546_vm1, %v8867_v52, %v8868_v57  ;;  %v1525_v16 = vsel %vm12546_vm1, %v8873_v39, %v8867_v52  ;;  %v1537_v10 = vmul.f32 %v8872_v46, %v1507_v15 }
 0x12d   : > { %v1535_v4 = vmul.f32 %v1526_v13, %v9554_v55  ;;  %v1534_v45 = vmul.f32 %v1525_v16, %v9560_v43  ;;  %v2372_v43 = vpack.i.b16 %v9504_v27, %v9504_v27  ;;  %v2383_v13 = vperm.slane %v2381_v20, 0 }
 0x12e   : > { %v1542_v8 = vpack.c.bf16 %v1537_v10, %v1537_v10 }
 0x12f   : > { %1398 = vrot.lane.b32.xlu2 %v1384_v1, %s9303_s29  ;;  %8437 = vmatmul.msk.bf16.vlgmr.msrb.gmra.mxu1 %vm409_vm10, %v323_v63  ;;  %v1540_v51 = vpack.c.bf16 %v1535_v4, %v1535_v4  ;;  %v1539_v18 = vpack.c.bf16 %v1534_v45, %v1534_v45  ;;  %v1533_v1 = vmul.f32 %v8873_v39, %v9529_v42  ;;  %v2392_v47 = vunpack.c.l.bf16 %v2383_v13 }
 0x130   : > { %1400 = vrot.lane.b32.xlu0 %v1385_v12, %s9303_s29  ;;  %v622_v3 = vpop.permute.xlu2 %621  ;;  %v9830_v4 = vunpack.c.l.bf16 %v9821_v44  ;;  %v1527_v39 = vsel %vm12546_vm1, %v8868_v57, %v8872_v46  ;;  %vm12547_vm1 = vcmask 539648  }
 0x131   : > { %8438 = vmatmul.msk.bf16.vlgmr.msrb.gmra.mxu2 %vm409_vm10, %v323_v63  ;;  %v9772_v61 = vpop.permute.xlu1 %8880  ;;  %v9774_v62 = vpop.permute.xlu0 %8875  ;;  %1242 = vrot.lane.b32.xlu1 %v1228_v22, %s9301_s9  ;;  %v2374_v22 = vperm.slane %v2372_v43, 0  ;;  %v1538_v19 = vpack.c.bf16 %v1533_v1, %v1533_v1 }
 0x132   : > { %8439 = vmatmul.msk.bf16.vlgmr.msrb.gmra.mxu3 %vm409_vm10, %v323_v63  ;;  %v8882_v14 = vunpack.i.l.bf16 %v9772_v61  ;;  %v8878_v26 = vunpack.i.h.bf16 %v9774_v62 }
 0x133   : > { %v2389_v42 = vunpack.c.l.bf16 %v2374_v22 }
 0x134   : > { %v1693_v60 = vmul.f32 %v8882_v14, %v1663_v40  ;;  %v1683_v33 = vsel %vm12586_vm4, %v8878_v26, %v8882_v14  ;;  %v8447_v40 = vld [vmem:[%s12529_s2 + $0xc] sm:$0xf] }
 0x135   : > { %v8919_v16 = vpack.i.bf16 %v2389_v42, %v2392_v47 }
 0x137   : > { %1396 = vrot.lane.b32.xlu2 %v1383_v58, %s9303_s29 }
 0x138   : > { %1554 = vrot.lane.b32.xlu0 %v1540_v51, %s12559_s30  ;;  %v9795_v49 = vpop.permute.xlu2 %774  ;;  %v2378_v51 = vpack.i.b16 %v9511_v31, %v9511_v31  ;;  %v9853_v31 = vld [vmem:[#allocation2 + $0x8] sm:$0xff] }
 0x139   : > { %v624_v25 = vpop.permute.xlu0 %623  ;;  %8905 = vrot.lane.b32.xlu1 %v8904_v5, %s12535_s10  ;;  %v620_v55 = vpop.permute.xlu1 %619  ;;  %v2375_v5 = vpack.i.b16 %v9508_v29, %v9508_v29  ;;  %v1536_v29 = vmul.f32 %v1527_v39, %v9552_v34  ;;  %s12552_s10 = smov 62  }
 0x13a   : > { %v629_v63 = vsel %vm625_vm2, %v622_v3, %v624_v25  ;;  %v628_v11 = vsel %vm625_vm2, %v620_v55, %v622_v3  ;;  %v1698_v3 = vpack.c.bf16 %v1693_v60, %v1693_v60 }
 0x13b   : > { %v643_v6 = vsel %vm275_vm7, %v629_v63, 0  ;;  %v640_v23 = vsel %vm275_vm7, %v628_v11, 0  ;;  %v2377_v25 = vperm.slane %v2375_v5, 0  ;;  %v1541_v63 = vpack.c.bf16 %v1536_v29, %v1536_v29 }
 0x13c   : > { %678 = vmatpush.bf16.msra.mxu2 %v640_v23  ;;  %691 = vmatpush.bf16.msra.mxu3 %v643_v6  ;;  %v9858_v11 = vunpack.c.h.bf16 %v9853_v31  ;;  %v2531_v5 = vpack.i.b16 %v9521_v37, %v9521_v37 }
 0x13d   : > { %v2390_v7 = vunpack.c.l.bf16 %v2377_v25  ;;  %v8453_v25 = vld [vmem:[%s12529_s2 + $0x10] sm:$0xf] }
 0x13e   : > { %v1692_v23 = vmul.f32 %v1683_v33, %v9858_v11  ;;  %v1950_v33 = vld [vmem:[#allocation2 + $0x10] sm:$0xf] }
 0x13f   : > { %1558 = vrot.lane.b32.xlu2 %v1542_v8, %s12559_s30 }
 0x140   : > { %1552 = vrot.lane.b32.xlu0 %v1539_v18, %s12559_s30  ;;  %v9824_v2 = vpop.permute.xlu2 %934 }
 0x141   : > { %8444 = vmatmul.msk.bf16.vlgmr.msra.gmra.mxu2 %vm409_vm10, %v8441_v35  ;;  %1402 = vrot.lane.b32.xlu1 %v1386_v56, %s9303_s29  ;;  %v9809_v52 = vpop.permute.xlu1 %778  ;;  %v618_v53 = vpop.permute.xlu0 %617 }
 0x142   : > { %8445 = vmatmul.msk.bf16.vlgmr.msra.gmra.mxu3 %vm409_vm10, %v8441_v35  ;;  %v626_v27 = vsel %vm625_vm2, %v9743_v9, %v618_v53  ;;  %v627_v28 = vsel %vm625_vm2, %v618_v53, %v620_v55  ;;  %v8883_v9 = vunpack.i.h.bf16 %v9772_v61  ;;  %v2380_v55 = vperm.slane %v2378_v51, 0 }
 0x143   : > { %v634_v12 = vsel %vm275_vm7, %v626_v27, 0  ;;  %v637_v21 = vsel %vm275_vm7, %v627_v28, 0  ;;  %v1697_v53 = vpack.c.bf16 %v1692_v23, %v1692_v23  ;;  %v9884_v27 = vunpack.c.l.bf16 %v9853_v31 }
 0x144   : > { %652 = vmatpush.bf16.msra.mxu0 %v634_v12  ;;  %665 = vmatpush.bf16.msra.mxu1 %v637_v21  ;;  %v1689_v57 = vmul.f32 %v8883_v9, %v9830_v4  ;;  %v2391_v8 = vunpack.c.l.bf16 %v2380_v55  ;;  %v8888_v28 = vunpack.i.h.bf16 %v9721_v0  ;;  %v8887_v21 = vunpack.i.l.bf16 %v9721_v0 }
 0x145   : > { %v2534_v51 = vpack.i.b16 %v9523_v38, %v9523_v38 }
 0x146   : > { %v1694_v10 = vpack.c.bf16 %v1689_v57, %v1689_v57 }
 0x147   : > { %1550 = vrot.lane.b32.xlu2 %v1538_v19, %s12559_s30  ;;  %8442 = vmatmul.msk.bf16.vlgmr.msra.gmra.mxu0 %vm409_vm10, %v8441_v35  ;;  %v2536_v29 = vperm.slane %v2534_v51, 0 }
 0x148   : > { %1714 = vrot.lane.b32.xlu0 %v1698_v3, %s12550_s16  ;;  %8443 = vmatmul.msk.bf16.vlgmr.msra.gmra.mxu1 %vm409_vm10, %v8441_v35  ;;  %v929_v45 = vpop.permute.xlu2 %928  ;;  %v8877_v35 = vunpack.i.l.bf16 %v9774_v62 }
 0x149   : > { %1394 = vrot.lane.b32.xlu1 %v1382_v50, %s9303_s29  ;;  %v773_v30 = vpop.permute.xlu1 %772  ;;  %v771_v58 = vpop.permute.xlu0 %770 }
 0x14a   : > { %v782_v32 = vsel %vm780_vm3, %v773_v30, %v9795_v49  ;;  %v781_v17 = vsel %vm780_vm3, %v771_v58, %v773_v30  ;;  %v1838_v30 = vsel %vm12545_vm5, %v8887_v21, %v8888_v28  ;;  %v1681_v0 = vsel %vm12586_vm4, %v8883_v9, %v8877_v35 }
 0x14b   : > { %v789_v46 = vsel %vm275_vm7, %v781_v17, 0  ;;  %v792_v15 = vsel %vm275_vm7, %v782_v32, 0  ;;  %v9915_v17 = vunpack.c.h.bf16 %v9821_v44  ;;  %v1847_v57 = vmul.f32 %v1838_v30, %v9884_v27 }
 0x14c   : > { %807 = vmatpush.bf16.msrb.mxu0 %v789_v46  ;;  %820 = vmatpush.bf16.msrb.mxu1 %v792_v15 }
 0x14d   : > { %v1690_v46 = vmul.f32 %v1681_v0, %v9915_v17  ;;  %v1852_v55 = vpack.c.bf16 %v1847_v57, %v1847_v57 }
 0x14f   : > { %8920 = vrot.lane.b32.xlu2 %v8919_v16, %s12543_s25  ;;  %v2533_v16 = vperm.slane %v2531_v5, 0 }
 0x150   : > { %1706 = vrot.lane.b32.xlu0 %v1694_v10, %s12550_s16  ;;  %v9898_v42 = vpop.permute.xlu2 %1082  ;;  %v1794_v10 = vld [vmem:[#allocation2 + $0x10] sm:$0xf] }
 0x151   : > { %1556 = vrot.lane.b32.xlu1 %v1541_v63, %s12559_s30  ;;  %v927_v34 = vpop.permute.xlu1 %926  ;;  %v777_v6 = vpop.permute.xlu0 %776  ;;  %v2546_v23 = vunpack.c.l.bf16 %v2533_v16  ;;  %v8459_v16 = vld [vmem:[%s12529_s2 + $0x14] sm:$0xf]  ;;  %s12569_s30 = smov 54  }
 0x152   : > { %v937_v36 = vsel %vm12558_vm0, %v927_v34, %v929_v45  ;;  %v783_v14 = vsel %vm780_vm3, %v9795_v49, %v777_v6  ;;  %v784_v18 = vsel %vm780_vm3, %v777_v6, %v9809_v52  ;;  %v8914_v49 = vpack.i.bf16 %v2391_v8, %v2390_v7 }
 0x153   : > { %v945_v56 = vsel %vm275_vm7, %v937_v36, 0  ;;  %v795_v43 = vsel %vm275_vm7, %v783_v14, 0  ;;  %v798_v20 = vsel %vm275_vm7, %v784_v18, 0  ;;  %v1682_v52 = vsel %vm12586_vm4, %v8877_v35, %v8878_v26 }
 0x154   : > { %833 = vmatpush.bf16.msrb.mxu2 %v795_v43  ;;  %846 = vmatpush.bf16.msrb.mxu3 %v798_v20  ;;  %v1691_v13 = vmul.f32 %v1682_v52, %v9884_v27  ;;  %v2547_v7 = vunpack.c.l.bf16 %v2536_v29  ;;  %v1819_v14 = vunpack.c.l.bf16 %v1794_v10  ;;  %v1975_v18 = vunpack.c.l.bf16 %v1950_v33 }
 0x155   : > { %963 = vmatpush.bf16.msra.mxu0 %v945_v56 }
 0x156   : > { %v1696_v47 = vpack.c.bf16 %v1691_v13, %v1691_v13 }
 0x157   : > { %1712 = vrot.lane.b32.xlu2 %v1697_v53, %s12550_s16  ;;  %8450 = vmatmul.msk.bf16.vlgmr.msrb.gmra.mxu2 %vm409_vm10, %v8447_v40 }
 0x158   : > { %8451 = vmatmul.msk.bf16.vlgmr.msrb.gmra.mxu3 %vm409_vm10, %v8447_v40  ;;  %8448 = vmatmul.msk.bf16.vlgmr.msrb.gmra.mxu0 %vm409_vm10, %v8447_v40  ;;  %v1089_v6 = vpop.permute.xlu2 %1088 }
 0x159   : > { %8915 = vrot.lane.b32.xlu1 %v8914_v49, %s12543_s25  ;;  %v933_v62 = vpop.permute.xlu1 %932  ;;  %v9881_v1 = vpop.permute.xlu0 %8890  ;;  %8449 = vmatmul.msk.bf16.vlgmr.msrb.gmra.mxu1 %vm409_vm10, %v8447_v40  ;;  %v8924_v49 = vpack.i.bf16 %v2547_v7, %v2546_v23  ;;  %s9307_s25 = smov 80  }
 0x15a   : > { %v940_v60 = vsel %vm12558_vm0, %v933_v62, %v9824_v2  ;;  %v8893_v24 = vunpack.i.h.bf16 %v9881_v1  ;;  %v8892_v12 = vunpack.i.l.bf16 %v9881_v1 }
 0x15b   : > { %v954_v22 = vsel %vm275_vm7, %v940_v60, 0 }
 0x15c   : > { %1002 = vmatpush.bf16.msra.mxu3 %v954_v22  ;;  %v1845_v19 = vmul.f32 %v8893_v24, %v9830_v4  ;;  %v1839_v3 = vsel %vm12545_vm5, %v8888_v28, %v8892_v12  ;;  %v1837_v58 = vsel %vm12545_vm5, %v8893_v24, %v8887_v21  ;;  %vm12556_vm5 = vcmask 965632  }
 0x15d   : > { %v1848_v50 = vmul.f32 %v1839_v3, %v9858_v11  ;;  %v1846_v15 = vmul.f32 %v1837_v58, %v9915_v17  ;;  %v1849_v35 = vmul.f32 %v8892_v12, %v1819_v14 }
 0x15e   : > { %v1850_v2 = vpack.c.bf16 %v1845_v19, %v1845_v19 }
 0x15f   : > { %v1853_v39 = vpack.c.bf16 %v1848_v50, %v1848_v50  ;;  %v1851_v34 = vpack.c.bf16 %v1846_v15, %v1846_v15 }
 0x160   : > { %1862 = vrot.lane.b32.xlu2 %v1850_v2, %s12548_s17 }
 0x161   : > { %1710 = vrot.lane.b32.xlu1 %v1696_v47, %s12550_s16  ;;  %v9911_v26 = vpop.permute.xlu1 %8900  ;;  %v931_v32 = vpop.permute.xlu0 %930  ;;  %1868 = vrot.lane.b32.xlu0 %v1853_v39, %s12548_s17 }
 0x162   : > { %v938_v61 = vsel %vm12558_vm0, %v929_v45, %v931_v32  ;;  %v939_v9 = vsel %vm12558_vm0, %v931_v32, %v933_v62  ;;  %v8902_v63 = vunpack.i.l.bf16 %v9911_v26  ;;  %v1695_v45 = vpack.c.bf16 %v1690_v46, %v1690_v46 }
 0x163   : > { %v948_v37 = vsel %vm275_vm7, %v938_v61, 0  ;;  %v951_v38 = vsel %vm275_vm7, %v939_v9, 0  ;;  %v8903_v52 = vunpack.i.h.bf16 %v9911_v26  ;;  %v1854_v62 = vpack.c.bf16 %v1849_v35, %v1849_v35  ;;  %v2106_v61 = vld [vmem:[#allocation2 + $0x10] sm:$0xf] }
 0x164   : > { %976 = vmatpush.bf16.msra.mxu1 %v948_v37  ;;  %989 = vmatpush.bf16.msra.mxu2 %v951_v38  ;;  %v2005_v40 = vmul.f32 %v8902_v63, %v1975_v18  ;;  %v2131_v38 = vunpack.c.l.bf16 %v2106_v61  ;;  %vm12562_vm0 = vcmask 900096  }
 0x165   : > { %v2001_v3 = vmul.f32 %v8903_v52, %v9830_v4 }
 0x166   : > { %v2010_v1 = vpack.c.bf16 %v2005_v40, %v2005_v40 }
 0x167   : > { %8456 = vmatmul.msk.bf16.vlgmr.msra.gmra.mxu2 %vm409_vm10, %v8453_v25  ;;  %v2006_v47 = vpack.c.bf16 %v2001_v3, %v2001_v3  ;;  %v2528_v3 = vpack.i.b16 %v9527_v41, %v9527_v41 }
 0x168   : > { %1866 = vrot.lane.b32.xlu2 %v1852_v55, %s12548_s17  ;;  %8457 = vmatmul.msk.bf16.vlgmr.msra.gmra.mxu3 %vm409_vm10, %v8453_v25 }
 0x169   : > { %1708 = vrot.lane.b32.xlu1 %v1695_v45, %s12550_s16  ;;  %v1087_v8 = vpop.permute.xlu1 %1086  ;;  %v8896_v36 = vpop.permute.xlu0 %8895  ;;  %1864 = vrot.lane.b32.xlu0 %v1851_v34, %s12548_s17  ;;  %v2684_v45 = vpack.i.b16 %v9534_v54, %v9534_v54  ;;  %v2693_v34 = vpack.i.b16 %v9536_v59, %v9536_v59  ;;  %s12564_s16 = smov 81  }
 0x16a   : > { %v1095_v56 = vsel %vm12556_vm5, %v1087_v8, %v1089_v6  ;;  %8455 = vmatmul.msk.bf16.vlgmr.msra.gmra.mxu1 %vm409_vm10, %v8453_v25  ;;  %8454 = vmatmul.msk.bf16.vlgmr.msra.gmra.mxu0 %vm409_vm10, %v8453_v25  ;;  %v8898_v43 = vunpack.i.h.bf16 %v8896_v36  ;;  %v8897_v53 = vunpack.i.l.bf16 %v8896_v36 }
 0x16b   : > { %v1107_v20 = vsel %vm275_vm7, %v1095_v56, 0  ;;  %v2686_v23 = vperm.slane %v2684_v45, 0  ;;  %v2695_v7 = vperm.slane %v2693_v34, 0  ;;  %v10040_v45 = vld [vmem:[#allocation2 + $0x10] sm:$0xf] }
 0x16c   : > { %1145 = vmatpush.bf16.msrb.mxu2 %v1107_v20  ;;  %v1995_v28 = vsel %vm12547_vm1, %v8898_v43, %v8902_v63  ;;  %v1994_v60 = vsel %vm12547_vm1, %v8897_v53, %v8898_v43  ;;  %v1993_v39 = vsel %vm12547_vm1, %v8903_v52, %v8897_v53  ;;  %vm12557_vm1 = vcmask 916480  }
 0x16d   : > { %v2004_v22 = vmul.f32 %v1995_v28, %v9858_v11  ;;  %v2003_v19 = vmul.f32 %v1994_v60, %v9884_v27  ;;  %v2002_v32 = vmul.f32 %v1993_v39, %v9915_v17  ;;  %v2701_v54 = vunpack.c.l.bf16 %v2686_v23  ;;  %v12614_v23 = vld [vmem:[#allocation5_spill] sm:$0xff] }
 0x16e   : > { %v2704_v18 = vunpack.c.l.bf16 %v2695_v7  ;;  %v2687_v7 = vpack.i.b16 %v12614_v23, %v12614_v23 }
 0x16f   : > { %v2009_v50 = vpack.c.bf16 %v2004_v22, %v2004_v22  ;;  %v2008_v2 = vpack.c.bf16 %v2003_v19, %v2003_v19  ;;  %v2007_v57 = vpack.c.bf16 %v2002_v32, %v2002_v32 }
 0x170   : > { %8925 = vrot.lane.b32.xlu2 %v8924_v49, %s9307_s25  ;;  %v8939_v35 = vpack.i.bf16 %v2701_v54, %v2704_v18 }
 0x171   : > { %v1247_v24 = vpop.permute.xlu2 %1246  ;;  %v1091_v21 = vpop.permute.xlu0 %1090  ;;  %1870 = vrot.lane.b32.xlu1 %v1854_v62, %s12548_s17  ;;  %2026 = vrot.lane.b32.xlu0 %v2010_v1, %s12552_s10  ;;  %s12721_s17 = smov 56  }
 0x172   : > { %v1096_v12 = vsel %vm12556_vm5, %v1089_v6, %v1091_v21  ;;  %v2271_v6 = vunpack.c.h.b16 %v9853_v31 }
 0x173   : > { %v1110_v13 = vsel %vm275_vm7, %v1096_v12, 0 }
 0x174   : > { %1158 = vmatpush.bf16.msrb.mxu3 %v1110_v13  ;;  %v2276_v36 = vpack.c.b16 %v2271_v6, %v2271_v6 }
 0x177   : > { %8462 = vmatmul.msk.bf16.vlgmr.msrb.gmra.mxu2 %vm409_vm10, %v8459_v16 }
 0x178   : > { %2024 = vrot.lane.b32.xlu2 %v2009_v50, %s12552_s10  ;;  %8463 = vmatmul.msk.bf16.vlgmr.msrb.gmra.mxu3 %vm409_vm10, %v8459_v16  ;;  %v12613_v50 = vld [vmem:[#allocation4_spill] sm:$0xff] }
 0x179   : > { %v9950_v30 = vpop.permute.xlu2 %8910  ;;  %v1085_v0 = vpop.permute.xlu0 %1084  ;;  %2022 = vrot.lane.b32.xlu1 %v2008_v2, %s12552_s10  ;;  %2018 = vrot.lane.b32.xlu0 %v2006_v47, %s12552_s10  ;;  %v2537_v2 = vpack.i.b16 %v12613_v50, %v12613_v50 }
 0x17a   : > { %v1093_v58 = vsel %vm12556_vm5, %v9898_v42, %v1085_v0  ;;  %v1094_v5 = vsel %vm12556_vm5, %v1085_v0, %v1087_v8  ;;  %v8912_v9 = vunpack.i.l.bf16 %v9950_v30  ;;  %v8913_v29 = vunpack.i.h.bf16 %v9950_v30  ;;  %v8465_v8 = vld [vmem:[%s12529_s2 + $0x18] sm:$0xf] }
 0x17b   : > { %v1101_v51 = vsel %vm275_vm7, %v1093_v58, 0  ;;  %v1104_v26 = vsel %vm275_vm7, %v1094_v5, 0  ;;  %vm12563_vm5 = vcmask 908288   ;;  %v2539_v32 = vperm.slane %v2537_v2, 0 }
 0x17c   : > { %1119 = vmatpush.bf16.msrb.mxu0 %v1101_v51  ;;  %1132 = vmatpush.bf16.msrb.mxu1 %v1104_v26  ;;  %v2161_v15 = vmul.f32 %v8912_v9, %v2131_v38  ;;  %v2157_v10 = vmul.f32 %v8913_v29, %v9830_v4  ;;  %v2530_v26 = vperm.slane %v2528_v3, 0  ;;  %v8477_v3 = vld [vmem:[%s12529_s2 + $0x20] sm:$0xf] }
 0x17e   : > { %v2166_v25 = vpack.c.bf16 %v2161_v15, %v2161_v15  ;;  %v2162_v33 = vpack.c.bf16 %v2157_v10, %v2157_v10  ;;  %v2548_v15 = vunpack.c.l.bf16 %v2539_v32 }
 0x17f   : > { %8461 = vmatmul.msk.bf16.vlgmr.msrb.gmra.mxu1 %vm409_vm10, %v8459_v16  ;;  %8460 = vmatmul.msk.bf16.vlgmr.msrb.gmra.mxu0 %vm409_vm10, %v8459_v16 }
 0x181   : > { %v1245_v37 = vpop.permute.xlu2 %1244  ;;  %2020 = vrot.lane.b32.xlu1 %v2007_v57, %s12552_s10  ;;  %s12573_s10 = smov 56  }
 0x182   : > { %v1252_v42 = vsel %vm12557_vm1, %v1245_v37, %v1247_v24 }
 0x183   : > { %v1266_v46 = vsel %vm275_vm7, %v1252_v42, 0 }
 0x184   : > { %1314 = vmatpush.bf16.msra.mxu3 %v1266_v46  ;;  %v2545_v46 = vunpack.c.l.bf16 %v2530_v26  ;;  %v12618_v26 = vld [vmem:[#allocation9_spill] sm:$0xff] }
 0x185   : > { %v2846_v32 = vpack.i.b16 %v12618_v26, %v12618_v26 }
 0x186   : > { %v8929_v10 = vpack.i.bf16 %v2545_v46, %v2548_v15 }
 0x188   : > { %8469 = vmatmul.msk.bf16.vlgmr.msra.gmra.mxu3 %vm409_vm10, %v8465_v8 }
 0x189   : > { %v1399_v55 = vpop.permute.xlu2 %1398  ;;  %2182 = vrot.lane.b32.xlu1 %v2166_v25, %s12573_s10 }
 0x191   : > { %v9978_v63 = vpop.permute.xlu2 %1396  ;;  %2174 = vrot.lane.b32.xlu1 %v2162_v33, %s12573_s10 }
 0x192   : > { %v1406_v49 = vsel %vm12563_vm5, %v9978_v63, %v1399_v55 }
 0x193   : > { %v1416_v21 = vsel %vm275_vm7, %v1406_v49, 0 }
 0x199   : > { %v9990_v14 = vpop.permute.xlu2 %1558  ;;  %2284 = vrot.lane.b32.xlu1 %v2276_v36, %s12566_s7 }
 0x19a   : > { %v1239_v56 = vpop.permute.xlu0 %1238 }
 0x19b   : > { %v1241_v59 = vpop.permute.xlu1 %1240 }
 0x19c   : > { %v1249_v43 = vsel %vm12557_vm1, %v1239_v56, %v1241_v59 }
 0x19d   : > { %v1257_v20 = vsel %vm275_vm7, %v1249_v43, 0  ;;  %v2270_v43 = vunpack.c.l.b16 %v9853_v31 }
 0x19e   : > { %1275 = vmatpush.bf16.msra.mxu0 %v1257_v20 }
 0x1a1   : > { %v1551_v40 = vpop.permute.xlu2 %1550  ;;  %8940 = vrot.lane.b32.xlu1 %v8939_v35, %s12564_s16  ;;  %8466 = vmatmul.msk.bf16.vlgmr.msra.gmra.mxu0 %vm409_vm10, %v8465_v8  ;;  %v2689_v35 = vperm.slane %v2687_v7, 0 }
 0x1a2   : > { %v1401_v53 = vpop.permute.xlu0 %1400 }
 0x1a3   : > { %v1407_v52 = vsel %vm12563_vm5, %v1399_v55, %v1401_v53  ;;  %v1243_v62 = vpop.permute.xlu1 %1242  ;;  %v8471_v55 = vld [vmem:[%s12529_s2 + $0x1c] sm:$0xf]  ;;  %v2702_v31 = vunpack.c.l.bf16 %v2689_v35 }
 0x1a4   : > { %v1250_v1 = vsel %vm12557_vm1, %v1241_v59, %v1243_v62  ;;  %v1251_v28 = vsel %vm12557_vm1, %v1243_v62, %v1245_v37  ;;  %v1419_v12 = vsel %vm275_vm7, %v1407_v52, 0  ;;  %vm12561_vm1 = vcmask 588800  }
 0x1a5   : > { %v1260_v60 = vsel %vm275_vm7, %v1250_v1, 0  ;;  %v1263_v24 = vsel %vm275_vm7, %v1251_v28, 0  ;;  %v2272_v59 = vunpack.c.l.b16 %v10040_v45  ;;  %v2275_v52 = vpack.c.b16 %v2270_v43, %v2270_v43 }
 0x1a6   : > { %1288 = vmatpush.bf16.msra.mxu1 %v1260_v60  ;;  %1301 = vmatpush.bf16.msra.mxu2 %v1263_v24 }
 0x1a7   : > { %v2277_v49 = vpack.c.b16 %v2272_v59, %v2272_v59 }
 0x1a9   : > { %v10006_v22 = vpop.permute.xlu2 %8920  ;;  %8467 = vmatmul.msk.bf16.vlgmr.msra.gmra.mxu1 %vm409_vm10, %v8465_v8  ;;  %8468 = vmatmul.msk.bf16.vlgmr.msra.gmra.mxu2 %vm409_vm10, %v8465_v8  ;;  %v12615_v8 = vld [vmem:[#allocation6_spill] sm:$0xff] }
 0x1aa   : > { %1444 = vmatpush.bf16.msrb.mxu1 %v1416_v21  ;;  %1457 = vmatpush.bf16.msrb.mxu2 %v1419_v12  ;;  %v10010_v13 = vpop.permute.xlu0 %1554  ;;  %v2690_v36 = vpack.i.b16 %v12615_v8, %v12615_v8  ;;  %v2268_v12 = vunpack.c.l.b16 %v9821_v44  ;;  %v8923_v35 = vunpack.i.h.bf16 %v10006_v22 }
 0x1ab   : > { %v8906_v19 = vpop.permute.xlu1 %8905 }
 0x1ac   : > { %v8908_v47 = vunpack.i.h.bf16 %v8906_v19  ;;  %v8907_v39 = vunpack.i.l.bf16 %v8906_v19  ;;  %v2273_v2 = vpack.c.b16 %v2268_v12, %v2268_v12 }
 0x1ae   : > { %v2150_v0 = vsel %vm12561_vm1, %v8907_v39, %v8908_v47  ;;  %v2151_v58 = vsel %vm12561_vm1, %v8908_v47, %v8912_v9  ;;  %v2149_v37 = vsel %vm12561_vm1, %v8913_v29, %v8907_v39  ;;  %v2849_v39 = vpack.i.b16 %v9587_v48, %v9587_v48 }
 0x1af   : > { %v2159_v5 = vmul.f32 %v2150_v0, %v9884_v27  ;;  %v2160_v51 = vmul.f32 %v2151_v58, %v9858_v11  ;;  %v2158_v29 = vmul.f32 %v2149_v37, %v9915_v17  ;;  %vm12568_vm1 = vcmask 605184  }
 0x1b0   : > { %v2851_v46 = vperm.slane %v2849_v39, 0 }
 0x1b1   : > { %v2164_v61 = vpack.c.bf16 %v2159_v5, %v2159_v5  ;;  %v2165_v41 = vpack.c.bf16 %v2160_v51, %v2160_v51  ;;  %v10025_v38 = vpop.permute.xlu2 %1712  ;;  %v2163_v33 = vpack.c.bf16 %v2158_v29, %v2158_v29  ;;  %v12617_v5 = vld [vmem:[#allocation8_spill] sm:$0xff] }
 0x1b2   : > { %v1553_v57 = vpop.permute.xlu0 %1552  ;;  %v2843_v51 = vpack.i.b16 %v12617_v5, %v12617_v5  ;;  %v2860_v7 = vunpack.c.l.bf16 %v2851_v46 }
 0x1b3   : > { %v1562_v42 = vsel %vm12562_vm0, %v1553_v57, %v10010_v13  ;;  %v1403_v9 = vpop.permute.xlu1 %1402  ;;  %2178 = vrot.lane.b32.xlu2 %v2164_v61, %s12573_s10  ;;  %2180 = vrot.lane.b32.xlu0 %v2165_v41, %s12573_s10  ;;  %v1561_v34 = vsel %vm12562_vm0, %v1551_v40, %v1553_v57  ;;  %v2692_v40 = vperm.slane %v2690_v36, 0  ;;  %v8922_v61 = vunpack.i.l.bf16 %v10006_v22 }
 0x1b4   : > { %v1408_v16 = vsel %vm12563_vm5, %v1401_v53, %v1403_v9  ;;  %v1572_v25 = vsel %vm275_vm7, %v1562_v42, 0  ;;  %v1569_v20 = vsel %vm275_vm7, %v1561_v34, 0  ;;  %v2269_v57 = vunpack.c.h.b16 %v9821_v44 }
 0x1b5   : > { %v1422_v30 = vsel %vm275_vm7, %v1408_v16, 0  ;;  %1600 = vmatpush.bf16.msra.mxu1 %v1572_v25  ;;  %v2703_v1 = vunpack.c.l.bf16 %v2692_v40  ;;  %v2845_v25 = vperm.slane %v2843_v51, 0 }
 0x1b6   : > { %1470 = vmatpush.bf16.msrb.mxu3 %v1422_v30  ;;  %v2848_v30 = vperm.slane %v2846_v32, 0  ;;  %v2274_v44 = vpack.c.b16 %v2269_v57, %v2269_v57 }
 0x1b7   : > { %v2858_v8 = vunpack.c.l.bf16 %v2845_v25 }
 0x1b8   : > { %v2859_v36 = vunpack.c.l.bf16 %v2848_v30 }
 0x1b9   : > { %8474 = vmatmul.msk.bf16.vlgmr.msrb.gmra.mxu2 %vm409_vm10, %v8471_v55  ;;  %8475 = vmatmul.msk.bf16.vlgmr.msrb.gmra.mxu3 %vm409_vm10, %v8471_v55 }
 0x1ba   : > { %8473 = vmatmul.msk.bf16.vlgmr.msrb.gmra.mxu1 %vm409_vm10, %v8471_v55  ;;  %v10052_v18 = vpop.permute.xlu2 %1862  ;;  %v1715_v53 = vpop.permute.xlu0 %1714 }
 0x1bb   : > { %v1395_v6 = vpop.permute.xlu1 %1394  ;;  %2176 = vrot.lane.b32.xlu2 %v2163_v33, %s12573_s10  ;;  %8930 = vrot.lane.b32.xlu0 %v8929_v10, %s9307_s25  ;;  %v2388_v33 = vunpack.c.l.bf16 %v10040_v45  ;;  %s12627_s10 = smov 110  }
 0x1bc   : > { %v1405_v54 = vsel %vm12563_vm5, %v1395_v6, %v9978_v63  ;;  %v1720_v63 = vsel %vm12586_vm4, %v10025_v38, %v1715_v53  ;;  %vm12578_vm5 = vcmask 654336   ;;  %v8483_v53 = vld [vmem:[%s12529_s2 + $0x24] sm:$0xf] }
 0x1bd   : > { %v1413_v56 = vsel %vm275_vm7, %v1405_v54, 0  ;;  %v1734_v19 = vsel %vm275_vm7, %v1720_v63, 0  ;;  %v2418_v40 = vmul.f32 %v8922_v61, %v2388_v33 }
 0x1be   : > { %1431 = vmatpush.bf16.msrb.mxu0 %v1413_v56 }
 0x1bf   : > { %v2423_v22 = vpack.c.bf16 %v2418_v40, %v2418_v40 }
 0x1c1   : > { %8472 = vmatmul.msk.bf16.vlgmr.msrb.gmra.mxu0 %vm409_vm10, %v8471_v55 }
 0x1c2   : > { %1587 = vmatpush.bf16.msra.mxu0 %v1569_v20  ;;  %v10074_v50 = vpop.permute.xlu2 %1866  ;;  %v10083_v0 = vpop.permute.xlu0 %1706 }
 0x1c3   : > { %v1557_v62 = vpop.permute.xlu1 %1556  ;;  %2286 = vrot.lane.b32.xlu2 %v2277_v49, %s12566_s7  ;;  %2282 = vrot.lane.b32.xlu0 %v2275_v52, %s12566_s7  ;;  %v8944_v49 = vpack.i.bf16 %v2859_v36, %v2858_v8 }
 0x1c4   : > { %v1563_v28 = vsel %vm12562_vm0, %v10010_v13, %v1557_v62  ;;  %v1564_v60 = vsel %vm12562_vm0, %v1557_v62, %v9990_v14  ;;  %v8934_v13 = vpack.i.bf16 %v2703_v1, %v2702_v31  ;;  %v12616_v14 = vld [vmem:[#allocation7_spill] sm:$0xff]  ;;  %vm12576_vm0 = vcmask 515072  }
 0x1c5   : > { %v1575_v24 = vsel %vm275_vm7, %v1563_v28, 0  ;;  %v1578_v21 = vsel %vm275_vm7, %v1564_v60, 0  ;;  %v2840_v47 = vpack.i.b16 %v12616_v14, %v12616_v14 }
 0x1c6   : > { %1613 = vmatpush.bf16.msra.mxu2 %v1575_v24  ;;  %1626 = vmatpush.bf16.msra.mxu3 %v1578_v21 }
 0x1c7   : > { %v2842_v9 = vperm.slane %v2840_v47, 0 }
 0x1c9   : > { %8480 = vmatmul.msk.bf16.vlgmr.msra.gmra.mxu2 %vm409_vm10, %v8477_v3  ;;  %8481 = vmatmul.msk.bf16.vlgmr.msra.gmra.mxu3 %vm409_vm10, %v8477_v3  ;;  %v2857_v23 = vunpack.c.l.bf16 %v2842_v9 }
 0x1ca   : > { %1782 = vmatpush.bf16.msrb.mxu3 %v1734_v19  ;;  %8479 = vmatmul.msk.bf16.vlgmr.msra.gmra.mxu1 %vm409_vm10, %v8477_v3  ;;  %v10097_v29 = vpop.permute.xlu2 %8925 }
 0x1cb   : > { %v8916_v58 = vpop.permute.xlu1 %8915  ;;  %2278 = vrot.lane.b32.xlu2 %v2273_v2, %s12566_s7  ;;  %8935 = vrot.lane.b32.xlu0 %v8934_v13, %s12564_s16  ;;  %v8928_v54 = vunpack.i.h.bf16 %v10097_v29  ;;  %v8927_v56 = vunpack.i.l.bf16 %v10097_v29  ;;  %v2414_v2 = vmul.f32 %v8923_v35, %v9830_v4  ;;  %s12591_s16 = smov 48  }
 0x1cc   : > { %v8918_v41 = vunpack.i.h.bf16 %v8916_v58  ;;  %v8917_v48 = vunpack.i.l.bf16 %v8916_v58 }
 0x1cd   : > { %v2563_v52 = vsel %vm12578_vm5, %v8927_v56, %v8928_v54 }
 0x1ce   : > { %v2408_v37 = vsel %vm12568_vm1, %v8918_v41, %v8922_v61  ;;  %v2407_v42 = vsel %vm12568_vm1, %v8917_v48, %v8918_v41  ;;  %v2406_v63 = vsel %vm12568_vm1, %v8923_v35, %v8917_v48  ;;  %v2572_v1 = vmul.f32 %v2563_v52, %v9884_v27  ;;  %v435_v52 = vpop.f32.mrf.mxu0 }
 0x1cf   : > { %v2417_v15 = vmul.f32 %v2408_v37, %v9858_v11  ;;  %v2416_v16 = vmul.f32 %v2407_v42, %v9884_v27  ;;  %v2415_v28 = vmul.f32 %v2406_v63, %v9915_v17  ;;  %vm12575_vm1 = vcmask 506880   ;;  %v448_v63 = vpop.f32.mrf.mxu1 }
 0x1d0   : > { %v2577_v14 = vpack.c.bf16 %v2572_v1, %v2572_v1 }
 0x1d1   : > { %v2422_v55 = vpack.c.bf16 %v2417_v15, %v2417_v15  ;;  %v2421_v10 = vpack.c.bf16 %v2416_v16, %v2416_v16  ;;  %8478 = vmatmul.msk.bf16.vlgmr.msra.gmra.mxu0 %vm409_vm10, %v8477_v3  ;;  %v2420_v47 = vpack.c.bf16 %v2415_v28, %v2415_v28  ;;  %v8489_v15 = vld [vmem:[%s12529_s2 + $0x28] sm:$0xf]  ;;  %v8495_v16 = vld [vmem:[%s12529_s2 + $0x2c] sm:$0xf] }
 0x1d3   : > { %v1711_v34 = vpop.permute.xlu1 %1710  ;;  %2437 = vrot.lane.b32.xlu2 %v2422_v55, %s12569_s30  ;;  %2435 = vrot.lane.b32.xlu1 %v2421_v10, %s12569_s30  ;;  %v1869_v6 = vpop.permute.xlu0 %1868 }
 0x1d4   : > { %v1719_v59 = vsel %vm12586_vm4, %v1711_v34, %v10025_v38  ;;  %2280 = vrot.lane.b32.xlu0 %v2274_v44, %s12566_s7  ;;  %v1875_v45 = vsel %vm12576_vm0, %v10074_v50, %v1869_v6  ;;  %v8949_v38 = vpack.i.bf16 %v2857_v23, %v2860_v7  ;;  %s12571_s7 = smov 82   ;;  %v461_v23 = vpop.f32.mrf.mxu2 }
 0x1d5   : > { %v1731_v43 = vsel %vm275_vm7, %v1719_v59, 0  ;;  %v1887_v20 = vsel %vm275_vm7, %v1875_v45, 0 }
 0x1d6   : > { %1769 = vmatpush.bf16.msrb.mxu2 %v1731_v43 }
 0x1d9   : > { %8487 = vmatmul.msk.bf16.vlgmr.msrb.gmra.mxu3 %vm409_vm10, %v8483_v53  ;;  %8486 = vmatmul.msk.bf16.vlgmr.msrb.gmra.mxu2 %vm409_vm10, %v8483_v53 }
 0x1da   : > { %1925 = vmatpush.bf16.msra.mxu2 %v1887_v20 }
 0x1db   : > { %v1709_v62 = vpop.permute.xlu1 %1708  ;;  %8950 = vrot.lane.b32.xlu2 %v8949_v38, %s12571_s7  ;;  %8945 = vrot.lane.b32.xlu1 %v8944_v49, %s12571_s7  ;;  %v1865_v31 = vpop.permute.xlu0 %1864  ;;  %v8501_v49 = vld [vmem:[%s12529_s2 + $0x30] sm:$0xf]  ;;  %s12587_s7 = smov 46  }
 0x1dc   : > { %v1717_v60 = vsel %vm12586_vm4, %v10083_v0, %v1709_v62  ;;  %v1718_v24 = vsel %vm12586_vm4, %v1709_v62, %v1711_v34  ;;  %2439 = vrot.lane.b32.xlu0 %v2423_v22, %s12569_s30  ;;  %v1873_v21 = vsel %vm12576_vm0, %v10052_v18, %v1865_v31  ;;  %v1874_v12 = vsel %vm12576_vm0, %v1865_v31, %v10074_v50  ;;  %v2025_v18 = vpop.permute.xlu2 %2024  ;;  %v463_v20 = vpop.f32.mrf.mxu2  ;;  %v2519_v22 = vld [vmem:[#allocation2 + $0x10] sm:$0xf] }
 0x1dd   : > { %v1725_v19 = vsel %vm275_vm7, %v1717_v60, 0  ;;  %v1728_v3 = vsel %vm275_vm7, %v1718_v24, 0  ;;  %v1881_v27 = vsel %vm275_vm7, %v1873_v21, 0  ;;  %v1884_v13 = vsel %vm275_vm7, %v1874_v12, 0  ;;  %v10184_v60 = vld [vmem:[#allocation1] sm:$0xff]  ;;  %v10186_v24 = vld [vmem:[#allocation1 + $0x9] sm:$0xff] }
 0x1de   : > { %1743 = vmatpush.bf16.msrb.mxu0 %v1725_v19  ;;  %1756 = vmatpush.bf16.msrb.mxu1 %v1728_v3  ;;  %v2419_v50 = vpack.c.bf16 %v2414_v2, %v2414_v2  ;;  %v2544_v28 = vunpack.c.l.bf16 %v2519_v22  ;;  %v10189_v12 = vld [vmem:[#allocation1 + $0x12] sm:$0xff]  ;;  %v10191_v19 = vld [vmem:[#allocation1 + $0x1b] sm:$0xff]  ;;  %v8541_v2 = vld [vmem:[%s12528_s1 + $0x4c] sm:$0xf]  ;;  %vm12630_vm4 = vcmask 916480  }
 0x1df   : > { %3102 = vst [vmem:[#allocation1] ss:$9 sm:$0xff] %v8541_v2 }
 0x1e1   : > { %8484 = vmatmul.msk.bf16.vlgmr.msrb.gmra.mxu0 %vm409_vm10, %v8483_v53  ;;  %8485 = vmatmul.msk.bf16.vlgmr.msrb.gmra.mxu1 %vm409_vm10, %v8483_v53  ;;  %v474_v53 = vpop.f32.mrf.mxu3 }
 0x1e2   : > { %1899 = vmatpush.bf16.msra.mxu0 %v1881_v27  ;;  %1912 = vmatpush.bf16.msra.mxu1 %v1884_v13 }
 0x1e3   : > { %2591 = vrot.lane.b32.xlu2 %v2577_v14, %s12591_s16  ;;  %2433 = vrot.lane.b32.xlu1 %v2420_v47, %s12569_s30  ;;  %v1871_v39 = vpop.permute.xlu1 %1870  ;;  %v2027_v0 = vpop.permute.xlu0 %2026 }
 0x1e4   : > { %v1876_v58 = vsel %vm12576_vm0, %v1869_v6, %v1871_v39  ;;  %2431 = vrot.lane.b32.xlu0 %v2419_v50, %s12569_s30  ;;  %v2032_v5 = vsel %vm12575_vm1, %v2025_v18, %v2027_v0  ;;  %vm12579_vm0 = vcmask 449536   ;;  %v528_v14 = vpop.f32.mrf.mxu2  ;;  %v437_v50 = vpop.f32.mrf.mxu0  ;;  %s12589_s30 = smov 47  }
 0x1e5   : > { %v1890_v51 = vsel %vm275_vm7, %v1876_v58, 0  ;;  %v2046_v26 = vsel %vm275_vm7, %v2032_v5, 0  ;;  %v450_v39 = vpop.f32.mrf.mxu1 }
 0x1e6   : > { %1938 = vmatpush.bf16.msra.mxu3 %v1890_v51  ;;  %v3106_v29 = vld [vmem:[#allocation1 + $0x1b] sm:$0xff] }
 0x1e9   : > { %8493 = vmatmul.msk.bf16.vlgmr.msra.gmra.mxu3 %vm409_vm10, %v8489_v15  ;;  %8492 = vmatmul.msk.bf16.vlgmr.msra.gmra.mxu2 %vm409_vm10, %v8489_v15  ;;  %v476_v21 = vpop.f32.mrf.mxu3 }
 0x1ea   : > { %2094 = vmatpush.bf16.msrb.mxu3 %v2046_v26 }
 0x1eb   : > { %v2023_v32 = vpop.permute.xlu1 %2022  ;;  %v2019_v48 = vpop.permute.xlu0 %2018 }
 0x1ec   : > { %v2031_v61 = vsel %vm12575_vm1, %v2023_v32, %v2025_v18  ;;  %v529_v18 = vadd.f32 %v528_v14, %v461_v23 }
 0x1ed   : > { %v2043_v41 = vsel %vm275_vm7, %v2031_v61, 0 }
 0x1ee   : > { %2081 = vmatpush.bf16.msrb.mxu2 %v2043_v41  ;;  %v3103_v41 = vld [vmem:[#allocation1] sm:$0xff] }
 0x1f1   : > { %8490 = vmatmul.msk.bf16.vlgmr.msra.gmra.mxu0 %vm409_vm10, %v8489_v15  ;;  %8491 = vmatmul.msk.bf16.vlgmr.msra.gmra.mxu1 %vm409_vm10, %v8489_v15  ;;  %v8547_v15 = vld [vmem:[%s12528_s1 + $0x50] sm:$0xf] }
 0x1f3   : > { %v2021_v57 = vpop.permute.xlu1 %2020 }
 0x1f4   : > { %v2029_v37 = vsel %vm12575_vm1, %v2019_v48, %v2021_v57  ;;  %v2030_v42 = vsel %vm12575_vm1, %v2021_v57, %v2023_v32  ;;  %vm12577_vm1 = vcmask 457728   ;;  %v530_v48 = vpop.f32.mrf.mxu2  ;;  %v3104_v57 = vld [vmem:[#allocation1 + $0x9] sm:$0xff] }
 0x1f5   : > { %v2037_v9 = vsel %vm275_vm7, %v2029_v37, 0  ;;  %v2040_v46 = vsel %vm275_vm7, %v2030_v42, 0  ;;  %v3105_v37 = vld [vmem:[#allocation1 + $0x12] sm:$0xff] }
 0x1f6   : > { %2055 = vmatpush.bf16.msrb.mxu0 %v2037_v9  ;;  %2068 = vmatpush.bf16.msrb.mxu1 %v2040_v46  ;;  %v502_v9 = vpop.f32.mrf.mxu0  ;;  %v515_v46 = vpop.f32.mrf.mxu1  ;;  %3256 = vst [vmem:[#allocation1] ss:$9 sm:$0xff] %v8547_v15 }
 0x1f9   : > { %8499 = vmatmul.msk.bf16.vlgmr.msrb.gmra.mxu3 %vm409_vm10, %v8495_v16  ;;  %8498 = vmatmul.msk.bf16.vlgmr.msrb.gmra.mxu2 %vm409_vm10, %v8495_v16 }
 0x1fb   : > { %v2183_v25 = vpop.permute.xlu1 %2182 }
 0x1fd   : > { %v10255_v14 = vld [vmem:[#allocation1 + $0x12] sm:$0xff]  ;;  %v10259_v50 = vld [vmem:[#allocation1 + $0x1b] sm:$0xff] }
 0x1fe   : > { %v517_v21 = vpop.f32.mrf.mxu1 }
 0x201   : > { %8496 = vmatmul.msk.bf16.vlgmr.msrb.gmra.mxu0 %vm409_vm10, %v8495_v16  ;;  %8497 = vmatmul.msk.bf16.vlgmr.msrb.gmra.mxu1 %vm409_vm10, %v8495_v16  ;;  %v10224_v16 = vld [vmem:[#allocation2 + $0x10] sm:$0xff]  }
 0x202   : > { %v2700_v23 = vunpack.c.l.bf16 %v10224_v16 }
 0x203   : > { %v2175_v55 = vpop.permute.xlu1 %2174 }
 0x20b   : > { %v2285_v8 = vpop.permute.xlu1 %2284 }
 0x20d   : > { %v2179_v30 = vpop.permute.xlu2 %2178 }
 0x213   : > { %v10215_v26 = vpop.permute.xlu1 %8940 }
 0x214   : > { %v8943_v39 = vunpack.i.h.bf16 %v10215_v26 }
 0x215   : > { %v2177_v10 = vpop.permute.xlu2 %2176 }
 0x216   : > { %v2185_v44 = vsel %vm12577_vm1, %v2175_v55, %v2177_v10  ;;  %v2186_v33 = vsel %vm12577_vm1, %v2177_v10, %v2179_v30  ;;  %v3107_v10 = vpack.i.b16 %v3103_v41, %v3103_v41 }
 0x217   : > { %v2193_v34 = vsel %vm275_vm7, %v2185_v44, 0  ;;  %v2196_v6 = vsel %vm275_vm7, %v2186_v33, 0  ;;  %v10231_v44 = vld [vmem:[#allocation2 + $0x8] sm:$0xff]  ;;  %v3116_v33 = vpack.i.b16 %v3106_v29, %v3106_v29 }
 0x218   : > { %2211 = vmatpush.bf16.msra.mxu0 %v2193_v34  ;;  %2224 = vmatpush.bf16.msra.mxu1 %v2196_v6  ;;  %v3110_v34 = vpack.i.b16 %v3104_v57, %v3104_v57 }
 0x21b   : > { %8502 = vmatmul.msk.bf16.vlgmr.msra.gmra.mxu0 %vm409_vm10, %v8501_v49  ;;  %8503 = vmatmul.msk.bf16.vlgmr.msra.gmra.mxu1 %vm409_vm10, %v8501_v49 }
 0x21d   : > { %v2287_v7 = vpop.permute.xlu2 %2286 }
 0x21e   : > { %v2292_v36 = vsel %vm12579_vm0, %v2285_v8, %v2287_v7  ;;  %v3113_v7 = vpack.i.b16 %v3105_v37, %v3105_v37 }
 0x21f   : > { %v2306_v38 = vsel %vm275_vm7, %v2292_v36, 0 }
 0x225   : > { %v2181_v59 = vpop.permute.xlu0 %2180 }
 0x226   : > { %v2187_v45 = vsel %vm12577_vm1, %v2179_v30, %v2181_v59  ;;  %v2188_v43 = vsel %vm12577_vm1, %v2181_v59, %v2183_v25  ;;  %v10226_v25 = vadd.f32 %v502_v9, %v435_v52  ;;  %v8942_v30 = vunpack.i.l.bf16 %v10215_v26 }
 0x227   : > { %v2199_v35 = vsel %vm275_vm7, %v2187_v45, 0  ;;  %v2202_v40 = vsel %vm275_vm7, %v2188_v43, 0  ;;  %vm12585_vm1 = vcmask 662528   ;;  %v2699_v45 = vunpack.c.h.bf16 %v10231_v44 }
 0x228   : > { %2237 = vmatpush.bf16.msra.mxu2 %v2199_v35  ;;  %2250 = vmatpush.bf16.msra.mxu3 %v2202_v40  ;;  %v2698_v43 = vunpack.c.l.bf16 %v10231_v44  ;;  %v2730_v20 = vmul.f32 %v8942_v30, %v2700_v23  ;;  %v3109_v35 = vperm.slane %v3107_v10, 0  ;;  %v667_v10 = vpop.f32.mrf.mxu1 }
 0x22b   : > { %8504 = vmatmul.msk.bf16.vlgmr.msra.gmra.mxu2 %vm409_vm10, %v8501_v49  ;;  %8505 = vmatmul.msk.bf16.vlgmr.msra.gmra.mxu3 %vm409_vm10, %v8501_v49  ;;  %v3112_v49 = vperm.slane %v3110_v34, 0 }
 0x22c   : > { %2354 = vmatpush.bf16.msrb.mxu3 %v2306_v38  ;;  %v3118_v38 = vperm.slane %v3116_v33, 0 }
 0x22d   : > { %v8931_v62 = vpop.permute.xlu0 %8930 }
 0x22e   : > { %v8933_v31 = vunpack.i.h.bf16 %v8931_v62  ;;  %v8932_v1 = vunpack.i.l.bf16 %v8931_v62 }
 0x230   : > { %v2570_v3 = vmul.f32 %v8933_v31, %v9830_v4  ;;  %v2574_v27 = vmul.f32 %v8932_v1, %v2544_v28  ;;  %v2564_v13 = vsel %vm12578_vm5, %v8928_v54, %v8932_v1  ;;  %v2562_v54 = vsel %vm12578_vm5, %v8933_v31, %v8927_v56  ;;  %v541_v56 = vpop.f32.mrf.mxu3  ;;  %v504_v28 = vpop.f32.mrf.mxu0 }
 0x231   : > { %v2573_v47 = vmul.f32 %v2564_v13, %v9858_v11  ;;  %v10208_v11 = vpop.permute.xlu2 %2278  ;;  %v2571_v61 = vmul.f32 %v2562_v54, %v9915_v17  ;;  %v10219_v42 = vadd.f32 %v541_v56, %v474_v53  ;;  %v10228_v17 = vadd.f32 %v515_v46, %v448_v63  ;;  %v680_v63 = vpop.f32.mrf.mxu2 }
 0x232   : > { %v2575_v4 = vpack.c.bf16 %v2570_v3, %v2570_v3  ;;  %v2579_v0 = vpack.c.bf16 %v2574_v27, %v2574_v27  ;;  %v3115_v31 = vperm.slane %v3113_v7, 0  ;;  %v10251_v1 = vadd.f32 %v680_v63, %v529_v18  ;;  %v10253_v3 = vld [vmem:[#allocation2] sm:$0xff] }
 0x233   : > { %v2578_v58 = vpack.c.bf16 %v2573_v47, %v2573_v47  ;;  %v2576_v55 = vpack.c.bf16 %v2571_v61, %v2571_v61  ;;  %v3258_v27 = vld [vmem:[#allocation1 + $0x9] sm:$0xff]  ;;  %vm12580_vm5 = vcmask 441344   ;;  %v10257_v47 = vld [vmem:[#allocation1] sm:$0xff]  ;;  %v3124_v18 = vunpack.c.l.bf16 %v3109_v35 }
 0x234   : > { %2587 = vrot.lane.b32.xlu2 %v2575_v4, %s12591_s16  ;;  %2595 = vrot.lane.b32.xlu1 %v2579_v0, %s12591_s16  ;;  %v2735_v4 = vpack.c.bf16 %v2730_v20, %v2730_v20  ;;  %v3125_v54 = vunpack.c.l.bf16 %v3112_v49  ;;  %v2696_v41 = vunpack.c.l.bf16 %v10253_v3  ;;  %v10290_v34 = vadd.f32 %v667_v10, %v10228_v17  ;;  %v8506_v49 = vld [vmem:[%s12529_s2 + $0x34] sm:$0xf] }
 0x235   : > { %v10210_v5 = vpop.permute.xlu0 %2282  ;;  %2593 = vrot.lane.b32.xlu0 %v2578_v58, %s12591_s16  ;;  %v3127_v58 = vunpack.c.l.bf16 %v3118_v38  ;;  %v3264_v7 = vpack.i.b16 %v3258_v27, %v3258_v27  ;;  %v3261_v17 = vpack.i.b16 %v10257_v47, %v10257_v47 }
 0x236   : > { %v2291_v51 = vsel %vm12579_vm0, %v10210_v5, %v2285_v8  ;;  %v2726_v9 = vmul.f32 %v8943_v39, %v2696_v41 }
 0x237   : > { %v2303_v32 = vsel %vm275_vm7, %v2291_v51, 0  ;;  %v3126_v51 = vunpack.c.l.bf16 %v3115_v31  ;;  %v3263_v47 = vperm.slane %v3261_v17, 0 }
 0x238   : > { %2341 = vmatpush.bf16.msrb.mxu2 %v2303_v32  ;;  %v543_v52 = vpop.f32.mrf.mxu3  ;;  %v8553_v32 = vld [vmem:[%s12528_s1 + $0x54] sm:$0xf] }
 0x239   : > { %v10239_v59 = vpop.permute.xlu2 %2437  ;;  %3410 = vst [vmem:[#allocation1] ss:$9 sm:$0xff] %v8553_v32  ;;  %v682_v46 = vpop.f32.mrf.mxu2 }
 0x23b   : > { %8509 = vmatmul.msk.bf16.vlgmr.msrb.gmra.mxu2 %vm409_vm10, %v8506_v49  ;;  %8510 = vmatmul.msk.bf16.vlgmr.msrb.gmra.mxu3 %vm409_vm10, %v8506_v49 }
 0x23d   : > { %v10233_v6 = vpop.permute.xlu0 %8935  ;;  %2589 = vrot.lane.b32.xlu0 %v2576_v55, %s12591_s16  ;;  %v8954_v55 = vpack.i.bf16 %v3126_v51, %v3125_v54  ;;  %s12642_s16 = smov 73  }
 0x23e   : > { %v8938_v8 = vunpack.i.h.bf16 %v10233_v6  ;;  %v8937_v36 = vunpack.i.l.bf16 %v10233_v6  ;;  %v3270_v6 = vpack.i.b16 %v10259_v50, %v10259_v50 }
 0x240   : > { %v2720_v40 = vsel %vm12585_vm1, %v8938_v8, %v8942_v30  ;;  %v2719_v53 = vsel %vm12585_vm1, %v8937_v36, %v8938_v8  ;;  %v693_v15 = vpop.f32.mrf.mxu3  ;;  %v8959_v30 = vpack.i.bf16 %v3124_v18, %v3127_v58  ;;  %v2731_v8 = vpack.c.bf16 %v2726_v9, %v2726_v9  ;;  %v3412_v32 = vld [vmem:[#allocation1 + $0x9] sm:$0xff] }
 0x241   : > { %v2729_v22 = vmul.f32 %v2720_v40, %v2699_v45  ;;  %v2728_v62 = vmul.f32 %v2719_v53, %v2698_v43  ;;  %v10292_v23 = vpop.permute.xlu2 %8950  ;;  %v2718_v20 = vsel %vm12585_vm1, %v8943_v39, %v8937_v36  ;;  %v3272_v50 = vperm.slane %v3270_v6, 0 }
 0x242   : > { %v8952_v36 = vunpack.i.l.bf16 %v10292_v23  ;;  %v8953_v10 = vunpack.i.h.bf16 %v10292_v23 }
 0x243   : > { %v2734_v13 = vpack.c.bf16 %v2729_v22, %v2729_v22  ;;  %v2733_v2 = vpack.c.bf16 %v2728_v62, %v2728_v62  ;;  %v3266_v22 = vperm.slane %v3264_v7, 0 }
 0x245   : > { %v10262_v0 = vpop.permute.xlu1 %2435  ;;  %2749 = vrot.lane.b32.xlu2 %v2734_v13, %s12589_s30  ;;  %2747 = vrot.lane.b32.xlu1 %v2733_v2, %s12589_s30  ;;  %v835_v13 = vpop.f32.mrf.mxu2  ;;  %v3279_v44 = vunpack.c.l.bf16 %v3266_v22 }
 0x246   : > { %v2444_v26 = vsel %vm12580_vm5, %v10262_v0, %v10239_v59  ;;  %v2281_v61 = vpop.permute.xlu0 %2280  ;;  %2751 = vrot.lane.b32.xlu0 %v2735_v4, %s12589_s30  ;;  %v669_v4 = vpop.f32.mrf.mxu1  ;;  %v854_v18 = vadd.f32 %v835_v13, %v10251_v1 }
 0x247   : > { %v2289_v29 = vsel %vm12579_vm0, %v10208_v11, %v2281_v61  ;;  %v2290_v48 = vsel %vm12579_vm0, %v2281_v61, %v10210_v5  ;;  %v2456_v56 = vsel %vm275_vm7, %v2444_v26, 0  ;;  %v10284_v11 = vadd.f32 %v693_v15, %v10219_v42  ;;  %v654_v5 = vpop.f32.mrf.mxu0  ;;  %v3413_v26 = vld [vmem:[#allocation1 + $0x12] sm:$0xff] }
 0x248   : > { %v2297_v57 = vsel %vm275_vm7, %v2289_v29, 0  ;;  %v2300_v37 = vsel %vm275_vm7, %v2290_v48, 0  ;;  %2494 = vmatpush.bf16.msra.mxu2 %v2456_v56  ;;  %v10287_v33 = vadd.f32 %v654_v5, %v10226_v25  ;;  %v3267_v42 = vpack.i.b16 %v10255_v14, %v10255_v14  ;;  %v695_v27 = vpop.f32.mrf.mxu3  ;;  %v2831_v14 = vld [vmem:[#allocation2 + $0x10] sm:$0xf] }
 0x249   : > { %2315 = vmatpush.bf16.msrb.mxu0 %v2297_v57  ;;  %2328 = vmatpush.bf16.msrb.mxu1 %v2300_v37  ;;  %vm12582_vm0 = vcmask 670720   ;;  %v2697_v25 = vunpack.c.h.bf16 %v10253_v3  ;;  %v2856_v61 = vunpack.c.l.bf16 %v2831_v14  ;;  %v3281_v48 = vunpack.c.l.bf16 %v3272_v50 }
 0x24a   : > { %v3269_v21 = vperm.slane %v3267_v42, 0  ;;  %v3418_v57 = vpack.i.b16 %v3412_v32, %v3412_v32  ;;  %v3421_v37 = vpack.i.b16 %v3413_v26, %v3413_v26 }
 0x24b   : > { %v2727_v63 = vmul.f32 %v2718_v20, %v2697_v25  ;;  %v2886_v15 = vmul.f32 %v8952_v36, %v2856_v61 }
 0x24c   : > { %8507 = vmatmul.msk.bf16.vlgmr.msrb.gmra.mxu0 %vm409_vm10, %v8506_v49  ;;  %8508 = vmatmul.msk.bf16.vlgmr.msrb.gmra.mxu1 %vm409_vm10, %v8506_v49  ;;  %v3420_v17 = vperm.slane %v3418_v57, 0  ;;  %v3423_v6 = vperm.slane %v3421_v37, 0 }
 0x24d   : > { %v10299_v35 = vpop.permute.xlu1 %8945  ;;  %8960 = vrot.lane.b32.xlu2 %v8959_v30, %s9284_s12  ;;  %8955 = vrot.lane.b32.xlu1 %v8954_v55, %s9284_s12  ;;  %v2732_v54 = vpack.c.bf16 %v2727_v63, %v2727_v63  ;;  %v837_v55 = vpop.f32.mrf.mxu2 }
 0x24e   : > { %v8948_v40 = vunpack.i.h.bf16 %v10299_v35  ;;  %v8947_v53 = vunpack.i.l.bf16 %v10299_v35  ;;  %v2440_v38 = vpop.permute.xlu0 %2439  ;;  %2743 = vrot.lane.b32.xlu0 %v2731_v8, %s12589_s30  ;;  %v822_v42 = vpop.f32.mrf.mxu1  ;;  %v3433_v22 = vunpack.c.l.bf16 %v3420_v17 }
 0x24f   : > { %v2445_v52 = vsel %vm12580_vm5, %v10239_v59, %v2440_v38  ;;  %v656_v39 = vpop.f32.mrf.mxu0  ;;  %v3414_v38 = vld [vmem:[#allocation1 + $0x1b] sm:$0xff]  ;;  %v853_v49 = vadd.f32 %v822_v42, %v10290_v34  ;;  %v2882_v34 = vmul.f32 %v8953_v10, %v2696_v41  ;;  %v2592_v17 = vpop.permute.xlu2 %2591 }
 0x250   : > { %v2459_v62 = vsel %vm275_vm7, %v2445_v52, 0  ;;  %v2875_v31 = vsel %vm12582_vm0, %v8947_v53, %v8948_v40  ;;  %v2876_v28 = vsel %vm12582_vm0, %v8948_v40, %v8952_v36  ;;  %v848_v5 = vpop.f32.mrf.mxu3  ;;  %v3411_v40 = vld [vmem:[#allocation1] sm:$0xff]  ;;  %v2891_v52 = vpack.c.bf16 %v2886_v15, %v2886_v15 }
 0x251   : > { %2507 = vmatpush.bf16.msra.mxu3 %v2459_v62  ;;  %v2884_v59 = vmul.f32 %v2875_v31, %v2698_v43  ;;  %v2885_v2 = vmul.f32 %v2876_v28, %v2699_v45  ;;  %v3280_v45 = vunpack.c.l.bf16 %v3269_v21  ;;  %v3278_v43 = vunpack.c.l.bf16 %v3263_v47 }
 0x252   : > { %v855_v8 = vadd.f32 %v848_v5, %v10284_v11  ;;  %v2874_v23 = vsel %vm12582_vm0, %v8953_v10, %v8947_v53  ;;  %v3415_v11 = vpack.i.b16 %v3411_v40, %v3411_v40  ;;  %v3424_v63 = vpack.i.b16 %v3414_v38, %v3414_v38 }
 0x253   : > { %v2889_v58 = vpack.c.bf16 %v2884_v59, %v2884_v59  ;;  %v2890_v51 = vpack.c.bf16 %v2885_v2, %v2885_v2  ;;  %v8964_v7 = vpack.i.bf16 %v3280_v45, %v3279_v44  ;;  %v3434_v62 = vunpack.c.l.bf16 %v3423_v6 }
 0x254   : > { %v3417_v28 = vperm.slane %v3415_v11, 0  ;;  %v3426_v53 = vperm.slane %v3424_v63, 0  ;;  %v2887_v14 = vpack.c.bf16 %v2882_v34, %v2882_v34  ;;  %vm12583_vm0 = vcmask 375808  }
 0x255   : > { %v2434_v29 = vpop.permute.xlu1 %2433  ;;  %2903 = vrot.lane.b32.xlu2 %v2889_v58, %s12587_s7  ;;  %2745 = vrot.lane.b32.xlu1 %v2732_v54, %s12589_s30  ;;  %v991_v35 = vpop.f32.mrf.mxu2  ;;  %v8974_v59 = vpack.i.bf16 %v3434_v62, %v3433_v22  ;;  %s12681_s30 = smov 72  }
 0x256   : > { %v2443_v56 = vsel %vm12580_vm5, %v2434_v29, %v10262_v0  ;;  %v2432_v1 = vpop.permute.xlu0 %2431  ;;  %2905 = vrot.lane.b32.xlu0 %v2890_v51, %s12587_s7  ;;  %v8969_v0 = vpack.i.bf16 %v3278_v43, %v3281_v48  ;;  %v1010_v21 = vadd.f32 %v991_v35, %v854_v18  ;;  %v824_v13 = vpop.f32.mrf.mxu1  ;;  %v3432_v47 = vunpack.c.l.bf16 %v3417_v28  ;;  %v8512_v51 = vld [vmem:[%s12529_s2 + $0x38] sm:$0xf] }
 0x257   : > { %v2442_v9 = vsel %vm12580_vm5, %v2432_v1, %v2434_v29  ;;  %v2453_v46 = vsel %vm275_vm7, %v2443_v56, 0  ;;  %v809_v20 = vpop.f32.mrf.mxu0  ;;  %v3435_v50 = vunpack.c.l.bf16 %v3426_v53  ;;  %8515 = vmatmul.msk.bf16.vlgmr.msra.gmra.mxu2 %vm409_vm10, %v8512_v51  ;;  %8516 = vmatmul.msk.bf16.vlgmr.msra.gmra.mxu3 %vm409_vm10, %v8512_v51  ;;  %vm12581_vm5 = vcmask 392192  }
 0x258   : > { %v2450_v30 = vsel %vm275_vm7, %v2442_v9, 0  ;;  %2481 = vmatpush.bf16.msra.mxu1 %v2453_v46  ;;  %v852_v36 = vadd.f32 %v809_v20, %v10287_v33  ;;  %v2883_v33 = vmul.f32 %v2874_v23, %v2697_v25  ;;  %v850_v31 = vpop.f32.mrf.mxu3 }
 0x259   : > { %2468 = vmatpush.bf16.msra.mxu0 %v2450_v30  ;;  %v8979_v25 = vpack.i.bf16 %v3432_v47, %v3435_v50 }
 0x25a   : > { %v2888_v2 = vpack.c.bf16 %v2883_v33, %v2883_v33 }
 0x25c   : > { %8513 = vmatmul.msk.bf16.vlgmr.msra.gmra.mxu0 %vm409_vm10, %v8512_v51  ;;  %8514 = vmatmul.msk.bf16.vlgmr.msra.gmra.mxu1 %vm409_vm10, %v8512_v51  ;;  %v10379_v51 = vld [vmem:[#allocation2 + $0x4] sm:$0xff] }
 0x25d   : > { %8965 = vrot.lane.b32.xlu2 %v8964_v7, %s12595_s15  ;;  %2907 = vrot.lane.b32.xlu1 %v2891_v52, %s12587_s7  ;;  %v993_v3 = vpop.f32.mrf.mxu2 }
 0x25e   : > { %8970 = vrot.lane.b32.xlu0 %v8969_v0, %s12595_s15  ;;  %v978_v58 = vpop.f32.mrf.mxu1  ;;  %v3123_v3 = vunpack.c.h.bf16 %v10224_v16 }
 0x25f   : > { %v811_v27 = vpop.f32.mrf.mxu0  ;;  %v1009_v54 = vadd.f32 %v978_v58, %v853_v49 }
 0x260   : > { %v1004_v41 = vpop.f32.mrf.mxu3 }
 0x261   : > { %v1011_v39 = vadd.f32 %v1004_v41, %v855_v8 }
 0x265   : > { %2901 = vrot.lane.b32.xlu2 %v2888_v2, %s12587_s7  ;;  %2899 = vrot.lane.b32.xlu1 %v2887_v14, %s12587_s7  ;;  %v1147_v26 = vpop.f32.mrf.mxu2  ;;  %s12715_s7 = smov 62  }
 0x266   : > { %8975 = vrot.lane.b32.xlu0 %v8974_v59, %s12593_s18  ;;  %v1166_v61 = vadd.f32 %v1147_v26, %v1010_v21  ;;  %v980_v44 = vpop.f32.mrf.mxu1 }
 0x267   : > { %v965_v4 = vpop.f32.mrf.mxu0 }
 0x268   : > { %v1008_v18 = vadd.f32 %v965_v4, %v852_v36  ;;  %v1006_v32 = vpop.f32.mrf.mxu3  ;;  %v8518_v4 = vld [vmem:[%s12529_s2 + $0x3c] sm:$0xf] }
 0x26d   : > { %8980 = vrot.lane.b32.xlu1 %v8979_v25, %s12593_s18  ;;  %v1149_v45 = vpop.f32.mrf.mxu2 }
 0x26e   : > { %v1134_v1 = vpop.f32.mrf.mxu1  ;;  %v10386_v45 = vunpack.c.l.bf16 %v10379_v51 }
 0x26f   : > { %v967_v29 = vpop.f32.mrf.mxu0  ;;  %v1165_v37 = vadd.f32 %v1134_v1, %v1009_v54 }
 0x270   : > { %v1160_v43 = vpop.f32.mrf.mxu3 }
 0x271   : > { %v1167_v48 = vadd.f32 %v1160_v43, %v1011_v39 }
 0x275   : > { %v1303_v46 = vpop.f32.mrf.mxu2 }
 0x276   : > { %v1322_v15 = vadd.f32 %v1303_v46, %v1166_v61  ;;  %v1136_v55 = vpop.f32.mrf.mxu1  ;;  %v8559_v46 = vld [vmem:[%s12528_s1 + $0x58] sm:$0xf] }
 0x277   : > { %v1121_v56 = vpop.f32.mrf.mxu0  ;;  %3564 = vst [vmem:[#allocation1] ss:$9 sm:$0xff] %v8559_v46 }
 0x278   : > { %v1164_v57 = vadd.f32 %v1121_v56, %v1008_v18  ;;  %v1162_v9 = vpop.f32.mrf.mxu3 }
 0x27d   : > { %v1305_v5 = vpop.f32.mrf.mxu2 }
 0x27e   : > { %v1290_v8 = vpop.f32.mrf.mxu1 }
 0x27f   : > { %v1123_v30 = vpop.f32.mrf.mxu0  ;;  %v1321_v42 = vadd.f32 %v1290_v8, %v1165_v37 }
 0x280   : > { %v1316_v10 = vpop.f32.mrf.mxu3 }
 0x281   : > { %v1323_v7 = vadd.f32 %v1316_v10, %v1167_v48 }
 0x285   : > { %v1459_v40 = vpop.f32.mrf.mxu2 }
 0x286   : > { %v1478_v38 = vadd.f32 %v1459_v40, %v1322_v15  ;;  %v1292_v49 = vpop.f32.mrf.mxu1 }
 0x287   : > { %v1277_v0 = vpop.f32.mrf.mxu0 }
 0x288   : > { %v1320_v20 = vadd.f32 %v1277_v0, %v1164_v57  ;;  %v1318_v6 = vpop.f32.mrf.mxu3  ;;  %v3001_v0 = vpack.i.b16 %v10189_v12, %v10189_v12  ;;  %v3004_v12 = vpack.i.b16 %v10191_v19, %v10191_v19 }
 0x28a   : > { %v3003_v49 = vperm.slane %v3001_v0, 0 }
 0x28d   : > { %v1461_v23 = vpop.f32.mrf.mxu2 }
 0x28e   : > { %v2588_v52 = vpop.permute.xlu2 %2587  ;;  %v1446_v33 = vpop.f32.mrf.mxu1 }
 0x28f   : > { %v1279_v36 = vpop.f32.mrf.mxu0  ;;  %v1477_v34 = vadd.f32 %v1446_v33, %v1321_v42 }
 0x290   : > { %v1472_v11 = vpop.f32.mrf.mxu3  ;;  %v3097_v36 = vld [vmem:[#allocation2 + $0xc] sm:$0xff] }
 0x291   : > { %v1479_v22 = vadd.f32 %v1472_v11, %v1323_v7  ;;  %v10421_v11 = vld [vmem:[%s12529_s2 + $0x40] sm:$0xf]  ;;  %v10427_v19 = vunpack.c.l.bf16 %v3097_v36 }
 0x295   : > { %v1615_v35 = vpop.f32.mrf.mxu2 }
 0x296   : > { %v1634_v28 = vadd.f32 %v1615_v35, %v1478_v38  ;;  %v1448_v27 = vpop.f32.mrf.mxu1 }
 0x297   : > { %v1433_v63 = vpop.f32.mrf.mxu0 }
 0x298   : > { %v1476_v62 = vadd.f32 %v1433_v63, %v1320_v20  ;;  %v1474_v53 = vpop.f32.mrf.mxu3 }
 0x299   : > { %v3568_v53 = vld [vmem:[#allocation1 + $0x1b] sm:$0xff] }
 0x29d   : > { %v1617_v41 = vpop.f32.mrf.mxu2 }
 0x29e   : > { %v1602_v26 = vpop.f32.mrf.mxu1 }
 0x29f   : > { %v2750_v31 = vpop.permute.xlu2 %2749  ;;  %v1435_v21 = vpop.f32.mrf.mxu0  ;;  %v1633_v44 = vadd.f32 %v1602_v26, %v1477_v34 }
 0x2a0   : > { %v1628_v18 = vpop.f32.mrf.mxu3  ;;  %v3013_v21 = vunpack.c.l.bf16 %v3003_v49 }
 0x2a1   : > { %v1635_v32 = vadd.f32 %v1628_v18, %v1479_v22  ;;  %v10442_v18 = vunpack.c.h.bf16 %v10379_v51 }
 0x2a5   : > { %v1771_v15 = vpop.f32.mrf.mxu2 }
 0x2a6   : > { %v2596_v13 = vpop.permute.xlu1 %2595  ;;  %v1790_v55 = vadd.f32 %v1771_v15, %v1634_v28  ;;  %v1604_v10 = vpop.f32.mrf.mxu1  ;;  %v3565_v28 = vld [vmem:[#allocation1] sm:$0xff] }
 0x2a7   : > { %v10366_v59 = vpop.permute.xlu2 %8960  ;;  %v2594_v2 = vpop.permute.xlu0 %2593  ;;  %v3569_v41 = vpack.i.b16 %v3565_v28, %v3565_v28 }
 0x2a8   : > { %v8962_v14 = vunpack.i.l.bf16 %v10366_v59  ;;  %v2600_v47 = vsel %vm12581_vm5, %v2592_v17, %v2594_v2  ;;  %v2601_v50 = vsel %vm12581_vm5, %v2594_v2, %v2596_v13  ;;  %v1589_v54 = vpop.f32.mrf.mxu0  ;;  %v8963_v61 = vunpack.i.h.bf16 %v10366_v59  ;;  %v1630_v30 = vpop.f32.mrf.mxu3 }
 0x2a9   : > { %v2612_v25 = vsel %vm275_vm7, %v2600_v47, 0  ;;  %v2615_v39 = vsel %vm275_vm7, %v2601_v50, 0  ;;  %v1632_v16 = vadd.f32 %v1589_v54, %v1476_v62  ;;  %v3567_v62 = vld [vmem:[#allocation1 + $0x12] sm:$0xff]  ;;  %v3006_v13 = vperm.slane %v3004_v12, 0 }
 0x2aa   : > { %2650 = vmatpush.bf16.msrb.mxu2 %v2612_v25  ;;  %2663 = vmatpush.bf16.msrb.mxu3 %v2615_v39  ;;  %v3152_v58 = vmul.f32 %v8962_v14, %v3123_v3  ;;  %v3148_v57 = vmul.f32 %v8963_v61, %v10386_v45  ;;  %v3575_v47 = vpack.i.b16 %v3567_v62, %v3567_v62  ;;  %v10437_v3 = vunpack.c.h.bf16 %v3097_v36 }
 0x2ab   : > { %v3578_v25 = vpack.i.b16 %v3568_v53, %v3568_v53 }
 0x2ac   : > { %v3157_v29 = vpack.c.bf16 %v3152_v58, %v3152_v58  ;;  %v3153_v7 = vpack.c.bf16 %v3148_v57, %v3148_v57 }
 0x2ad   : > { %8521 = vmatmul.msk.bf16.vlgmr.msrb.gmra.mxu2 %vm409_vm10, %v8518_v4  ;;  %8522 = vmatmul.msk.bf16.vlgmr.msrb.gmra.mxu3 %vm409_vm10, %v8518_v4  ;;  %v3580_v30 = vperm.slane %v3578_v25, 0 }
 0x2ae   : > { %3173 = vrot.lane.b32.xlu1 %v3157_v29, %s9290_s8  ;;  %v3014_v29 = vunpack.c.l.bf16 %v3006_v13 }
 0x2af   : > { %v10388_v43 = vpop.permute.xlu2 %2903  ;;  %v2590_v48 = vpop.permute.xlu0 %2589  ;;  %v3589_v12 = vunpack.c.l.bf16 %v3580_v30 }
 0x2b0   : > { %v2598_v56 = vsel %vm12581_vm5, %v2588_v52, %v2590_v48  ;;  %v2599_v1 = vsel %vm12581_vm5, %v2590_v48, %v2592_v17  ;;  %v1591_v5 = vpop.f32.mrf.mxu0  ;;  %vm12584_vm5 = vcmask 384000   ;;  %v2998_v17 = vpack.i.b16 %v10186_v24, %v10186_v24  ;;  %v1773_v52 = vpop.f32.mrf.mxu2  ;;  %v3566_v24 = vld [vmem:[#allocation1 + $0x9] sm:$0xff] }
 0x2b1   : > { %v2606_v37 = vsel %vm275_vm7, %v2598_v56, 0  ;;  %v2609_v9 = vsel %vm275_vm7, %v2599_v1, 0  ;;  %v1784_v63 = vpop.f32.mrf.mxu3  ;;  %v3572_v27 = vpack.i.b16 %v3566_v24, %v3566_v24  ;;  %v3577_v1 = vperm.slane %v3575_v47, 0 }
 0x2b2   : > { %2624 = vmatpush.bf16.msrb.mxu0 %v2606_v37  ;;  %2637 = vmatpush.bf16.msrb.mxu1 %v2609_v9  ;;  %v10423_v33 = vadd.f32 %v1784_v63, %v1635_v32  ;;  %v3000_v35 = vperm.slane %v2998_v17, 0  ;;  %v8565_v32 = vld [vmem:[%s12528_s1 + $0x5c] sm:$0xf] }
 0x2b3   : > { %v3574_v26 = vperm.slane %v3572_v27, 0  ;;  %3718 = vst [vmem:[#allocation1] ss:$9 sm:$0xff] %v8565_v32 }
 0x2b4   : > { %v3012_v54 = vunpack.c.l.bf16 %v3000_v35 }
 0x2b5   : > { %8519 = vmatmul.msk.bf16.vlgmr.msrb.gmra.mxu0 %vm409_vm10, %v8518_v4  ;;  %8520 = vmatmul.msk.bf16.vlgmr.msrb.gmra.mxu1 %vm409_vm10, %v8518_v4 }
 0x2b6   : > { %3165 = vrot.lane.b32.xlu1 %v3153_v7, %s9290_s8  ;;  %v3016_v7 = vmul.f32 %v3012_v54, %v10442_v18 }
 0x2b7   : > { %v10405_v8 = vpop.permute.xlu1 %2747  ;;  %v10411_v6 = vpop.permute.xlu2 %8965 }
 0x2b8   : > { %v2756_v20 = vsel %vm12584_vm5, %v10405_v8, %v2750_v31  ;;  %v2752_v42 = vpop.permute.xlu0 %2751  ;;  %v1745_v22 = vpop.f32.mrf.mxu0  ;;  %v8968_v52 = vunpack.i.h.bf16 %v10411_v6  ;;  %v8967_v62 = vunpack.i.l.bf16 %v10411_v6 }
 0x2b9   : > { %v2757_v40 = vsel %vm12584_vm5, %v2750_v31, %v2752_v42  ;;  %v2768_v38 = vsel %vm275_vm7, %v2756_v20, 0  ;;  %v10425_v34 = vadd.f32 %v1745_v22, %v1632_v16  ;;  %v1758_v31 = vpop.f32.mrf.mxu1  ;;  %v3017_v16 = vmul.f32 %v10427_v19, %v3013_v21  ;;  %v1927_v48 = vpop.f32.mrf.mxu2 }
 0x2ba   : > { %v2771_v23 = vsel %vm275_vm7, %v2757_v40, 0  ;;  %2806 = vmatpush.bf16.msra.mxu2 %v2768_v38  ;;  %v10431_v2 = vadd.f32 %v1758_v31, %v1633_v44  ;;  %v2995_v44 = vpack.i.b16 %v10184_v60, %v10184_v60  ;;  %v1786_v57 = vpop.f32.mrf.mxu3  ;;  %v10456_v37 = vadd.f32 %v1927_v48, %v1790_v55  ;;  %v3719_v48 = vld [vmem:[#allocation1] sm:$0xff] }
 0x2bb   : > { %2819 = vmatpush.bf16.msra.mxu3 %v2771_v23  ;;  %v3571_v60 = vperm.slane %v3569_v41, 0  ;;  %v3588_v42 = vunpack.c.l.bf16 %v3577_v1  ;;  %v10464_v55 = vmul.f32 %v10437_v3, %v3014_v29  ;;  %v3021_v36 = vpack.c.bf16 %v3017_v16, %v3017_v16  ;;  %v8571_v57 = vld [vmem:[%s12528_s1 + $0x60] sm:$0xf] }
 0x2bc   : > { %v2997_v17 = vperm.slane %v2995_v44, 0  ;;  %v3020_v22 = vpack.c.bf16 %v3016_v7, %v3016_v7  ;;  %v3723_v59 = vpack.i.b16 %v3719_v48, %v3719_v48 }
 0x2bd   : > { %8527 = vmatmul.msk.bf16.vlgmr.msra.gmra.mxu2 %vm409_vm10, %v10421_v11  ;;  %v3586_v49 = vunpack.c.l.bf16 %v3571_v60  ;;  %v3035_v41 = vsel %vm275_vm7, %v3021_v36, 0 }
 0x2be   : > { %8528 = vmatmul.msk.bf16.vlgmr.msra.gmra.mxu3 %vm409_vm10, %v10421_v11  ;;  %v3032_v44 = vsel %vm275_vm7, %v3020_v22, 0 }
 0x2bf   : > { %v10435_v50 = vpop.permute.xlu1 %8955  ;;  %v10460_v10 = vpop.permute.xlu2 %2901  ;;  %v8989_v25 = vpack.i.bf16 %v3586_v49, %v3589_v12  ;;  %v3725_v49 = vperm.slane %v3723_v59, 0 }
 0x2c0   : > { %v8958_v39 = vunpack.i.h.bf16 %v10435_v50  ;;  %v8957_v4 = vunpack.i.l.bf16 %v10435_v50  ;;  %v2744_v58 = vpop.permute.xlu0 %2743  ;;  %v1747_v9 = vpop.f32.mrf.mxu0  ;;  %v2911_v40 = vsel %vm12583_vm0, %v10460_v10, %v10388_v43 }
 0x2c1   : > { %v1760_v5 = vpop.f32.mrf.mxu1  ;;  %v1929_v53 = vpop.f32.mrf.mxu2  ;;  %v2921_v27 = vsel %vm275_vm7, %v2911_v40, 0 }
 0x2c2   : > { %v3141_v56 = vsel %vm368_vm8, %v8957_v4, %v8958_v39  ;;  %v3142_v51 = vsel %vm368_vm8, %v8958_v39, %v8962_v14  ;;  %v3587_v14 = vunpack.c.l.bf16 %v3574_v26  ;;  %v3720_v39 = vld [vmem:[#allocation1 + $0x9] sm:$0xff]  ;;  %v3011_v26 = vunpack.c.l.bf16 %v2997_v17 }
 0x2c3   : > { %v3150_v46 = vmul.f32 %v3141_v56, %v10427_v19  ;;  %v3151_v15 = vmul.f32 %v3142_v51, %v10437_v3  ;;  %v3726_v56 = vpack.i.b16 %v3720_v39, %v3720_v39 }
 0x2c4   : > { %v8984_v13 = vpack.i.bf16 %v3588_v42, %v3587_v14  ;;  %v3015_v50 = vmul.f32 %v10386_v45, %v3011_v26  ;;  %v3252_v14 = vld [vmem:[#allocation2 + $0x14] sm:$0xf] }
 0x2c5   : > { %v3155_v0 = vpack.c.bf16 %v3150_v46, %v3150_v46  ;;  %v3156_v20 = vpack.c.bf16 %v3151_v15, %v3151_v15 }
 0x2c7   : > { %v2746_v38 = vpop.permute.xlu1 %2745  ;;  %3169 = vrot.lane.b32.xlu2 %v3155_v0, %s9290_s8  ;;  %3171 = vrot.lane.b32.xlu0 %v3156_v20, %s9290_s8  ;;  %v3728_v0 = vperm.slane %v3726_v56, 0 }
 0x2c8   : > { %v2754_v23 = vsel %vm12584_vm5, %v2744_v58, %v2746_v38  ;;  %v2755_v24 = vsel %vm12584_vm5, %v2746_v38, %v10405_v8  ;;  %v2906_v63 = vpop.permute.xlu0 %2905  ;;  %v1940_v8 = vpop.f32.mrf.mxu3  ;;  %v3721_v58 = vld [vmem:[#allocation1 + $0x12] sm:$0xff] }
 0x2c9   : > { %v2912_v31 = vsel %vm12583_vm0, %v10388_v43, %v2906_v63  ;;  %v2762_v35 = vsel %vm275_vm7, %v2754_v23, 0  ;;  %v2765_v28 = vsel %vm275_vm7, %v2755_v24, 0  ;;  %v1901_v47 = vpop.f32.mrf.mxu0  ;;  %v10486_v43 = vld [vmem:[%s12529_s2 + $0x44] sm:$0xf]  ;;  %v10489_v54 = vadd.f32 %v1940_v8, %v10423_v33  ;;  %v1914_v16 = vpop.f32.mrf.mxu1 }
 0x2ca   : > { %2780 = vmatpush.bf16.msra.mxu0 %v2762_v35  ;;  %2793 = vmatpush.bf16.msra.mxu1 %v2765_v28  ;;  %v2924_v21 = vsel %vm275_vm7, %v2912_v31, 0  ;;  %v10492_v32 = vadd.f32 %v1901_v47, %v10425_v34  ;;  %v10495_v29 = vadd.f32 %v1914_v16, %v10431_v2  ;;  %v3022_v33 = vpack.c.bf16 %v10464_v55, %v10464_v55  ;;  %v3722_v2 = vld [vmem:[#allocation1 + $0x1b] sm:$0xff]  ;;  %v2083_v5 = vpop.f32.mrf.mxu2 }
 0x2cb   : > { %2962 = vmatpush.bf16.msrb.mxu2 %v2924_v21  ;;  %v3295_v34 = vsel %vm589_vm9, %v8967_v62, %v8968_v52  ;;  %v3729_v51 = vpack.i.b16 %v3721_v58, %v3721_v58  ;;  %v3732_v15 = vpack.i.b16 %v3722_v2, %v3722_v2  ;;  %3872 = vst [vmem:[#allocation1] ss:$9 sm:$0xff] %v8571_v57  ;;  %v3741_v31 = vunpack.c.l.bf16 %v3728_v0  ;;  %v3406_v57 = vld [vmem:[#allocation2 + $0x14] sm:$0xf] }
 0x2cc   : > { %v3304_v30 = vmul.f32 %v3295_v34, %v10427_v19  ;;  %v3038_v7 = vsel %vm275_vm7, %v3022_v33, 0  ;;  %v10531_v55 = vadd.f32 %v2083_v5, %v10456_v37  ;;  %v3019_v37 = vpack.c.bf16 %v3015_v50, %v3015_v50 }
 0x2cd   : > { %8525 = vmatmul.msk.bf16.vlgmr.msra.gmra.mxu0 %vm409_vm10, %v10421_v11  ;;  %8526 = vmatmul.msk.bf16.vlgmr.msra.gmra.mxu1 %vm409_vm10, %v10421_v11  ;;  %v3140_v11 = vsel %vm368_vm8, %v8963_v61, %v8957_v4  ;;  %v3731_v20 = vperm.slane %v3729_v51, 0  ;;  %v3734_v12 = vperm.slane %v3732_v15, 0  ;;  %v3740_v21 = vunpack.c.l.bf16 %v3725_v49 }
 0x2ce   : > { %2949 = vmatpush.bf16.msrb.mxu1 %v2921_v27  ;;  %8533 = vmatmul.msk.bf16.vlgmr.msrb.gmra.mxu2 %vm409_vm10, %v10486_v43  ;;  %v3149_v60 = vmul.f32 %v3140_v11, %v10442_v18  ;;  %v3309_v24 = vpack.c.bf16 %v3304_v30, %v3304_v30 }
 0x2cf   : > { %3073 = vmatpush.bf16.msra.mxu2 %v3035_v41  ;;  %v2908_v1 = vpop.permute.xlu1 %2907  ;;  %8985 = vrot.lane.b32.xlu2 %v8984_v13, %s9288_s23  ;;  %v3742_v35 = vunpack.c.l.bf16 %v3731_v20  ;;  %v3743_v27 = vunpack.c.l.bf16 %v3734_v12 }
 0x2d0   : > { %8990 = vrot.lane.b32.xlu0 %v8989_v25, %s9288_s23  ;;  %v2913_v9 = vsel %vm12583_vm0, %v2906_v63, %v2908_v1  ;;  %v10522_v46 = vpop.permute.xlu0 %8970  ;;  %v1942_v42 = vpop.f32.mrf.mxu3  ;;  %v3154_v23 = vpack.c.bf16 %v3149_v60, %v3149_v60  ;;  %v3277_v63 = vunpack.c.l.bf16 %v3252_v14  ;;  %v3029_v25 = vsel %vm275_vm7, %v3019_v37, 0 }
 0x2d1   : > { %v2927_v61 = vsel %vm275_vm7, %v2913_v9, 0  ;;  %v8972_v4 = vunpack.i.l.bf16 %v10522_v46  ;;  %v1903_v17 = vpop.f32.mrf.mxu0  ;;  %v1916_v38 = vpop.f32.mrf.mxu1  ;;  %v8973_v41 = vunpack.i.h.bf16 %v10522_v46  ;;  %v8994_v39 = vpack.i.bf16 %v3742_v35, %v3741_v31 }
 0x2d2   : > { %3060 = vmatpush.bf16.msra.mxu1 %v3032_v44  ;;  %2975 = vmatpush.bf16.msrb.mxu3 %v2927_v61  ;;  %v2085_v47 = vpop.f32.mrf.mxu2  ;;  %v8536_v44 = vld [vmem:[%s12529_s2 + $0x48] sm:$0xf]  ;;  %v8999_v2 = vpack.i.bf16 %v3740_v21, %v3743_v27  ;;  %v3875_v51 = vld [vmem:[#allocation1 + $0x12] sm:$0xff]  ;;  %v3873_v60 = vld [vmem:[#allocation1] sm:$0xff] }
 0x2d3   : > { %v3296_v40 = vsel %vm589_vm9, %v8968_v52, %v8972_v4  ;;  %v3306_v8 = vmul.f32 %v8972_v4, %v3277_v63  ;;  %v3874_v56 = vld [vmem:[#allocation1 + $0x9] sm:$0xff]  ;;  %v3302_v6 = vmul.f32 %v8973_v41, %v10386_v45  ;;  %v3431_v4 = vunpack.c.l.bf16 %v3406_v57  ;;  %v3876_v30 = vld [vmem:[#allocation1 + $0x1b] sm:$0xff] }
 0x2d4   : > { %v3305_v36 = vmul.f32 %v3296_v40, %v10437_v3  ;;  %v3880_v9 = vpack.i.b16 %v3874_v56, %v3874_v56  ;;  %v3877_v38 = vpack.i.b16 %v3873_v60, %v3873_v60 }
 0x2d5   : > { %8534 = vmatmul.msk.bf16.vlgmr.msrb.gmra.mxu3 %vm409_vm10, %v10486_v43  ;;  %v3311_v11 = vpack.c.bf16 %v3306_v8, %v3306_v8  ;;  %v3307_v42 = vpack.c.bf16 %v3302_v6, %v3302_v6 }
 0x2d6   : > { %3086 = vmatpush.bf16.msra.mxu3 %v3038_v7  ;;  %v3310_v22 = vpack.c.bf16 %v3305_v36, %v3305_v36  ;;  %v3882_v0 = vperm.slane %v3880_v9, 0  ;;  %v3886_v36 = vpack.i.b16 %v3876_v30, %v3876_v30  ;;  %v3879_v63 = vperm.slane %v3877_v38, 0 }
 0x2d7   : > { %v2900_v28 = vpop.permute.xlu1 %2899  ;;  %3167 = vrot.lane.b32.xlu2 %v3154_v23, %s9290_s8 }
 0x2d8   : > { %3323 = vrot.lane.b32.xlu0 %v3309_v24, %s9296_s19  ;;  %v2910_v52 = vsel %vm12583_vm0, %v2900_v28, %v10460_v10  ;;  %v10543_v53 = vpop.permute.xlu0 %8975  ;;  %3325 = vrot.lane.b32.xlu1 %v3310_v22, %s9296_s19  ;;  %v2096_v58 = vpop.f32.mrf.mxu3  ;;  %v3888_v22 = vperm.slane %v3886_v36, 0  ;;  %vm12619_vm0 = vcmask 973824  }
 0x2d9   : > { %v2918_v13 = vsel %vm275_vm7, %v2910_v52, 0  ;;  %v2057_v16 = vpop.f32.mrf.mxu0  ;;  %v8978_v10 = vunpack.i.h.bf16 %v10543_v53  ;;  %v8977_v26 = vunpack.i.l.bf16 %v10543_v53  ;;  %v2103_v33 = vadd.f32 %v2096_v58, %v10489_v54  ;;  %v2070_v48 = vpop.f32.mrf.mxu1  ;;  %vm12620_vm5 = vmmov %vm12619_vm0 }
 0x2da   : > { %2936 = vmatpush.bf16.msrb.mxu0 %v2918_v13  ;;  %v2100_v34 = vadd.f32 %v2057_v16, %v10492_v32  ;;  %v2101_v1 = vadd.f32 %v2070_v48, %v10495_v29  ;;  %v3294_v54 = vsel %vm589_vm9, %v8973_v41, %v8967_v62  ;;  %v3883_v29 = vpack.i.b16 %v3875_v51, %v3875_v51  ;;  %v2239_v50 = vpop.f32.mrf.mxu2 }
 0x2db   : > { %v3303_v46 = vmul.f32 %v3294_v54, %v10442_v18  ;;  %v2258_v5 = vadd.f32 %v2239_v50, %v10531_v55  ;;  %v3895_v55 = vunpack.c.l.bf16 %v3882_v0  ;;  %v3894_v41 = vunpack.c.l.bf16 %v3879_v63  ;;  %v8577_v0 = vld [vmem:[%s12528_s1 + $0x64] sm:$0xf] }
 0x2dc   : > { %v3885_v20 = vperm.slane %v3883_v29, 0  ;;  %4026 = vst [vmem:[#allocation1] ss:$9 sm:$0xff] %v8577_v0 }
 0x2dd   : > { %8531 = vmatmul.msk.bf16.vlgmr.msrb.gmra.mxu0 %vm409_vm10, %v10486_v43  ;;  %8532 = vmatmul.msk.bf16.vlgmr.msrb.gmra.mxu1 %vm409_vm10, %v10486_v43  ;;  %v3449_v43 = vsel %vm409_vm10, %v8977_v26, %v8978_v10  ;;  %v3308_v14 = vpack.c.bf16 %v3303_v46, %v3303_v46 }
 0x2de   : > { %3047 = vmatpush.bf16.msra.mxu0 %v3029_v25  ;;  %8539 = vmatmul.msk.bf16.vlgmr.msra.gmra.mxu2 %vm409_vm10, %v8536_v44  ;;  %v3458_v59 = vmul.f32 %v3449_v43, %v10427_v19  ;;  %v3896_v12 = vunpack.c.l.bf16 %v3885_v20  ;;  %v3897_v25 = vunpack.c.l.bf16 %v3888_v22 }
 0x2df   : > { %v8981_v32 = vpop.permute.xlu1 %8980  ;;  %3327 = vrot.lane.b32.xlu2 %v3311_v11, %s9296_s19 }
 0x2e0   : > { %8995 = vrot.lane.b32.xlu0 %v8994_v39, %s9289_s26  ;;  %9000 = vrot.lane.b32.xlu1 %v8999_v2, %s9289_s26  ;;  %v8982_v62 = vunpack.i.l.bf16 %v8981_v32  ;;  %v2098_v15 = vpop.f32.mrf.mxu3  ;;  %v3463_v17 = vpack.c.bf16 %v3458_v59, %v3458_v59  ;;  %v8983_v35 = vunpack.i.h.bf16 %v8981_v32  ;;  %v9004_v13 = vpack.i.bf16 %v3896_v12, %v3895_v55 }
 0x2e1   : > { %v2059_v61 = vpop.f32.mrf.mxu0  ;;  %v2072_v7 = vpop.f32.mrf.mxu1  ;;  %v9009_v48 = vpack.i.bf16 %v3894_v41, %v3897_v25 }
 0x2e2   : > { %v3450_v40 = vsel %vm409_vm10, %v8978_v10, %v8982_v62  ;;  %v3460_v49 = vmul.f32 %v8982_v62, %v3431_v4  ;;  %v2241_v24 = vpop.f32.mrf.mxu2  ;;  %v3448_v39 = vsel %vm409_vm10, %v8983_v35, %v8977_v26  ;;  %v3456_v58 = vmul.f32 %v8983_v35, %v10386_v45 }
 0x2e3   : > { %v3459_v23 = vmul.f32 %v3450_v40, %v10437_v3  ;;  %v3457_v10 = vmul.f32 %v3448_v39, %v10442_v18 }
 0x2e4   : > { %v3465_v28 = vpack.c.bf16 %v3460_v49, %v3460_v49  ;;  %v3461_v11 = vpack.c.bf16 %v3456_v58, %v3456_v58 }
 0x2e5   : > { %8540 = vmatmul.msk.bf16.vlgmr.msra.gmra.mxu3 %vm409_vm10, %v8536_v44  ;;  %v3464_v47 = vpack.c.bf16 %v3459_v23, %v3459_v23  ;;  %v3462_v56 = vpack.c.bf16 %v3457_v10, %v3457_v10 }
 0x2e7   : > { %3319 = vrot.lane.b32.xlu2 %v3307_v42, %s9296_s19  ;;  %v4029_v42 = vld [vmem:[#allocation1 + $0x12] sm:$0xff] }
 0x2e8   : > { %3321 = vrot.lane.b32.xlu0 %v3308_v14, %s9296_s19  ;;  %3477 = vrot.lane.b32.xlu1 %v3463_v17, %s9297_s20  ;;  %v2252_v37 = vpop.f32.mrf.mxu3  ;;  %v4028_v14 = vld [vmem:[#allocation1 + $0x9] sm:$0xff]  ;;  %v4037_v36 = vpack.i.b16 %v4029_v42, %v4029_v42 }
 0x2e9   : > { %v2213_v31 = vpop.f32.mrf.mxu0  ;;  %v2259_v52 = vadd.f32 %v2252_v37, %v2103_v33  ;;  %v2226_v27 = vpop.f32.mrf.mxu1  ;;  %v4034_v38 = vpack.i.b16 %v4028_v14, %v4028_v14 }
 0x2ea   : > { %v2256_v21 = vadd.f32 %v2213_v31, %v2100_v34  ;;  %v2257_v8 = vadd.f32 %v2226_v27, %v2101_v1  ;;  %v2343_v16 = vpop.f32.mrf.mxu2  ;;  %v4039_v63 = vperm.slane %v4037_v36, 0 }
 0x2eb   : > { %v4036_v24 = vperm.slane %v4034_v38, 0 }
 0x2ed   : > { %8537 = vmatmul.msk.bf16.vlgmr.msra.gmra.mxu0 %vm409_vm10, %v8536_v44  ;;  %8538 = vmatmul.msk.bf16.vlgmr.msra.gmra.mxu1 %vm409_vm10, %v8536_v44  ;;  %v2362_v44 = vadd.f32 %v2343_v16, %v2258_v5  ;;  %v4049_v27 = vunpack.c.l.bf16 %v4036_v24 }
 0x2ef   : > { %3479 = vrot.lane.b32.xlu2 %v3464_v47, %s9297_s20 }
 0x2f0   : > { %3481 = vrot.lane.b32.xlu0 %v3465_v28, %s9297_s20  ;;  %9005 = vrot.lane.b32.xlu1 %v9004_v13, %s9291_s11  ;;  %v2254_v33 = vpop.f32.mrf.mxu3  ;;  %v4050_v13 = vunpack.c.l.bf16 %v4039_v63 }
 0x2f1   : > { %v2215_v34 = vpop.f32.mrf.mxu0  ;;  %v2228_v2 = vpop.f32.mrf.mxu1  ;;  %v8542_v33 = vld [vmem:[%s12529_s2 + $0x4c] sm:$0xf] }
 0x2f2   : > { %v2345_v53 = vpop.f32.mrf.mxu2 }
 0x2f7   : > { %9010 = vrot.lane.b32.xlu2 %v9009_v48, %s9291_s11 }
 0x2f8   : > { %3473 = vrot.lane.b32.xlu0 %v3461_v11, %s9297_s20  ;;  %3475 = vrot.lane.b32.xlu1 %v3462_v56, %s9297_s20  ;;  %v2356_v26 = vpop.f32.mrf.mxu3 }
 0x2f9   : > { %v2317_v51 = vpop.f32.mrf.mxu0  ;;  %v2363_v1 = vadd.f32 %v2356_v26, %v2259_v52  ;;  %v2330_v32 = vpop.f32.mrf.mxu1 }
 0x2fa   : > { %v2360_v54 = vadd.f32 %v2317_v51, %v2256_v21  ;;  %v2361_v43 = vadd.f32 %v2330_v32, %v2257_v8  ;;  %v2496_v57 = vpop.f32.mrf.mxu2  ;;  %v4027_v32 = vld [vmem:[#allocation1] sm:$0xff] }
 0x2fb   : > { %v2515_v29 = vadd.f32 %v2496_v57, %v2362_v44  ;;  %v9014_v44 = vpack.i.bf16 %v4050_v13, %v4049_v27 }
 0x300   : > { %v2358_v9 = vpop.f32.mrf.mxu3 }
 0x301   : > { %v2319_v46 = vpop.f32.mrf.mxu0  ;;  %v2332_v6 = vpop.f32.mrf.mxu1 }
 0x302   : > { %v2498_v50 = vpop.f32.mrf.mxu2  ;;  %v4031_v6 = vpack.i.b16 %v4027_v32, %v4027_v32 }
 0x304   : > { %v4033_v14 = vperm.slane %v4031_v6, 0 }
 0x308   : > { %v2509_v62 = vpop.f32.mrf.mxu3 }
 0x309   : > { %v2470_v59 = vpop.f32.mrf.mxu0  ;;  %v2516_v15 = vadd.f32 %v2509_v62, %v2363_v1  ;;  %v2483_v4 = vpop.f32.mrf.mxu1 }
 0x30a   : > { %v2513_v61 = vadd.f32 %v2470_v59, %v2360_v54  ;;  %v2514_v60 = vadd.f32 %v2483_v4, %v2361_v43  ;;  %v3560_v54 = vld [vmem:[#allocation2 + $0x14] sm:$0xf]  ;;  %v8583_v4 = vld [vmem:[%s12528_s1 + $0x68] sm:$0xf] }
 0x30b   : > { %v4030_v43 = vld [vmem:[#allocation1 + $0x1b] sm:$0xff]  ;;  %v3585_v9 = vunpack.c.l.bf16 %v3560_v54 }
 0x30c   : > { %v4040_v50 = vpack.i.b16 %v4030_v43, %v4030_v43  ;;  %4180 = vst [vmem:[#allocation1] ss:$9 sm:$0xff] %v8583_v4 }
 0x30e   : > { %v4042_v42 = vperm.slane %v4040_v50, 0 }
 0x310   : > { %v2511_v30 = vpop.f32.mrf.mxu3 }
 0x311   : > { %v2472_v5 = vpop.f32.mrf.mxu0  ;;  %v2485_v7 = vpop.f32.mrf.mxu1 }
 0x313   : > { %v4183_v27 = vld [vmem:[#allocation1 + $0x12] sm:$0xff]  ;;  %v4181_v13 = vld [vmem:[#allocation1] sm:$0xff] }
 0x320   : > { %v3174_v17 = vpop.permute.xlu1 %3173 }
 0x321   : > { %v3170_v20 = vpop.permute.xlu2 %3169 }
 0x328   : > { %v3166_v35 = vpop.permute.xlu1 %3165 }
 0x329   : > { %v10597_v40 = vpop.permute.xlu2 %8985 }
 0x32a   : > { %v8988_v49 = vunpack.i.h.bf16 %v10597_v40  ;;  %v8987_v55 = vunpack.i.l.bf16 %v10597_v40 }
 0x32c   : > { %v3603_v12 = vsel %vm900_vm11, %v8987_v55, %v8988_v49 }
 0x32d   : > { %v3612_v23 = vmul.f32 %v3603_v12, %v10427_v19 }
 0x32f   : > { %v3617_v22 = vpack.c.bf16 %v3612_v23, %v3612_v23  ;;  %v4363_v23 = vld [vmem:[%s12528_s1] sm:$0xf] }
 0x330   : > { %v2652_v37 = vpop.f32.mrf.mxu2  ;;  %v2665_v31 = vpop.f32.mrf.mxu3 }
 0x331   : > { %v2671_v28 = vadd.f32 %v2652_v37, %v2515_v29  ;;  %v3168_v52 = vpop.permute.xlu2 %3167  ;;  %3631 = vrot.lane.b32.xlu2 %v3617_v22, %s9298_s24  ;;  %v2672_v21 = vadd.f32 %v2665_v31, %v2516_v15  ;;  %v4182_v22 = vld [vmem:[#allocation1 + $0x9] sm:$0xff] }
 0x332   : > { %v3175_v8 = vsel %vm404_vm13, %v3166_v35, %v3168_v52  ;;  %v3176_v47 = vsel %vm404_vm13, %v3168_v52, %v3170_v20  ;;  %v2626_v41 = vpop.f32.mrf.mxu0  ;;  %v2639_v25 = vpop.f32.mrf.mxu1 }
 0x333   : > { %v3183_v39 = vsel %vm275_vm7, %v3175_v8, 0  ;;  %v3186_v58 = vsel %vm275_vm7, %v3176_v47, 0  ;;  %v10608_v16 = vadd.f32 %v2626_v41, %v2513_v61  ;;  %v10610_v10 = vadd.f32 %v2639_v25, %v2514_v60  ;;  %v4184_v8 = vld [vmem:[#allocation1 + $0x1b] sm:$0xff] }
 0x334   : > { %3201 = vmatpush.bf16.msrb.mxu0 %v3183_v39  ;;  %3214 = vmatpush.bf16.msrb.mxu1 %v3186_v58  ;;  %4365 = vst [vmem:[#allocation1] ss:$9 sm:$0xff] %v4363_v23  ;;  %v10656_v58 = vld [vmem:[%s12529_s2 + $0x50] sm:$0xf] }
 0x337   : > { %8543 = vmatmul.msk.bf16.vlgmr.msrb.gmra.mxu0 %vm409_vm10, %v8542_v33  ;;  %8544 = vmatmul.msk.bf16.vlgmr.msrb.gmra.mxu1 %vm409_vm10, %v8542_v33 }
 0x338   : > { %v2654_v34 = vpop.f32.mrf.mxu2  ;;  %v2667_v48 = vpop.f32.mrf.mxu3 }
 0x339   : > { %v3172_v2 = vpop.permute.xlu0 %3171  ;;  %9015 = vrot.lane.b32.xlu2 %v9014_v44, %s9292_s13  ;;  %v3328_v62 = vpop.permute.xlu2 %3327 }
 0x33a   : > { %v3177_v11 = vsel %vm404_vm13, %v3170_v20, %v3172_v2  ;;  %v3178_v56 = vsel %vm404_vm13, %v3172_v2, %v3174_v17  ;;  %v2628_v53 = vpop.f32.mrf.mxu0  ;;  %v2641_v26 = vpop.f32.mrf.mxu1  ;;  %v4188_v2 = vpack.i.b16 %v4182_v22, %v4182_v22 }
 0x33b   : > { %v3189_v51 = vsel %vm275_vm7, %v3177_v11, 0  ;;  %v3192_v1 = vsel %vm275_vm7, %v3178_v56, 0  ;;  %v4191_v11 = vpack.i.b16 %v4183_v27, %v4183_v27 }
 0x33c   : > { %3227 = vmatpush.bf16.msrb.mxu2 %v3189_v51  ;;  %3240 = vmatpush.bf16.msrb.mxu3 %v3192_v1  ;;  %v4185_v1 = vpack.i.b16 %v4181_v13, %v4181_v13 }
 0x33d   : > { %v4193_v6 = vperm.slane %v4191_v11, 0 }
 0x33f   : > { %8545 = vmatmul.msk.bf16.vlgmr.msrb.gmra.mxu2 %vm409_vm10, %v8542_v33  ;;  %8546 = vmatmul.msk.bf16.vlgmr.msrb.gmra.mxu3 %vm409_vm10, %v8542_v33  ;;  %v3714_v33 = vld [vmem:[#allocation2 + $0x14] sm:$0xf] }
 0x340   : > { %v2808_v57 = vpop.f32.mrf.mxu2  ;;  %v3739_v48 = vunpack.c.l.bf16 %v3714_v33 }
 0x341   : > { %v2827_v29 = vadd.f32 %v2808_v57, %v2671_v28  ;;  %v2821_v61 = vpop.f32.mrf.mxu3  ;;  %v3320_v47 = vpop.permute.xlu2 %3319  ;;  %v4194_v57 = vpack.i.b16 %v4184_v8, %v4184_v8 }
 0x342   : > { %v8991_v46 = vpop.permute.xlu0 %8990  ;;  %v10627_v60 = vadd.f32 %v2821_v61, %v2672_v21 }
 0x343   : > { %v8993_v59 = vunpack.i.h.bf16 %v8991_v46  ;;  %v8992_v15 = vunpack.i.l.bf16 %v8991_v46  ;;  %v4190_v46 = vperm.slane %v4188_v2, 0  ;;  %v4196_v4 = vperm.slane %v4194_v57, 0 }
 0x345   : > { %v3602_v30 = vsel %vm900_vm11, %v8993_v59, %v8987_v55  ;;  %v3604_v5 = vsel %vm900_vm11, %v8988_v49, %v8992_v15  ;;  %v3614_v7 = vmul.f32 %v8992_v15, %v3585_v9  ;;  %v4048_v49 = vunpack.c.l.bf16 %v4033_v14 }
 0x346   : > { %v3613_v0 = vmul.f32 %v3604_v5, %v10437_v3  ;;  %v3611_v20 = vmul.f32 %v3602_v30, %v10442_v18  ;;  %v4051_v55 = vunpack.c.l.bf16 %v4042_v42  ;;  %v3610_v37 = vmul.f32 %v8993_v59, %v10386_v45 }
 0x347   : > { %v3619_v17 = vpack.c.bf16 %v3614_v7, %v3614_v7  ;;  %v4187_v15 = vperm.slane %v4185_v1, 0  ;;  %v4205_v22 = vunpack.c.l.bf16 %v4196_v4 }
 0x348   : > { %v3618_v40 = vpack.c.bf16 %v3613_v0, %v3613_v0  ;;  %v3616_v38 = vpack.c.bf16 %v3611_v20, %v3611_v20  ;;  %v2810_v36 = vpop.f32.mrf.mxu2  ;;  %v3615_v44 = vpack.c.bf16 %v3610_v37, %v3610_v37 }
 0x349   : > { %3635 = vrot.lane.b32.xlu1 %v3619_v17, %s9298_s24  ;;  %v2823_v21 = vpop.f32.mrf.mxu3  ;;  %v3480_v50 = vpop.permute.xlu2 %3479  ;;  %v4204_v36 = vunpack.c.l.bf16 %v4193_v6 }
 0x34a   : > { %v10634_v12 = vpop.permute.xlu0 %3323  ;;  %3633 = vrot.lane.b32.xlu0 %v3618_v40, %s9298_s24  ;;  %3629 = vrot.lane.b32.xlu2 %v3616_v38, %s9298_s24  ;;  %v3326_v24 = vpop.permute.xlu1 %3325  ;;  %v4203_v40 = vunpack.c.l.bf16 %v4190_v46 }
 0x34b   : > { %v2782_v63 = vpop.f32.mrf.mxu0  ;;  %v3331_v31 = vsel %vm625_vm2, %v10634_v12, %v3326_v24  ;;  %v3332_v35 = vsel %vm625_vm2, %v3326_v24, %v3328_v62  ;;  %v2795_v52 = vpop.f32.mrf.mxu1 }
 0x34c   : > { %v10646_v28 = vadd.f32 %v2782_v63, %v10608_v16  ;;  %v10649_v41 = vadd.f32 %v2795_v52, %v10610_v10  ;;  %v3343_v25 = vsel %vm275_vm7, %v3331_v31, 0  ;;  %v3346_v39 = vsel %vm275_vm7, %v3332_v35, 0  ;;  %v10696_v52 = vld [vmem:[%s12529_s2 + $0x54] sm:$0xf] }
 0x34d   : > { %3381 = vmatpush.bf16.msra.mxu2 %v3343_v25  ;;  %3394 = vmatpush.bf16.msra.mxu3 %v3346_v39  ;;  %v9019_v16 = vpack.i.bf16 %v4048_v49, %v4051_v55  ;;  %v4202_v49 = vunpack.c.l.bf16 %v4187_v15  ;;  %v9024_v21 = vpack.i.bf16 %v4204_v36, %v4203_v40 }
 0x350   : > { %8551 = vmatmul.msk.bf16.vlgmr.msra.gmra.mxu2 %vm409_vm10, %v10656_v58  ;;  %8552 = vmatmul.msk.bf16.vlgmr.msra.gmra.mxu3 %vm409_vm10, %v10656_v58 }
 0x351   : > { %v2964_v10 = vpop.f32.mrf.mxu2  ;;  %3627 = vrot.lane.b32.xlu1 %v3615_v44, %s9298_s24  ;;  %v9011_v27 = vpop.permute.xlu2 %9010 }
 0x352   : > { %v10663_v34 = vpop.permute.xlu0 %8995  ;;  %9020 = vrot.lane.b32.xlu0 %v9019_v16, %s9292_s13  ;;  %v10666_v56 = vadd.f32 %v2964_v10, %v2827_v29  ;;  %v9001_v51 = vpop.permute.xlu1 %9000  ;;  %v3867_v16 = vld [vmem:[#allocation2 + $0xc] sm:$0xff]  ;;  %v3868_v10 = vld [vmem:[#allocation2 + $0x14] sm:$0xf] }
 0x353   : > { %v8998_v53 = vunpack.i.h.bf16 %v10663_v34  ;;  %v8997_v26 = vunpack.i.l.bf16 %v10663_v34  ;;  %v9002_v54 = vunpack.i.l.bf16 %v9001_v51  ;;  %v2784_v32 = vpop.f32.mrf.mxu0  ;;  %v2797_v43 = vpop.f32.mrf.mxu1  ;;  %v9003_v30 = vunpack.i.h.bf16 %v9001_v51 }
 0x354   : > { %v10716_v51 = vunpack.c.l.bf16 %v3867_v16  ;;  %v3893_v32 = vunpack.c.l.bf16 %v3868_v10  ;;  %v9013_v43 = vunpack.i.h.bf16 %v9011_v27 }
 0x355   : > { %v3757_v9 = vsel %vm1056_vm12, %v8997_v26, %v8998_v53  ;;  %v3758_v62 = vsel %vm1056_vm12, %v8998_v53, %v9002_v54  ;;  %v3768_v59 = vmul.f32 %v9002_v54, %v3739_v48  ;;  %v3764_v37 = vmul.f32 %v9003_v30, %v10386_v45 }
 0x356   : > { %v3766_v29 = vmul.f32 %v3757_v9, %v10427_v19  ;;  %v3767_v61 = vmul.f32 %v3758_v62, %v10437_v3 }
 0x357   : > { %v3773_v5 = vpack.c.bf16 %v3768_v59, %v3768_v59  ;;  %v3769_v13 = vpack.c.bf16 %v3764_v37, %v3764_v37 }
 0x358   : > { %v2977_v7 = vpop.f32.mrf.mxu3  ;;  %v3771_v0 = vpack.c.bf16 %v3766_v29, %v3766_v29  ;;  %v3772_v17 = vpack.c.bf16 %v3767_v61, %v3767_v61 }
 0x359   : > { %v2966_v20 = vpop.f32.mrf.mxu2  ;;  %v10675_v14 = vadd.f32 %v2977_v7, %v10627_v60  ;;  %3789 = vrot.lane.b32.xlu2 %v3773_v5, %s9300_s27 }
 0x35a   : > { %v3322_v42 = vpop.permute.xlu0 %3321  ;;  %3785 = vrot.lane.b32.xlu0 %v3771_v0, %s9300_s27  ;;  %v10682_v38 = vpop.permute.xlu1 %3477  ;;  %3787 = vrot.lane.b32.xlu1 %v3772_v17, %s9300_s27 }
 0x35b   : > { %v3329_v19 = vsel %vm625_vm2, %v3320_v47, %v3322_v42  ;;  %v3330_v3 = vsel %vm625_vm2, %v3322_v42, %v10634_v12  ;;  %v3485_v60 = vsel %vm780_vm3, %v10682_v38, %v3480_v50  ;;  %v2938_v55 = vpop.f32.mrf.mxu0  ;;  %v2951_v23 = vpop.f32.mrf.mxu1  ;;  %v9012_v47 = vunpack.i.l.bf16 %v9011_v27 }
 0x35c   : > { %v3337_v24 = vsel %vm275_vm7, %v3329_v19, 0  ;;  %v3340_v63 = vsel %vm275_vm7, %v3330_v3, 0  ;;  %v2981_v12 = vadd.f32 %v2938_v55, %v10646_v28  ;;  %v2982_v31 = vadd.f32 %v2951_v23, %v10649_v41 }
 0x35d   : > { %3355 = vmatpush.bf16.msra.mxu0 %v3337_v24  ;;  %3368 = vmatpush.bf16.msra.mxu1 %v3340_v63  ;;  %v3497_v35 = vsel %vm275_vm7, %v3485_v60, 0  ;;  %v9029_v28 = vpack.i.bf16 %v4202_v49, %v4205_v22  ;;  %v3756_v41 = vsel %vm1056_vm12, %v9003_v30, %v8997_v26  ;;  %v10714_v26 = vunpack.c.h.bf16 %v3867_v16 }
 0x35e   : > { %3535 = vmatpush.bf16.msrb.mxu2 %v3497_v35  ;;  %v3922_v4 = vmul.f32 %v9012_v47, %v3893_v32  ;;  %v3918_v3 = vmul.f32 %v9013_v43, %v10386_v45 }
 0x360   : > { %8549 = vmatmul.msk.bf16.vlgmr.msra.gmra.mxu0 %vm409_vm10, %v10656_v58  ;;  %8550 = vmatmul.msk.bf16.vlgmr.msra.gmra.mxu1 %vm409_vm10, %v10656_v58  ;;  %v2979_v8 = vpop.f32.mrf.mxu3  ;;  %v3927_v36 = vpack.c.bf16 %v3922_v4, %v3922_v4 }
 0x361   : > { %8557 = vmatmul.msk.bf16.vlgmr.msrb.gmra.mxu2 %vm409_vm10, %v10696_v52  ;;  %v3075_v25 = vpop.f32.mrf.mxu2  ;;  %3781 = vrot.lane.b32.xlu2 %v3769_v13, %s9300_s27 }
 0x362   : > { %v3482_v39 = vpop.permute.xlu0 %3481  ;;  %v10706_v33 = vadd.f32 %v3075_v25, %v10666_v56  ;;  %9025 = vrot.lane.b32.xlu0 %v9024_v21, %s9293_s14  ;;  %v9006_v44 = vpop.permute.xlu1 %9005  ;;  %9030 = vrot.lane.b32.xlu1 %v9029_v28, %s9293_s14  ;;  %v3765_v56 = vmul.f32 %v3756_v41, %v10442_v18  ;;  %v8560_v21 = vld [vmem:[%s12529_s2 + $0x58] sm:$0xf] }
 0x363   : > { %v3486_v58 = vsel %vm780_vm3, %v3480_v50, %v3482_v39  ;;  %v9008_v48 = vunpack.i.h.bf16 %v9006_v44  ;;  %v9007_v2 = vunpack.i.l.bf16 %v9006_v44  ;;  %v2940_v11 = vpop.f32.mrf.mxu0  ;;  %v2953_v53 = vpop.f32.mrf.mxu1 }
 0x364   : > { %v3500_v34 = vsel %vm275_vm7, %v3486_v58, 0  ;;  %v3770_v50 = vpack.c.bf16 %v3765_v56, %v3765_v56 }
 0x365   : > { %3548 = vmatpush.bf16.msrb.mxu3 %v3500_v34  ;;  %v3912_v1 = vsel %vm1212_vm14, %v9008_v48, %v9012_v47  ;;  %v3911_v54 = vsel %vm1212_vm14, %v9007_v2, %v9008_v48  ;;  %v3910_v46 = vsel %vm1212_vm14, %v9013_v43, %v9007_v2  ;;  %v4022_v48 = vld [vmem:[#allocation2 + $0x14] sm:$0xf]  ;;  %v10764_v2 = vld [vmem:[#allocation2 + $0x4] sm:$0xff] }
 0x366   : > { %v3921_v57 = vmul.f32 %v3912_v1, %v10714_v26  ;;  %v3920_v9 = vmul.f32 %v3911_v54, %v10716_v51  ;;  %v4047_v56 = vunpack.c.l.bf16 %v4022_v48 }
 0x368   : > { %8558 = vmatmul.msk.bf16.vlgmr.msrb.gmra.mxu3 %vm409_vm10, %v10696_v52  ;;  %v3088_v6 = vpop.f32.mrf.mxu3  ;;  %v3926_v62 = vpack.c.bf16 %v3921_v57, %v3921_v57  ;;  %v3925_v59 = vpack.c.bf16 %v3920_v9, %v3920_v9  ;;  %v4043_v9 = vunpack.c.l.bf16 %v10764_v2 }
 0x369   : > { %v10726_v29 = vadd.f32 %v3088_v6, %v10675_v14  ;;  %v3077_v61 = vpop.f32.mrf.mxu2  ;;  %v3919_v14 = vmul.f32 %v3910_v46, %v10442_v18  ;;  %v3923_v18 = vpack.c.bf16 %v3918_v3, %v3918_v3 }
 0x36a   : > { %v3474_v15 = vpop.permute.xlu0 %3473  ;;  %v3476_v30 = vpop.permute.xlu1 %3475  ;;  %3783 = vrot.lane.b32.xlu0 %v3770_v50, %s9300_s27  ;;  %3941 = vrot.lane.b32.xlu2 %v3926_v62, %s9301_s9 }
 0x36b   : > { %v3483_v5 = vsel %vm780_vm3, %v3474_v15, %v3476_v30  ;;  %v3484_v7 = vsel %vm780_vm3, %v3476_v30, %v10682_v38  ;;  %3939 = vrot.lane.b32.xlu1 %v3925_v59, %s9301_s9  ;;  %v3049_v0 = vpop.f32.mrf.mxu0  ;;  %v3062_v20 = vpop.f32.mrf.mxu1  ;;  %v3924_v38 = vpack.c.bf16 %v3919_v14, %v3919_v14  ;;  %v4044_v14 = vunpack.c.h.bf16 %v10764_v2 }
 0x36c   : > { %v3092_v42 = vadd.f32 %v3049_v0, %v2981_v12  ;;  %v3093_v17 = vadd.f32 %v3062_v20, %v2982_v31  ;;  %v3491_v40 = vsel %vm275_vm7, %v3483_v5, 0  ;;  %v3494_v19 = vsel %vm275_vm7, %v3484_v7, 0 }
 0x36d   : > { %3509 = vmatpush.bf16.msrb.mxu0 %v3491_v40  ;;  %3522 = vmatpush.bf16.msrb.mxu1 %v3494_v19 }
 0x370   : > { %8555 = vmatmul.msk.bf16.vlgmr.msrb.gmra.mxu0 %vm409_vm10, %v10696_v52  ;;  %8556 = vmatmul.msk.bf16.vlgmr.msrb.gmra.mxu1 %vm409_vm10, %v10696_v52  ;;  %v3090_v49 = vpop.f32.mrf.mxu3 }
 0x371   : > { %v8566_v49 = vld [vmem:[%s12529_s2 + $0x5c] sm:$0xf] }
 0x372   : > { %3943 = vrot.lane.b32.xlu0 %v3927_v36, %s9301_s9  ;;  %3937 = vrot.lane.b32.xlu2 %v3924_v38, %s9301_s9 }
 0x373   : > { %3935 = vrot.lane.b32.xlu1 %v3923_v18, %s9301_s9  ;;  %v3051_v60 = vpop.f32.mrf.mxu0  ;;  %v3064_v45 = vpop.f32.mrf.mxu1  ;;  %v4176_v18 = vld [vmem:[#allocation2 + $0x14] sm:$0xf] }
 0x38b   : > { %v3632_v55 = vpop.permute.xlu2 %3631 }
 0x393   : > { %v9016_v23 = vpop.permute.xlu2 %9015 }
 0x394   : > { %v9018_v24 = vunpack.i.h.bf16 %v9016_v23  ;;  %v9017_v63 = vunpack.i.l.bf16 %v9016_v23 }
 0x396   : > { %v4065_v22 = vsel %vm1368_vm15, %v9017_v63, %v9018_v24 }
 0x397   : > { %v4074_v37 = vmul.f32 %v4065_v22, %v10716_v51  ;;  %v4201_v22 = vunpack.c.l.bf16 %v4176_v18 }
 0x399   : > { %v4079_v12 = vpack.c.bf16 %v4074_v37, %v4074_v37 }
 0x39b   : > { %4093 = vrot.lane.b32.xlu0 %v4079_v12, %s9303_s29 }
 0x3a4   : > { %v3630_v31 = vpop.permute.xlu2 %3629 }
 0x3a5   : > { %v3638_v35 = vsel %vm12619_vm0, %v3630_v31, %v3632_v55 }
 0x3a6   : > { %v3648_v52 = vsel %vm275_vm7, %v3638_v35, 0 }
 0x3a7   : > { %3676 = vmatpush.bf16.msra.mxu1 %v3648_v52 }
 0x3aa   : > { %8562 = vmatmul.msk.bf16.vlgmr.msra.gmra.mxu1 %vm409_vm10, %v8560_v21 }
 0x3b3   : > { %v3790_v25 = vpop.permute.xlu2 %3789 }
 0x3b4   : > { %v3203_v28 = vpop.f32.mrf.mxu0  ;;  %v3216_v13 = vpop.f32.mrf.mxu1 }
 0x3b5   : > { %v10754_v27 = vadd.f32 %v3203_v28, %v3092_v42  ;;  %v10756_v8 = vadd.f32 %v3216_v13, %v3093_v17 }
 0x3bb   : > { %v3636_v47 = vpop.permute.xlu1 %3635  ;;  %v3782_v62 = vpop.permute.xlu2 %3781 }
 0x3bc   : > { %v3634_v41 = vpop.permute.xlu0 %3633  ;;  %v3205_v58 = vpop.f32.mrf.mxu0 }
 0x3bd   : > { %v3639_v39 = vsel %vm12620_vm5, %v3632_v55, %v3634_v41  ;;  %v3640_v16 = vsel %vm12619_vm0, %v3634_v41, %v3636_v47  ;;  %v3218_v34 = vpop.f32.mrf.mxu1  ;;  %vm12621_vm5 = vmmov %vm12619_vm0  ;;  %vm12622_vm0 = vcmask 965632  }
 0x3be   : > { %v3651_v44 = vsel %vm275_vm7, %v3639_v39, 0  ;;  %v3654_v10 = vsel %vm275_vm7, %v3640_v16, 0 }
 0x3bf   : > { %3689 = vmatpush.bf16.msra.mxu2 %v3651_v44  ;;  %3702 = vmatpush.bf16.msra.mxu3 %v3654_v10 }
 0x3c2   : > { %8563 = vmatmul.msk.bf16.vlgmr.msra.gmra.mxu2 %vm409_vm10, %v8560_v21  ;;  %8564 = vmatmul.msk.bf16.vlgmr.msra.gmra.mxu3 %vm409_vm10, %v8560_v21  ;;  %v3229_v11 = vpop.f32.mrf.mxu2  ;;  %v3242_v53 = vpop.f32.mrf.mxu3 }
 0x3c3   : > { %v3248_v1 = vadd.f32 %v3229_v11, %v10706_v33  ;;  %v3249_v54 = vadd.f32 %v3242_v53, %v10726_v29  ;;  %v3628_v32 = vpop.permute.xlu1 %3627 }
 0x3c4   : > { %v9021_v43 = vpop.permute.xlu0 %9020  ;;  %v3637_v57 = vsel %vm12621_vm5, %v3628_v32, %v3630_v31  ;;  %vm12623_vm5 = vmmov %vm12622_vm0  ;;  %v10783_v38 = vpop.permute.xlu2 %3941 }
 0x3c5   : > { %v9023_v46 = vunpack.i.h.bf16 %v9021_v43  ;;  %v9022_v6 = vunpack.i.l.bf16 %v9021_v43  ;;  %v3645_v50 = vsel %vm275_vm7, %v3637_v57, 0 }
 0x3c6   : > { %3663 = vmatpush.bf16.msra.mxu0 %v3645_v50 }
 0x3c7   : > { %v4072_v59 = vmul.f32 %v9023_v46, %v4043_v9  ;;  %v4066_v15 = vsel %vm1368_vm15, %v9018_v24, %v9022_v6  ;;  %v4076_v61 = vmul.f32 %v9022_v6, %v4047_v56  ;;  %v4064_v0 = vsel %vm1368_vm15, %v9023_v46, %v9017_v63 }
 0x3c8   : > { %v4075_v33 = vmul.f32 %v4066_v15, %v10714_v26  ;;  %v4073_v19 = vmul.f32 %v4064_v0, %v4044_v14 }
 0x3c9   : > { %v4077_v4 = vpack.c.bf16 %v4072_v59, %v4072_v59  ;;  %v4081_v29 = vpack.c.bf16 %v4076_v61, %v4076_v61  ;;  %8561 = vmatmul.msk.bf16.vlgmr.msra.gmra.mxu0 %vm409_vm10, %v8560_v21 }
 0x3ca   : > { %v4080_v30 = vpack.c.bf16 %v4075_v33, %v4075_v33  ;;  %v3231_v5 = vpop.f32.mrf.mxu2  ;;  %v3244_v7 = vpop.f32.mrf.mxu3  ;;  %v4078_v60 = vpack.c.bf16 %v4073_v19, %v4073_v19 }
 0x3cb   : > { %4089 = vrot.lane.b32.xlu0 %v4077_v4, %s9303_s29  ;;  %4097 = vrot.lane.b32.xlu2 %v4081_v29, %s9303_s29 }
 0x3cc   : > { %4095 = vrot.lane.b32.xlu1 %v4080_v30, %s9303_s29  ;;  %v3786_v20 = vpop.permute.xlu0 %3785  ;;  %v3788_v42 = vpop.permute.xlu1 %3787 }
 0x3cd   : > { %v3793_v17 = vsel %vm12622_vm0, %v3786_v20, %v3788_v42  ;;  %v3794_v40 = vsel %vm12623_vm5, %v3788_v42, %v3790_v25  ;;  %vm12624_vm0 = vcmask 146432   ;;  %v3938_v25 = vpop.permute.xlu2 %3937 }
 0x3ce   : > { %v3805_v3 = vsel %vm275_vm7, %v3793_v17, 0  ;;  %v3808_v36 = vsel %vm275_vm7, %v3794_v40, 0  ;;  %vm12625_vm5 = vmmov %vm12624_vm0 }
 0x3cf   : > { %3843 = vmatpush.bf16.msrb.mxu2 %v3805_v3  ;;  %3856 = vmatpush.bf16.msrb.mxu3 %v3808_v36  ;;  %vm12626_vm1 = vmmov %vm12624_vm0 }
 0x3d2   : > { %8569 = vmatmul.msk.bf16.vlgmr.msrb.gmra.mxu2 %vm409_vm10, %v8566_v49  ;;  %8570 = vmatmul.msk.bf16.vlgmr.msrb.gmra.mxu3 %vm409_vm10, %v8566_v49 }
 0x3d3   : > { %v3383_v45 = vpop.f32.mrf.mxu2  ;;  %v3396_v55 = vpop.f32.mrf.mxu3 }
 0x3d4   : > { %v3402_v23 = vadd.f32 %v3383_v45, %v3248_v1  ;;  %v10790_v24 = vadd.f32 %v3396_v55, %v3249_v54  ;;  %v9026_v63 = vpop.permute.xlu0 %9025  ;;  %4091 = vrot.lane.b32.xlu1 %v4078_v60, %s9303_s29  ;;  %v9031_v31 = vpop.permute.xlu1 %9030 }
 0x3d5   : > { %v9028_v37 = vunpack.i.h.bf16 %v9026_v63  ;;  %v9027_v12 = vunpack.i.l.bf16 %v9026_v63  ;;  %v9032_v35 = vunpack.i.l.bf16 %v9031_v31  ;;  %v9033_v21 = vunpack.i.h.bf16 %v9031_v31  ;;  %v8578_v31 = vld [vmem:[%s12529_s2 + $0x64] sm:$0xf] }
 0x3d7   : > { %v4219_v52 = vsel %vm12624_vm0, %v9027_v12, %v9028_v37  ;;  %v4220_v28 = vsel %vm12625_vm5, %v9028_v37, %v9032_v35  ;;  %v4230_v13 = vmul.f32 %v9032_v35, %v4201_v22  ;;  %v4218_v34 = vsel %vm12626_vm1, %v9033_v21, %v9027_v12  ;;  %vm12631_vm1 = vmmov %vm12630_vm4 }
 0x3d8   : > { %v4228_v47 = vmul.f32 %v4219_v52, %v10716_v51  ;;  %v4229_v41 = vmul.f32 %v4220_v28, %v10714_v26  ;;  %v4226_v48 = vmul.f32 %v9033_v21, %v4043_v9  ;;  %vm12628_vm0 = vcmask 965632  }
 0x3d9   : > { %v4235_v39 = vpack.c.bf16 %v4230_v13, %v4230_v13  ;;  %vm12629_vm5 = vmmov %vm12628_vm0  ;;  %v4227_v50 = vmul.f32 %v4218_v34, %v4044_v14 }
 0x3da   : > { %v4233_v58 = vpack.c.bf16 %v4228_v47, %v4228_v47  ;;  %v4234_v44 = vpack.c.bf16 %v4229_v41, %v4229_v41 }
 0x3db   : > { %v3385_v16 = vpop.f32.mrf.mxu2  ;;  %v3398_v10 = vpop.f32.mrf.mxu3  ;;  %v4232_v59 = vpack.c.bf16 %v4227_v50, %v4227_v50 }
 0x3dc   : > { %v3784_v2 = vpop.permute.xlu0 %3783  ;;  %4251 = vrot.lane.b32.xlu1 %v4235_v39, %s12627_s10  ;;  %4247 = vrot.lane.b32.xlu2 %v4233_v58, %s12627_s10  ;;  %v4328_v10 = vld [vmem:[%s12530_s3] sm:$0xff] }
 0x3dd   : > { %v3357_v11 = vpop.f32.mrf.mxu0  ;;  %v3791_v53 = vsel %vm12628_vm0, %v3782_v62, %v3784_v2  ;;  %v3792_v56 = vsel %vm12629_vm5, %v3784_v2, %v3786_v20  ;;  %v3940_v26 = vpop.permute.xlu1 %3939  ;;  %4249 = vrot.lane.b32.xlu0 %v4234_v44, %s12627_s10  ;;  %vm12633_vm0 = vmmov %vm12631_vm1  ;;  %vm12634_vm5 = vcmask 908288  }
 0x3de   : > { %v3400_v51 = vadd.f32 %v3357_v11, %v10754_v27  ;;  %v3370_v1 = vpop.f32.mrf.mxu1  ;;  %v3946_v54 = vsel %vm12630_vm4, %v3938_v25, %v3940_v26  ;;  %v3947_v32 = vsel %vm12631_vm1, %v3940_v26, %v10783_v38  ;;  %v3799_v57 = vsel %vm275_vm7, %v3791_v53, 0  ;;  %v8572_v27 = vld [vmem:[%s12529_s2 + $0x60] sm:$0xf]  ;;  %vm12632_vm4 = vmmov %vm12631_vm1 }
 0x3df   : > { %v3401_v43 = vadd.f32 %v3370_v1, %v10756_v8  ;;  %3817 = vmatpush.bf16.msrb.mxu0 %v3799_v57  ;;  %v3802_v9 = vsel %vm275_vm7, %v3792_v56, 0  ;;  %v3959_v46 = vsel %vm275_vm7, %v3947_v32, 0  ;;  %v3956_v6 = vsel %vm275_vm7, %v3946_v54, 0  ;;  %vm12635_vm1 = vmmov %vm12634_vm5  ;;  %v8584_v32 = vld [vmem:[%s12529_s2 + $0x68] sm:$0xf] }
 0x3e0   : > { %3830 = vmatpush.bf16.msrb.mxu1 %v3802_v9  ;;  %3997 = vmatpush.bf16.msra.mxu2 %v3959_v46  ;;  %v4231_v8 = vpack.c.bf16 %v4226_v48, %v4226_v48  ;;  %v10860_v57 = vld [vmem:[#allocation1 + $0x9] sm:$0xff]  ;;  %v10862_v9 = vld [vmem:[#allocation1 + $0x12] sm:$0xff]  ;;  %v10864_v46 = vld [vmem:[#allocation1 + $0x1b] sm:$0xff] }
 0x3e2   : > { %8567 = vmatmul.msk.bf16.vlgmr.msrb.gmra.mxu0 %vm409_vm10, %v8566_v49 }
 0x3e3   : > { %8568 = vmatmul.msk.bf16.vlgmr.msrb.gmra.mxu1 %vm409_vm10, %v8566_v49  ;;  %8575 = vmatmul.msk.bf16.vlgmr.msra.gmra.mxu2 %vm409_vm10, %v8572_v27 }
 0x3e4   : > { %3984 = vmatpush.bf16.msra.mxu1 %v3956_v6  ;;  %v3537_v62 = vpop.f32.mrf.mxu2  ;;  %v3944_v61 = vpop.permute.xlu0 %3943  ;;  %4243 = vrot.lane.b32.xlu2 %v4231_v8, %s12627_s10 }
 0x3e5   : > { %v3556_v15 = vadd.f32 %v3537_v62, %v3402_v23  ;;  %v3359_v33 = vpop.f32.mrf.mxu0  ;;  %v3948_v4 = vsel %vm12632_vm4, %v10783_v38, %v3944_v61  ;;  %v3936_v29 = vpop.permute.xlu1 %3935  ;;  %4245 = vrot.lane.b32.xlu0 %v4232_v59, %s12627_s10  ;;  %vm12636_vm4 = vmmov %vm12635_vm1  ;;  %4331 = vperm.xlu1 %9034, %v4328_v10   ;;  %v8611_v10 = vld [vmem:[%s12528_s1 + $0x10] sm:$0xf] }
 0x3e6   : > { %v3372_v30 = vpop.f32.mrf.mxu1  ;;  %v3962_v5 = vsel %vm275_vm7, %v3948_v4, 0  ;;  %v3945_v7 = vsel %vm12633_vm0, %v3936_v29, %v3938_v25  ;;  %vm12637_vm0 = vmmov %vm12635_vm1  ;;  %v8589_v33 = vld [vmem:[%s12528_s1 + $0x4] sm:$0xf] }
 0x3e7   : > { %v3953_v0 = vsel %vm275_vm7, %v3945_v7, 0  ;;  %4010 = vmatpush.bf16.msra.mxu3 %v3962_v5 }
 0x3e8   : > { %3971 = vmatpush.bf16.msra.mxu0 %v3953_v0  ;;  %v8599_v0 = vld [vmem:[%s12528_s1 + $0x8] sm:$0xf] }
 0x3ea   : > { %8576 = vmatmul.msk.bf16.vlgmr.msra.gmra.mxu3 %vm409_vm10, %v8572_v27 }
 0x3eb   : > { %v3550_v20 = vpop.f32.mrf.mxu3 }
 0x3ec   : > { %v3557_v14 = vadd.f32 %v3550_v20, %v10790_v24  ;;  %v3539_v42 = vpop.f32.mrf.mxu2 }
 0x3ed   : > { %v3511_v17 = vpop.f32.mrf.mxu0 }
 0x3ee   : > { %v3524_v40 = vpop.f32.mrf.mxu1  ;;  %v3554_v19 = vadd.f32 %v3511_v17, %v3400_v51 }
 0x3ef   : > { %v3555_v3 = vadd.f32 %v3524_v40, %v3401_v43  ;;  %v10856_v43 = vld [vmem:[#allocation1] sm:$0xff] }
 0x3f0   : > { %4404 = vst [vmem:[#allocation1] ss:$9 sm:$0xff] %v8589_v33 }
 0x3f2   : > { %8573 = vmatmul.msk.bf16.vlgmr.msra.gmra.mxu0 %vm409_vm10, %v8572_v27 }
 0x3f3   : > { %v3552_v36 = vpop.f32.mrf.mxu3  ;;  %8574 = vmatmul.msk.bf16.vlgmr.msra.gmra.mxu1 %vm409_vm10, %v8572_v27 }
 0x3f5   : > { %v3513_v49 = vpop.f32.mrf.mxu0 }
 0x3f6   : > { %v3526_v38 = vpop.f32.mrf.mxu1 }
 0x3f7   : > { %v4405_v42 = vld [vmem:[#allocation1] sm:$0xff]  ;;  %v4406_v17 = vld [vmem:[#allocation1 + $0x9] sm:$0xff]  ;;  %v10878_v40 = vld [vmem:[#allocation1 + $0x12] sm:$0xff] }
 0x3f8   : > { %v4409_v36 = vpack.i.b16 %v4405_v42, %v4405_v42  ;;  %v4412_v38 = vpack.i.b16 %v4406_v17, %v4406_v17 }
 0x3fa   : > { %v4411_v49 = vperm.slane %v4409_v36, 0 }
 0x40d   : > { %v4094_v55 = vpop.permute.xlu0 %4093 }
 0x425   : > { %v4098_v23 = vpop.permute.xlu2 %4097 }
 0x427   : > { %v3678_v18 = vpop.f32.mrf.mxu1 }
 0x428   : > { %v10829_v60 = vadd.f32 %v3678_v18, %v3555_v3  ;;  %v10881_v3 = vld [vmem:[#allocation1 + $0x1b] sm:$0xff]  ;;  %v4414_v18 = vperm.slane %v4412_v38, 0 }
 0x429   : > { %4620 = vst [vmem:[#allocation1] ss:$9 sm:$0xff] %v8599_v0 }
 0x42f   : > { %v3680_v45 = vpop.f32.mrf.mxu1 }
 0x430   : > { %v4426_v45 = vunpack.c.l.bf16 %v4411_v49 }
 0x436   : > { %v4248_v2 = vpop.permute.xlu2 %4247 }
 0x43d   : > { %v4090_v21 = vpop.permute.xlu0 %4089 }
 0x43e   : > { %v4096_v63 = vpop.permute.xlu1 %4095  ;;  %v4244_v27 = vpop.permute.xlu2 %4243 }
 0x43f   : > { %v4101_v24 = vsel %vm12634_vm5, %v4094_v55, %v4096_v63  ;;  %v4102_v22 = vsel %vm12635_vm1, %v4096_v63, %v4098_v23  ;;  %vm12638_vm5 = vcmask 900096  }
 0x440   : > { %v4113_v37 = vsel %vm275_vm7, %v4101_v24, 0  ;;  %v4116_v12 = vsel %vm275_vm7, %v4102_v22, 0  ;;  %vm12639_vm1 = vmmov %vm12638_vm5 }
 0x441   : > { %4151 = vmatpush.bf16.msrb.mxu2 %v4113_v37  ;;  %4164 = vmatpush.bf16.msrb.mxu3 %v4116_v12 }
 0x444   : > { %8581 = vmatmul.msk.bf16.vlgmr.msrb.gmra.mxu2 %vm409_vm10, %v8578_v31  ;;  %8582 = vmatmul.msk.bf16.vlgmr.msrb.gmra.mxu3 %vm409_vm10, %v8578_v31 }
 0x445   : > { %v3691_v35 = vpop.f32.mrf.mxu2  ;;  %v3704_v52 = vpop.f32.mrf.mxu3 }
 0x446   : > { %v3710_v28 = vadd.f32 %v3691_v35, %v3556_v15  ;;  %v3711_v13 = vadd.f32 %v3704_v52, %v3557_v14  ;;  %v3665_v47 = vpop.f32.mrf.mxu0  ;;  %v4092_v41 = vpop.permute.xlu1 %4091 }
 0x447   : > { %v3708_v25 = vadd.f32 %v3665_v47, %v3554_v19  ;;  %v4099_v39 = vsel %vm12636_vm4, %v4090_v21, %v4092_v41  ;;  %v4100_v16 = vsel %vm12637_vm0, %v4092_v41, %v4094_v55  ;;  %vm12640_vm4 = vmmov %vm12639_vm1  ;;  %v4427_v55 = vunpack.c.l.bf16 %v4414_v18 }
 0x448   : > { %v4107_v58 = vsel %vm275_vm7, %v4099_v39, 0  ;;  %v4110_v44 = vsel %vm275_vm7, %v4100_v16, 0  ;;  %vm12641_vm0 = vmmov %vm12639_vm1  ;;  %v10886_v39 = vld [vmem:[#allocation1 + $0x9] sm:$0xff]  ;;  %v4623_v16 = vld [vmem:[#allocation1 + $0x12] sm:$0xff] }
 0x449   : > { %4125 = vmatpush.bf16.msrb.mxu0 %v4107_v58  ;;  %4138 = vmatpush.bf16.msrb.mxu1 %v4110_v44  ;;  %v9035_v22 = vpack.i.bf16 %v4427_v55, %v4426_v45  ;;  %v4624_v58 = vld [vmem:[#allocation1 + $0x1b] sm:$0xff]  ;;  %v8605_v44 = vld [vmem:[%s12528_s1 + $0xc] sm:$0xf]  ;;  %v4631_v49 = vpack.i.b16 %v4623_v16, %v4623_v16 }
 0x44a   : > { %v4634_v18 = vpack.i.b16 %v4624_v58, %v4624_v58 }
 0x44b   : > { %9036 = vrot.lane.b32.xlu1 %v9035_v22, %s9284_s12 }
 0x44c   : > { %8579 = vmatmul.msk.bf16.vlgmr.msrb.gmra.mxu0 %vm409_vm10, %v8578_v31  ;;  %8580 = vmatmul.msk.bf16.vlgmr.msrb.gmra.mxu1 %vm409_vm10, %v8578_v31 }
 0x44d   : > { %v3693_v34 = vpop.f32.mrf.mxu2  ;;  %v3706_v48 = vpop.f32.mrf.mxu3 }
 0x44e   : > { %v4252_v11 = vpop.permute.xlu1 %4251  ;;  %v3667_v53 = vpop.f32.mrf.mxu0 }
 0x44f   : > { %v4250_v56 = vpop.permute.xlu0 %4249 }
 0x450   : > { %v4255_v26 = vsel %vm12638_vm5, %v4248_v2, %v4250_v56  ;;  %v4256_v51 = vsel %vm12639_vm1, %v4250_v56, %v4252_v11  ;;  %vm12647_vm5 = vcmask 596992  }
 0x451   : > { %v4267_v1 = vsel %vm275_vm7, %v4255_v26, 0  ;;  %v4270_v54 = vsel %vm275_vm7, %v4256_v51, 0  ;;  %vm12659_vm1 = vmmov %vm12647_vm5 }
 0x452   : > { %4305 = vmatpush.bf16.msra.mxu2 %v4267_v1  ;;  %4318 = vmatpush.bf16.msra.mxu3 %v4270_v54 }
 0x455   : > { %8587 = vmatmul.msk.bf16.vlgmr.msra.gmra.mxu2 %vm409_vm10, %v8584_v32  ;;  %8588 = vmatmul.msk.bf16.vlgmr.msra.gmra.mxu3 %vm409_vm10, %v8584_v32  ;;  %v3845_v6 = vpop.f32.mrf.mxu2  ;;  %v3858_v50 = vpop.f32.mrf.mxu3 }
 0x456   : > { %v3864_v8 = vadd.f32 %v3845_v6, %v3710_v28  ;;  %v3865_v62 = vadd.f32 %v3858_v50, %v3711_v13 }
 0x457   : > { %v4246_v59 = vpop.permute.xlu0 %4245 }
 0x458   : > { %v4253_v15 = vsel %vm12640_vm4, %v4244_v27, %v4246_v59  ;;  %v4254_v61 = vsel %vm12641_vm0, %v4246_v59, %v4248_v2  ;;  %vm12675_vm4 = vcmask 973824   ;;  %vm12684_vm0 = vcmask 965632  }
 0x459   : > { %v4261_v4 = vsel %vm275_vm7, %v4253_v15, 0  ;;  %v4264_v29 = vsel %vm275_vm7, %v4254_v61, 0 }
 0x45a   : > { %4279 = vmatpush.bf16.msra.mxu0 %v4261_v4  ;;  %4292 = vmatpush.bf16.msra.mxu1 %v4264_v29 }
 0x45d   : > { %8585 = vmatmul.msk.bf16.vlgmr.msra.gmra.mxu0 %vm409_vm10, %v8584_v32  ;;  %8586 = vmatmul.msk.bf16.vlgmr.msra.gmra.mxu1 %vm409_vm10, %v8584_v32  ;;  %v3847_v30 = vpop.f32.mrf.mxu2  ;;  %v3860_v5 = vpop.f32.mrf.mxu3 }
 0x45f   : > { %v3819_v7 = vpop.f32.mrf.mxu0 }
 0x460   : > { %v3862_v20 = vadd.f32 %v3819_v7, %v3708_v25  ;;  %v3832_v14 = vpop.f32.mrf.mxu1  ;;  %v10884_v25 = vld [vmem:[#allocation1] sm:$0xff] }
 0x461   : > { %v3863_v19 = vadd.f32 %v3832_v14, %v10829_v60  ;;  %4773 = vst [vmem:[#allocation1] ss:$9 sm:$0xff] %v8605_v44 }
 0x466   : > { %v3999_v23 = vpop.f32.mrf.mxu2 }
 0x467   : > { %v4018_v63 = vadd.f32 %v3999_v23, %v3864_v8  ;;  %v3821_v24 = vpop.f32.mrf.mxu0 }
 0x468   : > { %v3834_v37 = vpop.f32.mrf.mxu1  ;;  %v4776_v34 = vld [vmem:[#allocation1 + $0x12] sm:$0xff]  ;;  %v4777_v48 = vld [vmem:[#allocation1 + $0x1b] sm:$0xff]  ;;  %v10896_v56 = vld [vmem:[#allocation1 + $0x9] sm:$0xff] }
 0x469   : > { %v10894_v2 = vld [vmem:[#allocation1] sm:$0xff]  ;;  %v4784_v11 = vpack.i.b16 %v4776_v34, %v4776_v34  ;;  %v4787_v53 = vpack.i.b16 %v4777_v48, %v4777_v48 }
 0x46a   : > { %4926 = vst [vmem:[#allocation1] ss:$9 sm:$0xff] %v8611_v10 }
 0x46b   : > { %v4786_v26 = vperm.slane %v4784_v11, 0  ;;  %v4789_v51 = vperm.slane %v4787_v53, 0 }
 0x46d   : > { %v4012_v12 = vpop.f32.mrf.mxu3  ;;  %v4797_v1 = vunpack.c.l.bf16 %v4786_v26  ;;  %v4798_v54 = vunpack.c.l.bf16 %v4789_v51  ;;  %v4778_v51 = vpack.i.b16 %v10894_v2, %v10894_v2 }
 0x46e   : > { %v4019_v31 = vadd.f32 %v4012_v12, %v3865_v62  ;;  %v4001_v35 = vpop.f32.mrf.mxu2  ;;  %v4415_v12 = vpack.i.b16 %v10878_v40, %v10878_v40 }
 0x46f   : > { %v3973_v60 = vpop.f32.mrf.mxu0  ;;  %v9060_v32 = vpack.i.bf16 %v4798_v54, %v4797_v1  ;;  %v4418_v35 = vpack.i.b16 %v10881_v3, %v10881_v3  ;;  %v4781_v1 = vpack.i.b16 %v10896_v56, %v10896_v56 }
 0x470   : > { %v4016_v52 = vadd.f32 %v3973_v60, %v3862_v20  ;;  %v3986_v21 = vpop.f32.mrf.mxu1  ;;  %v4417_v58 = vperm.slane %v4415_v12, 0  ;;  %v8641_v12 = vld [vmem:[%s12528_s1 + $0x24] sm:$0xf] }
 0x471   : > { %v4017_v28 = vadd.f32 %v3986_v21, %v3863_v19  ;;  %9061 = vrot.lane.b32.xlu1 %v9060_v32, %s12593_s18  ;;  %v4927_v6 = vld [vmem:[#allocation1] sm:$0xff]  ;;  %v4928_v50 = vld [vmem:[#allocation1 + $0x9] sm:$0xff]  ;;  %v4332_v19 = vpop.permute.xlu1 %4331  ;;  %v4420_v48 = vperm.slane %v4418_v35, 0 }
 0x472   : > { %v4931_v27 = vpack.i.b16 %v4927_v6, %v4927_v6  ;;  %v4934_v8 = vpack.i.b16 %v4928_v50, %v4928_v50  ;;  %v4428_v6 = vunpack.c.l.bf16 %v4417_v58 }
 0x473   : > { %v4429_v50 = vunpack.c.l.bf16 %v4420_v48 }
 0x474   : > { %v4933_v62 = vperm.slane %v4931_v27, 0  ;;  %v4936_v59 = vperm.slane %v4934_v8, 0  ;;  %v4625_v27 = vpack.i.b16 %v10884_v25, %v10884_v25  ;;  %v4628_v8 = vpack.i.b16 %v10886_v39, %v10886_v39  ;;  %v10918_v25 = vld [vmem:[#allocation1 + $0x12] sm:$0xff]  ;;  %v10920_v39 = vld [vmem:[#allocation1 + $0x1b] sm:$0xff] }
 0x475   : > { %v4014_v13 = vpop.f32.mrf.mxu3 }
 0x476   : > { %v4948_v15 = vunpack.c.l.bf16 %v4933_v62  ;;  %v4949_v61 = vunpack.c.l.bf16 %v4936_v59  ;;  %v4633_v13 = vperm.slane %v4631_v49, 0  ;;  %v4780_v59 = vperm.slane %v4778_v51, 0 }
 0x477   : > { %v3975_v47 = vpop.f32.mrf.mxu0  ;;  %v4627_v2 = vperm.slane %v4625_v27, 0 }
 0x478   : > { %v3988_v41 = vpop.f32.mrf.mxu1  ;;  %v9065_v33 = vpack.i.bf16 %v4949_v61, %v4948_v15  ;;  %v4636_v47 = vperm.slane %v4634_v18, 0  ;;  %v4644_v53 = vunpack.c.l.bf16 %v4633_v13  ;;  %v4783_v15 = vperm.slane %v4781_v1, 0  ;;  %v8647_v13 = vld [vmem:[%s12528_s1 + $0x28] sm:$0xf] }
 0x479   : > { %v9040_v61 = vpack.i.bf16 %v4429_v50, %v4428_v6  ;;  %v4795_v56 = vunpack.c.l.bf16 %v4780_v59  ;;  %v8670_v50 = vld [vmem:[%s12528_s1 + $0x38] sm:$0xf] }
 0x47a   : > { %9066 = vrot.lane.b32.xlu1 %v9065_v33, %s9288_s23  ;;  %v4645_v3 = vunpack.c.l.bf16 %v4636_v47  ;;  %v4630_v33 = vperm.slane %v4628_v8, 0 }
 0x47c   : > { %v9050_v62 = vpack.i.bf16 %v4645_v3, %v4644_v53 }
 0x4c7   : > { %v4153_v4 = vpop.f32.mrf.mxu2  ;;  %v4166_v29 = vpop.f32.mrf.mxu3 }
 0x4c8   : > { %v4172_v42 = vadd.f32 %v4153_v4, %v4018_v63  ;;  %v4173_v17 = vadd.f32 %v4166_v29, %v4019_v31  ;;  %v4796_v4 = vunpack.c.l.bf16 %v4783_v15  ;;  %v4642_v29 = vunpack.c.l.bf16 %v4627_v2 }
 0x4c9   : > { %v4127_v30 = vpop.f32.mrf.mxu0  ;;  %v4140_v5 = vpop.f32.mrf.mxu1 }
 0x4ca   : > { %v4170_v45 = vadd.f32 %v4127_v30, %v4016_v52  ;;  %v4171_v55 = vadd.f32 %v4140_v5, %v4017_v28  ;;  %v4643_v30 = vunpack.c.l.bf16 %v4630_v33  ;;  %v9055_v5 = vpack.i.bf16 %v4796_v4, %v4795_v56 }
 0x4cf   : > { %v4155_v7 = vpop.f32.mrf.mxu2  ;;  %v4168_v0 = vpop.f32.mrf.mxu3 }
 0x4d0   : > { %v9045_v7 = vpack.i.bf16 %v4643_v30, %v4642_v29  ;;  %v8617_v0 = vld [vmem:[%s12528_s1 + $0x14] sm:$0xf]  ;;  %v8676_v30 = vld [vmem:[%s12528_s1 + $0x3c] sm:$0xf] }
 0x4d1   : > { %v4129_v20 = vpop.f32.mrf.mxu0  ;;  %v4142_v14 = vpop.f32.mrf.mxu1  ;;  %5079 = vst [vmem:[#allocation1] ss:$9 sm:$0xff] %v8617_v0 }
 0x4d8   : > { %v4307_v36 = vpop.f32.mrf.mxu2  ;;  %v4320_v38 = vpop.f32.mrf.mxu3  ;;  %v10925_v20 = vld [vmem:[#allocation1 + $0x9] sm:$0xff]  ;;  %v10927_v14 = vld [vmem:[#allocation1 + $0x12] sm:$0xff] }
 0x4d9   : > { %v4326_v23 = vadd.f32 %v4307_v36, %v4172_v42  ;;  %v4327_v24 = vadd.f32 %v4320_v38, %v4173_v17  ;;  %v10929_v42 = vld [vmem:[#allocation1 + $0x1b] sm:$0xff] }
 0x4da   : > { %v4281_v22 = vpop.f32.mrf.mxu0  ;;  %v4294_v37 = vpop.f32.mrf.mxu1  ;;  %v10931_v17 = vld [vmem:[#allocation1] sm:$0xff]  ;;  %v8629_v36 = vld [vmem:[%s12528_s1 + $0x1c] sm:$0xf] }
 0x4db   : > { %v4336_v60 = vadd.f32 %v4332_v19, %v4326_v23  ;;  %v4337_v63 = vadd.f32 %v4332_v19, %v4327_v24  ;;  %v4324_v31 = vadd.f32 %v4281_v22, %v4170_v45  ;;  %v4325_v21 = vadd.f32 %v4294_v37, %v4171_v55  ;;  %v8635_v55 = vld [vmem:[%s12528_s1 + $0x20] sm:$0xf] }
 0x4dd   : > { %v4340_v41 = vmax.f32 %v4336_v60, 0.0  ;;  %v4341_v16 = vmax.f32 %v4337_v63, 0.0  ;;  %v4334_v52 = vadd.f32 %v4332_v19, %v4324_v31  ;;  %v4335_v28 = vadd.f32 %v4332_v19, %v4325_v21  ;;  %v8623_v19 = vld [vmem:[%s12528_s1 + $0x18] sm:$0xf]  ;;  %v10969_v21 = vpop.permute.xlu1 %9036 }
 0x4de   : > { %5232 = vst [vmem:[#allocation1] ss:$9 sm:$0xff] %v8623_v19  ;;  %v12598_v2 = vunpack.i.h.bf16 %v10969_v21  ;;  %v9038_v33 = vunpack.i.l.bf16 %v10969_v21 }
 0x4df   : > { %v4338_v44 = vmax.f32 %v4334_v52, 0.0  ;;  %v4339_v10 = vmax.f32 %v4335_v28, 0.0  ;;  %v4343_v34 = vpack.c.bf16 %v4341_v16, %v4340_v41  ;;  %v8653_v28 = vld [vmem:[%s12528_s1 + $0x2c] sm:$0xf] }
 0x4e0   : > { %v4309_v11 = vpop.f32.mrf.mxu2  ;;  %v4322_v40 = vpop.f32.mrf.mxu3  ;;  %v4442_v4 = vsel %vm368_vm8, %v9038_v33, %v12598_v2 }
 0x4e1   : > { %v4342_v26 = vpack.c.bf16 %v4339_v10, %v4338_v44  ;;  %4348 = vrot.lane.b32.xlu0 %v4343_v34, %s12642_s16 }
 0x4e2   : > { %v4283_v54 = vpop.f32.mrf.mxu0  ;;  %v4296_v32 = vpop.f32.mrf.mxu1 }
 0x4e3   : > { %4346 = vrot.lane.b32.xlu2 %v4342_v26, %s12642_s16  ;;  %v8659_v26 = vld [vmem:[%s12528_s1 + $0x30] sm:$0xf]  ;;  %s12699_s16 = smov 74  }
 0x4e5   : > { %v10939_v38 = vld [vmem:[#allocation1 + $0x9] sm:$0xff]  ;;  %v10941_v49 = vld [vmem:[#allocation1 + $0x12] sm:$0xff]  ;;  %v10943_v18 = vld [vmem:[#allocation1 + $0x1b] sm:$0xff]  ;;  %v10985_v58 = vpop.permute.xlu1 %9061 }
 0x4e6   : > { %v10945_v45 = vld [vmem:[#allocation1] sm:$0xff]  ;;  %v12599_v48 = vunpack.i.h.bf16 %v10985_v58  ;;  %v12597_v11 = vunpack.i.l.bf16 %v10985_v58 }
 0x4e7   : > { %5385 = vst [vmem:[#allocation1] ss:$9 sm:$0xff] %v8629_v36 }
 0x4e8   : > { %v11002_v53 = vsel %vm409_vm10, %v12597_v11, %v12599_v48 }
 0x4e9   : > { %9051 = vrot.lane.b32.xlu0 %v9050_v62, %s12595_s15 }
 0x4eb   : > { %9041 = vrot.lane.b32.xlu2 %v9040_v61, %s9284_s12 }
 0x4ee   : > { %v10950_v23 = vld [vmem:[#allocation1 + $0x9] sm:$0xff]  ;;  %v10952_v24 = vld [vmem:[#allocation1 + $0x12] sm:$0xff]  ;;  %v10954_v22 = vld [vmem:[#allocation1] sm:$0xff] }
 0x4ef   : > { %v10956_v37 = vld [vmem:[#allocation1 + $0x1b] sm:$0xff] }
 0x4f0   : > { %5538 = vst [vmem:[#allocation1] ss:$9 sm:$0xff] %v8635_v55 }
 0x4f1   : > { %9056 = vrot.lane.b32.xlu0 %v9055_v5, %s12593_s18  ;;  %s12674_s18 = smov 65  }
 0x4f3   : > { %9046 = vrot.lane.b32.xlu2 %v9045_v7, %s12595_s15  ;;  %s12673_s15 = smov 64  }
 0x4f7   : > { %v10961_v35 = vld [vmem:[#allocation1] sm:$0xff]  ;;  %v10963_v60 = vld [vmem:[#allocation1 + $0x9] sm:$0xff]  ;;  %v10965_v63 = vld [vmem:[#allocation1 + $0x12] sm:$0xff] }
 0x4f8   : > { %v10967_v31 = vld [vmem:[#allocation1 + $0x1b] sm:$0xff] }
 0x4f9   : > { %5691 = vst [vmem:[#allocation1] ss:$9 sm:$0xff] %v8641_v12 }
 0x500   : > { %v10974_v47 = vld [vmem:[#allocation1] sm:$0xff]  ;;  %v10976_v41 = vld [vmem:[#allocation1 + $0x9] sm:$0xff]  ;;  %v10978_v16 = vld [vmem:[#allocation1 + $0x12] sm:$0xff] }
 0x501   : > { %v10980_v52 = vld [vmem:[#allocation1 + $0x1b] sm:$0xff] }
 0x502   : > { %5844 = vst [vmem:[#allocation1] ss:$9 sm:$0xff] %v8647_v13 }
 0x509   : > { %v10987_v44 = vld [vmem:[#allocation1 + $0x9] sm:$0xff]  ;;  %v10989_v10 = vld [vmem:[#allocation1 + $0x12] sm:$0xff]  ;;  %v10991_v34 = vld [vmem:[#allocation1] sm:$0xff] }
 0x50a   : > { %v10995_v40 = vld [vmem:[#allocation1 + $0x1b] sm:$0xff] }
 0x50b   : > { %5997 = vst [vmem:[#allocation1] ss:$9 sm:$0xff] %v8653_v28 }
 0x512   : > { %v11007_v3 = vld [vmem:[#allocation1 + $0x9] sm:$0xff]  ;;  %v11009_v51 = vld [vmem:[#allocation1 + $0x12] sm:$0xff]  ;;  %v11011_v1 = vld [vmem:[#allocation1 + $0x1b] sm:$0xff] }
 0x513   : > { %12643 = vst [vmem:[#allocation4_spill] sm:$0xff] %v11011_v1  ;;  %v11013_v54 = vld [vmem:[#allocation1] sm:$0xff] }
 0x514   : > { %12644 = vst [vmem:[#allocation5_spill] sm:$0xff] %v11013_v54 }
 0x515   : > { %6150 = vst [vmem:[#allocation1] ss:$9 sm:$0xff] %v8659_v26 }
 0x51c   : > { %v11018_v27 = vld [vmem:[#allocation1] sm:$0xff]  ;;  %v11022_v62 = vld [vmem:[#allocation1 + $0x9] sm:$0xff]  ;;  %v11025_v15 = vld [vmem:[#allocation1 + $0x12] sm:$0xff] }
 0x51d   : > { %v11020_v8 = vld [vmem:[#allocation1 + $0x1b] sm:$0xff]  ;;  %12646 = vst [vmem:[#allocation7_spill] sm:$0xff] %v11022_v62 }
 0x51e   : > { %12645 = vst [vmem:[#allocation6_spill] sm:$0xff] %v11020_v8 }
 0x51f   : > { %12648 = vst [vmem:[#allocation8_spill] sm:$0xff] %v11025_v15 }
 0x520   : > { %6403 = vst [vmem:[#allocation1] ss:$9 sm:$0xff] %v8670_v50 }
 0x527   : > { %v11043_v0 = vld [vmem:[#allocation1] sm:$0xff]  ;;  %v11045_v19 = vld [vmem:[#allocation1 + $0x9] sm:$0xff]  ;;  %v11047_v36 = vld [vmem:[#allocation1 + $0x12] sm:$0xff] }
 0x528   : > { %12650 = vst [vmem:[#allocation9_spill] sm:$0xff] %v11043_v0  ;;  %v11049_v55 = vld [vmem:[#allocation1 + $0x1b] sm:$0xff] }
 0x529   : > { %12651 = vst [vmem:[#allocation3_spill] sm:$0xff] %v11045_v19 }
 0x52a   : > { %12652 = vst [vmem:[#allocation10_spill] sm:$0xff] %v11047_v36 }
 0x52b   : > { %12653 = vst [vmem:[#allocation11_spill] sm:$0xff] %v11049_v55 }
 0x52c   : > { %6556 = vst [vmem:[#allocation1] ss:$9 sm:$0xff] %v8676_v30 }
 0x533   : > { %v11063_v30 = vld [vmem:[#allocation1 + $0x12] sm:$0xff] }
 0x534   : > { %12655 = vst [vmem:[#allocation13_spill] sm:$0xff] %v11063_v30 }
 0x53d   : > { %v4347_v32 = vpop.permute.xlu2 %4346 }
 0x53e   : > { %v4350_v6 = vrot.slane %v4347_v32, 4 }
 0x540   : > { %v4352_v59 = vsel %vm12647_vm5, %v4350_v6, %v4347_v32  ;;  %vm12685_vm5 = vmmov %vm12675_vm4 }
 0x541   : > { %4358 = vst.msk [vmem:[#allocation2] sm:$0xff] %vm9497_vm6, %v4352_v59  ;;  %vm12658_vm6 = vcmask 592896  }
 0x545   : > { %v11031_v56 = vpop.permute.xlu2 %9041 }
 0x548   : > { %v4921_v29 = vld [vmem:[#allocation2] sm:$0xff] }
 0x549   : > { %v11039_v5 = vunpack.c.l.bf16 %v4921_v29  ;;  %v11041_v7 = vunpack.c.h.bf16 %v4921_v29 }
 0x54b   : > { %v4451_v12 = vmul.f32 %v11041_v7, %v4442_v4  ;;  %v4450_v13 = vmul.f32 %v9038_v33, %v11039_v5  ;;  %v8682_v33 = vld [vmem:[%s12528_s1 + $0x40] sm:$0xf]  ;;  %v11061_v4 = vld [vmem:[#allocation1 + $0x9] sm:$0xff] }
 0x54c   : > { %12654 = vst [vmem:[#allocation12_spill] sm:$0xff] %v11061_v4 }
 0x54d   : > { %v9047_v28 = vpop.permute.xlu2 %9046  ;;  %v4456_v26 = vpack.c.bf16 %v4451_v12, %v4451_v12  ;;  %v4455_v32 = vpack.c.bf16 %v4450_v13, %v4450_v13  ;;  %v11065_v12 = vld [vmem:[#allocation1] sm:$0xff] }
 0x54e   : > { %v9049_v50 = vunpack.i.h.bf16 %v9047_v28  ;;  %v9048_v59 = vunpack.i.l.bf16 %v9047_v28  ;;  %12656 = vst [vmem:[#allocation14_spill] sm:$0xff] %v11065_v12 }
 0x54f   : > { %4469 = vrot.lane.b32.xlu1 %v4456_v26, %s9290_s8  ;;  %4467 = vrot.lane.b32.xlu0 %v4455_v32, %s9290_s8  ;;  %v11067_v26 = vld [vmem:[#allocation1 + $0x1b] sm:$0xff] }
 0x550   : > { %v4658_v61 = vsel %vm589_vm9, %v9048_v59, %v9049_v50  ;;  %v4666_v29 = vmul.f32 %v9048_v59, %v11039_v5  ;;  %12657 = vst [vmem:[#allocation15_spill] sm:$0xff] %v11067_v26 }
 0x551   : > { %v4667_v11 = vmul.f32 %v11041_v7, %v4658_v61  ;;  %6709 = vst [vmem:[#allocation1] ss:$9 sm:$0xff] %v8682_v33 }
 0x552   : > { %v4671_v2 = vpack.c.bf16 %v4666_v29, %v4666_v29 }
 0x553   : > { %v4349_v13 = vpop.permute.xlu0 %4348  ;;  %v4672_v28 = vpack.c.bf16 %v4667_v11, %v4667_v11  ;;  %v8688_v11 = vld [vmem:[%s12528_s1 + $0x44] sm:$0xf] }
 0x554   : > { %v4351_v32 = vrot.slane %v4349_v13, 4 }
 0x555   : > { %4685 = vrot.lane.b32.xlu2 %v4672_v28, %s9296_s19  ;;  %v11088_v28 = vpop.permute.xlu1 %9066 }
 0x556   : > { %v4353_v59 = vsel %vm275_vm7, %v4350_v6, %v4351_v32  ;;  %4360 = vst.msk [vmem:[#allocation2 + $0x10] sm:$0xf] %vm12658_vm6, %v4351_v32  ;;  %vm12686_vm6 = vcmask 146432  }
 0x557   : > { %v11073_v61 = vsel %vm12659_vm1, %v4353_v59, %v4349_v13  ;;  %4683 = vrot.lane.b32.xlu1 %v4671_v2, %s9296_s19  ;;  %v9044_v59 = vunpack.i.h.bf16 %v11031_v56  ;;  %vm12687_vm1 = vcmask 523264  }
 0x558   : > { %4359 = vst [vmem:[#allocation2 + $0x8] sm:$0xff] %v11073_v61  ;;  %v11082_v29 = vld [vmem:[#allocation1] sm:$0xff]  ;;  %v11084_v33 = vld [vmem:[#allocation1 + $0x9] sm:$0xff]  ;;  %v11086_v6 = vld [vmem:[#allocation1 + $0x12] sm:$0xff] }
 0x559   : > { %12660 = vst [vmem:[#allocation16_spill] sm:$0xff] %v11082_v29  ;;  %v11091_v32 = vld [vmem:[#allocation1 + $0x1b] sm:$0xff] }
 0x55a   : > { %12661 = vst [vmem:[#allocation17_spill] sm:$0xff] %v11084_v33  ;;  %v12601_v33 = vunpack.i.h.bf16 %v11088_v28 }
 0x55b   : > { %v11080_v48 = vpop.permute.xlu0 %9051  ;;  %12662 = vst [vmem:[#allocation18_spill] sm:$0xff] %v11086_v6  ;;  %v12602_v6 = vunpack.i.l.bf16 %v11088_v28 }
 0x55c   : > { %v12600_v13 = vunpack.i.l.bf16 %v11080_v48  ;;  %12663 = vst [vmem:[#allocation19_spill] sm:$0xff] %v11091_v32 }
 0x55d   : > { %v4401_v2 = vld [vmem:[#allocation2 + $0x10] sm:$0xf]  ;;  %6862 = vst [vmem:[#allocation1] ss:$9 sm:$0xff] %v8688_v11  ;;  %v4964_v32 = vsel %vm900_vm11, %v12602_v6, %v12601_v33 }
 0x55e   : > { %v11097_v26 = vsel %vm589_vm9, %v9049_v50, %v12600_v13  ;;  %v4425_v12 = vunpack.c.l.bf16 %v4401_v2  ;;  %v5087_v50 = vpack.i.b16 %v10925_v20, %v10925_v20  ;;  %v4617_v13 = vld [vmem:[#allocation2 + $0x10] sm:$0xf]  ;;  %v4973_v4 = vmul.f32 %v4964_v32, %v11041_v7 }
 0x55f   : > { %v4770_v33 = vld [vmem:[#allocation2 + $0x10] sm:$0xf]  ;;  %v4641_v62 = vunpack.c.l.bf16 %v4617_v13  ;;  %v9043_v13 = vunpack.i.l.bf16 %v11031_v56 }
 0x560   : > { %v4454_v29 = vmul.f32 %v9044_v59, %v4425_v12  ;;  %v5090_v12 = vpack.i.b16 %v10927_v14, %v10927_v14  ;;  %v5089_v15 = vperm.slane %v5087_v50, 0  ;;  %v4794_v8 = vunpack.c.l.bf16 %v4770_v33 }
 0x561   : > { %v4978_v32 = vpack.c.bf16 %v4973_v4, %v4973_v4  ;;  %v5240_v50 = vpack.i.b16 %v10939_v38, %v10939_v38  ;;  %v11144_v4 = vunpack.c.l.bf16 %v11073_v61  ;;  %v4937_v38 = vpack.i.b16 %v10918_v25, %v10918_v25 }
 0x562   : > { %v4459_v36 = vpack.c.bf16 %v4454_v29, %v4454_v29  ;;  %v8694_v29 = vld [vmem:[%s12528_s1 + $0x48] sm:$0xf]  ;;  %v5092_v1 = vperm.slane %v5090_v12, 0 }
 0x563   : > { %v11106_v19 = vpop.permute.xlu0 %9056  ;;  %v4939_v25 = vperm.slane %v4937_v38, 0 }
 0x564   : > { %v12603_v2 = vunpack.i.h.bf16 %v11106_v19  ;;  %v9058_v11 = vunpack.i.l.bf16 %v11106_v19  ;;  %4475 = vrot.lane.b32.xlu1 %v4459_v36, %s9290_s8  ;;  %v11118_v6 = vld [vmem:[#allocation1] sm:$0xff]  ;;  %v11127_v55 = vld [vmem:[#allocation1 + $0x9] sm:$0xff]  ;;  %v11129_v14 = vld [vmem:[#allocation1 + $0x12] sm:$0xff] }
 0x565   : > { %12664 = vst [vmem:[#allocation20_spill] sm:$0xff] %v11118_v6  ;;  %v11125_v36 = vld [vmem:[#allocation1 + $0x1b] sm:$0xff] }
 0x566   : > { %v4811_v20 = vsel %vm409_vm10, %v9058_v11, %v12603_v2  ;;  %v4819_v30 = vmul.f32 %v9058_v11, %v11039_v5  ;;  %12665 = vst [vmem:[#allocation21_spill] sm:$0xff] %v11127_v55  ;;  %v9054_v2 = vunpack.i.h.bf16 %v11080_v48  ;;  %v5102_v11 = vunpack.c.l.bf16 %v5089_v15 }
 0x567   : > { %12666 = vst [vmem:[#allocation22_spill] sm:$0xff] %v11129_v14  ;;  %v4820_v0 = vmul.f32 %v11041_v7, %v4811_v20  ;;  %v5103_v14 = vunpack.c.l.bf16 %v5092_v1  ;;  %v11147_v1 = vunpack.c.h.bf16 %v11073_v61 }
 0x568   : > { %7014 = vst [vmem:[#allocation1] ss:$9 sm:$0xff] %v8694_v29  ;;  %v4824_v6 = vpack.c.bf16 %v4819_v30, %v4819_v30  ;;  %v4670_v55 = vmul.f32 %v9054_v2, %v4641_v62  ;;  %v5243_v30 = vpack.i.b16 %v10941_v49, %v10941_v49  ;;  %v5242_v62 = vperm.slane %v5240_v50, 0 }
 0x569   : > { %v4825_v54 = vpack.c.bf16 %v4820_v0, %v4820_v0  ;;  %v12667_v0 = vunpack.i.h.bf16 %v10985_v58  ;;  %v9075_v15 = vpack.i.bf16 %v5103_v14, %v5102_v11  ;;  %v4940_v49 = vpack.i.b16 %v10920_v39, %v10920_v39 }
 0x56a   : > { %4836 = vrot.lane.b32.xlu2 %v4824_v6, %s9297_s20  ;;  %v5245_v6 = vperm.slane %v5243_v30, 0  ;;  %v5255_v29 = vunpack.c.l.bf16 %v5242_v62 }
 0x56b   : > { %4838 = vrot.lane.b32.xlu0 %v4825_v54, %s9297_s20  ;;  %v4823_v33 = vmul.f32 %v12667_v0, %v4794_v8  ;;  %v4675_v54 = vpack.c.bf16 %v4670_v55, %v4670_v55  ;;  %v12668_v8 = vunpack.i.h.bf16 %v10969_v21  ;;  %v4444_v55 = vsel %vm368_vm8, %v9043_v13, %v9044_v59 }
 0x56c   : > { %4991 = vrot.lane.b32.xlu1 %v4978_v32, %s9298_s24  ;;  %v5256_v20 = vunpack.c.l.bf16 %v5245_v6  ;;  %v4453_v14 = vmul.f32 %v4444_v55, %v11147_v1  ;;  %v4942_v32 = vperm.slane %v4940_v49, 0  ;;  %v12669_v21 = vunpack.i.l.bf16 %v11080_v48 }
 0x56d   : > { %v4828_v12 = vpack.c.bf16 %v4823_v33, %v4823_v33  ;;  %v4443_v56 = vsel %vm368_vm8, %v12668_v8, %v9043_v13  ;;  %v4950_v59 = vunpack.c.l.bf16 %v4939_v25  ;;  %v5084_v33 = vpack.i.b16 %v10931_v17, %v10931_v17 }
 0x56e   : > { %v4452_v61 = vmul.f32 %v4443_v56, %v11144_v4  ;;  %v9085_v39 = vpack.i.bf16 %v5256_v20, %v5255_v29  ;;  %v4660_v50 = vsel %vm589_vm9, %v12669_v21, %v9054_v2  ;;  %v4458_v30 = vpack.c.bf16 %v4453_v14, %v4453_v14 }
 0x56f   : > { %v4951_v0 = vunpack.c.l.bf16 %v4942_v32  ;;  %v5093_v13 = vpack.i.b16 %v10929_v42, %v10929_v42  ;;  %v5393_v48 = vpack.i.b16 %v10950_v23, %v10950_v23  ;;  %v5396_v2 = vpack.i.b16 %v10952_v24, %v10952_v24 }
 0x570   : > { %v4457_v11 = vpack.c.bf16 %v4452_v61, %v4452_v61  ;;  %v4669_v62 = vmul.f32 %v4660_v50, %v11147_v1  ;;  %v5086_v6 = vperm.slane %v5084_v33, 0  ;;  %v5237_v24 = vpack.i.b16 %v10945_v45, %v10945_v45 }
 0x571   : > { %v9070_v17 = vpack.i.bf16 %v4951_v0, %v4950_v59  ;;  %v5395_v42 = vperm.slane %v5393_v48, 0  ;;  %v5398_v38 = vperm.slane %v5396_v2, 0  ;;  %v5246_v55 = vpack.i.b16 %v10943_v18, %v10943_v18 }
 0x572   : > { %4691 = vrot.lane.b32.xlu2 %v4675_v54, %s9296_s19  ;;  %v12670_v54 = vunpack.i.l.bf16 %v11088_v28  ;;  %v4674_v8 = vpack.c.bf16 %v4669_v62, %v4669_v62  ;;  %v5101_v56 = vunpack.c.l.bf16 %v5086_v6  ;;  %v5239_v14 = vperm.slane %v5237_v24, 0 }
 0x573   : > { %4844 = vrot.lane.b32.xlu0 %v4828_v12, %s9297_s20  ;;  %v5095_v12 = vperm.slane %v5093_v13, 0  ;;  %v5408_v61 = vunpack.c.l.bf16 %v5395_v42  ;;  %v5409_v29 = vunpack.c.l.bf16 %v5398_v38  ;;  %v5248_v25 = vperm.slane %v5246_v55, 0 }
 0x574   : > { %9076 = vrot.lane.b32.xlu1 %v9075_v15, %s9289_s26  ;;  %v4972_v15 = vmul.f32 %v12670_v54, %v11039_v5  ;;  %v5390_v45 = vpack.i.b16 %v10954_v22, %v10954_v22  ;;  %v5399_v18 = vpack.i.b16 %v10956_v37, %v10956_v37  ;;  %v12671_v21 = vunpack.i.l.bf16 %v10985_v58 }
 0x575   : > { %v5104_v23 = vunpack.c.l.bf16 %v5095_v12  ;;  %v9095_v32 = vpack.i.bf16 %v5409_v29, %v5408_v61  ;;  %v12672_v50 = vunpack.i.h.bf16 %v11106_v19  ;;  %v5543_v59 = vpack.i.b16 %v10961_v35, %v10961_v35 }
 0x576   : > { %v4977_v49 = vpack.c.bf16 %v4972_v15, %v4972_v15  ;;  %v5552_v0 = vpack.i.b16 %v10967_v31, %v10967_v31  ;;  %v5392_v13 = vperm.slane %v5390_v45, 0  ;;  %v5401_v48 = vperm.slane %v5399_v18, 0 }
 0x577   : > { %v9080_v20 = vpack.i.bf16 %v5101_v56, %v5104_v23  ;;  %v5545_v37 = vperm.slane %v5543_v59, 0  ;;  %v5696_v35 = vpack.i.b16 %v10974_v47, %v10974_v47  ;;  %v5705_v31 = vpack.i.b16 %v10980_v52, %v10980_v52 }
 0x578   : > { %v5554_v2 = vperm.slane %v5552_v0, 0  ;;  %v5407_v19 = vunpack.c.l.bf16 %v5392_v13  ;;  %v5410_v54 = vunpack.c.l.bf16 %v5401_v48  ;;  %v5855_v56 = vpack.i.b16 %v10989_v10, %v10989_v10 }
 0x579   : > { %v5560_v15 = vunpack.c.l.bf16 %v5545_v37  ;;  %v5698_v12 = vperm.slane %v5696_v35, 0  ;;  %v5707_v42 = vperm.slane %v5705_v31, 0  ;;  %v4370_v29 = vpack.i.b16 %v10856_v43, %v10856_v43 }
 0x57a   : > { %4471 = vrot.lane.b32.xlu2 %v4457_v11, %s9290_s8  ;;  %v5254_v11 = vunpack.c.l.bf16 %v5239_v14  ;;  %v5563_v62 = vunpack.c.l.bf16 %v5554_v2  ;;  %v5857_v24 = vperm.slane %v5855_v56, 0  ;;  %v4373_v18 = vpack.i.b16 %v10860_v57, %v10860_v57  ;;  %v11243_v2 = vld [vmem:[%s12531_s4] sm:$0xf] }
 0x57b   : > { %4473 = vrot.lane.b32.xlu0 %v4458_v30, %s9290_s8  ;;  %v4812_v30 = vsel %vm409_vm10, %v12672_v50, %v12671_v21  ;;  %v5713_v38 = vunpack.c.l.bf16 %v5698_v12  ;;  %v11230_v50 = vld [vmem:[%s12531_s4 + $0x4] sm:$0xf]  ;;  %v4376_v12 = vpack.i.b16 %v10862_v9, %v10862_v9 }
 0x57c   : > { %9086 = vrot.lane.b32.xlu1 %v9085_v39, %s9291_s11  ;;  %v5257_v39 = vunpack.c.l.bf16 %v5248_v25  ;;  %v4821_v22 = vmul.f32 %v4812_v30, %v11144_v4  ;;  %v9110_v6 = vpack.i.bf16 %v5560_v15, %v5563_v62  ;;  %v5868_v55 = vunpack.c.l.bf16 %v5857_v24  ;;  %v4923_v62 = vld [vmem:[#allocation2 + $0x10] sm:$0xf] }
 0x57d   : > { %v4375_v30 = vperm.slane %v4373_v18, 0  ;;  %v4947_v31 = vunpack.c.l.bf16 %v4923_v62  ;;  %v5076_v24 = vld [vmem:[#allocation2 + $0x10] sm:$0xf] }
 0x57e   : > { %v9090_v33 = vpack.i.bf16 %v5254_v11, %v5257_v39  ;;  %v4826_v58 = vpack.c.bf16 %v4821_v22, %v4821_v22 }
 0x582   : > { %9071 = vrot.lane.b32.xlu2 %v9070_v17, %s9288_s23  ;;  %v9100_v17 = vpack.i.bf16 %v5407_v19, %v5410_v54 }
 0x583   : > { %4989 = vrot.lane.b32.xlu0 %v4977_v49, %s9298_s24  ;;  %v5716_v49 = vunpack.c.l.bf16 %v5707_v42 }
 0x584   : > { %4689 = vrot.lane.b32.xlu1 %v4674_v8, %s9296_s19  ;;  %v5852_v8 = vpack.i.b16 %v10987_v44, %v10987_v44 }
 0x585   : > { %v9120_v47 = vpack.i.bf16 %v5713_v38, %v5716_v49  ;;  %v4379_v49 = vpack.i.b16 %v10864_v46, %v10864_v46 }
 0x586   : > { %v5854_v23 = vperm.slane %v5852_v8, 0 }
 0x588   : > { %v5867_v52 = vunpack.c.l.bf16 %v5854_v23  ;;  %v4378_v23 = vperm.slane %v4376_v12, 0 }
 0x58a   : > { %9081 = vrot.lane.b32.xlu2 %v9080_v20, %s9289_s26  ;;  %v9125_v61 = vpack.i.bf16 %v5868_v55, %v5867_v52  ;;  %v4372_v20 = vperm.slane %v4370_v29, 0  ;;  %v4381_v52 = vperm.slane %v4379_v49, 0  ;;  %v11272_v55 = vld [vmem:[%s12531_s4 + $0x8] sm:$0xf] }
 0x58c   : > { %9096 = vrot.lane.b32.xlu1 %v9095_v32, %s9292_s13  ;;  %v4386_v14 = vunpack.c.l.bf16 %v4372_v20 }
 0x58e   : > { %v4390_v44 = vmul.f32 %v11039_v5, %v4386_v14  ;;  %v4388_v14 = vunpack.c.l.bf16 %v4378_v23 }
 0x590   : > { %v4394_v10 = vpack.c.bf16 %v4390_v44, %v4390_v44 }
 0x592   : > { %9091 = vrot.lane.b32.xlu2 %v9090_v33, %s9291_s11  ;;  %v4552_v43 = vsel %vm275_vm7, %v4394_v10, 0  ;;  %v4387_v33 = vunpack.c.l.bf16 %v4375_v30  ;;  %v4389_v10 = vunpack.c.l.bf16 %v4381_v52  ;;  %v5699_v52 = vpack.i.b16 %v10976_v41, %v10976_v41 }
 0x594   : > { %4840 = vrot.lane.b32.xlu1 %v4826_v58, %s9297_s20  ;;  %v4391_v13 = vmul.f32 %v11041_v7, %v4387_v33  ;;  %v4393_v30 = vmul.f32 %v11147_v1, %v4389_v10 }
 0x596   : > { %v4395_v48 = vpack.c.bf16 %v4391_v13, %v4391_v13 }
 0x598   : > { %v4555_v15 = vsel %vm275_vm7, %v4395_v48, 0 }
 0x59a   : > { %9101 = vrot.lane.b32.xlu2 %v9100_v17, %s9292_s13 }
 0x59c   : > { %9111 = vrot.lane.b32.xlu1 %v9110_v6, %s9293_s14 }
 0x5a4   : > { %9121 = vrot.lane.b32.xlu1 %v9120_v47, %s12673_s15 }
 0x5ac   : > { %9126 = vrot.lane.b32.xlu1 %v9125_v61, %s12674_s18  ;;  %v5100_v61 = vunpack.c.l.bf16 %v5076_v24 }
 0x5af   : > { %v11219_v25 = vpop.permute.xlu2 %4685 }
 0x5c1   : > { %v4470_v32 = vpop.permute.xlu1 %4469  ;;  %v4468_v11 = vpop.permute.xlu0 %4467 }
 0x5c2   : > { %v4477_v39 = vsel %vm404_vm13, %v4468_v11, %v4470_v32 }
 0x5c3   : > { %v4485_v45 = vsel %vm275_vm7, %v4477_v39, 0 }
 0x5c4   : > { %4503 = vmatpush.bf16.msrb.mxu0 %v4485_v45  ;;  %v4837_v21 = vpop.permute.xlu2 %4836 }
 0x5c7   : > { %8591 = vmatmul.msk.bf16.vlgmr.msrb.gmra.mxu0 %vm409_vm10, %v11230_v50 }
 0x5c8   : > { %4570 = vmatpush.bf16.msra.mxu0 %v4552_v43 }
 0x5c9   : > { %v4684_v59 = vpop.permute.xlu1 %4683 }
 0x5ca   : > { %v4693_v0 = vsel %vm625_vm2, %v4684_v59, %v11219_v25 }
 0x5cb   : > { %v4701_v57 = vsel %vm275_vm7, %v4693_v0, 0  ;;  %v5546_v0 = vpack.i.b16 %v10963_v60, %v10963_v60  ;;  %v4397_v60 = vpack.c.bf16 %v4393_v30, %v4393_v30 }
 0x5cc   : > { %4719 = vmatpush.bf16.msrb.mxu0 %v4701_v57  ;;  %v11237_v22 = vpop.permute.xlu2 %4691  ;;  %v5549_v57 = vpack.i.b16 %v10965_v63, %v10965_v63 }
 0x5cd   : > { %v5548_v49 = vperm.slane %v5546_v0, 0 }
 0x5cf   : > { %v5561_v23 = vunpack.c.l.bf16 %v5548_v49 }
 0x5d4   : > { %v4472_v37 = vpop.permute.xlu2 %4471 }
 0x5d5   : > { %v4478_v58 = vsel %vm404_vm13, %v4470_v32, %v4472_v37 }
 0x5d6   : > { %v4476_v19 = vpop.permute.xlu1 %4475  ;;  %v4488_v54 = vsel %vm275_vm7, %v4478_v58, 0  ;;  %v4822_v58 = vmul.f32 %v11002_v53, %v11147_v1  ;;  %v5551_v53 = vperm.slane %v5549_v57, 0 }
 0x5d7   : > { %4516 = vmatpush.bf16.msrb.mxu1 %v4488_v54  ;;  %8595 = vmatmul.msk.bf16.vlgmr.msra.gmra.mxu0 %vm409_vm10, %v11243_v2  ;;  %v4668_v54 = vmul.f32 %v11097_v26, %v11144_v4 }
 0x5d8   : > { %v5562_v24 = vunpack.c.l.bf16 %v5551_v53 }
 0x5da   : > { %8592 = vmatmul.msk.bf16.vlgmr.msrb.gmra.mxu1 %vm409_vm10, %v11230_v50 }
 0x5db   : > { %4583 = vmatpush.bf16.msra.mxu1 %v4555_v15 }
 0x5dc   : > { %v11252_v35 = vpop.permute.xlu2 %9071 }
 0x5dd   : > { %v9074_v17 = vunpack.i.h.bf16 %v11252_v35  ;;  %v11255_v6 = vpop.permute.xlu0 %4838 }
 0x5de   : > { %v4846_v42 = vsel %vm780_vm3, %v4837_v21, %v11255_v6  ;;  %v11261_v38 = vpop.permute.xlu1 %4991  ;;  %v4392_v21 = vmul.f32 %v11144_v4, %v4388_v14 }
 0x5df   : > { %v4976_v8 = vmul.f32 %v9074_v17, %v4947_v31  ;;  %v4854_v56 = vsel %vm275_vm7, %v4846_v42, 0 }
 0x5e0   : > { %4872 = vmatpush.bf16.msra.mxu0 %v4854_v56  ;;  %v4396_v48 = vpack.c.bf16 %v4392_v21, %v4392_v21  ;;  %v4561_v56 = vsel %vm275_vm7, %v4397_v60, 0 }
 0x5e1   : > { %v4981_v47 = vpack.c.bf16 %v4976_v8, %v4976_v8  ;;  %v4827_v8 = vpack.c.bf16 %v4822_v58, %v4822_v58 }
 0x5e2   : > { %v4558_v26 = vsel %vm275_vm7, %v4396_v48, 0 }
 0x5e3   : > { %4997 = vrot.lane.b32.xlu0 %v4981_v47, %s9298_s24  ;;  %v4673_v47 = vpack.c.bf16 %v4668_v54, %v4668_v54  ;;  %v5229_v54 = vld [vmem:[#allocation2 + $0x10] sm:$0xf] }
 0x5e4   : > { %v9082_v9 = vpop.permute.xlu2 %9081 }
 0x5e5   : > { %v9084_v46 = vunpack.i.h.bf16 %v9082_v9  ;;  %v9083_v29 = vunpack.i.l.bf16 %v9082_v9  ;;  %v11274_v20 = vpop.permute.xlu0 %4844  ;;  %v5702_v9 = vpack.i.b16 %v10978_v16, %v10978_v16 }
 0x5e6   : > { %v11276_v44 = vpop.permute.xlu1 %9076 }
 0x5e7   : > { %v5125_v32 = vmul.f32 %v9084_v46, %v11039_v5  ;;  %v5129_v11 = vmul.f32 %v9083_v29, %v5100_v61  ;;  %v9079_v39 = vunpack.i.h.bf16 %v11276_v44  ;;  %8601 = vmatmul.msk.bf16.vlgmr.msrb.gmra.mxu0 %vm409_vm10, %v11272_v55  ;;  %v9078_v15 = vunpack.i.l.bf16 %v11276_v44 }
 0x5e8   : > { %v9073_v61 = vunpack.i.l.bf16 %v11252_v35 }
 0x5e9   : > { %v5130_v45 = vpack.c.bf16 %v5125_v32, %v5125_v32  ;;  %v5134_v18 = vpack.c.bf16 %v5129_v11, %v5129_v11  ;;  %v5119_v43 = vsel %vm1056_vm12, %v9079_v39, %v9083_v29  ;;  %v9105_v11 = vpack.i.bf16 %v5562_v24, %v5561_v23 }
 0x5ea   : > { %8596 = vmatmul.msk.bf16.vlgmr.msra.gmra.mxu1 %vm409_vm10, %v11243_v2  ;;  %v5128_v59 = vmul.f32 %v5119_v43, %v11147_v1 }
 0x5eb   : > { %5150 = vrot.lane.b32.xlu2 %v5134_v18, %s9300_s27  ;;  %5142 = vrot.lane.b32.xlu0 %v5130_v45, %s9300_s27  ;;  %v5701_v45 = vperm.slane %v5699_v52, 0  ;;  %v5704_v18 = vperm.slane %v5702_v9, 0 }
 0x5ec   : > { %v5133_v13 = vpack.c.bf16 %v5128_v59, %v5128_v59 }
 0x5ed   : > { %v4474_v33 = vpop.permute.xlu0 %4473  ;;  %v5714_v59 = vunpack.c.l.bf16 %v5701_v45  ;;  %v5715_v0 = vunpack.c.l.bf16 %v5704_v18 }
 0x5ee   : > { %v4479_v62 = vsel %vm404_vm13, %v4472_v37, %v4474_v33  ;;  %v4480_v31 = vsel %vm404_vm13, %v4474_v33, %v4476_v19  ;;  %v11303_v12 = vpop.permute.xlu1 %9086  ;;  %5148 = vrot.lane.b32.xlu1 %v5133_v13, %s9300_s27  ;;  %v5117_v37 = vsel %vm1056_vm12, %v9084_v46, %v9078_v15  ;;  %v11312_v19 = vpop.permute.xlu2 %9091 }
 0x5ef   : > { %v4491_v63 = vsel %vm275_vm7, %v4479_v62, 0  ;;  %v4494_v42 = vsel %vm275_vm7, %v4480_v31, 0  ;;  %v5126_v29 = vmul.f32 %v5117_v37, %v11041_v7  ;;  %v9088_v57 = vunpack.i.l.bf16 %v11303_v12 }
 0x5f0   : > { %4529 = vmatpush.bf16.msrb.mxu2 %v4491_v63  ;;  %4542 = vmatpush.bf16.msrb.mxu3 %v4494_v42  ;;  %v9094_v62 = vunpack.i.h.bf16 %v11312_v19  ;;  %v9115_v60 = vpack.i.bf16 %v5715_v0, %v5714_v59  ;;  %v9093_v63 = vunpack.i.l.bf16 %v11312_v19  ;;  %v9089_v42 = vunpack.i.h.bf16 %v11303_v12 }
 0x5f1   : > { %v5131_v43 = vpack.c.bf16 %v5126_v29, %v5126_v29  ;;  %v5849_v29 = vpack.i.b16 %v10991_v34, %v10991_v34  ;;  %v6005_v0 = vpack.i.b16 %v11007_v3, %v11007_v3 }
 0x5f2   : > { %v5270_v37 = vsel %vm1212_vm14, %v9094_v62, %v9088_v57 }
 0x5f3   : > { %4842 = vrot.lane.b32.xlu2 %v4827_v8, %s9297_s20  ;;  %4687 = vrot.lane.b32.xlu0 %v4673_v47, %s9296_s19  ;;  %v5253_v8 = vunpack.c.l.bf16 %v5229_v54  ;;  %v5272_v47 = vsel %vm1212_vm14, %v9089_v42, %v9093_v63  ;;  %v5279_v24 = vmul.f32 %v5270_v37, %v11041_v7  ;;  %v5851_v35 = vperm.slane %v5849_v29, 0 }
 0x5f4   : > { %4596 = vmatpush.bf16.msra.mxu2 %v4558_v26  ;;  %4609 = vmatpush.bf16.msra.mxu3 %v4561_v56  ;;  %v5281_v52 = vmul.f32 %v5272_v47, %v11147_v1 }
 0x5f5   : > { %8593 = vmatmul.msk.bf16.vlgmr.msrb.gmra.mxu2 %vm409_vm10, %v11230_v50  ;;  %v4990_v46 = vpop.permute.xlu0 %4989  ;;  %8594 = vmatmul.msk.bf16.vlgmr.msrb.gmra.mxu3 %vm409_vm10, %v11230_v50  ;;  %v12676_v50 = vunpack.i.h.bf16 %v11088_v28  ;;  %v5282_v56 = vmul.f32 %v9093_v63, %v5253_v8  ;;  %v6007_v63 = vperm.slane %v6005_v0, 0 }
 0x5f6   : > { %v4999_v14 = vsel %vm12675_vm4, %v4990_v46, %v11261_v38  ;;  %v11329_v10 = vpop.permute.xlu1 %4689  ;;  %v11340_v30 = vpop.permute.xlu2 %9101  ;;  %v5284_v46 = vpack.c.bf16 %v5279_v24, %v5279_v24  ;;  %vm12688_vm4 = vmmov %vm12687_vm1 }
 0x5f7   : > { %v5007_v41 = vsel %vm275_vm7, %v4999_v14, 0  ;;  %v4696_v16 = vsel %vm625_vm2, %v11329_v10, %v11237_v22  ;;  %v4965_v21 = vsel %vm900_vm11, %v12676_v50, %v9073_v61  ;;  %v9104_v13 = vunpack.i.h.bf16 %v11340_v30  ;;  %v5382_v50 = vld [vmem:[#allocation2 + $0x10] sm:$0xf] }
 0x5f8   : > { %5025 = vmatpush.bf16.msrb.mxu0 %v5007_v41  ;;  %v4710_v32 = vsel %vm275_vm7, %v4696_v16, 0  ;;  %v4974_v22 = vmul.f32 %v4965_v21, %v11144_v4  ;;  %v9103_v28 = vunpack.i.l.bf16 %v11340_v30  ;;  %v5287_v9 = vpack.c.bf16 %v5282_v56, %v5282_v56  ;;  %v5535_v41 = vld [vmem:[#allocation2 + $0x10] sm:$0xf] }
 0x5f9   : > { %4758 = vmatpush.bf16.msrb.mxu3 %v4710_v32  ;;  %v4966_v14 = vsel %vm900_vm11, %v9073_v61, %v9074_v17  ;;  %v5286_v16 = vpack.c.bf16 %v5281_v52, %v5281_v52  ;;  %v5278_v32 = vmul.f32 %v9094_v62, %v11039_v5  ;;  %v5559_v45 = vunpack.c.l.bf16 %v5535_v41  ;;  %v12677_v56 = vld [vmem:[#allocation6_spill] sm:$0xff] }
 0x5fa   : > { %v4979_v31 = vpack.c.bf16 %v4974_v22, %v4974_v22  ;;  %v4975_v34 = vmul.f32 %v4966_v14, %v11147_v1  ;;  %v5406_v54 = vunpack.c.l.bf16 %v5382_v50  ;;  %v6164_v44 = vpack.i.b16 %v12677_v56, %v12677_v56  ;;  %v12683_v50 = vld [vmem:[#allocation8_spill] sm:$0xff] }
 0x5fb   : > { %5144 = vrot.lane.b32.xlu2 %v5131_v43, %s9300_s27  ;;  %9106 = vrot.lane.b32.xlu0 %v9105_v11, %s9293_s14  ;;  %v5283_v18 = vpack.c.bf16 %v5278_v32, %v5278_v32  ;;  %v5866_v43 = vunpack.c.l.bf16 %v5851_v35  ;;  %v5271_v41 = vsel %vm1212_vm14, %v9088_v57, %v9089_v42  ;;  %v12682_v57 = vld [vmem:[#allocation7_spill] sm:$0xff] }
 0x5fc   : > { %v4980_v21 = vpack.c.bf16 %v4975_v34, %v4975_v34  ;;  %v6166_v52 = vperm.slane %v6164_v44, 0  ;;  %v12680_v34 = vld [vmem:[#allocation4_spill] sm:$0xff]  ;;  %v6158_v42 = vpack.i.b16 %v12682_v57, %v12682_v57 }
 0x5fd   : > { %v6011_v30 = vpack.i.b16 %v12680_v34, %v12680_v34 }
 0x5fe   : > { %v9097_v33 = vpop.permute.xlu1 %9096  ;;  %v6175_v29 = vunpack.c.l.bf16 %v6166_v52 }
 0x5ff   : > { %v9099_v48 = vunpack.i.h.bf16 %v9097_v33  ;;  %v9098_v58 = vunpack.i.l.bf16 %v9097_v33  ;;  %v6008_v33 = vpack.i.b16 %v11009_v51, %v11009_v51  ;;  %v5118_v51 = vsel %vm1056_vm12, %v9078_v15, %v9079_v39 }
 0x600   : > { %v5127_v37 = vmul.f32 %v5118_v51, %v11144_v4 }
 0x601   : > { %v11351_v49 = vsel %vm1368_vm15, %v9099_v48, %v9103_v28  ;;  %v5423_v53 = vsel %vm1368_vm15, %v9104_v13, %v9098_v58  ;;  %v5424_v62 = vsel %vm1368_vm15, %v9098_v58, %v9099_v48  ;;  %v6020_v48 = vunpack.c.l.bf16 %v6007_v63 }
 0x602   : > { %v5432_v26 = vmul.f32 %v5423_v53, %v11041_v7  ;;  %v6010_v53 = vperm.slane %v6008_v33, 0  ;;  %v5132_v47 = vpack.c.bf16 %v5127_v37, %v5127_v37  ;;  %v11446_v33 = vld [vmem:[%s12531_s4 + $0xc] sm:$0xf] }
 0x603   : > { %4993 = vrot.lane.b32.xlu2 %v4979_v31, %s9298_s24  ;;  %9116 = vrot.lane.b32.xlu0 %v9115_v60, %s12673_s15  ;;  %v5435_v31 = vmul.f32 %v9103_v28, %v5406_v54 }
 0x604   : > { %v5437_v19 = vpack.c.bf16 %v5432_v26, %v5432_v26  ;;  %v5433_v26 = vmul.f32 %v5424_v62, %v11144_v4  ;;  %v6021_v58 = vunpack.c.l.bf16 %v6010_v53  ;;  %8607 = vmatmul.msk.bf16.vlgmr.msra.gmra.mxu0 %vm409_vm10, %v11446_v33 }
 0x605   : > { %8597 = vmatmul.msk.bf16.vlgmr.msra.gmra.mxu2 %vm409_vm10, %v11243_v2  ;;  %8598 = vmatmul.msk.bf16.vlgmr.msra.gmra.mxu3 %vm409_vm10, %v11243_v2  ;;  %v5858_v2 = vpack.i.b16 %v10995_v40, %v10995_v40  ;;  %v5440_v3 = vpack.c.bf16 %v5435_v31, %v5435_v31 }
 0x606   : > { %v11369_v23 = vpop.permute.xlu1 %4840  ;;  %5450 = vrot.lane.b32.xlu1 %v5437_v19, %s9303_s29  ;;  %v5438_v8 = vpack.c.bf16 %v5433_v26, %v5433_v26  ;;  %v6155_v19 = vpack.i.b16 %v11018_v27, %v11018_v27  ;;  %v9135_v39 = vpack.i.bf16 %v6021_v58, %v6020_v48  ;;  %v5431_v27 = vmul.f32 %v9104_v13, %v11039_v5 }
 0x607   : > { %v5860_v61 = vperm.slane %v5858_v2, 0  ;;  %v5280_v13 = vmul.f32 %v5271_v41, %v11144_v4 }
 0x608   : > { %v6157_v24 = vperm.slane %v6155_v19, 0  ;;  %v5436_v14 = vpack.c.bf16 %v5431_v27, %v5431_v27  ;;  %v4847_v19 = vsel %vm780_vm3, %v11255_v6, %v11369_v23 }
 0x609   : > { %v5869_v59 = vunpack.c.l.bf16 %v5860_v61  ;;  %v5285_v61 = vpack.c.bf16 %v5280_v13, %v5280_v13  ;;  %v4857_v52 = vsel %vm275_vm7, %v4847_v19, 0 }
 0x60b   : > { %5303 = vrot.lane.b32.xlu2 %v5287_v9, %s9301_s9  ;;  %5297 = vrot.lane.b32.xlu0 %v5284_v46, %s9301_s9  ;;  %v9130_v60 = vpack.i.bf16 %v5866_v43, %v5869_v59  ;;  %v6172_v46 = vunpack.c.l.bf16 %v6157_v24  ;;  %v6160_v43 = vperm.slane %v6158_v42, 0 }
 0x60d   : > { %v9150_v2 = vpack.i.bf16 %v6172_v46, %v6175_v29  ;;  %v6173_v59 = vunpack.c.l.bf16 %v6160_v43 }
 0x60e   : > { %v11384_v11 = vpop.permute.xlu1 %9111  ;;  %5301 = vrot.lane.b32.xlu1 %v5286_v16, %s9301_s9  ;;  %v12679_v16 = vld [vmem:[#allocation5_spill] sm:$0xff] }
 0x60f   : > { %v9113_v17 = vunpack.i.l.bf16 %v11384_v11  ;;  %v9114_v28 = vunpack.i.h.bf16 %v11384_v11  ;;  %v6002_v32 = vpack.i.b16 %v12679_v16, %v12679_v16  ;;  %v11566_v11 = vld [vmem:[%s12531_s4 + $0x14] sm:$0xf] }
 0x611   : > { %v5588_v40 = vmul.f32 %v9113_v17, %v5559_v45  ;;  %v5584_v15 = vmul.f32 %v9114_v28, %v11039_v5  ;;  %v6004_v35 = vperm.slane %v6002_v32, 0  ;;  %v6013_v45 = vperm.slane %v6011_v30, 0 }
 0x613   : > { %v5593_v22 = vpack.c.bf16 %v5588_v40, %v5588_v40  ;;  %5295 = vrot.lane.b32.xlu2 %v5283_v18, %s9301_s9  ;;  %4995 = vrot.lane.b32.xlu0 %v4980_v21, %s9298_s24  ;;  %v5589_v9 = vpack.c.bf16 %v5584_v15, %v5584_v15  ;;  %v6019_v12 = vunpack.c.l.bf16 %v6004_v35  ;;  %v6022_v18 = vunpack.c.l.bf16 %v6013_v45 }
 0x614   : > { %v6161_v40 = vpack.i.b16 %v12683_v50, %v12683_v50  ;;  %v5434_v35 = vmul.f32 %v11351_v49, %v11147_v1  ;;  %v5688_v50 = vld [vmem:[#allocation2 + $0x10] sm:$0xf] }
 0x615   : > { %8604 = vmatmul.msk.bf16.vlgmr.msrb.gmra.mxu3 %vm409_vm10, %v11272_v55  ;;  %v9140_v21 = vpack.i.bf16 %v6019_v12, %v6022_v18  ;;  %v11527_v12 = vld [vmem:[#allocation2 + $0x8] sm:$0xff] }
 0x616   : > { %5609 = vrot.lane.b32.xlu1 %v5593_v22, %s12627_s10  ;;  %v6163_v22 = vperm.slane %v6161_v40, 0 }
 0x618   : > { %v6174_v0 = vunpack.c.l.bf16 %v6163_v22  ;;  %v5439_v22 = vpack.c.bf16 %v5434_v35, %v5434_v35 }
 0x61a   : > { %v9145_v54 = vpack.i.bf16 %v6174_v0, %v6173_v59  ;;  %v12690_v59 = vld [vmem:[#allocation9_spill] sm:$0xff] }
 0x61b   : > { %9131 = vrot.lane.b32.xlu2 %v9130_v60, %s12674_s18  ;;  %5456 = vrot.lane.b32.xlu0 %v5440_v3, %s9303_s29  ;;  %s12678_s18 = smov 66   ;;  %v6408_v0 = vpack.i.b16 %v12690_v59, %v12690_v59  ;;  %v12700_v59 = vld [vmem:[#allocation12_spill] sm:$0xff] }
 0x61e   : > { %5452 = vrot.lane.b32.xlu1 %v5438_v8, %s9303_s29  ;;  %v11472_v8 = vpop.permute.xlu1 %9121 }
 0x623   : > { %9136 = vrot.lane.b32.xlu2 %v9135_v39, %s12678_s18  ;;  %5146 = vrot.lane.b32.xlu0 %v5132_v47, %s9300_s27 }
 0x626   : > { %5601 = vrot.lane.b32.xlu1 %v5589_v9, %s12627_s10 }
 0x62b   : > { %5448 = vrot.lane.b32.xlu0 %v5436_v14, %s9303_s29  ;;  %v11505_v14 = vld [vmem:[#allocation2] sm:$0xff] }
 0x62c   : > { %v11512_v32 = vunpack.c.l.bf16 %v11505_v14 }
 0x62e   : > { %9151 = vrot.lane.b32.xlu1 %v9150_v2, %s12681_s30 }
 0x633   : > { %5299 = vrot.lane.b32.xlu0 %v5285_v61, %s9301_s9  ;;  %v9123_v61 = vunpack.i.l.bf16 %v11472_v8 }
 0x63b   : > { %9141 = vrot.lane.b32.xlu0 %v9140_v21, %s12678_s18  ;;  %v11539_v21 = vunpack.c.h.bf16 %v11527_v12 }
 0x643   : > { %9146 = vrot.lane.b32.xlu0 %v9145_v54, %s12681_s30  ;;  %s12689_s30 = smov 63   ;;  %v12691_v54 = vld [vmem:[#allocation11_spill] sm:$0xff] }
 0x645   : > { %v11451_v62 = vpop.permute.xlu2 %5150 }
 0x64d   : > { %v4843_v31 = vpop.permute.xlu2 %4842 }
 0x64e   : > { %v4849_v60 = vsel %vm780_vm3, %v4843_v31, %v11274_v20  ;;  %v11470_v20 = vld [vmem:[%s12531_s4 + $0x10] sm:$0xf]  ;;  %v4848_v56 = vsel %vm780_vm3, %v11369_v23, %v4843_v31  ;;  %v6417_v31 = vpack.i.b16 %v12691_v54, %v12691_v54 }
 0x64f   : > { %v4863_v63 = vsel %vm275_vm7, %v4849_v60, 0  ;;  %8613 = vmatmul.msk.bf16.vlgmr.msrb.gmra.mxu0 %vm409_vm10, %v11470_v20  ;;  %v4860_v9 = vsel %vm275_vm7, %v4848_v56, 0  ;;  %v12701_v54 = vld [vmem:[#allocation13_spill] sm:$0xff] }
 0x650   : > { %4911 = vmatpush.bf16.msra.mxu3 %v4863_v63 }
 0x653   : > { %8610 = vmatmul.msk.bf16.vlgmr.msra.gmra.mxu3 %vm409_vm10, %v11446_v33 }
 0x655   : > { %v11458_v53 = vpop.permute.xlu2 %5144  ;;  %v11460_v26 = vpop.permute.xlu0 %4997 }
 0x65d   : > { %v5143_v3 = vpop.permute.xlu0 %5142  ;;  %v11462_v51 = vpop.permute.xlu2 %4993 }
 0x65e   : > { %v5152_v48 = vsel %vm12684_vm0, %v5143_v3, %v11458_v53  ;;  %v5000_v6 = vsel %vm12685_vm5, %v11261_v38, %v11462_v51  ;;  %vm12692_vm0 = vmmov %vm12686_vm6  ;;  %vm12693_vm5 = vcmask 916480  }
 0x65f   : > { %v5160_v58 = vsel %vm275_vm7, %v5152_v48, 0 }
 0x660   : > { %5178 = vmatpush.bf16.msra.mxu0 %v5160_v58 }
 0x663   : > { %8619 = vmatmul.msk.bf16.vlgmr.msra.gmra.mxu0 %vm409_vm10, %v11566_v11 }
 0x665   : > { %v11476_v37 = vpop.permute.xlu2 %5303  ;;  %v4688_v44 = vpop.permute.xlu0 %4687 }
 0x666   : > { %v4694_v39 = vsel %vm625_vm2, %v11219_v25, %v4688_v44  ;;  %v4695_v15 = vsel %vm625_vm2, %v4688_v44, %v11329_v10  ;;  %v11494_v25 = vpop.permute.xlu1 %9126  ;;  %v5010_v10 = vsel %vm275_vm7, %v5000_v6, 0  ;;  %v6419_v44 = vperm.slane %v6417_v31, 0 }
 0x667   : > { %v4704_v47 = vsel %vm275_vm7, %v4694_v39, 0  ;;  %v4707_v24 = vsel %vm275_vm7, %v4695_v15, 0  ;;  %v5841_v15 = vld [vmem:[#allocation2 + $0x10] sm:$0xf]  ;;  %v9129_v35 = vunpack.i.h.bf16 %v11494_v25 }
 0x668   : > { %4732 = vmatpush.bf16.msrb.mxu1 %v4704_v47  ;;  %4745 = vmatpush.bf16.msrb.mxu2 %v4707_v24 }
 0x66b   : > { %8602 = vmatmul.msk.bf16.vlgmr.msrb.gmra.mxu1 %vm409_vm10, %v11272_v55  ;;  %8603 = vmatmul.msk.bf16.vlgmr.msrb.gmra.mxu2 %vm409_vm10, %v11272_v55 }
 0x66c   : > { %4885 = vmatpush.bf16.msra.mxu1 %v4857_v52  ;;  %4898 = vmatpush.bf16.msra.mxu2 %v4860_v9  ;;  %v6428_v52 = vunpack.c.l.bf16 %v6419_v44 }
 0x66d   : > { %v5296_v23 = vpop.permute.xlu2 %5295  ;;  %v9107_v27 = vpop.permute.xlu0 %9106 }
 0x66e   : > { %v9108_v46 = vunpack.i.l.bf16 %v9107_v27  ;;  %v11507_v2 = vpop.permute.xlu1 %5148  ;;  %v9109_v57 = vunpack.i.h.bf16 %v9107_v27  ;;  %v11578_v27 = vunpack.c.l.bf16 %v11527_v12 }
 0x670   : > { %5038 = vmatpush.bf16.msrb.mxu1 %v5010_v10  ;;  %v5576_v38 = vsel %vm12686_vm6, %v9114_v28, %v9108_v46  ;;  %v9124_v28 = vunpack.i.h.bf16 %v11472_v8  ;;  %v5578_v63 = vsel %vm12692_vm0, %v9109_v57, %v9113_v17  ;;  %vm12694_vm6 = vmmov %vm12692_vm0 }
 0x671   : > { %v5585_v29 = vmul.f32 %v5576_v38, %v11041_v7  ;;  %v5587_v17 = vmul.f32 %v5578_v63, %v11539_v21  ;;  %v5577_v9 = vsel %vm12694_vm6, %v9108_v46, %v9109_v57  ;;  %v5865_v38 = vunpack.c.l.bf16 %v5841_v15 }
 0x672   : > { %v9128_v46 = vunpack.i.l.bf16 %v11494_v25  ;;  %vm12698_vm6 = vcmask 531456  }
 0x673   : > { %v5590_v41 = vpack.c.bf16 %v5585_v29, %v5585_v29  ;;  %v5592_v10 = vpack.c.bf16 %v5587_v17, %v5587_v17 }
 0x675   : > { %v11509_v16 = vpop.permute.xlu2 %9131  ;;  %v11515_v34 = vpop.permute.xlu0 %9116  ;;  %5603 = vrot.lane.b32.xlu2 %v5590_v41, %s12627_s10 }
 0x676   : > { %v9134_v55 = vunpack.i.h.bf16 %v11509_v16  ;;  %v9119_v30 = vunpack.i.h.bf16 %v11515_v34  ;;  %v9118_v13 = vunpack.i.l.bf16 %v11515_v34  ;;  %v9133_v6 = vunpack.i.l.bf16 %v11509_v16 }
 0x677   : > { %v5737_v34 = vmul.f32 %v9124_v28, %v11039_v5  ;;  %v11639_v5 = vunpack.c.h.bf16 %v11505_v14 }
 0x678   : > { %v5890_v45 = vmul.f32 %v9134_v55, %v11512_v32  ;;  %v5729_v18 = vsel %vm12687_vm1, %v9124_v28, %v9118_v13  ;;  %v5731_v49 = vsel %vm12688_vm4, %v9119_v30, %v9123_v61  ;;  %v11541_v43 = vpop.permute.xlu1 %5450  ;;  %vm12695_vm1 = vcmask 965632  }
 0x679   : > { %v5738_v40 = vmul.f32 %v5729_v18, %v11041_v7  ;;  %v5712_v7 = vunpack.c.l.bf16 %v5688_v50  ;;  %v5740_v3 = vmul.f32 %v5731_v49, %v11539_v21  ;;  %vm12696_vm4 = vcmask 973824  }
 0x67a   : > { %v5895_v42 = vpack.c.bf16 %v5890_v45, %v5890_v45  ;;  %vm12697_vm0 = vmmov %vm12696_vm4  ;;  %v5894_v49 = vmul.f32 %v9133_v6, %v5865_v38 }
 0x67b   : > { %8608 = vmatmul.msk.bf16.vlgmr.msra.gmra.mxu1 %vm409_vm10, %v11446_v33  ;;  %v5743_v60 = vpack.c.bf16 %v5738_v40, %v5738_v40  ;;  %8609 = vmatmul.msk.bf16.vlgmr.msra.gmra.mxu2 %vm409_vm10, %v11446_v33  ;;  %v5741_v19 = vmul.f32 %v9123_v61, %v5712_v7  ;;  %v6410_v33 = vperm.slane %v6408_v0, 0  ;;  %v5745_v39 = vpack.c.bf16 %v5740_v3, %v5740_v3  ;;  %v12703_v3 = vld [vmem:[#allocation3_spill] sm:$0xff] }
 0x67c   : > { %5907 = vrot.lane.b32.xlu1 %v5895_v42, %s12689_s30  ;;  %v6564_v0 = vpack.i.b16 %v12700_v59, %v12700_v59  ;;  %v5899_v31 = vpack.c.bf16 %v5894_v49, %v5894_v49 }
 0x67d   : > { %v11556_v48 = vpop.permute.xlu0 %5297  ;;  %5454 = vrot.lane.b32.xlu2 %v5439_v22, %s9303_s29  ;;  %5756 = vrot.lane.b32.xlu0 %v5743_v60, %s12673_s15  ;;  %v5746_v47 = vpack.c.bf16 %v5741_v19, %v5741_v19  ;;  %v6425_v24 = vunpack.c.l.bf16 %v6410_v33  ;;  %v12704_v19 = vld [vmem:[#allocation10_spill] sm:$0xff] }
 0x67e   : > { %v5305_v58 = vsel %vm12693_vm5, %v5296_v23, %v11556_v48  ;;  %v5155_v23 = vsel %vm12695_vm1, %v11507_v2, %v11451_v62  ;;  %v5586_v62 = vmul.f32 %v5577_v9, %v11578_v27  ;;  %vm12702_vm1 = vcmask 523264  }
 0x67f   : > { %v5313_v56 = vsel %vm275_vm7, %v5305_v58, 0  ;;  %v9160_v42 = vpack.i.bf16 %v6425_v24, %v6428_v52  ;;  %v5169_v50 = vsel %vm275_vm7, %v5155_v23, 0  ;;  %v5730_v7 = vsel %vm12702_vm1, %v9118_v13, %v9119_v30 }
 0x680   : > { %5331 = vmatpush.bf16.msrb.mxu0 %v5313_v56  ;;  %v11580_v29 = vpop.permute.xlu1 %5301  ;;  %v5591_v22 = vpack.c.bf16 %v5586_v62, %v5586_v62  ;;  %v6411_v58 = vpack.i.b16 %v12703_v3, %v12703_v3  ;;  %v6566_v30 = vperm.slane %v6564_v0, 0  ;;  %v5739_v56 = vmul.f32 %v5730_v7, %v11578_v27 }
 0x682   : > { %v6579_v15 = vunpack.c.l.bf16 %v6566_v30  ;;  %v5744_v8 = vpack.c.bf16 %v5739_v56, %v5739_v56 }
 0x684   : > { %5760 = vrot.lane.b32.xlu1 %v5745_v39, %s12673_s15  ;;  %v5742_v39 = vpack.c.bf16 %v5737_v34, %v5737_v34  ;;  %v6147_v34 = vld [vmem:[#allocation2 + $0x10] sm:$0xf] }
 0x685   : > { %v4996_v41 = vpop.permute.xlu0 %4995  ;;  %5762 = vrot.lane.b32.xlu2 %v5746_v47, %s12673_s15  ;;  %5607 = vrot.lane.b32.xlu0 %v5592_v10, %s12627_s10 }
 0x686   : > { %v5001_v45 = vsel %vm12696_vm4, %v11462_v51, %v4996_v41  ;;  %v5002_v61 = vsel %vm12697_vm0, %v4996_v41, %v11460_v26  ;;  %v5308_v51 = vsel %vm12693_vm5, %v11580_v29, %v11476_v37  ;;  %v5883_v26 = vsel %vm12698_vm6, %v9128_v46, %v9129_v35  ;;  %vm12705_vm4 = vmmov %vm12698_vm6 }
 0x687   : > { %v5013_v18 = vsel %vm275_vm7, %v5001_v45, 0  ;;  %v5016_v57 = vsel %vm275_vm7, %v5002_v61, 0  ;;  %v5322_v40 = vsel %vm275_vm7, %v5308_v51, 0  ;;  %v6567_v37 = vpack.i.b16 %v12701_v54, %v12701_v54 }
 0x688   : > { %5051 = vmatpush.bf16.msrb.mxu2 %v5013_v18  ;;  %5064 = vmatpush.bf16.msrb.mxu3 %v5016_v57  ;;  %v5892_v60 = vmul.f32 %v5883_v26, %v11144_v4  ;;  %v6414_v4 = vpack.i.b16 %v12704_v19, %v12704_v19  ;;  %v11632_v44 = vpop.permute.xlu1 %5609  ;;  %v5882_v24 = vsel %vm12705_vm4, %v9134_v55, %v9128_v46  ;;  %vm12706_vm0 = vcmask 965632  }
 0x689   : > { %v6569_v13 = vperm.slane %v6567_v37, 0  ;;  %vm12707_vm5 = vmmov %vm12706_vm0  ;;  %v5891_v38 = vmul.f32 %v5882_v24, %v11639_v5  ;;  %vm12708_vm6 = vcmask 908288   ;;  %vm12710_vm4 = vcmask 916480  }
 0x68a   : > { %v5897_v33 = vpack.c.bf16 %v5892_v60, %v5892_v60  ;;  %v6416_v17 = vperm.slane %v6414_v4, 0  ;;  %vm12709_vm1 = vmmov %vm12708_vm6  ;;  %v8624_v4 = vld [vmem:[%s12531_s4 + $0x18] sm:$0xf] }
 0x68b   : > { %8616 = vmatmul.msk.bf16.vlgmr.msrb.gmra.mxu3 %vm409_vm10, %v11470_v20  ;;  %8614 = vmatmul.msk.bf16.vlgmr.msrb.gmra.mxu1 %vm409_vm10, %v11470_v20  ;;  %v6580_v47 = vunpack.c.l.bf16 %v6569_v13 }
 0x68c   : > { %5217 = vmatpush.bf16.msra.mxu3 %v5169_v50  ;;  %9161 = vrot.lane.b32.xlu1 %v9160_v42, %s12699_s16  ;;  %v6427_v23 = vunpack.c.l.bf16 %v6416_v17  ;;  %v6171_v17 = vunpack.c.l.bf16 %v6147_v34 }
 0x68d   : > { %v11618_v63 = vpop.permute.xlu0 %5456  ;;  %5605 = vrot.lane.b32.xlu2 %v5591_v22, %s12627_s10  ;;  %8615 = vmatmul.msk.bf16.vlgmr.msrb.gmra.mxu2 %vm409_vm10, %v11470_v20  ;;  %v6413_v20 = vperm.slane %v6411_v58, 0  ;;  %v9165_v46 = vpack.i.bf16 %v6580_v47, %v6579_v15  ;;  %v5994_v22 = vld [vmem:[#allocation2 + $0x10] sm:$0xf] }
 0x68e   : > { %5915 = vrot.lane.b32.xlu0 %v5899_v31, %s12689_s30  ;;  %v6018_v59 = vunpack.c.l.bf16 %v5994_v22  ;;  %8625 = vmatmul.msk.bf16.vlgmr.msrb.gmra.mxu0 %vm409_vm10, %v8624_v4  ;;  %v11730_v22 = vld [vmem:[%s12531_s4 + $0x1c] sm:$0xf] }
 0x68f   : > { %v6426_v10 = vunpack.c.l.bf16 %v6413_v20 }
 0x690   : > { %5370 = vmatpush.bf16.msrb.mxu3 %v5322_v40 }
 0x691   : > { %v9155_v45 = vpack.i.bf16 %v6427_v23, %v6426_v10  ;;  %v12719_v10 = vld [vmem:[#allocation14_spill] sm:$0xff] }
 0x692   : > { %v6561_v23 = vpack.i.b16 %v12719_v10, %v12719_v10 }
 0x694   : > { %5911 = vrot.lane.b32.xlu1 %v5897_v33, %s12689_s30 }
 0x695   : > { %v5147_v28 = vpop.permute.xlu0 %5146  ;;  %5754 = vrot.lane.b32.xlu2 %v5742_v39, %s12673_s15 }
 0x696   : > { %v5153_v52 = vsel %vm12706_vm0, %v11458_v53, %v5147_v28  ;;  %v5154_v9 = vsel %vm12707_vm5, %v5147_v28, %v11507_v2  ;;  %5758 = vrot.lane.b32.xlu0 %v5744_v8, %s12673_s15  ;;  %v5896_v53 = vpack.c.bf16 %v5891_v38, %v5891_v38  ;;  %v11653_v2 = vpop.permute.xlu1 %5452  ;;  %vm12711_vm0 = vmmov %vm12710_vm4  ;;  %vm12712_vm5 = vcmask 539648   ;;  %v12720_v38 = vld [vmem:[#allocation15_spill] sm:$0xff]  ;;  %s12725_s15 = smov 55  }
 0x697   : > { %v5163_v55 = vsel %vm275_vm7, %v5153_v52, 0  ;;  %v5166_v41 = vsel %vm275_vm7, %v5154_v9, 0  ;;  %v5459_v57 = vsel %vm12709_vm1, %v11541_v43, %v11653_v2  ;;  %vm12714_vm1 = vcmask 531456  }
 0x698   : > { %5191 = vmatpush.bf16.msra.mxu1 %v5163_v55  ;;  %5204 = vmatpush.bf16.msra.mxu2 %v5166_v41  ;;  %v5469_v40 = vsel %vm275_vm7, %v5459_v57, 0  ;;  %v5884_v13 = vsel %vm12714_vm1, %v9129_v35, %v9133_v6  ;;  %v6570_v55 = vpack.i.b16 %v12720_v38, %v12720_v38 }
 0x699   : > { %v5893_v25 = vmul.f32 %v5884_v13, %v11147_v1 }
 0x69b   : > { %8622 = vmatmul.msk.bf16.vlgmr.msra.gmra.mxu3 %vm409_vm10, %v11566_v11  ;;  %8620 = vmatmul.msk.bf16.vlgmr.msra.gmra.mxu1 %vm409_vm10, %v11566_v11  ;;  %v5898_v8 = vpack.c.bf16 %v5893_v25, %v5893_v25 }
 0x69c   : > { %9166 = vrot.lane.b32.xlu1 %v9165_v46, %s9307_s25 }
 0x69d   : > { %v5449_v61 = vpop.permute.xlu0 %5448  ;;  %5909 = vrot.lane.b32.xlu2 %v5896_v53, %s12689_s30  ;;  %8621 = vmatmul.msk.bf16.vlgmr.msra.gmra.mxu2 %vm409_vm10, %v11566_v11  ;;  %v6563_v53 = vperm.slane %v6561_v23, 0 }
 0x69e   : > { %v5458_v62 = vsel %vm12708_vm6, %v5449_v61, %v11541_v43  ;;  %9156 = vrot.lane.b32.xlu0 %v9155_v45, %s12699_s16  ;;  %v11667_v50 = vpop.permute.xlu1 %5601  ;;  %v9137_v43 = vpop.permute.xlu2 %9136  ;;  %vm12713_vm6 = vmmov %vm12712_vm5  ;;  %v6572_v61 = vperm.slane %v6570_v55, 0 }
 0x69f   : > { %v5466_v18 = vsel %vm275_vm7, %v5458_v62, 0  ;;  %v9139_v54 = vunpack.i.h.bf16 %v9137_v43  ;;  %v9138_v37 = vunpack.i.l.bf16 %v9137_v43 }
 0x6a0   : > { %5484 = vmatpush.bf16.msra.mxu0 %v5466_v18 }
 0x6a3   : > { %8631 = vmatmul.msk.bf16.vlgmr.msra.gmra.mxu0 %vm409_vm10, %v11730_v22 }
 0x6a5   : > { %v5300_v42 = vpop.permute.xlu0 %5299 }
 0x6a6   : > { %v5306_v49 = vsel %vm12710_vm4, %v11556_v48, %v5300_v42  ;;  %v5307_v11 = vsel %vm12711_vm0, %v5300_v42, %v11580_v29  ;;  %v11676_v60 = vpop.permute.xlu1 %9151  ;;  %vm12716_vm4 = vcmask 588800   ;;  %vm12717_vm0 = vmmov %vm12712_vm5  ;;  %v6578_v42 = vunpack.c.l.bf16 %v6563_v53 }
 0x6a7   : > { %v5316_v51 = vsel %vm275_vm7, %v5306_v49, 0  ;;  %v5319_v26 = vsel %vm275_vm7, %v5307_v11, 0  ;;  %v9153_v56 = vunpack.i.l.bf16 %v11676_v60  ;;  %v9154_v16 = vunpack.i.h.bf16 %v11676_v60  ;;  %v11721_v11 = vld [vmem:[#allocation2 + $0x10] sm:$0xf]  ;;  %vm12727_vm1 = vmmov %vm12716_vm4  ;;  %v12730_v60 = vld [vmem:[#allocation21_spill] sm:$0xff] }
 0x6a8   : > { %5344 = vmatpush.bf16.msrb.mxu1 %v5316_v51  ;;  %5357 = vmatpush.bf16.msrb.mxu2 %v5319_v26  ;;  %v6036_v9 = vsel %vm12717_vm0, %v9138_v37, %v9139_v54  ;;  %v6581_v49 = vunpack.c.l.bf16 %v6572_v61  ;;  %v6310_v26 = vunpack.c.l.b16 %v11721_v11 }
 0x6a9   : > { %v6200_v35 = vmul.f32 %v9153_v56, %v6171_v17  ;;  %v6045_v46 = vmul.f32 %v6036_v9, %v11578_v27  ;;  %v6196_v51 = vmul.f32 %v9154_v16, %v11512_v32 }
 0x6ab   : > { %8626 = vmatmul.msk.bf16.vlgmr.msrb.gmra.mxu1 %vm409_vm10, %v8624_v4  ;;  %8628 = vmatmul.msk.bf16.vlgmr.msrb.gmra.mxu3 %vm409_vm10, %v8624_v4  ;;  %v6205_v28 = vpack.c.bf16 %v6200_v35, %v6200_v35  ;;  %v6050_v57 = vpack.c.bf16 %v6045_v46, %v6045_v46  ;;  %v6201_v43 = vpack.c.bf16 %v6196_v51, %v6196_v51  ;;  %v12729_v35 = vld [vmem:[#allocation18_spill] sm:$0xff] }
 0x6ac   : > { %5497 = vmatpush.bf16.msra.mxu1 %v5469_v40  ;;  %v9170_v40 = vpack.i.bf16 %v6578_v42, %v6581_v49 }
 0x6ad   : > { %v9142_v0 = vpop.permute.xlu0 %9141  ;;  %8627 = vmatmul.msk.bf16.vlgmr.msrb.gmra.mxu2 %vm409_vm10, %v8624_v4  ;;  %v6309_v4 = vunpack.c.h.b16 %v11527_v12 }
 0x6ae   : > { %v9144_v31 = vunpack.i.h.bf16 %v9142_v0  ;;  %v9143_v48 = vunpack.i.l.bf16 %v9142_v0  ;;  %v12722_v0 = vld [vmem:[#allocation20_spill] sm:$0xff] }
 0x6b0   : > { %v6035_v29 = vsel %vm12712_vm5, %v9144_v31, %v9138_v37  ;;  %v6037_v7 = vsel %vm12713_vm6, %v9139_v54, %v9143_v48  ;;  %v6047_v3 = vmul.f32 %v9143_v48, %v6018_v59  ;;  %vm12718_vm5 = vmmov %vm12716_vm4  ;;  %v6043_v41 = vmul.f32 %v9144_v31, %v11512_v32  ;;  %v12723_v31 = vld [vmem:[#allocation16_spill] sm:$0xff] }
 0x6b1   : > { %v6044_v58 = vmul.f32 %v6035_v29, %v11639_v5  ;;  %v6046_v19 = vmul.f32 %v6037_v7, %v11539_v21  ;;  %v6315_v59 = vpack.c.b16 %v6310_v26, %v6310_v26  ;;  %v6867_v54 = vpack.i.b16 %v12722_v0, %v12722_v0  ;;  %v12724_v29 = vld [vmem:[#allocation19_spill] sm:$0xff] }
 0x6b2   : > { %v6052_v30 = vpack.c.bf16 %v6047_v3, %v6047_v3  ;;  %v6048_v62 = vpack.c.bf16 %v6043_v41, %v6043_v41  ;;  %v6876_v37 = vpack.i.b16 %v11125_v36, %v11125_v36  ;;  %v6714_v48 = vpack.i.b16 %v12723_v31, %v12723_v31 }
 0x6b3   : > { %v6051_v33 = vpack.c.bf16 %v6046_v19, %v6046_v19  ;;  %v6049_v20 = vpack.c.bf16 %v6044_v58, %v6044_v58  ;;  %v6723_v7 = vpack.i.b16 %v12724_v29, %v12724_v29  ;;  %v6308_v3 = vunpack.c.l.b16 %v11527_v12 }
 0x6b4   : > { %6068 = vrot.lane.b32.xlu2 %v6052_v30, %s12715_s7  ;;  %v6306_v58 = vunpack.c.l.b16 %v11505_v14  ;;  %v6869_v34 = vperm.slane %v6867_v54, 0  ;;  %vm12726_vm6 = vcmask 900096   ;;  %v6878_v30 = vperm.slane %v6876_v37, 0 }
 0x6b5   : > { %v11696_v39 = vpop.permute.xlu0 %9146  ;;  %6066 = vrot.lane.b32.xlu1 %v6051_v33, %s12715_s7  ;;  %6062 = vrot.lane.b32.xlu0 %v6049_v20, %s12715_s7  ;;  %v6716_v13 = vperm.slane %v6714_v48, 0  ;;  %v6725_v33 = vperm.slane %v6723_v7, 0  ;;  %v6313_v17 = vpack.c.b16 %v6308_v3, %v6308_v3 }
 0x6b6   : > { %v9148_v6 = vunpack.i.l.bf16 %v11696_v39  ;;  %v9149_v15 = vunpack.i.h.bf16 %v11696_v39  ;;  %v6311_v39 = vpack.c.b16 %v6306_v58, %v6306_v58 }
 0x6b8   : > { %v6188_v47 = vsel %vm12716_vm4, %v9154_v16, %v9148_v6  ;;  %v6189_v1 = vsel %vm12718_vm5, %v9148_v6, %v9149_v15  ;;  %v6190_v25 = vsel %vm12727_vm1, %v9149_v15, %v9153_v56  ;;  %v6314_v16 = vpack.c.b16 %v6309_v4, %v6309_v4  ;;  %v12728_v6 = vld [vmem:[#allocation17_spill] sm:$0xff]  ;;  %v12731_v15 = vld [vmem:[#allocation22_spill] sm:$0xff]  ;;  %vm12736_vm5 = vmmov %vm12726_vm6 }
 0x6b9   : > { %v6197_v24 = vmul.f32 %v6188_v47, %v11639_v5  ;;  %v6198_v45 = vmul.f32 %v6189_v1, %v11578_v27  ;;  %v6717_v12 = vpack.i.b16 %v12728_v6, %v12728_v6  ;;  %v6720_v47 = vpack.i.b16 %v12729_v35, %v12729_v35 }
 0x6ba   : > { %v6870_v56 = vpack.i.b16 %v12730_v60, %v12730_v60  ;;  %v6199_v9 = vmul.f32 %v6190_v25, %v11539_v21  ;;  %vm12732_vm4 = vcmask 908288  }
 0x6bb   : > { %v6202_v52 = vpack.c.bf16 %v6197_v24, %v6197_v24  ;;  %v6203_v18 = vpack.c.bf16 %v6198_v45, %v6198_v45  ;;  %8632 = vmatmul.msk.bf16.vlgmr.msra.gmra.mxu1 %vm409_vm10, %v11730_v22  ;;  %v6887_v24 = vunpack.c.l.bf16 %v6878_v30  ;;  %v6719_v10 = vperm.slane %v6717_v12, 0  ;;  %vm12733_vm0 = vmmov %vm12732_vm4 }
 0x6bc   : > { %5913 = vrot.lane.b32.xlu2 %v5898_v8, %s12689_s30  ;;  %v6731_v8 = vunpack.c.l.bf16 %v6716_v13  ;;  %v6722_v23 = vperm.slane %v6720_v47, 0  ;;  %v6872_v61 = vperm.slane %v6870_v56, 0  ;;  %s12735_s30 = smov 81  }
 0x6bd   : > { %6215 = vrot.lane.b32.xlu1 %v6202_v52, %s12721_s17  ;;  %6221 = vrot.lane.b32.xlu0 %v6205_v28, %s12721_s17  ;;  %v6734_v28 = vunpack.c.l.bf16 %v6725_v33  ;;  %v6873_v52 = vpack.i.b16 %v12731_v15, %v12731_v15 }
 0x6be   : > { %v6885_v42 = vunpack.c.l.bf16 %v6872_v61  ;;  %v11830_v61 = vld [vmem:[#allocation1 + $0x12] sm:$0xff] }
 0x6bf   : > { %v9180_v46 = vpack.i.bf16 %v6731_v8, %v6734_v28 }
 0x6c4   : > { %6060 = vrot.lane.b32.xlu2 %v6048_v62, %s12715_s7  ;;  %v6875_v62 = vperm.slane %v6873_v52, 0  ;;  %v8642_v52 = vld [vmem:[%s12531_s4 + $0x24] sm:$0xf] }
 0x6c5   : > { %6217 = vrot.lane.b32.xlu1 %v6203_v18, %s12721_s17  ;;  %6064 = vrot.lane.b32.xlu0 %v6050_v57, %s12715_s7  ;;  %v6204_v18 = vpack.c.bf16 %v6199_v9, %v6199_v9  ;;  %v8636_v57 = vld [vmem:[%s12531_s4 + $0x20] sm:$0xf]  ;;  %s12734_s7 = smov 82  }
 0x6c6   : > { %v6886_v49 = vunpack.c.l.bf16 %v6875_v62  ;;  %v11832_v62 = vld [vmem:[#allocation1 + $0x1b] sm:$0xff] }
 0x6cc   : > { %9171 = vrot.lane.b32.xlu2 %v9170_v40, %s9307_s25  ;;  %v9185_v40 = vpack.i.bf16 %v6886_v49, %v6885_v42  ;;  %s8751_s25 = sshll.u32 %s12815_s22, 4 }
 0x6cd   : > { %6324 = vrot.lane.b32.xlu1 %v6315_v59, %s12725_s15  ;;  %6213 = vrot.lane.b32.xlu0 %v6201_v43, %s12721_s17  ;;  %v6307_v43 = vunpack.c.h.b16 %v11505_v14 }
 0x6cf   : > { %v5604_v19 = vpop.permute.xlu2 %5603  ;;  %v6312_v37 = vpack.c.b16 %v6307_v43, %v6307_v43 }
 0x6d0   : > { %v5611_v36 = vsel %vm12726_vm6, %v11667_v50, %v5604_v19  ;;  %v6884_v50 = vunpack.c.l.bf16 %v6869_v34  ;;  %vm12737_vm6 = vcmask 523264  }
 0x6d1   : > { %v5619_v20 = vsel %vm275_vm7, %v5611_v36, 0  ;;  %vm12738_vm1 = vmmov %vm12737_vm6 }
 0x6d2   : > { %5637 = vmatpush.bf16.msrb.mxu0 %v5619_v20  ;;  %v9190_v41 = vpack.i.bf16 %v6884_v50, %v6887_v24 }
 0x6d4   : > { %6320 = vrot.lane.b32.xlu2 %v6313_v17, %s12725_s15 }
 0x6d5   : > { %6316 = vrot.lane.b32.xlu1 %v6311_v39, %s12725_s15  ;;  %6322 = vrot.lane.b32.xlu0 %v6314_v16, %s12725_s15  ;;  %v6424_v39 = vunpack.c.l.bf16 %v11721_v11 }
 0x6d6   : > { %8637 = vmatmul.msk.bf16.vlgmr.msrb.gmra.mxu0 %vm409_vm10, %v8636_v57 }
 0x6d7   : > { %v5455_v1 = vpop.permute.xlu2 %5454 }
 0x6d8   : > { %v5460_v38 = vsel %vm12732_vm4, %v11653_v2, %v5455_v1  ;;  %v5461_v55 = vsel %vm12733_vm0, %v5455_v1, %v11618_v63  ;;  %v6732_v63 = vunpack.c.l.bf16 %v6719_v10  ;;  %v6733_v2 = vunpack.c.l.bf16 %v6722_v23  ;;  %vm12740_vm0 = vmmov %vm12736_vm5 }
 0x6d9   : > { %v5472_v45 = vsel %vm275_vm7, %v5460_v38, 0  ;;  %v5475_v53 = vsel %vm275_vm7, %v5461_v55, 0  ;;  %vm12739_vm4 = vcmask 515072  }
 0x6da   : > { %5510 = vmatpush.bf16.msra.mxu2 %v5472_v45  ;;  %5523 = vmatpush.bf16.msra.mxu3 %v5475_v53  ;;  %v9175_v26 = vpack.i.bf16 %v6733_v2, %v6732_v63 }
 0x6dc   : > { %6219 = vrot.lane.b32.xlu2 %v6204_v18, %s12721_s17  ;;  %s12742_s17 = smov 54   ;;  %v8700_v18 = vld [vmem:[%s12528_s1 + $0x4c] sm:$0xf] }
 0x6dd   : > { %9191 = vrot.lane.b32.xlu1 %v9190_v41, %s12734_s7  ;;  %9181 = vrot.lane.b32.xlu0 %v9180_v46, %s12735_s30  ;;  %v11824_v41 = vld [vmem:[#allocation1] sm:$0xff]  ;;  %v11826_v46 = vld [vmem:[#allocation1 + $0x9] sm:$0xff] }
 0x6de   : > { %8634 = vmatmul.msk.bf16.vlgmr.msra.gmra.mxu3 %vm409_vm10, %v11730_v22  ;;  %8633 = vmatmul.msk.bf16.vlgmr.msra.gmra.mxu2 %vm409_vm10, %v11730_v22  ;;  %7125 = vst [vmem:[#allocation1] ss:$9 sm:$0xff] %v8700_v18 }
 0x6df   : > { %v5763_v51 = vpop.permute.xlu2 %5762 }
 0x6e4   : > { %9176 = vrot.lane.b32.xlu2 %v9175_v26, %s12735_s30  ;;  %s12768_s30 = smov 47  }
 0x6e5   : > { %9186 = vrot.lane.b32.xlu0 %v9185_v40, %s12734_s7 }
 0x6e7   : > { %v5606_v59 = vpop.permute.xlu2 %5605 }
 0x6e8   : > { %v5612_v0 = vsel %vm12736_vm5, %v5604_v19, %v5606_v59  ;;  %vm12741_vm5 = vmmov %vm12740_vm0 }
 0x6e9   : > { %v5622_v54 = vsel %vm275_vm7, %v5612_v0, 0 }
 0x6ea   : > { %5650 = vmatpush.bf16.msrb.mxu1 %v5622_v54 }
 0x6ec   : > { %6318 = vrot.lane.b32.xlu2 %v6312_v37, %s12725_s15  ;;  %s12755_s15 = smov 48  }
 0x6ed   : > { %8638 = vmatmul.msk.bf16.vlgmr.msrb.gmra.mxu1 %vm409_vm10, %v8636_v57 }
 0x6ee   : > { %v5908_v31 = vpop.permute.xlu1 %5907 }
 0x6ef   : > { %v5755_v22 = vpop.permute.xlu2 %5754  ;;  %v5757_v48 = vpop.permute.xlu0 %5756 }
 0x6f0   : > { %v5764_v29 = vsel %vm12737_vm6, %v5755_v22, %v5757_v48  ;;  %vm12743_vm6 = vmmov %vm12739_vm4  ;;  %v7128_v22 = vld [vmem:[#allocation1 + $0x12] sm:$0xff] }
 0x6f1   : > { %v5772_v7 = vsel %vm275_vm7, %v5764_v29, 0  ;;  %v11855_v29 = vpop.f32.mrf.mxu1 }
 0x6f2   : > { %5790 = vmatpush.bf16.msra.mxu0 %v5772_v7  ;;  %v11857_v7 = vpop.f32.mrf.mxu2 }
 0x6f5   : > { %8643 = vmatmul.msk.bf16.vlgmr.msra.gmra.mxu0 %vm409_vm10, %v8642_v52 }
 0x6f6   : > { %v5761_v14 = vpop.permute.xlu1 %5760 }
 0x6f7   : > { %v5910_v3 = vpop.permute.xlu2 %5909  ;;  %v5767_v58 = vsel %vm12738_vm1, %v5761_v14, %v5763_v51  ;;  %v5608_v19 = vpop.permute.xlu0 %5607 }
 0x6f8   : > { %v5917_v4 = vsel %vm12739_vm4, %v5908_v31, %v5910_v3  ;;  %v5613_v34 = vsel %vm12740_vm0, %v5606_v59, %v5608_v19  ;;  %v5614_v36 = vsel %vm12741_vm5, %v5608_v19, %v11632_v44  ;;  %v5781_v20 = vsel %vm275_vm7, %v5767_v58, 0  ;;  %vm12744_vm4 = vmmov %vm12738_vm1  ;;  %v8648_v59 = vld [vmem:[%s12531_s4 + $0x28] sm:$0xf] }
 0x6f9   : > { %v5925_v30 = vsel %vm275_vm7, %v5917_v4, 0  ;;  %v5625_v13 = vsel %vm275_vm7, %v5613_v34, 0  ;;  %v5628_v33 = vsel %vm275_vm7, %v5614_v36, 0  ;;  %vm12745_vm0 = vcmask 605184   ;;  %v7127_v31 = vld [vmem:[#allocation1 + $0x9] sm:$0xff] }
 0x6fa   : > { %5943 = vmatpush.bf16.msrb.mxu0 %v5925_v30  ;;  %5663 = vmatpush.bf16.msrb.mxu2 %v5625_v13  ;;  %vm12746_vm5 = vmmov %vm12745_vm0  ;;  %v7133_v58 = vpack.i.b16 %v7127_v31, %v7127_v31  ;;  %v7136_v19 = vpack.i.b16 %v7128_v22, %v7128_v22 }
 0x6fb   : > { %5676 = vmatpush.bf16.msrb.mxu3 %v5628_v33 }
 0x6fd   : > { %8639 = vmatmul.msk.bf16.vlgmr.msrb.gmra.mxu2 %vm409_vm10, %v8636_v57 }
 0x6fe   : > { %v9162_v17 = vpop.permute.xlu1 %9161  ;;  %8640 = vmatmul.msk.bf16.vlgmr.msrb.gmra.mxu3 %vm409_vm10, %v8636_v57 }
 0x6ff   : > { %5829 = vmatpush.bf16.msra.mxu3 %v5781_v20  ;;  %v9163_v25 = vunpack.i.l.bf16 %v9162_v17  ;;  %v9164_v6 = vunpack.i.h.bf16 %v9162_v17  ;;  %v7126_v17 = vld [vmem:[#allocation1] sm:$0xff] }
 0x700   : > { %v5916_v16 = vpop.permute.xlu0 %5915 }
 0x701   : > { %v6453_v44 = vmul.f32 %v9163_v25, %v6424_v39  ;;  %v6449_v47 = vmul.f32 %v9164_v6, %v11512_v32 }
 0x703   : > { %v6458_v12 = vpack.c.bf16 %v6453_v44, %v6453_v44  ;;  %v6454_v28 = vpack.c.bf16 %v6449_v47, %v6449_v47 }
 0x705   : > { %6474 = vrot.lane.b32.xlu2 %v6458_v12, %s12742_s17  ;;  %8649 = vmatmul.msk.bf16.vlgmr.msrb.gmra.mxu0 %vm409_vm10, %v8648_v59 }
 0x706   : > { %v5912_v35 = vpop.permute.xlu1 %5911 }
 0x707   : > { %v5918_v50 = vsel %vm12743_vm6, %v5910_v3, %v5912_v35  ;;  %vm12747_vm6 = vmmov %vm12745_vm0  ;;  %v6553_v3 = vld [vmem:[#allocation2 + $0x10] sm:$0xf] }
 0x708   : > { %v5759_v24 = vpop.permute.xlu0 %5758  ;;  %v5928_v15 = vsel %vm275_vm7, %v5918_v50, 0  ;;  %v6577_v36 = vunpack.c.l.bf16 %v6553_v3  ;;  %v7138_v50 = vperm.slane %v7136_v19, 0 }
 0x709   : > { %v5765_v8 = vsel %vm12738_vm1, %v5757_v48, %v5759_v24  ;;  %v5766_v11 = vsel %vm12744_vm4, %v5759_v24, %v5761_v14  ;;  %vm12748_vm1 = vcmask 515072   ;;  %v11853_v48 = vpop.f32.mrf.mxu0  ;;  %v11859_v14 = vpop.f32.mrf.mxu3 }
 0x70a   : > { %v5775_v60 = vsel %vm275_vm7, %v5765_v8, 0  ;;  %v5778_v56 = vsel %vm275_vm7, %v5766_v11, 0  ;;  %vm12749_vm4 = vmmov %vm12748_vm1 }
 0x70b   : > { %5803 = vmatpush.bf16.msra.mxu1 %v5775_v60  ;;  %5816 = vmatpush.bf16.msra.mxu2 %v5778_v56  ;;  %v4520_v56 = vpop.f32.mrf.mxu1 }
 0x70d   : > { %6466 = vrot.lane.b32.xlu2 %v6454_v28, %s12742_s17  ;;  %v7130_v28 = vpack.i.b16 %v7126_v17, %v7126_v17 }
 0x70e   : > { %v6069_v9 = vpop.permute.xlu2 %6068  ;;  %8644 = vmatmul.msk.bf16.vlgmr.msra.gmra.mxu1 %vm409_vm10, %v8642_v52  ;;  %8646 = vmatmul.msk.bf16.vlgmr.msra.gmra.mxu3 %vm409_vm10, %v8642_v52  ;;  %v9167_v37 = vpop.permute.xlu1 %9166 }
 0x70f   : > { %5956 = vmatpush.bf16.msrb.mxu1 %v5928_v15  ;;  %8645 = vmatmul.msk.bf16.vlgmr.msra.gmra.mxu2 %vm409_vm10, %v8642_v52  ;;  %v9168_v34 = vunpack.i.l.bf16 %v9167_v37  ;;  %v9169_v39 = vunpack.i.h.bf16 %v9167_v37 }
 0x710   : > { %v9157_v1 = vpop.permute.xlu0 %9156 }
 0x711   : > { %v9159_v10 = vunpack.i.h.bf16 %v9157_v1  ;;  %v9158_v23 = vunpack.i.l.bf16 %v9157_v1  ;;  %v4507_v60 = vpop.f32.mrf.mxu0  ;;  %v4533_v1 = vpop.f32.mrf.mxu2 }
 0x713   : > { %v6443_v38 = vsel %vm12745_vm0, %v9159_v10, %v9163_v25  ;;  %v6441_v55 = vsel %vm12746_vm5, %v9164_v6, %v9158_v23  ;;  %v6442_v42 = vsel %vm12747_vm6, %v9158_v23, %v9159_v10  ;;  %vm12750_vm0 = vcmask 506880   ;;  %v7129_v6 = vld [vmem:[#allocation1 + $0x1b] sm:$0xff]  ;;  %v4546_v10 = vpop.f32.mrf.mxu3 }
 0x714   : > { %v6452_v45 = vmul.f32 %v6443_v38, %v11539_v21  ;;  %v6450_v53 = vmul.f32 %v6441_v55, %v11639_v5  ;;  %v6451_v43 = vmul.f32 %v6442_v42, %v11578_v27  ;;  %vm12751_vm5 = vmmov %vm12750_vm0  ;;  %vm12752_vm6 = vcmask 654336  }
 0x716   : > { %v5914_v57 = vpop.permute.xlu2 %5913  ;;  %v6457_v63 = vpack.c.bf16 %v6452_v45, %v6452_v45  ;;  %v6455_v2 = vpack.c.bf16 %v6450_v53, %v6450_v53  ;;  %v6456_v54 = vpack.c.bf16 %v6451_v43, %v6451_v43  ;;  %v7149_v45 = vunpack.c.l.bf16 %v7138_v50 }
 0x717   : > { %v5919_v49 = vsel %vm12748_vm1, %v5912_v35, %v5914_v57  ;;  %v5920_v51 = vsel %vm12749_vm4, %v5914_v57, %v5916_v16  ;;  %v7135_v16 = vperm.slane %v7133_v58, 0  ;;  %vm12753_vm1 = vmmov %vm12752_vm6 }
 0x718   : > { %v5931_v26 = vsel %vm275_vm7, %v5919_v49, 0  ;;  %v5934_v40 = vsel %vm275_vm7, %v5920_v51, 0  ;;  %6472 = vrot.lane.b32.xlu1 %v6457_v63, %s12742_s17  ;;  %6468 = vrot.lane.b32.xlu0 %v6455_v2, %s12742_s17  ;;  %vm12754_vm4 = vmmov %vm12753_vm1  ;;  %v7132_v2 = vperm.slane %v7130_v28, 0 }
 0x719   : > { %5969 = vmatpush.bf16.msrb.mxu2 %v5931_v26  ;;  %5982 = vmatpush.bf16.msrb.mxu3 %v5934_v40  ;;  %v7148_v55 = vunpack.c.l.bf16 %v7135_v16  ;;  %v4598_v3 = vpop.f32.mrf.mxu2 }
 0x71a   : > { %v7147_v40 = vunpack.c.l.bf16 %v7132_v2 }
 0x71b   : > { %v9195_v51 = vpack.i.bf16 %v7149_v45, %v7148_v55 }
 0x71e   : > { %v6061_v0 = vpop.permute.xlu2 %6060  ;;  %8650 = vmatmul.msk.bf16.vlgmr.msrb.gmra.mxu1 %vm409_vm10, %v8648_v59  ;;  %8652 = vmatmul.msk.bf16.vlgmr.msrb.gmra.mxu3 %vm409_vm10, %v8648_v59 }
 0x71f   : > { %8651 = vmatmul.msk.bf16.vlgmr.msrb.gmra.mxu2 %vm409_vm10, %v8648_v59 }
 0x720   : > { %6470 = vrot.lane.b32.xlu0 %v6456_v54, %s12742_s17  ;;  %v4585_v54 = vpop.f32.mrf.mxu1 }
 0x721   : > { %v4586_v22 = vadd.f32 %v4585_v54, %v11855_v29  ;;  %v11936_v54 = vld [vmem:[#allocation2 + $0x10] sm:$0xff]  }
 0x726   : > { %v9172_v4 = vpop.permute.xlu2 %9171 }
 0x727   : > { %v9174_v30 = vunpack.i.h.bf16 %v9172_v4  ;;  %v9173_v13 = vunpack.i.l.bf16 %v9172_v4  ;;  %v11861_v33 = vpop.permute.xlu1 %6066  ;;  %v11863_v20 = vpop.permute.xlu0 %6062 }
 0x728   : > { %v6073_v25 = vsel %vm12750_vm0, %v11861_v33, %v6069_v9  ;;  %v6070_v44 = vsel %vm12751_vm5, %v6061_v0, %v11863_v20  ;;  %v7139_v9 = vpack.i.b16 %v7129_v6, %v7129_v6  ;;  %v4572_v0 = vpop.f32.mrf.mxu0  ;;  %vm12756_vm0 = vcmask 457728  }
 0x729   : > { %v6594_v12 = vsel %vm12752_vm6, %v9174_v30, %v9168_v34  ;;  %v6602_v35 = vmul.f32 %v9174_v30, %v11512_v32  ;;  %v6606_v47 = vmul.f32 %v9173_v13, %v6577_v36  ;;  %v6087_v8 = vsel %vm275_vm7, %v6073_v25, 0  ;;  %v8654_v32 = vld [vmem:[%s12531_s4 + $0x2c] sm:$0xf]  ;;  %vm12757_vm5 = vmmov %vm12756_vm0 }
 0x72a   : > { %v6603_v24 = vmul.f32 %v6594_v12, %v11639_v5  ;;  %v6078_v11 = vsel %vm275_vm7, %v6070_v44, 0  ;;  %6135 = vmatpush.bf16.msra.mxu3 %v6087_v8  ;;  %v6595_v5 = vsel %vm12753_vm1, %v9168_v34, %v9169_v39  ;;  %v6596_v38 = vsel %vm12754_vm4, %v9169_v39, %v9173_v13  ;;  %vm12758_vm6 = vmmov %vm12756_vm0  ;;  %v4587_v12 = vpop.f32.mrf.mxu1 }
 0x72b   : > { %v6607_v15 = vpack.c.bf16 %v6602_v35, %v6602_v35  ;;  %v6611_v52 = vpack.c.bf16 %v6606_v47, %v6606_v47  ;;  %6096 = vmatpush.bf16.msra.mxu0 %v6078_v11  ;;  %v6604_v18 = vmul.f32 %v6595_v5, %v11578_v27  ;;  %v7141_v42 = vperm.slane %v7139_v9, 0 }
 0x72c   : > { %v6608_v23 = vpack.c.bf16 %v6603_v24, %v6603_v24  ;;  %v6605_v49 = vmul.f32 %v6596_v38, %v11539_v21  ;;  %v4573_v31 = vadd.f32 %v4572_v0, %v11853_v48  ;;  %v4599_v36 = vadd.f32 %v4598_v3, %v11857_v7  ;;  %v4611_v48 = vpop.f32.mrf.mxu3  ;;  %v11934_v0 = vld [vmem:[#allocation2] sm:$0xff] }
 0x72d   : > { %6619 = vrot.lane.b32.xlu1 %v6607_v15, %s12755_s15  ;;  %6627 = vrot.lane.b32.xlu0 %v6611_v52, %s12755_s15  ;;  %v6609_v26 = vpack.c.bf16 %v6604_v18, %v6604_v18  ;;  %v7150_v43 = vunpack.c.l.bf16 %v7141_v42  ;;  %vm12759_vm1 = vcmask 506880   ;;  %v4612_v6 = vadd.f32 %v4611_v48, %v11859_v14  ;;  %v8706_v14 = vld [vmem:[%s12528_s1 + $0x50] sm:$0xf] }
 0x72e   : > { %v11881_v53 = vpop.permute.xlu2 %6320  ;;  %6621 = vrot.lane.b32.xlu2 %v6608_v23, %s12755_s15  ;;  %8655 = vmatmul.msk.bf16.vlgmr.msra.gmra.mxu0 %vm409_vm10, %v8654_v32  ;;  %v6610_v59 = vpack.c.bf16 %v6605_v49, %v6605_v49  ;;  %vm12760_vm4 = vmmov %vm12759_vm1  ;;  %7278 = vst [vmem:[#allocation1] ss:$9 sm:$0xff] %v8706_v14 }
 0x72f   : > { %v6216_v57 = vpop.permute.xlu1 %6215  ;;  %v6222_v63 = vpop.permute.xlu0 %6221  ;;  %8658 = vmatmul.msk.bf16.vlgmr.msra.gmra.mxu3 %vm409_vm10, %v8654_v32  ;;  %v9200_v34 = vpack.i.bf16 %v7147_v40, %v7150_v43 }
 0x732   : > { %v4734_v60 = vpop.f32.mrf.mxu1 }
 0x733   : > { %v4765_v52 = vadd.f32 %v4734_v60, %v4586_v22 }
 0x734   : > { %v4613_v8 = vpop.f32.mrf.mxu3 }
 0x735   : > { %6623 = vrot.lane.b32.xlu1 %v6609_v26, %s12755_s15  ;;  %9196 = vrot.lane.b32.xlu0 %v9195_v51, %s9284_s12  ;;  %v11922_v38 = vld [vmem:[#allocation1] sm:$0xff]  ;;  %v7281_v2 = vld [vmem:[#allocation1 + $0x12] sm:$0xff] }
 0x736   : > { %v6220_v37 = vpop.permute.xlu2 %6219  ;;  %6625 = vrot.lane.b32.xlu2 %v6610_v59, %s12755_s15  ;;  %v11929_v49 = vld [vmem:[#allocation1 + $0x1b] sm:$0xff]  ;;  %v7283_v60 = vpack.i.b16 %v11922_v38, %v11922_v38  ;;  %s12770_s15 = smov 2  }
 0x737   : > { %v6226_v58 = vsel %vm12756_vm0, %v6220_v37, %v6222_v63  ;;  %v6218_v19 = vpop.permute.xlu1 %6217  ;;  %v6065_v4 = vpop.permute.xlu0 %6064  ;;  %v7280_v63 = vld [vmem:[#allocation1 + $0x9] sm:$0xff] }
 0x738   : > { %v6240_v30 = vsel %vm275_vm7, %v6226_v58, 0  ;;  %v6224_v13 = vsel %vm12757_vm5, %v6216_v57, %v6218_v19  ;;  %v6225_v17 = vsel %vm12758_vm6, %v6218_v19, %v6220_v37  ;;  %v6071_v39 = vsel %vm12759_vm1, %v11863_v20, %v6065_v4  ;;  %v4574_v20 = vpop.f32.mrf.mxu0 }
 0x739   : > { %v6234_v29 = vsel %vm275_vm7, %v6224_v13, 0  ;;  %v6237_v25 = vsel %vm275_vm7, %v6225_v17, 0  ;;  %v6072_v44 = vsel %vm12760_vm4, %v6065_v4, %v11861_v33  ;;  %v6081_v16 = vsel %vm275_vm7, %v6071_v39, 0  ;;  %6288 = vmatpush.bf16.msrb.mxu3 %v6240_v30  ;;  %v4600_v33 = vpop.f32.mrf.mxu2 }
 0x73a   : > { %v6084_v7 = vsel %vm275_vm7, %v6072_v44, 0  ;;  %6109 = vmatpush.bf16.msra.mxu1 %v6081_v16  ;;  %vm12761_vm5 = vcmask 449536   ;;  %v4736_v59 = vpop.f32.mrf.mxu1  ;;  %v7286_v19 = vpack.i.b16 %v7280_v63, %v7280_v63  ;;  %v7289_v4 = vpack.i.b16 %v7281_v2, %v7281_v2  ;;  %v6859_v2 = vld [vmem:[#allocation2 + $0x10] sm:$0xf] }
 0x73b   : > { %6122 = vmatpush.bf16.msra.mxu2 %v6084_v7  ;;  %vm12762_vm6 = vmmov %vm12761_vm5  ;;  %v6880_v30 = vunpack.c.h.bf16 %v11934_v0  ;;  %v6730_v13 = vunpack.c.l.bf16 %v11936_v54 }
 0x73c   : > { %vm12763_vm1 = vmmov %vm12761_vm5  ;;  %v4760_v42 = vpop.f32.mrf.mxu3  ;;  %v7288_v44 = vperm.slane %v7286_v19, 0  ;;  %v7291_v16 = vperm.slane %v7289_v4, 0 }
 0x73d   : > { %9201 = vrot.lane.b32.xlu1 %v9200_v34, %s9284_s12  ;;  %8656 = vmatmul.msk.bf16.vlgmr.msra.gmra.mxu1 %vm409_vm10, %v8654_v32  ;;  %vm12764_vm4 = vmmov %vm12763_vm1  ;;  %v4767_v43 = vadd.f32 %v4760_v42, %v4612_v6 }
 0x73e   : > { %6262 = vmatpush.bf16.msrb.mxu1 %v6234_v29  ;;  %v11909_v35 = vpop.permute.xlu2 %9176  ;;  %8657 = vmatmul.msk.bf16.vlgmr.msra.gmra.mxu2 %vm409_vm10, %v8654_v32  ;;  %v8712_v32 = vld [vmem:[%s12528_s1 + $0x54] sm:$0xf] }
 0x73f   : > { %6275 = vmatpush.bf16.msrb.mxu2 %v6237_v25  ;;  %v6325_v47 = vpop.permute.xlu1 %6324  ;;  %v6214_v50 = vpop.permute.xlu0 %6213  ;;  %7431 = vst [vmem:[#allocation1] ss:$9 sm:$0xff] %v8712_v32  ;;  %v7301_v32 = vunpack.c.l.bf16 %v7288_v44 }
 0x740   : > { %v6223_v24 = vsel %vm12756_vm0, %v6214_v50, %v6216_v57  ;;  %v4721_v28 = vpop.f32.mrf.mxu0  ;;  %vm12765_vm0 = vcmask 662528  }
 0x741   : > { %v6231_v11 = vsel %vm275_vm7, %v6223_v24, 0  ;;  %v4764_v15 = vadd.f32 %v4721_v28, %v4573_v31  ;;  %v4747_v9 = vpop.f32.mrf.mxu2  ;;  %v9178_v31 = vunpack.i.l.bf16 %v11909_v35  ;;  %v6879_v28 = vunpack.c.l.bf16 %v11934_v0 }
 0x742   : > { %6249 = vmatpush.bf16.msrb.mxu0 %v6231_v11  ;;  %v4766_v23 = vadd.f32 %v4747_v9, %v4599_v36  ;;  %v9179_v36 = vunpack.i.h.bf16 %v11909_v35  ;;  %v4887_v33 = vpop.f32.mrf.mxu1 }
 0x744   : > { %v4762_v34 = vpop.f32.mrf.mxu3 }
 0x746   : > { %v6319_v56 = vpop.permute.xlu2 %6318  ;;  %v11947_v7 = vld [vmem:[#allocation1] sm:$0xff]  ;;  %v11953_v50 = vld [vmem:[#allocation1 + $0x12] sm:$0xff] }
 0x747   : > { %v6327_v1 = vsel %vm12761_vm5, %v6319_v56, %v11881_v53  ;;  %v6317_v10 = vpop.permute.xlu1 %6316  ;;  %v6323_v5 = vpop.permute.xlu0 %6322  ;;  %vm12766_vm5 = vmmov %vm12765_vm0  ;;  %v11949_v12 = vld [vmem:[#allocation1 + $0x1b] sm:$0xff] }
 0x748   : > { %v6337_v55 = vsel %vm275_vm7, %v6327_v1, 0  ;;  %v6326_v45 = vsel %vm12762_vm6, %v6317_v10, %v6319_v56  ;;  %v6328_v18 = vsel %vm12763_vm1, %v11881_v53, %v6323_v5  ;;  %v6329_v57 = vsel %vm12764_vm4, %v6323_v5, %v6325_v47  ;;  %v4723_v53 = vpop.f32.mrf.mxu0  ;;  %v11951_v47 = vld [vmem:[#allocation1 + $0x9] sm:$0xff]  ;;  %vm12767_vm6 = vmmov %vm12765_vm0 }
 0x749   : > { %v6334_v51 = vsel %vm275_vm7, %v6326_v45, 0  ;;  %v6340_v26 = vsel %vm275_vm7, %v6328_v18, 0  ;;  %v6343_v40 = vsel %vm275_vm7, %v6329_v57, 0  ;;  %6365 = vmatpush.bf16.msra.mxu1 %v6337_v55  ;;  %v4749_v37 = vpop.f32.mrf.mxu2  ;;  %v6748_v14 = vsel %vm12767_vm6, %v9178_v31, %v9179_v36 }
 0x74a   : > { %6352 = vmatpush.bf16.msra.mxu0 %v6334_v51  ;;  %6378 = vmatpush.bf16.msra.mxu2 %v6340_v26  ;;  %v7292_v56 = vpack.i.b16 %v11929_v49, %v11929_v49  ;;  %v7302_v1 = vunpack.c.l.bf16 %v7291_v16  ;;  %v6757_v5 = vmul.f32 %v6748_v14, %v11578_v27  ;;  %v7285_v57 = vperm.slane %v7283_v60, 0  ;;  %v6858_v26 = vld [vmem:[#allocation2 + $0x8] sm:$0xff]  ;;  %v4889_v59 = vpop.f32.mrf.mxu1 }
 0x74b   : > { %6391 = vmatpush.bf16.msra.mxu3 %v6343_v40  ;;  %vm12769_vm1 = vcmask 670720   ;;  %v6881_v4 = vunpack.c.l.bf16 %v6858_v26  ;;  %v7439_v16 = vpack.i.b16 %v11951_v47, %v11951_v47 }
 0x74c   : > { %v4913_v10 = vpop.f32.mrf.mxu3  ;;  %v7294_v63 = vperm.slane %v7292_v56, 0  ;;  %v9205_v42 = vpack.i.bf16 %v7302_v1, %v7301_v32  ;;  %v6762_v40 = vpack.c.bf16 %v6757_v5, %v6757_v5  ;;  %vm12771_vm4 = vmmov %vm12769_vm1 }
 0x74d   : > { %v4920_v55 = vadd.f32 %v4913_v10, %v4767_v43  ;;  %v7300_v43 = vunpack.c.l.bf16 %v7285_v57 }
 0x74f   : > { %v9182_v22 = vpop.permute.xlu0 %9181  ;;  %v9192_v45 = vpop.permute.xlu1 %9191 }
 0x750   : > { %v9184_v3 = vunpack.i.h.bf16 %v9182_v22  ;;  %v9183_v58 = vunpack.i.l.bf16 %v9182_v22  ;;  %v4874_v35 = vpop.f32.mrf.mxu0  ;;  %v9193_v49 = vunpack.i.l.bf16 %v9192_v45  ;;  %v7303_v22 = vunpack.c.l.bf16 %v7294_v63 }
 0x751   : > { %v11956_v8 = vadd.f32 %v4874_v35, %v4764_v15  ;;  %v4900_v11 = vpop.f32.mrf.mxu2  ;;  %v8718_v15 = vld [vmem:[%s12528_s1 + $0x58] sm:$0xf] }
 0x752   : > { %v6747_v17 = vsel %vm12765_vm0, %v9184_v3, %v9178_v31  ;;  %v6749_v39 = vsel %vm12766_vm5, %v9179_v36, %v9183_v58  ;;  %v6759_v29 = vmul.f32 %v9183_v58, %v6730_v13  ;;  %v11967_v9 = vadd.f32 %v4900_v11, %v4766_v23  ;;  %7584 = vst [vmem:[#allocation1] ss:$9 sm:$0xff] %v8718_v15  ;;  %v8660_v13 = vld [vmem:[%s12531_s4 + $0x30] sm:$0xf]  ;;  %vm12772_vm0 = vmmov %vm12769_vm1 }
 0x753   : > { %v6756_v48 = vmul.f32 %v6880_v30, %v6747_v17  ;;  %v6758_v25 = vmul.f32 %v6749_v39, %v11539_v21  ;;  %v11958_v21 = vadd.f32 %v4887_v33, %v4765_v52  ;;  %v6755_v38 = vmul.f32 %v9184_v3, %v6879_v28  ;;  %v8724_v17 = vld [vmem:[%s12528_s1 + $0x5c] sm:$0xf]  ;;  %8663 = vmatmul.msk.bf16.vlgmr.msrb.gmra.mxu2 %vm409_vm10, %v8660_v13  ;;  %v5040_v33 = vpop.f32.mrf.mxu1 }
 0x754   : > { %v6764_v6 = vpack.c.bf16 %v6759_v29, %v6759_v29  ;;  %v6883_v31 = vunpack.c.l.bf16 %v6859_v2  ;;  %v4915_v34 = vpop.f32.mrf.mxu3  ;;  %8664 = vmatmul.msk.bf16.vlgmr.msrb.gmra.mxu3 %vm409_vm10, %v8660_v13  ;;  %8661 = vmatmul.msk.bf16.vlgmr.msrb.gmra.mxu0 %vm409_vm10, %v8660_v13  ;;  %v9210_v29 = vpack.i.bf16 %v7300_v43, %v7303_v22  ;;  %v6882_v15 = vunpack.c.h.bf16 %v6858_v26 }
 0x755   : > { %v6761_v20 = vpack.c.bf16 %v6756_v48, %v6756_v48  ;;  %v6763_v24 = vpack.c.bf16 %v6758_v25, %v6758_v25  ;;  %v6760_v51 = vpack.c.bf16 %v6755_v38, %v6755_v38  ;;  %8662 = vmatmul.msk.bf16.vlgmr.msrb.gmra.mxu1 %vm409_vm10, %v8660_v13  ;;  %v9194_v25 = vunpack.i.h.bf16 %v9192_v45 }
 0x756   : > { %6780 = vrot.lane.b32.xlu2 %v6764_v6, %s12768_s30  ;;  %v6912_v39 = vmul.f32 %v9193_v49, %v6883_v31  ;;  %v7442_v6 = vpack.i.b16 %v11953_v50, %v11953_v50  ;;  %v5071_v60 = vadd.f32 %v5040_v33, %v11958_v21  ;;  %v7441_v38 = vperm.slane %v7439_v16, 0 }
 0x757   : > { %6774 = vrot.lane.b32.xlu0 %v6761_v20, %s12768_s30  ;;  %v9187_v52 = vpop.permute.xlu0 %9186  ;;  %6778 = vrot.lane.b32.xlu1 %v6763_v24, %s12768_s30  ;;  %v7436_v20 = vpack.i.b16 %v11947_v7, %v11947_v7  ;;  %v7445_v7 = vpack.i.b16 %v11949_v12, %v11949_v12  ;;  %v6908_v21 = vmul.f32 %v9194_v25, %v6879_v28  ;;  %vm12775_vm5 = vcmask 441344  }
 0x758   : > { %v9189_v23 = vunpack.i.h.bf16 %v9187_v52  ;;  %v9188_v18 = vunpack.i.l.bf16 %v9187_v52  ;;  %v4876_v53 = vpop.f32.mrf.mxu0  ;;  %v6917_v44 = vpack.c.bf16 %v6912_v39, %v6912_v39  ;;  %v7444_v45 = vperm.slane %v7442_v6, 0  ;;  %vm12776_vm6 = vmmov %vm12775_vm5 }
 0x759   : > { %v4902_v37 = vpop.f32.mrf.mxu2  ;;  %v7586_v3 = vld [vmem:[#allocation1 + $0x9] sm:$0xff]  ;;  %v7587_v58 = vld [vmem:[#allocation1 + $0x12] sm:$0xff]  ;;  %v11979_v19 = vld [vmem:[#allocation1] sm:$0xff] }
 0x75a   : > { %v6901_v27 = vsel %vm12769_vm1, %v9188_v18, %v9189_v23  ;;  %v11982_v36 = vld [vmem:[#allocation1 + $0x1b] sm:$0xff]  ;;  %v6902_v14 = vsel %vm12771_vm4, %v9189_v23, %v9193_v49  ;;  %v6900_v52 = vsel %vm12772_vm0, %v9194_v25, %v9188_v18  ;;  %v7592_v50 = vpack.i.b16 %v7586_v3, %v7586_v3  ;;  %vm12777_vm1 = vmmov %vm12775_vm5 }
 0x75b   : > { %7737 = vst [vmem:[#allocation1] ss:$9 sm:$0xff] %v8724_v17  ;;  %v6910_v48 = vmul.f32 %v6901_v27, %v6881_v4  ;;  %v7595_v32 = vpack.i.b16 %v7587_v58, %v7587_v58  ;;  %v6911_v1 = vmul.f32 %v6902_v14, %v6882_v15  ;;  %v6909_v5 = vmul.f32 %v6900_v52, %v6880_v30  ;;  %v8665_v4 = vld [vmem:[%s12531_s4 + $0x34] sm:$0xf]  ;;  %vm12778_vm4 = vmmov %vm12777_vm1 }
 0x75c   : > { %v7438_v23 = vperm.slane %v7436_v20, 0  ;;  %v7447_v18 = vperm.slane %v7445_v7, 0  ;;  %v7594_v12 = vperm.slane %v7592_v50, 0  ;;  %v7589_v28 = vpack.i.b16 %v11979_v19, %v11979_v19 }
 0x75d   : > { %v6915_v24 = vpack.c.bf16 %v6910_v48, %v6910_v48  ;;  %v7597_v57 = vperm.slane %v7595_v32, 0  ;;  %v6916_v63 = vpack.c.bf16 %v6911_v1, %v6911_v1  ;;  %v6914_v49 = vpack.c.bf16 %v6909_v5, %v6909_v5 }
 0x75e   : > { %6772 = vrot.lane.b32.xlu2 %v6760_v51, %s12768_s30  ;;  %v7454_v51 = vunpack.c.l.bf16 %v7441_v38  ;;  %v7455_v0 = vunpack.c.l.bf16 %v7444_v45  ;;  %v7453_v30 = vunpack.c.l.bf16 %v7438_v23  ;;  %v7607_v53 = vunpack.c.l.bf16 %v7594_v12 }
 0x75f   : > { %6776 = vrot.lane.b32.xlu0 %v6762_v40, %s12768_s30  ;;  %9206 = vrot.lane.b32.xlu1 %v9205_v42, %s12770_s15  ;;  %s12773_s30 = smov 46   ;;  %v5042_v42 = vpop.f32.mrf.mxu1  ;;  %v7598_v40 = vpack.i.b16 %v11982_v36, %v11982_v36  ;;  %v7608_v59 = vunpack.c.l.bf16 %v7597_v57  ;;  %v7591_v31 = vperm.slane %v7589_v28, 0  ;;  %vm12779_vm0 = vcmask 392192  }
 0x760   : > { %v5027_v35 = vpop.f32.mrf.mxu0  ;;  %v9215_v27 = vpack.i.bf16 %v7455_v0, %v7454_v51 }
 0x761   : > { %v5070_v11 = vadd.f32 %v5027_v35, %v11956_v8  ;;  %v5053_v56 = vpop.f32.mrf.mxu2  ;;  %v5066_v8 = vpop.f32.mrf.mxu3  ;;  %v7600_v22 = vperm.slane %v7598_v40, 0  ;;  %v9225_v3 = vpack.i.bf16 %v7608_v59, %v7607_v53  ;;  %v7606_v13 = vunpack.c.l.bf16 %v7591_v31 }
 0x762   : > { %v5072_v47 = vadd.f32 %v5053_v56, %v11967_v9  ;;  %v5073_v10 = vadd.f32 %v5066_v8, %v4920_v55  ;;  %v6913_v9 = vpack.c.bf16 %v6908_v21, %v6908_v21  ;;  %v7456_v55 = vunpack.c.l.bf16 %v7447_v18  ;;  %v7739_v58 = vld [vmem:[#allocation1 + $0x9] sm:$0xff]  ;;  %v7740_v19 = vld [vmem:[#allocation1 + $0x12] sm:$0xff]  ;;  %v6475_v56 = vpop.permute.xlu2 %6474 }
 0x763   : > { %8668 = vmatmul.msk.bf16.vlgmr.msra.gmra.mxu2 %vm409_vm10, %v8665_v4  ;;  %v7745_v25 = vpack.i.b16 %v7739_v58, %v7739_v58 }
 0x764   : > { %v9220_v43 = vpack.i.bf16 %v7453_v30, %v7456_v55  ;;  %8669 = vmatmul.msk.bf16.vlgmr.msra.gmra.mxu3 %vm409_vm10, %v8665_v4  ;;  %8666 = vmatmul.msk.bf16.vlgmr.msra.gmra.mxu0 %vm409_vm10, %v8665_v4 }
 0x765   : > { %8667 = vmatmul.msk.bf16.vlgmr.msra.gmra.mxu1 %vm409_vm10, %v8665_v4  ;;  %v7747_v33 = vperm.slane %v7745_v25, 0 }
 0x766   : > { %9211 = vrot.lane.b32.xlu2 %v9210_v29, %s12770_s15  ;;  %s12774_s15 = smov 8   ;;  %v7609_v29 = vunpack.c.l.bf16 %v7600_v22 }
 0x767   : > { %6933 = vrot.lane.b32.xlu0 %v6917_v44, %s12773_s30  ;;  %6929 = vrot.lane.b32.xlu1 %v6915_v24, %s12773_s30  ;;  %v5193_v36 = vpop.f32.mrf.mxu1  ;;  %v7748_v44 = vpack.i.b16 %v7740_v19, %v7740_v19  ;;  %v7760_v15 = vunpack.c.l.bf16 %v7747_v33 }
 0x768   : > { %v5029_v2 = vpop.f32.mrf.mxu0  ;;  %v5224_v39 = vadd.f32 %v5193_v36, %v5071_v60  ;;  %v9230_v35 = vpack.i.bf16 %v7606_v13, %v7609_v29 }
 0x769   : > { %v5055_v26 = vpop.f32.mrf.mxu2  ;;  %v5068_v37 = vpop.f32.mrf.mxu3  ;;  %v7750_v14 = vperm.slane %v7748_v44, 0  ;;  %v8671_v2 = vld [vmem:[%s12531_s4 + $0x38] sm:$0xf] }
 0x76a   : > { %v6467_v38 = vpop.permute.xlu2 %6466 }
 0x76b   : > { %v7761_v52 = vunpack.c.l.bf16 %v7750_v14 }
 0x76d   : > { %v9235_v50 = vpack.i.bf16 %v7761_v52, %v7760_v15 }
 0x76e   : > { %6931 = vrot.lane.b32.xlu2 %v6916_v63, %s12773_s30 }
 0x76f   : > { %6925 = vrot.lane.b32.xlu0 %v6913_v9, %s12773_s30  ;;  %6927 = vrot.lane.b32.xlu1 %v6914_v49, %s12773_s30 }
 0x770   : > { %v5180_v34 = vpop.f32.mrf.mxu0 }
 0x771   : > { %v5223_v17 = vadd.f32 %v5180_v34, %v5070_v11  ;;  %v5206_v48 = vpop.f32.mrf.mxu2  ;;  %v5219_v6 = vpop.f32.mrf.mxu3 }
 0x772   : > { %v5225_v16 = vadd.f32 %v5206_v48, %v5072_v47  ;;  %v5226_v20 = vadd.f32 %v5219_v6, %v5073_v10  ;;  %v5195_v11 = vpop.f32.mrf.mxu1 }
 0x776   : > { %9216 = vrot.lane.b32.xlu2 %v9215_v27, %s12774_s15 }
 0x777   : > { %9221 = vrot.lane.b32.xlu0 %v9220_v43, %s12774_s15  ;;  %9226 = vrot.lane.b32.xlu1 %v9225_v3, %s9288_s23 }
 0x778   : > { %v5182_v24 = vpop.f32.mrf.mxu0 }
 0x779   : > { %v5208_v60 = vpop.f32.mrf.mxu2  ;;  %v5221_v7 = vpop.f32.mrf.mxu3 }
 0x77a   : > { %v5346_v8 = vpop.f32.mrf.mxu1 }
 0x77b   : > { %v5377_v21 = vadd.f32 %v5346_v8, %v5224_v39  ;;  %v7741_v8 = vld [vmem:[#allocation1 + $0x1b] sm:$0xff] }
 0x77e   : > { %9231 = vrot.lane.b32.xlu2 %v9230_v35, %s9288_s23 }
 0x780   : > { %v5333_v32 = vpop.f32.mrf.mxu0 }
 0x781   : > { %v5376_v47 = vadd.f32 %v5333_v32, %v5223_v17  ;;  %v5359_v1 = vpop.f32.mrf.mxu2  ;;  %v5372_v5 = vpop.f32.mrf.mxu3  ;;  %v7738_v32 = vld [vmem:[#allocation1] sm:$0xff] }
 0x782   : > { %v5378_v10 = vadd.f32 %v5359_v1, %v5225_v16  ;;  %v5379_v45 = vadd.f32 %v5372_v5, %v5226_v20  ;;  %v5348_v49 = vpop.f32.mrf.mxu1  ;;  %v8677_v16 = vld [vmem:[%s12531_s4 + $0x3c] sm:$0xf]  ;;  %v12068_v1 = vld [vmem:[#allocation2 + $0xc] sm:$0xff]  ;;  %v7751_v5 = vpack.i.b16 %v7741_v8, %v7741_v8 }
 0x786   : > { %9236 = vrot.lane.b32.xlu2 %v9235_v50, %s9289_s26 }
 0x788   : > { %v5335_v42 = vpop.f32.mrf.mxu0  ;;  %v6622_v55 = vpop.permute.xlu2 %6621 }
 0x789   : > { %v5361_v51 = vpop.f32.mrf.mxu2  ;;  %v5374_v28 = vpop.f32.mrf.mxu3 }
 0x78a   : > { %v6473_v23 = vpop.permute.xlu1 %6472  ;;  %v6469_v18 = vpop.permute.xlu0 %6468 }
 0x78b   : > { %v6479_v12 = vsel %vm12775_vm5, %v6473_v23, %v6475_v56  ;;  %v6476_v57 = vsel %vm12776_vm6, %v6467_v38, %v6469_v18  ;;  %v5499_v37 = vpop.f32.mrf.mxu1  ;;  %vm12780_vm5 = vmmov %vm12779_vm0 }
 0x78c   : > { %v6493_v9 = vsel %vm275_vm7, %v6479_v12, 0  ;;  %v6484_v63 = vsel %vm275_vm7, %v6476_v57, 0  ;;  %v5530_v27 = vadd.f32 %v5499_v37, %v5377_v21  ;;  %vm12781_vm6 = vmmov %vm12779_vm0  ;;  %v8730_v21 = vld [vmem:[%s12528_s1 + $0x60] sm:$0xf]  ;;  %v7146_v12 = vunpack.c.h.bf16 %v11936_v54 }
 0x78d   : > { %6502 = vmatpush.bf16.msrb.mxu0 %v6484_v63  ;;  %6541 = vmatpush.bf16.msrb.mxu3 %v6493_v9  ;;  %7890 = vst [vmem:[#allocation1] ss:$9 sm:$0xff] %v8730_v21 }
 0x790   : > { %8675 = vmatmul.msk.bf16.vlgmr.msrb.gmra.mxu3 %vm409_vm10, %v8671_v2  ;;  %8672 = vmatmul.msk.bf16.vlgmr.msrb.gmra.mxu0 %vm409_vm10, %v8671_v2  ;;  %v5486_v59 = vpop.f32.mrf.mxu0  ;;  %v6626_v34 = vpop.permute.xlu2 %6625 }
 0x791   : > { %v5529_v31 = vadd.f32 %v5486_v59, %v5376_v47  ;;  %v5512_v43 = vpop.f32.mrf.mxu2  ;;  %v5525_v3 = vpop.f32.mrf.mxu3 }
 0x792   : > { %v6471_v26 = vpop.permute.xlu0 %6470  ;;  %v5531_v22 = vadd.f32 %v5512_v43, %v5378_v10  ;;  %v5532_v58 = vadd.f32 %v5525_v3, %v5379_v45  ;;  %v7742_v10 = vpack.i.b16 %v7738_v32, %v7738_v32 }
 0x793   : > { %v6477_v0 = vsel %vm12777_vm1, %v6469_v18, %v6471_v26  ;;  %v6478_v30 = vsel %vm12778_vm4, %v6471_v26, %v6473_v23  ;;  %v5501_v4 = vpop.f32.mrf.mxu1  ;;  %vm12782_vm1 = vmmov %vm12779_vm0  ;;  %v7753_v26 = vperm.slane %v7751_v5, 0  ;;  %vm12783_vm4 = vcmask 384000  }
 0x794   : > { %v6487_v40 = vsel %vm275_vm7, %v6477_v0, 0  ;;  %v6490_v53 = vsel %vm275_vm7, %v6478_v30, 0  ;;  %v7744_v28 = vperm.slane %v7742_v10, 0  ;;  %v12084_v4 = vld [vmem:[#allocation2 + $0x4] sm:$0xff] }
 0x795   : > { %6515 = vmatpush.bf16.msrb.mxu1 %v6487_v40  ;;  %6528 = vmatpush.bf16.msrb.mxu2 %v6490_v53  ;;  %v7762_v40 = vunpack.c.l.bf16 %v7753_v26 }
 0x796   : > { %v7759_v54 = vunpack.c.l.bf16 %v7744_v28 }
 0x798   : > { %8674 = vmatmul.msk.bf16.vlgmr.msrb.gmra.mxu2 %vm409_vm10, %v8671_v2  ;;  %8673 = vmatmul.msk.bf16.vlgmr.msrb.gmra.mxu1 %vm409_vm10, %v8671_v2  ;;  %v5488_v19 = vpop.f32.mrf.mxu0  ;;  %v12076_v2 = vunpack.c.h.bf16 %v12068_v1 }
 0x799   : > { %v5514_v36 = vpop.f32.mrf.mxu2  ;;  %v5527_v29 = vpop.f32.mrf.mxu3  ;;  %v9240_v19 = vpack.i.bf16 %v7759_v54, %v7762_v40 }
 0x79a   : > { %v7893_v36 = vld [vmem:[#allocation1 + $0x12] sm:$0xff] }
 0x79b   : > { %v5652_v20 = vpop.f32.mrf.mxu1  ;;  %v7901_v29 = vpack.i.b16 %v7893_v36, %v7893_v36 }
 0x79c   : > { %v5683_v14 = vadd.f32 %v5652_v20, %v5530_v27 }
 0x79f   : > { %v6620_v13 = vpop.permute.xlu1 %6619  ;;  %v6628_v17 = vpop.permute.xlu0 %6627 }
 0x7a0   : > { %v6629_v39 = vsel %vm12779_vm0, %v6620_v13, %v6622_v55  ;;  %v6632_v48 = vsel %vm12780_vm5, %v6626_v34, %v6628_v17  ;;  %v5639_v6 = vpop.f32.mrf.mxu0  ;;  %v7275_v17 = vld [vmem:[#allocation2 + $0x14] sm:$0xf]  ;;  %vm12784_vm0 = vmmov %vm12783_vm4 }
 0x7a1   : > { %v6637_v25 = vsel %vm275_vm7, %v6629_v39, 0  ;;  %v6646_v44 = vsel %vm275_vm7, %v6632_v48, 0  ;;  %v5682_v33 = vadd.f32 %v5639_v6, %v5529_v31  ;;  %v5665_v60 = vpop.f32.mrf.mxu2  ;;  %v5678_v56 = vpop.f32.mrf.mxu3  ;;  %v12088_v39 = vunpack.c.l.bf16 %v12084_v4  ;;  %vm12786_vm5 = vmmov %vm12784_vm0 }
 0x7a2   : > { %6655 = vmatpush.bf16.msra.mxu0 %v6637_v25  ;;  %6694 = vmatpush.bf16.msra.mxu3 %v6646_v44  ;;  %v5684_v7 = vadd.f32 %v5665_v60, %v5531_v22  ;;  %v5685_v50 = vadd.f32 %v5678_v56, %v5532_v58  ;;  %v7299_v6 = vunpack.c.l.bf16 %v7275_v17 }
 0x7a3   : > { %v5654_v45 = vpop.f32.mrf.mxu1 }
 0x7a5   : > { %8681 = vmatmul.msk.bf16.vlgmr.msra.gmra.mxu3 %vm409_vm10, %v8677_v16  ;;  %8678 = vmatmul.msk.bf16.vlgmr.msra.gmra.mxu0 %vm409_vm10, %v8677_v16 }
 0x7a7   : > { %v6624_v35 = vpop.permute.xlu1 %6623  ;;  %v12061_v47 = vpop.permute.xlu0 %9196 }
 0x7a8   : > { %v6630_v24 = vsel %vm12781_vm6, %v6622_v55, %v6624_v35  ;;  %v6631_v11 = vsel %vm12782_vm1, %v6624_v35, %v6626_v34  ;;  %v5641_v38 = vpop.f32.mrf.mxu0  ;;  %v9199_v18 = vunpack.i.h.bf16 %v12061_v47  ;;  %v7892_v34 = vld [vmem:[#allocation1 + $0x9] sm:$0xff]  ;;  %vm12787_vm6 = vcmask 375808  }
 0x7a9   : > { %v6640_v15 = vsel %vm275_vm7, %v6630_v24, 0  ;;  %v6643_v52 = vsel %vm275_vm7, %v6631_v11, 0  ;;  %v5667_v9 = vpop.f32.mrf.mxu2  ;;  %v5680_v63 = vpop.f32.mrf.mxu3  ;;  %v7898_v48 = vpack.i.b16 %v7892_v34, %v7892_v34  ;;  %v8736_v24 = vld [vmem:[%s12528_s1 + $0x64] sm:$0xf]  ;;  %vm12788_vm1 = vmmov %vm12787_vm6 }
 0x7aa   : > { %6668 = vmatpush.bf16.msra.mxu1 %v6640_v15  ;;  %6681 = vmatpush.bf16.msra.mxu2 %v6643_v52  ;;  %v7903_v15 = vperm.slane %v7901_v29, 0  ;;  %v9198_v52 = vunpack.i.l.bf16 %v12061_v47  ;;  %v7028_v47 = vpack.i.b16 %v11832_v62, %v11832_v62 }
 0x7ab   : > { %v5805_v59 = vpop.f32.mrf.mxu1  ;;  %v7900_v56 = vperm.slane %v7898_v48, 0 }
 0x7ac   : > { %v5836_v31 = vadd.f32 %v5805_v59, %v5683_v14  ;;  %v12094_v14 = vld [vmem:[#allocation1 + $0x1b] sm:$0xff]  ;;  %v7914_v21 = vunpack.c.l.bf16 %v7903_v15  ;;  %v7164_v38 = vsel %vm368_vm8, %v9198_v52, %v9199_v18  ;;  %v7030_v40 = vperm.slane %v7028_v47, 0 }
 0x7ad   : > { %8680 = vmatmul.msk.bf16.vlgmr.msra.gmra.mxu2 %vm409_vm10, %v8677_v16  ;;  %8679 = vmatmul.msk.bf16.vlgmr.msra.gmra.mxu1 %vm409_vm10, %v8677_v16  ;;  %v7913_v8 = vunpack.c.l.bf16 %v7900_v56 }
 0x7af   : > { %v12070_v23 = vpop.permute.xlu1 %9201 }
 0x7b0   : > { %v9203_v57 = vunpack.i.l.bf16 %v12070_v23  ;;  %v12078_v42 = vpop.permute.xlu2 %6780  ;;  %v5792_v53 = vpop.f32.mrf.mxu0  ;;  %v9204_v13 = vunpack.i.h.bf16 %v12070_v23 }
 0x7b1   : > { %v5835_v37 = vadd.f32 %v5792_v53, %v5682_v33  ;;  %v5818_v27 = vpop.f32.mrf.mxu2  ;;  %v5831_v43 = vpop.f32.mrf.mxu3  ;;  %v12092_v33 = vld [vmem:[#allocation1] sm:$0xff] }
 0x7b2   : > { %v7165_v49 = vsel %vm368_vm8, %v9199_v18, %v9203_v57  ;;  %v7175_v51 = vmul.f32 %v9203_v57, %v7146_v12  ;;  %v5837_v3 = vadd.f32 %v5818_v27, %v5684_v7  ;;  %v5838_v58 = vadd.f32 %v5831_v43, %v5685_v50  ;;  %8043 = vst [vmem:[#allocation1] ss:$9 sm:$0xff] %v8736_v24 }
 0x7b3   : > { %v7174_v0 = vmul.f32 %v7165_v49, %v12076_v2  ;;  %v5807_v44 = vpop.f32.mrf.mxu1  ;;  %v7171_v16 = vmul.f32 %v9204_v13, %v12088_v39  ;;  %v12112_v12 = vunpack.c.l.bf16 %v12068_v1  ;;  %v7025_v18 = vpack.i.b16 %v11830_v61, %v11830_v61  ;;  %v8683_v61 = vld [vmem:[%s12531_s4 + $0x40] sm:$0xf] }
 0x7b4   : > { %v7180_v30 = vpack.c.bf16 %v7175_v51, %v7175_v51  ;;  %v7163_v27 = vsel %vm368_vm8, %v9204_v13, %v9198_v52  ;;  %v7022_v43 = vpack.i.b16 %v11826_v46, %v11826_v46  ;;  %vm12785_vm8 = vmmov %vm12784_vm0 }
 0x7b5   : > { %v7179_v55 = vpack.c.bf16 %v7174_v0, %v7174_v0  ;;  %v7176_v7 = vpack.c.bf16 %v7171_v16, %v7171_v16  ;;  %v7173_v1 = vmul.f32 %v7164_v38, %v12112_v12  ;;  %v7027_v53 = vperm.slane %v7025_v18, 0 }
 0x7b6   : > { %7196 = vrot.lane.b32.xlu0 %v7180_v30, %s9290_s8  ;;  %v9245_v30 = vpack.i.bf16 %v7914_v21, %v7913_v8 }
 0x7b7   : > { %7194 = vrot.lane.b32.xlu2 %v7179_v55, %s9290_s8  ;;  %v7178_v59 = vpack.c.bf16 %v7173_v1, %v7173_v1  ;;  %v7037_v13 = vunpack.c.l.bf16 %v7027_v53 }
 0x7b8   : > { %v6773_v22 = vpop.permute.xlu2 %6772  ;;  %v5794_v25 = vpop.f32.mrf.mxu0 }
 0x7b9   : > { %v5820_v20 = vpop.f32.mrf.mxu2  ;;  %v5833_v35 = vpop.f32.mrf.mxu3  ;;  %v7041_v52 = vmul.f32 %v12112_v12, %v7037_v13 }
 0x7ba   : > { %v7024_v20 = vperm.slane %v7022_v43, 0 }
 0x7bb   : > { %v5958_v5 = vpop.f32.mrf.mxu1 }
 0x7bc   : > { %v12109_v23 = vadd.f32 %v5958_v5, %v5836_v31 }
 0x7be   : > { %9241 = vrot.lane.b32.xlu0 %v9240_v19, %s9289_s26 }
 0x7c0   : > { %v12099_v11 = vpop.permute.xlu2 %9211  ;;  %v5945_v10 = vpop.f32.mrf.mxu0 }
 0x7c1   : > { %v9213_v60 = vunpack.i.l.bf16 %v12099_v11  ;;  %v12107_v45 = vadd.f32 %v5945_v10, %v5835_v37  ;;  %v5971_v57 = vpop.f32.mrf.mxu2  ;;  %v5984_v9 = vpop.f32.mrf.mxu3  ;;  %v7019_v37 = vpack.i.b16 %v11824_v41, %v11824_v41  ;;  %v7895_v41 = vpack.i.b16 %v12092_v33, %v12092_v33 }
 0x7c2   : > { %v12121_v51 = vadd.f32 %v5971_v57, %v5837_v3  ;;  %v12123_v28 = vadd.f32 %v5984_v9, %v5838_v58  ;;  %v7038_v3 = vunpack.c.l.bf16 %v7030_v40  ;;  %v7904_v58 = vpack.i.b16 %v12094_v14, %v12094_v14 }
 0x7c3   : > { %v7328_v50 = vmul.f32 %v9213_v60, %v7299_v6  ;;  %v7021_v25 = vperm.slane %v7019_v37, 0  ;;  %v7897_v33 = vperm.slane %v7895_v41, 0  ;;  %v7036_v10 = vunpack.c.l.bf16 %v7024_v20  ;;  %v7428_v20 = vld [vmem:[#allocation2 + $0x14] sm:$0xf] }
 0x7c4   : > { %v7042_v35 = vmul.f32 %v12076_v2, %v7038_v3  ;;  %v7906_v14 = vperm.slane %v7904_v58, 0 }
 0x7c5   : > { %v7333_v32 = vpack.c.bf16 %v7328_v50, %v7328_v50  ;;  %v7035_v21 = vunpack.c.l.bf16 %v7021_v25  ;;  %v7912_v57 = vunpack.c.l.bf16 %v7897_v33 }
 0x7c6   : > { %7188 = vrot.lane.b32.xlu0 %v7176_v7, %s9290_s8  ;;  %v7046_v47 = vpack.c.bf16 %v7042_v35, %v7042_v35  ;;  %v7915_v9 = vunpack.c.l.bf16 %v7906_v14 }
 0x7c7   : > { %7349 = vrot.lane.b32.xlu1 %v7333_v32, %s9296_s19 }
 0x7c8   : > { %v12117_v63 = vpop.permute.xlu2 %6931  ;;  %v5947_v31 = vpop.f32.mrf.mxu0  ;;  %v9250_v53 = vpack.i.bf16 %v7912_v57, %v7915_v9 }
 0x7c9   : > { %v6775_v49 = vpop.permute.xlu0 %6774  ;;  %v6779_v26 = vpop.permute.xlu1 %6778 }
 0x7ca   : > { %v6782_v0 = vsel %vm12783_vm4, %v6773_v22, %v6775_v49  ;;  %v6785_v62 = vsel %vm12784_vm0, %v6779_v26, %v12078_v42  ;;  %v5960_v42 = vpop.f32.mrf.mxu1  ;;  %v12142_v22 = vunpack.c.h.bf16 %v12084_v4  ;;  %v5973_v19 = vpop.f32.mrf.mxu2  ;;  %vm12789_vm4 = vmmov %vm12788_vm1 }
 0x7cb   : > { %v6790_v55 = vsel %vm275_vm7, %v6782_v0, 0  ;;  %v6799_v54 = vsel %vm275_vm7, %v6785_v62, 0  ;;  %v5986_v34 = vpop.f32.mrf.mxu3  ;;  %v7045_v0 = vpack.c.bf16 %v7041_v52, %v7041_v52  ;;  %vm12790_vm0 = vmmov %vm12788_vm1 }
 0x7cc   : > { %6808 = vmatpush.bf16.msrb.mxu0 %v6790_v55  ;;  %6847 = vmatpush.bf16.msrb.mxu3 %v6799_v54  ;;  %v7172_v46 = vmul.f32 %v7163_v27, %v12142_v22  ;;  %v7040_v37 = vmul.f32 %v12142_v22, %v7036_v10  ;;  %v9214_v27 = vunpack.i.h.bf16 %v12099_v11  ;;  %v12213_v10 = vld [vmem:[#allocation1] sm:$0xff] }
 0x7ce   : > { %9246 = vrot.lane.b32.xlu0 %v9245_v30, %s9291_s11  ;;  %v7177_v50 = vpack.c.bf16 %v7172_v46, %v7172_v46  ;;  %v7044_v34 = vpack.c.bf16 %v7040_v37, %v7040_v37  ;;  %v7324_v13 = vmul.f32 %v9214_v27, %v12088_v39 }
 0x7cf   : > { %8684 = vmatmul.msk.bf16.vlgmr.msrb.gmra.mxu0 %vm409_vm10, %v8683_v61  ;;  %8687 = vmatmul.msk.bf16.vlgmr.msrb.gmra.mxu3 %vm409_vm10, %v8683_v61 }
 0x7d0   : > { %7192 = vrot.lane.b32.xlu1 %v7178_v59, %s9290_s8  ;;  %v12151_v17 = vpop.permute.xlu2 %9216  ;;  %v6098_v32 = vpop.f32.mrf.mxu0  ;;  %v8689_v59 = vld [vmem:[%s12531_s4 + $0x44] sm:$0xf]  ;;  %v7329_v14 = vpack.c.bf16 %v7324_v13, %v7324_v13 }
 0x7d1   : > { %v6777_v36 = vpop.permute.xlu0 %6776  ;;  %v12153_v4 = vpop.permute.xlu1 %9206  ;;  %v9219_v24 = vunpack.i.h.bf16 %v12151_v17  ;;  %v9218_v56 = vunpack.i.l.bf16 %v12151_v17  ;;  %v6141_v5 = vadd.f32 %v6098_v32, %v12107_v45  ;;  %v8046_v32 = vld [vmem:[#allocation1 + $0x12] sm:$0xff] }
 0x7d2   : > { %v6783_v48 = vsel %vm12785_vm8, %v6775_v49, %v6777_v36  ;;  %v6784_v29 = vsel %vm12786_vm5, %v6777_v36, %v6779_v26  ;;  %v9209_v44 = vunpack.i.h.bf16 %v12153_v4  ;;  %v6111_v8 = vpop.f32.mrf.mxu1  ;;  %v6124_v49 = vpop.f32.mrf.mxu2 }
 0x7d3   : > { %v6793_v16 = vsel %vm275_vm7, %v6783_v48, 0  ;;  %v6796_v6 = vsel %vm275_vm7, %v6784_v29, 0  ;;  %v6142_v38 = vadd.f32 %v6111_v8, %v12109_v23  ;;  %v6137_v18 = vpop.f32.mrf.mxu3  ;;  %v7470_v1 = vsel %vm409_vm10, %v9218_v56, %v9219_v24 }
 0x7d4   : > { %6821 = vmatpush.bf16.msrb.mxu1 %v6793_v16  ;;  %6834 = vmatpush.bf16.msrb.mxu2 %v6796_v6  ;;  %v7318_v15 = vsel %vm589_vm9, %v9209_v44, %v9213_v60  ;;  %v6143_v45 = vadd.f32 %v6124_v49, %v12121_v51  ;;  %v6144_v23 = vadd.f32 %v6137_v18, %v12123_v28  ;;  %v7062_v51 = vsel %vm275_vm7, %v7046_v47, 0 }
 0x7d5   : > { %v7327_v7 = vmul.f32 %v7318_v15, %v12076_v2  ;;  %v7059_v28 = vsel %vm275_vm7, %v7045_v0, 0  ;;  %v7056_v6 = vsel %vm275_vm7, %v7044_v34, 0  ;;  %v8045_v15 = vld [vmem:[#allocation1 + $0x9] sm:$0xff] }
 0x7d6   : > { %v8742_v0 = vld [vmem:[%s12528_s1 + $0x68] sm:$0xf] }
 0x7d7   : > { %8685 = vmatmul.msk.bf16.vlgmr.msrb.gmra.mxu1 %vm409_vm10, %v8683_v61  ;;  %8686 = vmatmul.msk.bf16.vlgmr.msrb.gmra.mxu2 %vm409_vm10, %v8683_v61  ;;  %v7332_v60 = vpack.c.bf16 %v7327_v7, %v7327_v7  ;;  %v7479_v61 = vmul.f32 %v7470_v1, %v12112_v12  ;;  %v8051_v1 = vpack.i.b16 %v8045_v15, %v8045_v15 }
 0x7d8   : > { %7190 = vrot.lane.b32.xlu1 %v7177_v50, %s9290_s8  ;;  %v6100_v31 = vpop.f32.mrf.mxu0  ;;  %v7452_v50 = vunpack.c.l.bf16 %v7428_v20 }
 0x7d9   : > { %v6934_v26 = vpop.permute.xlu0 %6933  ;;  %v6930_v30 = vpop.permute.xlu1 %6929  ;;  %7347 = vrot.lane.b32.xlu0 %v7332_v60, %s9296_s19  ;;  %v7484_v43 = vpack.c.bf16 %v7479_v61, %v7479_v61  ;;  %v12215_v60 = vld [vmem:[#allocation1 + $0x1b] sm:$0xff]  ;;  %v8695_v61 = vld [vmem:[%s12531_s4 + $0x48] sm:$0xf]  ;;  %v8053_v17 = vperm.slane %v8051_v1, 0  ;;  %v8048_v1 = vpack.i.b16 %v12213_v10, %v12213_v10 }
 0x7da   : > { %v6938_v62 = vsel %vm12787_vm6, %v12117_v63, %v6934_v26  ;;  %v6937_v55 = vsel %vm12788_vm1, %v6930_v30, %v12117_v63  ;;  %v7039_v63 = vmul.f32 %v12088_v39, %v7035_v21  ;;  %v6113_v42 = vpop.f32.mrf.mxu1  ;;  %v6126_v3 = vpop.f32.mrf.mxu2  ;;  %v8054_v26 = vpack.i.b16 %v8046_v32, %v8046_v32  ;;  %8196 = vst [vmem:[#allocation1] ss:$9 sm:$0xff] %v8742_v0 }
 0x7db   : > { %v6952_v54 = vsel %vm275_vm7, %v6938_v62, 0  ;;  %v6949_v40 = vsel %vm275_vm7, %v6937_v55, 0  ;;  %v6139_v41 = vpop.f32.mrf.mxu3  ;;  %v12234_v55 = vpop.permute.xlu2 %9231  ;;  %v8066_v3 = vunpack.c.l.bf16 %v8053_v17  ;;  %vm12802_vm1 = vcmask 916480  }
 0x7dc   : > { %7000 = vmatpush.bf16.msra.mxu3 %v6952_v54  ;;  %6987 = vmatpush.bf16.msra.mxu2 %v6949_v40  ;;  %v7043_v19 = vpack.c.bf16 %v7039_v63, %v7039_v63  ;;  %v8056_v63 = vperm.slane %v8054_v26, 0  ;;  %v8057_v26 = vpack.i.b16 %v12215_v60, %v12215_v60 }
 0x7de   : > { %v7053_v16 = vsel %vm275_vm7, %v7043_v19, 0  ;;  %v8067_v41 = vunpack.c.l.bf16 %v8056_v63 }
 0x7df   : > { %8693 = vmatmul.msk.bf16.vlgmr.msra.gmra.mxu3 %vm409_vm10, %v8689_v59 }
 0x7e0   : > { %7110 = vmatpush.bf16.msrb.mxu3 %v7062_v51  ;;  %7097 = vmatpush.bf16.msrb.mxu2 %v7059_v28  ;;  %v6251_v35 = vpop.f32.mrf.mxu0 }
 0x7e1   : > { %9251 = vrot.lane.b32.xlu1 %v9250_v53, %s9291_s11  ;;  %v6926_v58 = vpop.permute.xlu0 %6925  ;;  %v6928_v36 = vpop.permute.xlu1 %6927  ;;  %7498 = vrot.lane.b32.xlu0 %v7484_v43, %s9297_s20  ;;  %v6294_v52 = vadd.f32 %v6251_v35, %v6141_v5  ;;  %v9208_v5 = vunpack.i.l.bf16 %v12153_v4 }
 0x7e2   : > { %v6936_v46 = vsel %vm12789_vm4, %v6928_v36, %v6930_v30  ;;  %v6935_v48 = vsel %vm12790_vm0, %v6926_v58, %v6928_v36  ;;  %v6264_v33 = vpop.f32.mrf.mxu1  ;;  %v6277_v8 = vpop.f32.mrf.mxu2  ;;  %vm12803_vm4 = vmmov %vm12802_vm1 }
 0x7e3   : > { %v6946_v29 = vsel %vm275_vm7, %v6936_v46, 0  ;;  %v6943_v25 = vsel %vm275_vm7, %v6935_v48, 0  ;;  %v6295_v7 = vadd.f32 %v6264_v33, %v6142_v38  ;;  %v6290_v21 = vpop.f32.mrf.mxu3  ;;  %v6296_v57 = vadd.f32 %v6277_v8, %v6143_v45  ;;  %v7581_v38 = vld [vmem:[#allocation2 + $0x14] sm:$0xf]  ;;  %vm12804_vm0 = vmmov %vm12802_vm1 }
 0x7e4   : > { %6961 = vmatpush.bf16.msra.mxu0 %v6943_v25  ;;  %6974 = vmatpush.bf16.msra.mxu1 %v6946_v29  ;;  %v6297_v9 = vadd.f32 %v6290_v21, %v6144_v23  ;;  %v7605_v62 = vunpack.c.l.bf16 %v7581_v38  ;;  %v7317_v40 = vsel %vm589_vm9, %v9208_v5, %v9209_v44  ;;  %v9234_v48 = vunpack.i.h.bf16 %v12234_v55 }
 0x7e5   : > { %v7326_v44 = vmul.f32 %v7317_v40, %v12112_v12  ;;  %v9255_v29 = vpack.i.bf16 %v8067_v41, %v8066_v3 }
 0x7e6   : > { %v7630_v11 = vmul.f32 %v9234_v48, %v12088_v39 }
 0x7e7   : > { %8692 = vmatmul.msk.bf16.vlgmr.msra.gmra.mxu2 %vm409_vm10, %v8689_v59  ;;  %8690 = vmatmul.msk.bf16.vlgmr.msra.gmra.mxu0 %vm409_vm10, %v8689_v59  ;;  %v7331_v36 = vpack.c.bf16 %v7326_v44, %v7326_v44 }
 0x7e8   : > { %7071 = vmatpush.bf16.msrb.mxu0 %v7053_v16  ;;  %7084 = vmatpush.bf16.msrb.mxu1 %v7056_v6  ;;  %v6253_v51 = vpop.f32.mrf.mxu0  ;;  %v7316_v6 = vsel %vm589_vm9, %v9214_v27, %v9208_v5  ;;  %v7635_v21 = vpack.c.bf16 %v7630_v11, %v7630_v11  ;;  %vm12791_vm9 = vcmask 973824  }
 0x7e9   : > { %8691 = vmatmul.msk.bf16.vlgmr.msra.gmra.mxu1 %vm409_vm10, %v8689_v59  ;;  %7341 = vrot.lane.b32.xlu1 %v7329_v14, %s9296_s19  ;;  %v12218_v47 = vpop.permute.xlu0 %9221  ;;  %v12251_v43 = vpop.permute.xlu1 %9226  ;;  %v8199_v51 = vld [vmem:[#allocation1 + $0x12] sm:$0xff] }
 0x7ea   : > { %v9224_v49 = vunpack.i.h.bf16 %v12218_v47  ;;  %v9223_v18 = vunpack.i.l.bf16 %v12218_v47  ;;  %v6279_v37 = vpop.f32.mrf.mxu2  ;;  %v9229_v19 = vunpack.i.h.bf16 %v12251_v43  ;;  %v9228_v34 = vunpack.i.l.bf16 %v12251_v43 }
 0x7eb   : > { %v6292_v31 = vpop.f32.mrf.mxu3 }
 0x7ec   : > { %v7469_v45 = vsel %vm409_vm10, %v9224_v49, %v9218_v56  ;;  %v7471_v23 = vsel %vm409_vm10, %v9219_v24, %v9223_v18  ;;  %v7481_v30 = vmul.f32 %v9223_v18, %v7452_v50  ;;  %v9233_v56 = vunpack.i.l.bf16 %v12234_v55  ;;  %v6266_v24 = vpop.f32.mrf.mxu1 }
 0x7ed   : > { %v7478_v54 = vmul.f32 %v7469_v45, %v12142_v22  ;;  %v7480_v53 = vmul.f32 %v7471_v23, %v12076_v2  ;;  %v7623_v15 = vsel %vm900_vm11, %v9228_v34, %v9229_v19  ;;  %v7622_v0 = vsel %vm900_vm11, %v9234_v48, %v9228_v34 }
 0x7ee   : > { %v7486_v28 = vpack.c.bf16 %v7481_v30, %v7481_v30  ;;  %v7634_v42 = vmul.f32 %v9233_v56, %v7605_v62  ;;  %v7632_v27 = vmul.f32 %v7623_v15, %v12112_v12  ;;  %v7477_v45 = vmul.f32 %v9224_v49, %v12088_v39  ;;  %v8198_v49 = vld [vmem:[#allocation1 + $0x9] sm:$0xff] }
 0x7ef   : > { %v7483_v59 = vpack.c.bf16 %v7478_v54, %v7478_v54  ;;  %8699 = vmatmul.msk.bf16.vlgmr.msrb.gmra.mxu3 %vm409_vm10, %v8695_v61  ;;  %v7485_v4 = vpack.c.bf16 %v7480_v53, %v7480_v53  ;;  %v7631_v23 = vmul.f32 %v7622_v0, %v12142_v22  ;;  %v8050_v62 = vperm.slane %v8048_v1, 0  ;;  %v8197_v0 = vld [vmem:[#allocation1] sm:$0xff] }
 0x7f0   : > { %7502 = vrot.lane.b32.xlu2 %v7486_v28, %s9297_s20  ;;  %v7639_v58 = vpack.c.bf16 %v7634_v42, %v7634_v42  ;;  %v6354_v13 = vpop.f32.mrf.mxu0  ;;  %v8059_v54 = vperm.slane %v8057_v26, 0  ;;  %v7624_v53 = vsel %vm900_vm11, %v9229_v19, %v9233_v56  ;;  %v8204_v28 = vpack.i.b16 %v8198_v49, %v8198_v49  ;;  %vm12792_vm11 = vmmov %vm12791_vm9 }
 0x7f1   : > { %7496 = vrot.lane.b32.xlu0 %v7483_v59, %s9297_s20  ;;  %7500 = vrot.lane.b32.xlu1 %v7485_v4, %s9297_s20  ;;  %v6397_v25 = vadd.f32 %v6354_v13, %v6294_v52  ;;  %v8200_v52 = vld [vmem:[#allocation1 + $0x1b] sm:$0xff]  ;;  %v7636_v10 = vpack.c.bf16 %v7631_v23, %v7631_v23  ;;  %v8065_v60 = vunpack.c.l.bf16 %v8050_v62  ;;  %v8207_v59 = vpack.i.b16 %v8199_v51, %v8199_v51 }
 0x7f2   : > { %v6380_v20 = vpop.f32.mrf.mxu2  ;;  %v8210_v50 = vpack.i.b16 %v8200_v52, %v8200_v52  ;;  %v8068_v40 = vunpack.c.l.bf16 %v8059_v54  ;;  %v7633_v63 = vmul.f32 %v7624_v53, %v12076_v2  ;;  %v8206_v42 = vperm.slane %v8204_v28, 0 }
 0x7f3   : > { %v6393_v35 = vpop.f32.mrf.mxu3  ;;  %v6399_v33 = vadd.f32 %v6380_v20, %v6296_v57  ;;  %v7637_v57 = vpack.c.bf16 %v7632_v27, %v7632_v27  ;;  %v8209_v4 = vperm.slane %v8207_v59, 0 }
 0x7f4   : > { %v6367_v46 = vpop.f32.mrf.mxu1  ;;  %v6400_v14 = vadd.f32 %v6393_v35, %v6297_v9  ;;  %v8212_v9 = vperm.slane %v8210_v50, 0  ;;  %v9260_v17 = vpack.i.bf16 %v8065_v60, %v8068_v40  ;;  %v7638_v41 = vpack.c.bf16 %v7633_v63, %v7633_v63 }
 0x7f5   : > { %v6398_v16 = vadd.f32 %v6367_v46, %v6295_v7  ;;  %v7325_v7 = vmul.f32 %v7316_v6, %v12142_v22  ;;  %v8219_v55 = vunpack.c.l.bf16 %v8206_v42  ;;  %v8220_v34 = vunpack.c.l.bf16 %v8209_v4 }
 0x7f6   : > { %v8221_v30 = vunpack.c.l.bf16 %v8212_v9  ;;  %v8201_v60 = vpack.i.b16 %v8197_v0, %v8197_v0 }
 0x7f7   : > { %8698 = vmatmul.msk.bf16.vlgmr.msrb.gmra.mxu2 %vm409_vm10, %v8695_v61  ;;  %8696 = vmatmul.msk.bf16.vlgmr.msrb.gmra.mxu0 %vm409_vm10, %v8695_v61  ;;  %v7330_v5 = vpack.c.bf16 %v7325_v7, %v7325_v7  ;;  %v9265_v48 = vpack.i.bf16 %v8220_v34, %v8219_v55 }
 0x7f8   : > { %7345 = vrot.lane.b32.xlu2 %v7331_v36, %s9296_s19  ;;  %v6356_v32 = vpop.f32.mrf.mxu0  ;;  %v8203_v51 = vperm.slane %v8201_v60, 0 }
 0x7f9   : > { %8697 = vmatmul.msk.bf16.vlgmr.msrb.gmra.mxu1 %vm409_vm10, %v8695_v61  ;;  %7655 = vrot.lane.b32.xlu0 %v7639_v58, %s9298_s24  ;;  %v7482_v61 = vpack.c.bf16 %v7477_v45, %v7477_v45  ;;  %v9237_v58 = vpop.permute.xlu2 %9236 }
 0x7fa   : > { %9256 = vrot.lane.b32.xlu1 %v9255_v29, %s9292_s13  ;;  %v6382_v38 = vpop.f32.mrf.mxu2  ;;  %v9239_v36 = vunpack.i.h.bf16 %v9237_v58  ;;  %v9238_v13 = vunpack.i.l.bf16 %v9237_v58  ;;  %v8218_v59 = vunpack.c.l.bf16 %v8203_v51 }
 0x7fb   : > { %v6395_v18 = vpop.f32.mrf.mxu3 }
 0x7fc   : > { %v6369_v8 = vpop.f32.mrf.mxu1 }
 0x7fd   : > { %v12304_v8 = vld [vmem:[%s12531_s4 + $0x4c] sm:$0xf] }
 0x800   : > { %7343 = vrot.lane.b32.xlu2 %v7330_v5, %s9296_s19  ;;  %v7734_v5 = vld [vmem:[#allocation2 + $0x14] sm:$0xf] }
 0x801   : > { %7647 = vrot.lane.b32.xlu0 %v7635_v21, %s9298_s24  ;;  %v7758_v38 = vunpack.c.l.bf16 %v7734_v5 }
 0x802   : > { %7651 = vrot.lane.b32.xlu1 %v7637_v57, %s9298_s24 }
 0x808   : > { %7494 = vrot.lane.b32.xlu2 %v7482_v61, %s9297_s20 }
 0x809   : > { %8232 = vrot.lane.b32.xlu0 %v8221_v30, %s9293_s14 }
 0x80a   : > { %7649 = vrot.lane.b32.xlu1 %v7636_v10, %s9298_s24 }
 0x80d   : > { %v6504_v47 = vpop.f32.mrf.mxu0 }
 0x80e   : > { %v6547_v24 = vadd.f32 %v6504_v47, %v6397_v25  ;;  %v7776_v25 = vsel %vm1056_vm12, %v9238_v13, %v9239_v36 }
 0x810   : > { %9261 = vrot.lane.b32.xlu2 %v9260_v17, %s9292_s13  ;;  %s251_s13 = scalar_lea.vmem %s12533_s6, %s8751_s25 }
 0x813   : > { %v6543_v37 = vpop.f32.mrf.mxu3 }
 0x814   : > { %v6550_v31 = vadd.f32 %v6543_v37, %v6400_v14  ;;  %v7195_v14 = vpop.permute.xlu2 %7194 }
 0x815   : > { %v6517_v44 = vpop.f32.mrf.mxu1  ;;  %v6506_v43 = vpop.f32.mrf.mxu0 }
 0x816   : > { %v6548_v3 = vadd.f32 %v6517_v44, %v6398_v16  ;;  %v7785_v16 = vmul.f32 %v7776_v25, %v12112_v12 }
 0x818   : > { %7653 = vrot.lane.b32.xlu2 %v7638_v41, %s9298_s24  ;;  %v7790_v15 = vpack.c.bf16 %v7785_v16, %v7785_v16  ;;  %v8707_v16 = vld [vmem:[%s12531_s4 + $0x50] sm:$0xf] }
 0x81b   : > { %v6530_v56 = vpop.f32.mrf.mxu2  ;;  %v6545_v19 = vpop.f32.mrf.mxu3 }
 0x81c   : > { %v6549_v46 = vadd.f32 %v6530_v56, %v6399_v33 }
 0x81d   : > { %v6519_v29 = vpop.f32.mrf.mxu1 }
 0x820   : > { %9266 = vrot.lane.b32.xlu2 %v9265_v48, %s9293_s14 }
 0x822   : > { %v6657_v6 = vpop.f32.mrf.mxu0 }
 0x823   : > { %v6532_v20 = vpop.f32.mrf.mxu2  ;;  %v12294_v35 = vadd.f32 %v6657_v6, %v6547_v24  ;;  %v7887_v6 = vld [vmem:[#allocation2 + $0x14] sm:$0xf] }
 0x824   : > { %v7911_v20 = vunpack.c.l.bf16 %v7887_v6 }
 0x828   : > { %v7197_v52 = vpop.permute.xlu0 %7196  ;;  %v6696_v7 = vpop.f32.mrf.mxu3  ;;  %7804 = vrot.lane.b32.xlu2 %v7790_v15, %s9300_s27 }
 0x829   : > { %v7201_v11 = vsel %vm404_vm13, %v7195_v14, %v7197_v52  ;;  %v12298_v33 = vadd.f32 %v6696_v7, %v6550_v31 }
 0x82a   : > { %v7215_v27 = vsel %vm275_vm7, %v7201_v11, 0  ;;  %v6670_v50 = vpop.f32.mrf.mxu1  ;;  %v6659_v32 = vpop.f32.mrf.mxu0 }
 0x82b   : > { %7263 = vmatpush.bf16.msra.mxu3 %v7215_v27  ;;  %v12306_v21 = vadd.f32 %v6670_v50, %v6548_v3 }
 0x82e   : > { %8705 = vmatmul.msk.bf16.vlgmr.msra.gmra.mxu3 %vm409_vm10, %v12304_v8 }
 0x830   : > { %v9242_v18 = vpop.permute.xlu0 %9241  ;;  %v6683_v57 = vpop.f32.mrf.mxu2 }
 0x831   : > { %v9244_v9 = vunpack.i.h.bf16 %v9242_v18  ;;  %v9243_v1 = vunpack.i.l.bf16 %v9242_v18  ;;  %v12310_v26 = vadd.f32 %v6683_v57, %v6549_v46  ;;  %v6698_v45 = vpop.f32.mrf.mxu3 }
 0x832   : > { %v6672_v23 = vpop.f32.mrf.mxu1 }
 0x833   : > { %v7775_v30 = vsel %vm1056_vm12, %v9244_v9, %v9238_v13  ;;  %v7777_v62 = vsel %vm1056_vm12, %v9239_v36, %v9243_v1  ;;  %v7787_v54 = vmul.f32 %v9243_v1, %v7758_v38  ;;  %v7783_v53 = vmul.f32 %v9244_v9, %v12088_v39  ;;  %vm12793_vm12 = vmmov %vm12791_vm9 }
 0x834   : > { %v7784_v61 = vmul.f32 %v7775_v30, %v12142_v22  ;;  %v7786_v10 = vmul.f32 %v7777_v62, %v12076_v2 }
 0x835   : > { %v7792_v40 = vpack.c.bf16 %v7787_v54, %v7787_v54  ;;  %v7788_v63 = vpack.c.bf16 %v7783_v53, %v7783_v53 }
 0x836   : > { %v7789_v17 = vpack.c.bf16 %v7784_v61, %v7784_v61  ;;  %v7791_v47 = vpack.c.bf16 %v7786_v10, %v7786_v10 }
 0x837   : > { %7808 = vrot.lane.b32.xlu1 %v7792_v40, %s9300_s27 }
 0x838   : > { %v7189_v49 = vpop.permute.xlu0 %7188  ;;  %7802 = vrot.lane.b32.xlu2 %v7789_v17, %s9300_s27  ;;  %7806 = vrot.lane.b32.xlu0 %v7791_v47, %s9300_s27  ;;  %v6685_v24 = vpop.f32.mrf.mxu2 }
 0x839   : > { %v7350_v28 = vpop.permute.xlu1 %7349 }
 0x83f   : > { %7800 = vrot.lane.b32.xlu1 %v7788_v63, %s9300_s27 }
 0x840   : > { %v9247_v37 = vpop.permute.xlu0 %9246  ;;  %8226 = vrot.lane.b32.xlu0 %v8218_v59, %s9293_s14 }
 0x841   : > { %v9249_v31 = vunpack.i.h.bf16 %v9247_v37  ;;  %v9248_v42 = vunpack.i.l.bf16 %v9247_v37 }
 0x842   : > { %v7193_v4 = vpop.permute.xlu1 %7192 }
 0x843   : > { %v7929_v44 = vsel %vm1212_vm14, %v9248_v42, %v9249_v31  ;;  %v7200_v43 = vsel %vm404_vm13, %v7193_v4, %v7195_v14 }
 0x844   : > { %v7938_v3 = vmul.f32 %v7929_v44, %v12112_v12  ;;  %v7212_v41 = vsel %vm275_vm7, %v7200_v43, 0 }
 0x845   : > { %7250 = vmatpush.bf16.msra.mxu2 %v7212_v41 }
 0x846   : > { %v7943_v58 = vpack.c.bf16 %v7938_v3, %v7938_v3 }
 0x848   : > { %8704 = vmatmul.msk.bf16.vlgmr.msra.gmra.mxu2 %vm409_vm10, %v12304_v8  ;;  %7957 = vrot.lane.b32.xlu1 %v7943_v58, %s9301_s9 }
 0x84a   : > { %v7191_v55 = vpop.permute.xlu1 %7190  ;;  %v12331_v19 = vpop.permute.xlu2 %7502 }
 0x84b   : > { %v7198_v34 = vsel %vm404_vm13, %v7189_v49, %v7191_v55  ;;  %v7199_v56 = vsel %vm404_vm13, %v7191_v55, %v7193_v4  ;;  %v7348_v13 = vpop.permute.xlu0 %7347  ;;  %v8713_v55 = vld [vmem:[%s12531_s4 + $0x54] sm:$0xf]  ;;  %vm12794_vm13 = vmmov %vm12791_vm9 }
 0x84c   : > { %v7206_v36 = vsel %vm275_vm7, %v7198_v34, 0  ;;  %v7209_v12 = vsel %vm275_vm7, %v7199_v56, 0  ;;  %v6810_v46 = vpop.f32.mrf.mxu0  ;;  %v7354_v48 = vsel %vm625_vm2, %v7348_v13, %v7350_v28  ;;  %v8040_v34 = vld [vmem:[#allocation2 + $0x14] sm:$0xf] }
 0x84d   : > { %v12337_v29 = vadd.f32 %v6810_v46, %v12294_v35  ;;  %7224 = vmatpush.bf16.msra.mxu0 %v7206_v36  ;;  %7237 = vmatpush.bf16.msra.mxu1 %v7209_v12  ;;  %v7368_v25 = vsel %vm275_vm7, %v7354_v48, 0  ;;  %v8064_v12 = vunpack.c.l.bf16 %v8040_v34  ;;  %v12384_v48 = vld [vmem:[#allocation2 + $0xc] sm:$0xff] }
 0x84e   : > { %7416 = vmatpush.bf16.msrb.mxu3 %v7368_v25 }
 0x850   : > { %8702 = vmatmul.msk.bf16.vlgmr.msra.gmra.mxu0 %vm409_vm10, %v12304_v8  ;;  %8703 = vmatmul.msk.bf16.vlgmr.msra.gmra.mxu1 %vm409_vm10, %v12304_v8 }
 0x851   : > { %8711 = vmatmul.msk.bf16.vlgmr.msrb.gmra.mxu3 %vm409_vm10, %v8707_v16 }
 0x852   : > { %v6849_v52 = vpop.f32.mrf.mxu3  ;;  %v7346_v7 = vpop.permute.xlu2 %7345 }
 0x853   : > { %v9252_v14 = vpop.permute.xlu1 %9251  ;;  %v6856_v11 = vadd.f32 %v6849_v52, %v12298_v33  ;;  %v7353_v27 = vsel %vm625_vm2, %v7346_v7, %v7348_v13  ;;  %v7499_v33 = vpop.permute.xlu0 %7498 }
 0x854   : > { %v9254_v35 = vunpack.i.h.bf16 %v9252_v14  ;;  %v9253_v15 = vunpack.i.l.bf16 %v9252_v14  ;;  %v6823_v50 = vpop.f32.mrf.mxu1  ;;  %v6812_v18 = vpop.f32.mrf.mxu0  ;;  %v7365_v57 = vsel %vm275_vm7, %v7353_v27, 0 }
 0x855   : > { %v6854_v9 = vadd.f32 %v6823_v50, %v12306_v21  ;;  %7403 = vmatpush.bf16.msrb.mxu2 %v7365_v57 }
 0x856   : > { %v7936_v32 = vmul.f32 %v9254_v35, %v12088_v39  ;;  %v7930_v5 = vsel %vm1212_vm14, %v9249_v31, %v9253_v15  ;;  %v7940_v38 = vmul.f32 %v9253_v15, %v7911_v20  ;;  %v7928_v39 = vsel %vm1212_vm14, %v9254_v35, %v9248_v42 }
 0x857   : > { %v7939_v8 = vmul.f32 %v7930_v5, %v12076_v2  ;;  %v7937_v61 = vmul.f32 %v7928_v39, %v12142_v22  ;;  %v8063_v15 = vunpack.c.h.bf16 %v12384_v48  ;;  %v12392_v5 = vld [vmem:[#allocation2 + $0x4] sm:$0xff]  ;;  %vm12795_vm14 = vcmask 146432  }
 0x858   : > { %v7941_v1 = vpack.c.bf16 %v7936_v32, %v7936_v32  ;;  %v7945_v0 = vpack.c.bf16 %v7940_v38, %v7940_v38  ;;  %8710 = vmatmul.msk.bf16.vlgmr.msrb.gmra.mxu2 %vm409_vm10, %v8707_v16  ;;  %vm12801_vm6 = vmmov %vm12795_vm14 }
 0x859   : > { %v7944_v45 = vpack.c.bf16 %v7939_v8, %v7939_v8  ;;  %v7942_v47 = vpack.c.bf16 %v7937_v61, %v7937_v61 }
 0x85a   : > { %7953 = vrot.lane.b32.xlu1 %v7941_v1, %s9301_s9  ;;  %7961 = vrot.lane.b32.xlu0 %v7945_v0, %s9301_s9  ;;  %v6836_v2 = vpop.f32.mrf.mxu2  ;;  %v6851_v21 = vpop.f32.mrf.mxu3 }
 0x85b   : > { %7959 = vrot.lane.b32.xlu2 %v7944_v45, %s9301_s9  ;;  %v7342_v23 = vpop.permute.xlu1 %7341  ;;  %v6855_v30 = vadd.f32 %v6836_v2, %v12310_v26  ;;  %v7344_v62 = vpop.permute.xlu2 %7343  ;;  %v8060_v21 = vunpack.c.l.bf16 %v12392_v5 }
 0x85c   : > { %v6825_v54 = vpop.f32.mrf.mxu1  ;;  %v7351_v10 = vsel %vm625_vm2, %v7342_v23, %v7344_v62  ;;  %v7352_v60 = vsel %vm625_vm2, %v7344_v62, %v7346_v7  ;;  %v8062_v7 = vunpack.c.l.bf16 %v12384_v48  ;;  %v8344_v48 = vld [vmem:[%s12532_s5] sm:$0xff]  ;;  %vm12797_vm2 = vcmask 965632  }
 0x85d   : > { %v7359_v40 = vsel %vm275_vm7, %v7351_v10, 0  ;;  %v7362_v17 = vsel %vm275_vm7, %v7352_v60, 0  ;;  %v8193_v60 = vld [vmem:[#allocation2 + $0x14] sm:$0xf]  ;;  %vm12799_vm8 = vmmov %vm12797_vm2 }
 0x85e   : > { %7377 = vmatpush.bf16.msrb.mxu0 %v7359_v40  ;;  %7390 = vmatpush.bf16.msrb.mxu1 %v7362_v17  ;;  %vm12800_vm5 = vmmov %vm12797_vm2 }
 0x861   : > { %8708 = vmatmul.msk.bf16.vlgmr.msrb.gmra.mxu0 %vm409_vm10, %v8707_v16  ;;  %8709 = vmatmul.msk.bf16.vlgmr.msrb.gmra.mxu1 %vm409_vm10, %v8707_v16 }
 0x862   : > { %v6838_v26 = vpop.f32.mrf.mxu2  ;;  %v7002_v49 = vpop.f32.mrf.mxu3 }
 0x863   : > { %7955 = vrot.lane.b32.xlu2 %v7942_v47, %s9301_s9  ;;  %v7497_v22 = vpop.permute.xlu0 %7496  ;;  %v7009_v51 = vadd.f32 %v7002_v49, %v6856_v11  ;;  %v7495_v24 = vpop.permute.xlu2 %7494  ;;  %v8719_v49 = vld [vmem:[%s12531_s4 + $0x58] sm:$0xf] }
 0x864   : > { %v7505_v53 = vsel %vm780_vm3, %v7497_v22, %v7499_v33  ;;  %v7501_v28 = vpop.permute.xlu1 %7500  ;;  %v7504_v59 = vsel %vm780_vm3, %v7495_v24, %v7497_v22  ;;  %v6963_v37 = vpop.f32.mrf.mxu0  ;;  %v8217_v22 = vunpack.c.l.bf16 %v8193_v60 }
 0x865   : > { %v7515_v63 = vsel %vm275_vm7, %v7505_v53, 0  ;;  %v7506_v31 = vsel %vm780_vm3, %v7499_v33, %v7501_v28  ;;  %v7507_v42 = vsel %vm780_vm3, %v7501_v28, %v12331_v19  ;;  %v7512_v4 = vsel %vm275_vm7, %v7504_v59, 0  ;;  %vm12798_vm3 = vmmov %vm12797_vm2 }
 0x866   : > { %v7006_v44 = vadd.f32 %v6963_v37, %v12337_v29  ;;  %v6976_v43 = vpop.f32.mrf.mxu1  ;;  %7543 = vmatpush.bf16.msra.mxu1 %v7515_v63  ;;  %v7518_v3 = vsel %vm275_vm7, %v7506_v31, 0  ;;  %v7521_v41 = vsel %vm275_vm7, %v7507_v42, 0  ;;  %7530 = vmatpush.bf16.msra.mxu0 %v7512_v4  ;;  %v8061_v33 = vunpack.c.h.bf16 %v12392_v5  ;;  %v8731_v5 = vld [vmem:[%s12531_s4 + $0x60] sm:$0xf] }
 0x867   : > { %v7007_v58 = vadd.f32 %v6976_v43, %v6854_v9  ;;  %7556 = vmatpush.bf16.msra.mxu2 %v7518_v3  ;;  %7569 = vmatpush.bf16.msra.mxu3 %v7521_v41 }
 0x86a   : > { %v6989_v56 = vpop.f32.mrf.mxu2  ;;  %8716 = vmatmul.msk.bf16.vlgmr.msra.gmra.mxu2 %vm409_vm10, %v8713_v55  ;;  %8717 = vmatmul.msk.bf16.vlgmr.msra.gmra.mxu3 %vm409_vm10, %v8713_v55  ;;  %v7004_v36 = vpop.f32.mrf.mxu3 }
 0x86b   : > { %v7008_v19 = vadd.f32 %v6989_v56, %v6855_v30  ;;  %v7656_v13 = vpop.permute.xlu0 %7655  ;;  %v9262_v46 = vpop.permute.xlu2 %9261 }
 0x86c   : > { %v9263_v29 = vunpack.i.l.bf16 %v9262_v46  ;;  %v9257_v25 = vpop.permute.xlu1 %9256  ;;  %v6965_v6 = vpop.f32.mrf.mxu0  ;;  %v9264_v52 = vunpack.i.h.bf16 %v9262_v46 }
 0x86d   : > { %v9259_v16 = vunpack.i.h.bf16 %v9257_v25  ;;  %v9258_v20 = vunpack.i.l.bf16 %v9257_v25 }
 0x86e   : > { %v6978_v14 = vpop.f32.mrf.mxu1  ;;  %v8093_v35 = vmul.f32 %v9263_v29, %v8064_v12  ;;  %v8089_v26 = vmul.f32 %v9264_v52, %v8060_v21 }
 0x86f   : > { %v8083_v11 = vsel %vm1368_vm15, %v9259_v16, %v9263_v29  ;;  %v8082_v27 = vsel %vm1368_vm15, %v9258_v20, %v9259_v16  ;;  %v8081_v1 = vsel %vm1368_vm15, %v9264_v52, %v9258_v20  ;;  %vm12796_vm15 = vmmov %vm12795_vm14 }
 0x870   : > { %v8098_v50 = vpack.c.bf16 %v8093_v35, %v8093_v35  ;;  %v8092_v32 = vmul.f32 %v8083_v11, %v8063_v15  ;;  %v8091_v38 = vmul.f32 %v8082_v27, %v8062_v7  ;;  %v8090_v40 = vmul.f32 %v8081_v1, %v8061_v33  ;;  %v8725_v35 = vld [vmem:[%s12531_s4 + $0x5c] sm:$0xf] }
 0x871   : > { %8714 = vmatmul.msk.bf16.vlgmr.msra.gmra.mxu0 %vm409_vm10, %v8713_v55  ;;  %8715 = vmatmul.msk.bf16.vlgmr.msra.gmra.mxu1 %vm409_vm10, %v8713_v55  ;;  %v8094_v59 = vpack.c.bf16 %v8089_v26, %v8089_v26 }
 0x872   : > { %v6991_v18 = vpop.f32.mrf.mxu2  ;;  %v7112_v8 = vpop.f32.mrf.mxu3  ;;  %v8097_v57 = vpack.c.bf16 %v8092_v32, %v8092_v32  ;;  %8114 = vrot.lane.b32.xlu2 %v8098_v50, %s9303_s29  ;;  %v8096_v39 = vpack.c.bf16 %v8091_v38, %v8091_v38  ;;  %v8095_v53 = vpack.c.bf16 %v8090_v40, %v8090_v40 }
 0x873   : > { %v7648_v9 = vpop.permute.xlu0 %7647  ;;  %v12400_v0 = vadd.f32 %v7112_v8, %v7009_v51  ;;  %v7654_v45 = vpop.permute.xlu2 %7653 }
 0x874   : > { %v7660_v2 = vsel %vm12791_vm9, %v7654_v45, %v7656_v13  ;;  %v7652_v23 = vpop.permute.xlu1 %7651  ;;  %8112 = vrot.lane.b32.xlu1 %v8097_v57, %s9303_s29  ;;  %v7073_v30 = vpop.f32.mrf.mxu0  ;;  %8110 = vrot.lane.b32.xlu0 %v8096_v39, %s9303_s29  ;;  %vm12805_vm9 = vmmov %vm12804_vm0 }
 0x875   : > { %v7674_v62 = vsel %vm275_vm7, %v7660_v2, 0  ;;  %v7659_v54 = vsel %vm12792_vm11, %v7652_v23, %v7654_v45  ;;  %v12409_v61 = vadd.f32 %v7073_v30, %v7006_v44  ;;  %vm12806_vm11 = vcmask 908288  }
 0x876   : > { %v7086_v10 = vpop.f32.mrf.mxu1  ;;  %v7671_v17 = vsel %vm275_vm7, %v7659_v54, 0  ;;  %7722 = vmatpush.bf16.msrb.mxu3 %v7674_v62 }
 0x877   : > { %v12414_v47 = vadd.f32 %v7086_v10, %v7007_v58  ;;  %7709 = vmatpush.bf16.msrb.mxu2 %v7671_v17 }
 0x87a   : > { %v7099_v51 = vpop.f32.mrf.mxu2  ;;  %8722 = vmatmul.msk.bf16.vlgmr.msrb.gmra.mxu2 %vm409_vm10, %v8719_v49  ;;  %8723 = vmatmul.msk.bf16.vlgmr.msrb.gmra.mxu3 %vm409_vm10, %v8719_v49  ;;  %v7114_v28 = vpop.f32.mrf.mxu3 }
 0x87b   : > { %v12423_v24 = vadd.f32 %v7099_v51, %v7008_v19  ;;  %v9267_v63 = vpop.permute.xlu2 %9266  ;;  %v8233_v37 = vpop.permute.xlu0 %8232 }
 0x87c   : > { %v9269_v31 = vunpack.i.h.bf16 %v9267_v63  ;;  %v9268_v42 = vunpack.i.l.bf16 %v9267_v63  ;;  %v7650_v4 = vpop.permute.xlu1 %7649  ;;  %8108 = vrot.lane.b32.xlu1 %v8095_v53, %s9303_s29  ;;  %v8246_v44 = vmul.f32 %v8233_v37, %v8217_v22  ;;  %v7075_v43 = vpop.f32.mrf.mxu0  ;;  %8106 = vrot.lane.b32.xlu0 %v8094_v59, %s9303_s29 }
 0x87d   : > { %v7657_v3 = vsel %vm12793_vm12, %v7648_v9, %v7650_v4  ;;  %v7658_v41 = vsel %vm12794_vm13, %v7650_v4, %v7652_v23  ;;  %vm12807_vm12 = vmmov %vm12806_vm11 }
 0x87e   : > { %v7088_v58 = vpop.f32.mrf.mxu1  ;;  %v8235_v55 = vsel %vm12795_vm14, %v9268_v42, %v9269_v31  ;;  %v7665_v34 = vsel %vm275_vm7, %v7657_v3, 0  ;;  %v7668_v56 = vsel %vm275_vm7, %v7658_v41, 0  ;;  %v8236_v19 = vsel %vm12796_vm15, %v9269_v31, %v8233_v37  ;;  %vm12808_vm13 = vmmov %vm12806_vm11 }
 0x87f   : > { %v8245_v36 = vmul.f32 %v8236_v19, %v8063_v15  ;;  %7683 = vmatpush.bf16.msrb.mxu0 %v7665_v34  ;;  %7696 = vmatpush.bf16.msrb.mxu1 %v7668_v56  ;;  %v8244_v12 = vmul.f32 %v8235_v55, %v8062_v7  ;;  %v8251_v13 = vpack.c.bf16 %v8246_v44, %v8246_v44  ;;  %vm12809_vm14 = vmmov %vm12806_vm11  ;;  %vm12810_vm15 = vcmask 900096  }
 0x881   : > { %v8250_v46 = vpack.c.bf16 %v8245_v36, %v8245_v36  ;;  %v8249_v29 = vpack.c.bf16 %v8244_v12, %v8244_v12 }
 0x882   : > { %v7101_v25 = vpop.f32.mrf.mxu2  ;;  %8720 = vmatmul.msk.bf16.vlgmr.msrb.gmra.mxu0 %vm409_vm10, %v8719_v49  ;;  %8721 = vmatmul.msk.bf16.vlgmr.msrb.gmra.mxu1 %vm409_vm10, %v8719_v49 }
 0x883   : > { %8263 = vrot.lane.b32.xlu2 %v8249_v29, %s12627_s10  ;;  %v7805_v6 = vpop.permute.xlu2 %7804 }
 0x884   : > { %8267 = vrot.lane.b32.xlu1 %v8251_v13, %s12627_s10  ;;  %8265 = vrot.lane.b32.xlu0 %v8250_v46, %s12627_s10 }
 0x88c   : > { %8347 = vperm.xlu1 %9034, %v8344_v48  }
 0x892   : > { %v7803_v16 = vpop.permute.xlu2 %7802 }
 0x893   : > { %v7811_v20 = vsel %vm12797_vm2, %v7803_v16, %v7805_v6  ;;  %vm12811_vm2 = vmmov %vm12810_vm15 }
 0x894   : > { %v7821_v14 = vsel %vm275_vm7, %v7811_v20, 0 }
 0x895   : > { %7849 = vmatpush.bf16.msra.mxu1 %v7821_v14 }
 0x898   : > { %8727 = vmatmul.msk.bf16.vlgmr.msra.gmra.mxu1 %vm409_vm10, %v8725_v35 }
 0x8a9   : > { %v7809_v15 = vpop.permute.xlu1 %7808 }
 0x8aa   : > { %v7807_v52 = vpop.permute.xlu0 %7806 }
 0x8ab   : > { %v7812_v7 = vsel %vm12798_vm3, %v7805_v6, %v7807_v52  ;;  %v7813_v11 = vsel %vm12799_vm8, %v7807_v52, %v7809_v15  ;;  %vm12812_vm3 = vmmov %vm12811_vm2 }
 0x8ac   : > { %v7824_v27 = vsel %vm275_vm7, %v7812_v7, 0  ;;  %v7827_v50 = vsel %vm275_vm7, %v7813_v11, 0  ;;  %vm12813_vm8 = vmmov %vm12811_vm2 }
 0x8ad   : > { %7862 = vmatpush.bf16.msra.mxu2 %v7824_v27  ;;  %7875 = vmatpush.bf16.msra.mxu3 %v7827_v50 }
 0x8b0   : > { %8728 = vmatmul.msk.bf16.vlgmr.msra.gmra.mxu2 %vm409_vm10, %v8725_v35  ;;  %8729 = vmatmul.msk.bf16.vlgmr.msra.gmra.mxu3 %vm409_vm10, %v8725_v35 }
 0x8b1   : > { %v7265_v32 = vpop.f32.mrf.mxu3  ;;  %v7801_v38 = vpop.permute.xlu1 %7800 }
 0x8b2   : > { %v7272_v18 = vadd.f32 %v7265_v32, %v12400_v0  ;;  %v7810_v8 = vsel %vm12800_vm5, %v7801_v38, %v7803_v16  ;;  %v8227_v57 = vpop.permute.xlu0 %8226  ;;  %v8737_v16 = vld [vmem:[%s12531_s4 + $0x64] sm:$0xf] }
 0x8b3   : > { %v7818_v9 = vsel %vm275_vm7, %v7810_v8, 0  ;;  %v8234_v1 = vsel %vm12801_vm6, %v8227_v57, %v9268_v42  ;;  %v8242_v45 = vmul.f32 %v8227_v57, %v8060_v21 }
 0x8b4   : > { %v8243_v39 = vmul.f32 %v8234_v1, %v8061_v33  ;;  %7836 = vmatpush.bf16.msra.mxu0 %v7818_v9 }
 0x8b5   : > { %v7960_v2 = vpop.permute.xlu2 %7959  ;;  %v8247_v23 = vpack.c.bf16 %v8242_v45, %v8242_v45 }
 0x8b6   : > { %v8248_v30 = vpack.c.bf16 %v8243_v39, %v8243_v39 }
 0x8b7   : > { %8726 = vmatmul.msk.bf16.vlgmr.msra.gmra.mxu0 %vm409_vm10, %v8725_v35  ;;  %8259 = vrot.lane.b32.xlu2 %v8247_v23, %s12627_s10 }
 0x8b8   : > { %8261 = vrot.lane.b32.xlu0 %v8248_v30, %s12627_s10 }
 0x8b9   : > { %v7267_v0 = vpop.f32.mrf.mxu3 }
 0x8ba   : > { %v7958_v62 = vpop.permute.xlu1 %7957 }
 0x8bb   : > { %v7965_v54 = vsel %vm12802_vm1, %v7958_v62, %v7960_v2 }
 0x8bc   : > { %v7977_v10 = vsel %vm275_vm7, %v7965_v54, 0 }
 0x8bd   : > { %v7956_v21 = vpop.permute.xlu2 %7955  ;;  %8015 = vmatpush.bf16.msrb.mxu2 %v7977_v10 }
 0x8be   : > { %v7964_v33 = vsel %vm12803_vm4, %v7956_v21, %v7958_v62 }
 0x8bf   : > { %v7974_v60 = vsel %vm275_vm7, %v7964_v33, 0 }
 0x8c0   : > { %8002 = vmatpush.bf16.msrb.mxu1 %v7974_v60  ;;  %8734 = vmatmul.msk.bf16.vlgmr.msrb.gmra.mxu2 %vm409_vm10, %v8731_v5 }
 0x8c3   : > { %8733 = vmatmul.msk.bf16.vlgmr.msrb.gmra.mxu1 %vm409_vm10, %v8731_v5 }
 0x8cb   : > { %v7252_v40 = vpop.f32.mrf.mxu2 }
 0x8cc   : > { %v7954_v17 = vpop.permute.xlu1 %7953  ;;  %v7271_v26 = vadd.f32 %v7252_v40, %v12423_v24  ;;  %v7962_v22 = vpop.permute.xlu0 %7961 }
 0x8cd   : > { %v7963_v49 = vsel %vm12804_vm0, %v7954_v17, %v7956_v21  ;;  %v7966_v53 = vsel %vm12805_vm9, %v7960_v2, %v7962_v22  ;;  %v7226_v28 = vpop.f32.mrf.mxu0  ;;  %v7239_v59 = vpop.f32.mrf.mxu1  ;;  %v8743_v21 = vld [vmem:[%s12531_s4 + $0x68] sm:$0xf] }
 0x8ce   : > { %v7971_v51 = vsel %vm275_vm7, %v7963_v49, 0  ;;  %v7980_v63 = vsel %vm275_vm7, %v7966_v53, 0  ;;  %v7269_v37 = vadd.f32 %v7226_v28, %v12409_v61  ;;  %v7270_v31 = vadd.f32 %v7239_v59, %v12414_v47  ;;  %v8115_v47 = vpop.permute.xlu2 %8114 }
 0x8cf   : > { %7989 = vmatpush.bf16.msrb.mxu0 %v7971_v51  ;;  %8028 = vmatpush.bf16.msrb.mxu3 %v7980_v63 }
 0x8d2   : > { %8732 = vmatmul.msk.bf16.vlgmr.msrb.gmra.mxu0 %vm409_vm10, %v8731_v5  ;;  %8735 = vmatmul.msk.bf16.vlgmr.msrb.gmra.mxu3 %vm409_vm10, %v8731_v5 }
 0x8d3   : > { %v7254_v24 = vpop.f32.mrf.mxu2 }
 0x8d4   : > { %v7418_v42 = vpop.f32.mrf.mxu3 }
 0x8d5   : > { %v7228_v4 = vpop.f32.mrf.mxu0  ;;  %v7425_v44 = vadd.f32 %v7418_v42, %v7272_v18  ;;  %v7241_v43 = vpop.f32.mrf.mxu1 }
 0x8db   : > { %v7405_v3 = vpop.f32.mrf.mxu2 }
 0x8dc   : > { %v7420_v41 = vpop.f32.mrf.mxu3  ;;  %v7424_v58 = vadd.f32 %v7405_v3, %v7271_v26 }
 0x8dd   : > { %v8264_v9 = vpop.permute.xlu2 %8263 }
 0x8de   : > { %v7379_v55 = vpop.f32.mrf.mxu0  ;;  %v7392_v34 = vpop.f32.mrf.mxu1 }
 0x8df   : > { %v7422_v56 = vadd.f32 %v7379_v55, %v7269_v37  ;;  %v7423_v61 = vadd.f32 %v7392_v34, %v7270_v31 }
 0x8e3   : > { %v7407_v19 = vpop.f32.mrf.mxu2 }
 0x8e6   : > { %v7381_v36 = vpop.f32.mrf.mxu0  ;;  %v7394_v12 = vpop.f32.mrf.mxu1 }
 0x8e7   : > { %v8113_v13 = vpop.permute.xlu1 %8112  ;;  %v8111_v46 = vpop.permute.xlu0 %8110 }
 0x8e8   : > { %v8119_v29 = vsel %vm12806_vm11, %v8113_v13, %v8115_v47  ;;  %v8118_v25 = vsel %vm12807_vm12, %v8111_v46, %v8113_v13 }
 0x8e9   : > { %v8133_v6 = vsel %vm275_vm7, %v8119_v29, 0  ;;  %v8130_v48 = vsel %vm275_vm7, %v8118_v25, 0 }
 0x8ea   : > { %8168 = vmatpush.bf16.msra.mxu2 %v8130_v48  ;;  %8181 = vmatpush.bf16.msra.mxu3 %v8133_v6 }
 0x8ed   : > { %8740 = vmatmul.msk.bf16.vlgmr.msra.gmra.mxu2 %vm409_vm10, %v8737_v16  ;;  %8741 = vmatmul.msk.bf16.vlgmr.msra.gmra.mxu3 %vm409_vm10, %v8737_v16  ;;  %v7558_v20 = vpop.f32.mrf.mxu2  ;;  %v7571_v14 = vpop.f32.mrf.mxu3 }
 0x8ee   : > { %v7577_v35 = vadd.f32 %v7558_v20, %v7424_v58  ;;  %v7578_v15 = vadd.f32 %v7571_v14, %v7425_v44  ;;  %v7532_v52 = vpop.f32.mrf.mxu0  ;;  %v7545_v7 = vpop.f32.mrf.mxu1 }
 0x8ef   : > { %v8109_v11 = vpop.permute.xlu1 %8108  ;;  %v7575_v27 = vadd.f32 %v7532_v52, %v7422_v56  ;;  %v7576_v50 = vadd.f32 %v7545_v7, %v7423_v61  ;;  %v8107_v32 = vpop.permute.xlu0 %8106 }
 0x8f0   : > { %v8117_v38 = vsel %vm12808_vm13, %v8109_v11, %v8111_v46  ;;  %v8116_v18 = vsel %vm12809_vm14, %v8107_v32, %v8109_v11 }
 0x8f1   : > { %v8127_v8 = vsel %vm275_vm7, %v8117_v38, 0  ;;  %v8124_v57 = vsel %vm275_vm7, %v8116_v18, 0 }
 0x8f2   : > { %8142 = vmatpush.bf16.msra.mxu0 %v8124_v57  ;;  %8155 = vmatpush.bf16.msra.mxu1 %v8127_v8 }
 0x8f5   : > { %8738 = vmatmul.msk.bf16.vlgmr.msra.gmra.mxu0 %vm409_vm10, %v8737_v16  ;;  %8739 = vmatmul.msk.bf16.vlgmr.msra.gmra.mxu1 %vm409_vm10, %v8737_v16  ;;  %v7560_v1 = vpop.f32.mrf.mxu2  ;;  %v7573_v45 = vpop.f32.mrf.mxu3 }
 0x8f6   : > { %v7534_v39 = vpop.f32.mrf.mxu0  ;;  %v7547_v2 = vpop.f32.mrf.mxu1 }
 0x8f7   : > { %v8268_v23 = vpop.permute.xlu1 %8267  ;;  %v8266_v30 = vpop.permute.xlu0 %8265 }
 0x8f8   : > { %v8271_v0 = vsel %vm12810_vm15, %v8264_v9, %v8266_v30  ;;  %v8272_v62 = vsel %vm12811_vm2, %v8266_v30, %v8268_v23 }
 0x8f9   : > { %v8283_v54 = vsel %vm275_vm7, %v8271_v0, 0  ;;  %v8286_v10 = vsel %vm275_vm7, %v8272_v62, 0  ;;  %v9271_v0 = vld [vmem:[%s9369_s28 + $0x10] sm:$0xff] }
 0x8fa   : > { %8321 = vmatpush.bf16.msrb.mxu2 %v8283_v54  ;;  %8334 = vmatpush.bf16.msrb.mxu3 %v8286_v10  ;;  %v9272_v54 = vld [vmem:[%s9369_s28 + $0x18] sm:$0xff] }
 0x8fd   : > { %8746 = vmatmul.msk.bf16.vlgmr.msrb.gmra.mxu2 %vm409_vm10, %v8743_v21  ;;  %8747 = vmatmul.msk.bf16.vlgmr.msrb.gmra.mxu3 %vm409_vm10, %v8743_v21  ;;  %v7711_v5 = vpop.f32.mrf.mxu2  ;;  %v7724_v33 = vpop.f32.mrf.mxu3 }
 0x8fe   : > { %v7730_v60 = vadd.f32 %v7711_v5, %v7577_v35  ;;  %v7731_v40 = vadd.f32 %v7724_v33, %v7578_v15 }
 0x8ff   : > { %v7685_v17 = vpop.f32.mrf.mxu0  ;;  %v7698_v49 = vpop.f32.mrf.mxu1 }
 0x900   : > { %v7728_v26 = vadd.f32 %v7685_v17, %v7575_v27  ;;  %v7729_v22 = vadd.f32 %v7698_v49, %v7576_v50  ;;  %v8348_v2 = vpop.permute.xlu1 %8347 }
 0x905   : > { %v7713_v51 = vpop.f32.mrf.mxu2  ;;  %v7726_v53 = vpop.f32.mrf.mxu3 }
 0x907   : > { %v7687_v28 = vpop.f32.mrf.mxu0  ;;  %v7700_v59 = vpop.f32.mrf.mxu1 }
 0x911   : > { %v8260_v24 = vpop.permute.xlu2 %8259 }
 0x915   : > { %v7851_v63 = vpop.f32.mrf.mxu1 }
 0x916   : > { %v7882_v37 = vadd.f32 %v7851_v63, %v7729_v22  ;;  %v9273_v63 = vld [vmem:[%s9369_s28] sm:$0xff] }
 0x91d   : > { %v7853_v31 = vpop.f32.mrf.mxu1 }
 0x91e   : > { %v9274_v31 = vld [vmem:[%s9369_s28 + $0x8] sm:$0xff] }
 0x92a   : > { %v8262_v42 = vpop.permute.xlu0 %8261 }
 0x92b   : > { %v8269_v4 = vsel %vm12812_vm3, %v8260_v24, %v8262_v42  ;;  %v8270_v44 = vsel %vm12813_vm8, %v8262_v42, %v8264_v9 }
 0x92c   : > { %v8277_v43 = vsel %vm275_vm7, %v8269_v4, 0  ;;  %v8280_v3 = vsel %vm275_vm7, %v8270_v44, 0 }
 0x92d   : > { %8295 = vmatpush.bf16.msrb.mxu0 %v8277_v43  ;;  %8308 = vmatpush.bf16.msrb.mxu1 %v8280_v3 }
 0x930   : > { %8744 = vmatmul.msk.bf16.vlgmr.msrb.gmra.mxu0 %vm409_vm10, %v8743_v21  ;;  %8745 = vmatmul.msk.bf16.vlgmr.msrb.gmra.mxu1 %vm409_vm10, %v8743_v21 }
 0x933   : > { %v7864_v41 = vpop.f32.mrf.mxu2  ;;  %v7877_v58 = vpop.f32.mrf.mxu3 }
 0x934   : > { %v7883_v55 = vadd.f32 %v7864_v41, %v7730_v60  ;;  %v7884_v34 = vadd.f32 %v7877_v58, %v7731_v40  ;;  %v7838_v56 = vpop.f32.mrf.mxu0 }
 0x935   : > { %v7881_v61 = vadd.f32 %v7838_v56, %v7728_v26 }
 0x93b   : > { %v7866_v19 = vpop.f32.mrf.mxu2  ;;  %v7879_v47 = vpop.f32.mrf.mxu3 }
 0x93c   : > { %v7840_v36 = vpop.f32.mrf.mxu0 }
 0x940   : > { %v8004_v12 = vpop.f32.mrf.mxu1 }
 0x941   : > { %v8035_v13 = vadd.f32 %v8004_v12, %v7882_v37 }
 0x943   : > { %v8017_v46 = vpop.f32.mrf.mxu2 }
 0x944   : > { %v8036_v38 = vadd.f32 %v8017_v46, %v7883_v55 }
 0x948   : > { %v8006_v29 = vpop.f32.mrf.mxu1 }
 0x94b   : > { %v8019_v25 = vpop.f32.mrf.mxu2 }
 0x94f   : > { %v7991_v6 = vpop.f32.mrf.mxu0 }
 0x950   : > { %v8034_v48 = vadd.f32 %v7991_v6, %v7881_v61 }
 0x955   : > { %v8030_v16 = vpop.f32.mrf.mxu3 }
 0x956   : > { %v8037_v18 = vadd.f32 %v8030_v16, %v7884_v34 }
 0x957   : > { %v7993_v20 = vpop.f32.mrf.mxu0 }
 0x95d   : > { %v8032_v14 = vpop.f32.mrf.mxu3 }
 0x970   : > { %v8170_v35 = vpop.f32.mrf.mxu2  ;;  %v8183_v15 = vpop.f32.mrf.mxu3 }
 0x971   : > { %v8189_v8 = vadd.f32 %v8170_v35, %v8036_v38  ;;  %v8190_v57 = vadd.f32 %v8183_v15, %v8037_v18 }
 0x972   : > { %v8144_v52 = vpop.f32.mrf.mxu0  ;;  %v8157_v7 = vpop.f32.mrf.mxu1 }
 0x973   : > { %v8187_v17 = vadd.f32 %v8144_v52, %v8034_v48  ;;  %v8188_v26 = vadd.f32 %v8157_v7, %v8035_v13 }
 0x978   : > { %v8172_v11 = vpop.f32.mrf.mxu2  ;;  %v8185_v27 = vpop.f32.mrf.mxu3 }
 0x97a   : > { %v8146_v50 = vpop.f32.mrf.mxu0  ;;  %v8159_v32 = vpop.f32.mrf.mxu1 }
 0x980   : > { %v8323_v9 = vpop.f32.mrf.mxu2  ;;  %v8336_v1 = vpop.f32.mrf.mxu3 }
 0x981   : > { %v8342_v45 = vadd.f32 %v8323_v9, %v8189_v8  ;;  %v8343_v39 = vadd.f32 %v8336_v1, %v8190_v57 }
 0x983   : > { %v8352_v23 = vadd.f32 %v8348_v2, %v8342_v45  ;;  %v8353_v30 = vadd.f32 %v8348_v2, %v8343_v39 }
 0x985   : > { %v8356_v62 = vadd.f32 %v9271_v0, %v8352_v23  ;;  %v8357_v10 = vadd.f32 %v9272_v54, %v8353_v30 }
 0x987   : > { %v8360_v21 = vmax.f32 %v8356_v62, 0.0  ;;  %v8361_v5 = vmax.f32 %v8357_v10, 0.0 }
 0x988   : > { %v8325_v33 = vpop.f32.mrf.mxu2  ;;  %v8338_v60 = vpop.f32.mrf.mxu3 }
 0x989   : > { %v8363_v40 = vpack.c.bf16 %v8361_v5, %v8360_v21 }
 0x98b   : > { %8365 = vst [vmem:[%s251_s13 + $0x8] sm:$0xff] %v8363_v40 }
 0x9ad   : > { %v8297_v49 = vpop.f32.mrf.mxu0  ;;  %v8310_v22 = vpop.f32.mrf.mxu1 }
 0x9ae   : > { %v8340_v51 = vadd.f32 %v8297_v49, %v8187_v17  ;;  %v8341_v53 = vadd.f32 %v8310_v22, %v8188_v26 }
 0x9b0   : > { %v8350_v28 = vadd.f32 %v8348_v2, %v8340_v51  ;;  %v8351_v59 = vadd.f32 %v8348_v2, %v8341_v53 }
 0x9b2   : > { %v8354_v37 = vadd.f32 %v9273_v63, %v8350_v28  ;;  %v8355_v24 = vadd.f32 %v9274_v31, %v8351_v59 }
 0x9b4   : > { %v8358_v42 = vmax.f32 %v8354_v37, 0.0  ;;  %v8359_v4 = vmax.f32 %v8355_v24, 0.0 }
 0x9b5   : > { %v8299_v44 = vpop.f32.mrf.mxu0  ;;  %v8312_v43 = vpop.f32.mrf.mxu1 }
 0x9b6   : > { %v8362_v3 = vpack.c.bf16 %v8359_v4, %v8358_v42 }
 0x9b8   : > { %8364 = vst [vmem:[%s251_s13] sm:$0xff] %v8362_v3 }
 0x9b9 PF: > { %s16_s21 = sadd.s32 1, %s9281_s21  }
 0x9ba   : > { %p13_p4 = scmp.ge.s32.totalorder %s16_s21, 4  }
 0x9bc   :  { %15 = sbr.rel (!%p13_p4) target bundleno = 1 (0x1), region = 151 }

</bundles_post_ra>
